<compile_context>
chip_gen: v5e
topology: v5e:2x2
jax: 0.10.0
libtpu: 0.0.40
codegen_flags: <defaults>
</compile_context>

<pallas_src>
import jax
import jax.numpy as jnp
from jax.experimental import pallas as pl
from jax.experimental.pallas import tpu as pltpu

CIN, COUT = 3, 4
KH = KW = 5
PAD = 1
BN_EPS = 1e-5

# ---- packed-parameter layout (one flat f32 vector living in SMEM) -------------
_NW = COUT * CIN * KH * KW      # 300 conv weights, order (f, c, ky, kx)
_CB0 = _NW                      # 300..303  conv bias
_G0 = _CB0 + COUT               # 304..307  BN gamma
_B0 = _G0 + COUT                # 308..311  BN beta
_LW0 = _B0 + COUT               # 312..315  linear weight
_LB = _LW0 + COUT               # 316       linear bias
_NPARAMS = _LB + 1              # 317


def _round_up(v, m):
    return -(-v // m) * m


def _make_kernel(n, n8, h, w, lanes_in, lanes_acc):
    hp, wp = h + 2 * PAD, w + 2 * PAD
    hout, wout = hp - KH + 1, wp - KW + 1
    inv_count = 1.0 / float(n * hout * wout)     # BN stats over real samples only
    inv_hw = 1.0 / float(hout * wout)

    def kernel(x_ref, m_ref, p_ref, out_ref):
        # x_ref : (CIN*n8, lanes_in) f32 — per-channel 8-aligned sublane blocks,
        #                                  flat zero-padded spatial image on lanes.
        # m_ref : (n8, lanes_acc)    f32 — 1 where (row < n) and lane is a valid
        #                                  conv-output position, else 0.
        # p_ref : (_NPARAMS,)        f32 in SMEM — all weights/biases as scalars.
        # out_ref: (n8, 1)           f32
        x_all = x_ref[...]
        mask = m_ref[...]

        # Hoist the 300 conv-weight scalar reads off the (unrolled) FMA chain.
        wv = [p_ref[i] for i in range(_NW)]

        # ---- Conv2d: 24 stacked XLU rolls + 300 scalar-broadcast VPU FMAs ------
        # rolled[p] == x_all[p + off], so acc position p_out = oy*wp + ox picks up
        # the (oy+ky, ox+kx) input tap.  Two partial accumulators per filter (even/
        # odd taps) double the number of independent add chains.
        acc = [[None, None] for _ in range(COUT)]
        for ky in range(KH):
            for kx in range(KW):
                off = ky * wp + kx
                par = (ky * KW + kx) & 1
                if off == 0:
                    shifted = x_all
                else:
                    # positive circular shift == shift left by `off`; no wrap
                    # reaches the first lanes_acc lanes (lanes_in >= lanes_acc+off).
                    shifted = pltpu.roll(x_all, shift=lanes_in - off, axis=1)
                for c in range(CIN):
                    # sublane block (multiple of 8) x first 2 lane-vregs: aligned.
                    tap = shifted[c * n8:(c + 1) * n8, :lanes_acc]
                    for f in range(COUT):
                        term = wv[((f * CIN + c) * KH + ky) * KW + kx] * tap
                        if acc[f][par] is None:
                            acc[f][par] = term
                        else:
                            acc[f][par] = acc[f][par] + term

        # ---- per-channel BN (train-mode batch stats) + ReLU + global avg-pool
        #      + Linear(4,1) tail, all on the VPU (4 independent dataflow chains) --
        out = None
        for f in range(COUT):
            a = (acc[f][0] + acc[f][1]) + p_ref[_CB0 + f]        # conv bias
            am = a * mask                                        # mask cols + pad rows
            s1 = jnp.sum(jnp.sum(am, axis=1, keepdims=True), axis=0, keepdims=True)
            s2 = jnp.sum(jnp.sum(am * am, axis=1, keepdims=True), axis=0, keepdims=True)
            mu = s1 * inv_count
            var = s2 * inv_count - mu * mu                       # f32 accumulation
            scale = p_ref[_G0 + f] * jax.lax.rsqrt(var + BN_EPS)
            shift = p_ref[_B0 + f] - mu * scale
            y = jnp.maximum(a * scale + shift, 0.0) * mask       # BN affine + ReLU
            pooled = jnp.sum(y, axis=1, keepdims=True) * inv_hw  # (n8, 1)
            term = pooled * p_ref[_LW0 + f]
            out = term if out is None else out + term
        out_ref[...] = out + p_ref[_LB]

    return kernel


def testarch_forward(x_nchw, params):
    """x_nchw: (N, 3, H, W) float32.  Returns (N, 1, 1, 1) float32."""
    n, c, h, w = x_nchw.shape
    assert c == CIN
    n8 = max(8, _round_up(n, 8))                 # sublane-aligned batch rows
    hp, wp = h + 2 * PAD, w + 2 * PAD
    hout, wout = hp - KH + 1, wp - KW + 1
    span = hout * wp                             # flat conv-output extent (pitch wp)
    lanes_acc = _round_up(span, 128)             # accumulator lane width (vreg-aligned)
    max_off = (KH - 1) * wp + (KW - 1)
    # big enough that (a) the whole padded image fits and (b) rolls never wrap
    # garbage into the first lanes_acc lanes.
    lanes_in = _round_up(max_off + lanes_acc, 128)

    # Operational guard for the gridless design (see TODO at top of file).
    vmem_bytes = 4 * (CIN * n8 * lanes_in + n8 * lanes_acc * (2 * COUT + 5))
    assert vmem_bytes < 24 * 2 ** 20, (
        "working set too large for the gridless kernel; add a batch/H grid with "
        "two-phase BatchNorm (see TODO(synk))")

    # Layout prep (few KB at this scale; XLA fuses the pads/transpose into one copy).
    # TODO(synk): at large shapes build this layout in-kernel from raw NCHW rows.
    xp = jnp.pad(x_nchw.astype(jnp.float32),
                 ((0, n8 - n), (0, 0), (PAD, PAD), (PAD, PAD)))   # (n8, C, hp, wp)
    xp = jnp.transpose(xp, (1, 0, 2, 3)).reshape(CIN * n8, hp * wp)
    xp = jnp.pad(xp, ((0, 0), (0, lanes_in - hp * wp)))

    # Precomputed validity mask: valid conv-output lane AND real (non-padded) batch row.
    pcol = jnp.arange(lanes_acc, dtype=jnp.int32)
    col_ok = ((pcol % wp) < wout) & (pcol < span)
    row_ok = jnp.arange(n8, dtype=jnp.int32) < n
    mask = (row_ok[:, None] & col_ok[None, :]).astype(jnp.float32)   # (n8, lanes_acc)

    packed = jnp.concatenate([
        params["conv_w"].reshape(-1),     # (COUT, CIN, KH, KW)
        params["conv_b"].reshape(-1),     # (COUT,)
        params["bn_gamma"].reshape(-1),   # (COUT,)
        params["bn_beta"].reshape(-1),    # (COUT,)
        params["lin_w"].reshape(-1),      # (1, COUT)
        params["lin_b"].reshape(-1),      # (1,)
    ]).astype(jnp.float32)

    out = pl.pallas_call(
        _make_kernel(n, n8, h, w, lanes_in, lanes_acc),
        out_shape=jax.ShapeDtypeStruct((n8, 1), jnp.float32),
        in_specs=[
            pl.BlockSpec(memory_space=pltpu.MemorySpace.VMEM),   # activations
            pl.BlockSpec(memory_space=pltpu.MemorySpace.VMEM),   # validity mask
            pl.BlockSpec(memory_space=pltpu.MemorySpace.SMEM),   # packed params
        ],
        out_specs=pl.BlockSpec(memory_space=pltpu.MemorySpace.VMEM),
    )(xp, mask, packed)
    # (n8, 1) -> (N, 1, 1, 1) to match PyTorch's output shape
    return out[:n].reshape(n, 1, 1, 1)


def init_params(key):
    k1, k2, k3, k4 = jax.random.split(key, 4)
    return dict(
        conv_w=jax.random.normal(k1, (COUT, CIN, KH, KW), jnp.float32) * 0.1,
        conv_b=jax.random.normal(k2, (COUT,), jnp.float32) * 0.1,
        bn_gamma=jnp.ones((COUT,), jnp.float32),    # nn.BatchNorm2d default weight
        bn_beta=jnp.zeros((COUT,), jnp.float32),    # nn.BatchNorm2d default bias
        lin_w=jax.random.normal(k3, (1, COUT), jnp.float32) * 0.5,
        lin_b=jax.random.normal(k4, (1,), jnp.float32) * 0.1,
    )


def _reference(x, params):
    """Pure-JAX reference of TestArch.forward (train-mode BatchNorm)."""
    out = jax.lax.conv_general_dilated(
        x, params["conv_w"], window_strides=(1, 1),
        padding=((PAD, PAD), (PAD, PAD)),
        dimension_numbers=("NCHW", "OIHW", "NCHW"))
    out = out + params["conv_b"].reshape(1, COUT, 1, 1)
    mu = jnp.mean(out, axis=(0, 2, 3), keepdims=True)
    var = jnp.mean((out - mu) ** 2, axis=(0, 2, 3), keepdims=True)
    out = (out - mu) * jax.lax.rsqrt(var + BN_EPS)
    out = out * params["bn_gamma"].reshape(1, COUT, 1, 1) \
          + params["bn_beta"].reshape(1, COUT, 1, 1)
    out = jnp.maximum(out, 0.0)
    pooled = jnp.mean(out, axis=(2, 3))                       # (N, COUT)
    y = pooled @ params["lin_w"].T + params["lin_b"]          # (N, 1)
    return y.reshape(-1, 1, 1, 1)


if __name__ == "__main__":
    key = jax.random.PRNGKey(0)
    kx_, kp = jax.random.split(key)
    x = jax.random.normal(kx_, (2, CIN, 16, 16), jnp.float32)   # NCHW like PyTorch
    params = init_params(kp)

    out = jax.jit(testarch_forward)(x, params)
    jax.block_until_ready(out)
    assert out.shape == (2, 1, 1, 1)

    ref = _reference(x, params)
    assert bool(jnp.allclose(out, ref, rtol=1e-2, atol=1e-2))
    print("KERNEL_OK")
</pallas_src>

<mosaic_0001>
module attributes {stable_mosaic.version = 11 : i64} {
  func.func @kernel(%arg0: memref<24x384xf32, #tpu.memory_space<vmem>>, %arg1: memref<8x256xf32, #tpu.memory_space<vmem>>, %arg2: memref<317xf32, #tpu.memory_space<smem>>, %arg3: memref<8x1xf32, #tpu.memory_space<vmem>>) attributes {dimension_semantics = [], scalar_prefetch = 0 : i64, scratch_operands = 0 : i64, tpu.core_type = #tpu.core_type<tc>} {
    %c0 = arith.constant 0 : index
    %c0_0 = arith.constant 0 : index
    %0 = vector.load %arg0[%c0, %c0_0] : memref<24x384xf32, #tpu.memory_space<vmem>>, vector<24x384xf32>
    %c0_1 = arith.constant 0 : index
    %c0_2 = arith.constant 0 : index
    %1 = vector.load %arg1[%c0_1, %c0_2] : memref<8x256xf32, #tpu.memory_space<vmem>>, vector<8x256xf32>
    %c0_3 = arith.constant 0 : index
    %2 = memref.load %arg2[%c0_3] : memref<317xf32, #tpu.memory_space<smem>>
    %c1 = arith.constant 1 : index
    %3 = memref.load %arg2[%c1] : memref<317xf32, #tpu.memory_space<smem>>
    %c2 = arith.constant 2 : index
    %4 = memref.load %arg2[%c2] : memref<317xf32, #tpu.memory_space<smem>>
    %c3 = arith.constant 3 : index
    %5 = memref.load %arg2[%c3] : memref<317xf32, #tpu.memory_space<smem>>
    %c4 = arith.constant 4 : index
    %6 = memref.load %arg2[%c4] : memref<317xf32, #tpu.memory_space<smem>>
    %c5 = arith.constant 5 : index
    %7 = memref.load %arg2[%c5] : memref<317xf32, #tpu.memory_space<smem>>
    %c6 = arith.constant 6 : index
    %8 = memref.load %arg2[%c6] : memref<317xf32, #tpu.memory_space<smem>>
    %c7 = arith.constant 7 : index
    %9 = memref.load %arg2[%c7] : memref<317xf32, #tpu.memory_space<smem>>
    %c8 = arith.constant 8 : index
    %10 = memref.load %arg2[%c8] : memref<317xf32, #tpu.memory_space<smem>>
    %c9 = arith.constant 9 : index
    %11 = memref.load %arg2[%c9] : memref<317xf32, #tpu.memory_space<smem>>
    %c10 = arith.constant 10 : index
    %12 = memref.load %arg2[%c10] : memref<317xf32, #tpu.memory_space<smem>>
    %c11 = arith.constant 11 : index
    %13 = memref.load %arg2[%c11] : memref<317xf32, #tpu.memory_space<smem>>
    %c12 = arith.constant 12 : index
    %14 = memref.load %arg2[%c12] : memref<317xf32, #tpu.memory_space<smem>>
    %c13 = arith.constant 13 : index
    %15 = memref.load %arg2[%c13] : memref<317xf32, #tpu.memory_space<smem>>
    %c14 = arith.constant 14 : index
    %16 = memref.load %arg2[%c14] : memref<317xf32, #tpu.memory_space<smem>>
    %c15 = arith.constant 15 : index
    %17 = memref.load %arg2[%c15] : memref<317xf32, #tpu.memory_space<smem>>
    %c16 = arith.constant 16 : index
    %18 = memref.load %arg2[%c16] : memref<317xf32, #tpu.memory_space<smem>>
    %c17 = arith.constant 17 : index
    %19 = memref.load %arg2[%c17] : memref<317xf32, #tpu.memory_space<smem>>
    %c18 = arith.constant 18 : index
    %20 = memref.load %arg2[%c18] : memref<317xf32, #tpu.memory_space<smem>>
    %c19 = arith.constant 19 : index
    %21 = memref.load %arg2[%c19] : memref<317xf32, #tpu.memory_space<smem>>
    %c20 = arith.constant 20 : index
    %22 = memref.load %arg2[%c20] : memref<317xf32, #tpu.memory_space<smem>>
    %c21 = arith.constant 21 : index
    %23 = memref.load %arg2[%c21] : memref<317xf32, #tpu.memory_space<smem>>
    %c22 = arith.constant 22 : index
    %24 = memref.load %arg2[%c22] : memref<317xf32, #tpu.memory_space<smem>>
    %c23 = arith.constant 23 : index
    %25 = memref.load %arg2[%c23] : memref<317xf32, #tpu.memory_space<smem>>
    %c24 = arith.constant 24 : index
    %26 = memref.load %arg2[%c24] : memref<317xf32, #tpu.memory_space<smem>>
    %c25 = arith.constant 25 : index
    %27 = memref.load %arg2[%c25] : memref<317xf32, #tpu.memory_space<smem>>
    %c26 = arith.constant 26 : index
    %28 = memref.load %arg2[%c26] : memref<317xf32, #tpu.memory_space<smem>>
    %c27 = arith.constant 27 : index
    %29 = memref.load %arg2[%c27] : memref<317xf32, #tpu.memory_space<smem>>
    %c28 = arith.constant 28 : index
    %30 = memref.load %arg2[%c28] : memref<317xf32, #tpu.memory_space<smem>>
    %c29 = arith.constant 29 : index
    %31 = memref.load %arg2[%c29] : memref<317xf32, #tpu.memory_space<smem>>
    %c30 = arith.constant 30 : index
    %32 = memref.load %arg2[%c30] : memref<317xf32, #tpu.memory_space<smem>>
    %c31 = arith.constant 31 : index
    %33 = memref.load %arg2[%c31] : memref<317xf32, #tpu.memory_space<smem>>
    %c32 = arith.constant 32 : index
    %34 = memref.load %arg2[%c32] : memref<317xf32, #tpu.memory_space<smem>>
    %c33 = arith.constant 33 : index
    %35 = memref.load %arg2[%c33] : memref<317xf32, #tpu.memory_space<smem>>
    %c34 = arith.constant 34 : index
    %36 = memref.load %arg2[%c34] : memref<317xf32, #tpu.memory_space<smem>>
    %c35 = arith.constant 35 : index
    %37 = memref.load %arg2[%c35] : memref<317xf32, #tpu.memory_space<smem>>
    %c36 = arith.constant 36 : index
    %38 = memref.load %arg2[%c36] : memref<317xf32, #tpu.memory_space<smem>>
    %c37 = arith.constant 37 : index
    %39 = memref.load %arg2[%c37] : memref<317xf32, #tpu.memory_space<smem>>
    %c38 = arith.constant 38 : index
    %40 = memref.load %arg2[%c38] : memref<317xf32, #tpu.memory_space<smem>>
    %c39 = arith.constant 39 : index
    %41 = memref.load %arg2[%c39] : memref<317xf32, #tpu.memory_space<smem>>
    %c40 = arith.constant 40 : index
    %42 = memref.load %arg2[%c40] : memref<317xf32, #tpu.memory_space<smem>>
    %c41 = arith.constant 41 : index
    %43 = memref.load %arg2[%c41] : memref<317xf32, #tpu.memory_space<smem>>
    %c42 = arith.constant 42 : index
    %44 = memref.load %arg2[%c42] : memref<317xf32, #tpu.memory_space<smem>>
    %c43 = arith.constant 43 : index
    %45 = memref.load %arg2[%c43] : memref<317xf32, #tpu.memory_space<smem>>
    %c44 = arith.constant 44 : index
    %46 = memref.load %arg2[%c44] : memref<317xf32, #tpu.memory_space<smem>>
    %c45 = arith.constant 45 : index
    %47 = memref.load %arg2[%c45] : memref<317xf32, #tpu.memory_space<smem>>
    %c46 = arith.constant 46 : index
    %48 = memref.load %arg2[%c46] : memref<317xf32, #tpu.memory_space<smem>>
    %c47 = arith.constant 47 : index
    %49 = memref.load %arg2[%c47] : memref<317xf32, #tpu.memory_space<smem>>
    %c48 = arith.constant 48 : index
    %50 = memref.load %arg2[%c48] : memref<317xf32, #tpu.memory_space<smem>>
    %c49 = arith.constant 49 : index
    %51 = memref.load %arg2[%c49] : memref<317xf32, #tpu.memory_space<smem>>
    %c50 = arith.constant 50 : index
    %52 = memref.load %arg2[%c50] : memref<317xf32, #tpu.memory_space<smem>>
    %c51 = arith.constant 51 : index
    %53 = memref.load %arg2[%c51] : memref<317xf32, #tpu.memory_space<smem>>
    %c52 = arith.constant 52 : index
    %54 = memref.load %arg2[%c52] : memref<317xf32, #tpu.memory_space<smem>>
    %c53 = arith.constant 53 : index
    %55 = memref.load %arg2[%c53] : memref<317xf32, #tpu.memory_space<smem>>
    %c54 = arith.constant 54 : index
    %56 = memref.load %arg2[%c54] : memref<317xf32, #tpu.memory_space<smem>>
    %c55 = arith.constant 55 : index
    %57 = memref.load %arg2[%c55] : memref<317xf32, #tpu.memory_space<smem>>
    %c56 = arith.constant 56 : index
    %58 = memref.load %arg2[%c56] : memref<317xf32, #tpu.memory_space<smem>>
    %c57 = arith.constant 57 : index
    %59 = memref.load %arg2[%c57] : memref<317xf32, #tpu.memory_space<smem>>
    %c58 = arith.constant 58 : index
    %60 = memref.load %arg2[%c58] : memref<317xf32, #tpu.memory_space<smem>>
    %c59 = arith.constant 59 : index
    %61 = memref.load %arg2[%c59] : memref<317xf32, #tpu.memory_space<smem>>
    %c60 = arith.constant 60 : index
    %62 = memref.load %arg2[%c60] : memref<317xf32, #tpu.memory_space<smem>>
    %c61 = arith.constant 61 : index
    %63 = memref.load %arg2[%c61] : memref<317xf32, #tpu.memory_space<smem>>
    %c62 = arith.constant 62 : index
    %64 = memref.load %arg2[%c62] : memref<317xf32, #tpu.memory_space<smem>>
    %c63 = arith.constant 63 : index
    %65 = memref.load %arg2[%c63] : memref<317xf32, #tpu.memory_space<smem>>
    %c64 = arith.constant 64 : index
    %66 = memref.load %arg2[%c64] : memref<317xf32, #tpu.memory_space<smem>>
    %c65 = arith.constant 65 : index
    %67 = memref.load %arg2[%c65] : memref<317xf32, #tpu.memory_space<smem>>
    %c66 = arith.constant 66 : index
    %68 = memref.load %arg2[%c66] : memref<317xf32, #tpu.memory_space<smem>>
    %c67 = arith.constant 67 : index
    %69 = memref.load %arg2[%c67] : memref<317xf32, #tpu.memory_space<smem>>
    %c68 = arith.constant 68 : index
    %70 = memref.load %arg2[%c68] : memref<317xf32, #tpu.memory_space<smem>>
    %c69 = arith.constant 69 : index
    %71 = memref.load %arg2[%c69] : memref<317xf32, #tpu.memory_space<smem>>
    %c70 = arith.constant 70 : index
    %72 = memref.load %arg2[%c70] : memref<317xf32, #tpu.memory_space<smem>>
    %c71 = arith.constant 71 : index
    %73 = memref.load %arg2[%c71] : memref<317xf32, #tpu.memory_space<smem>>
    %c72 = arith.constant 72 : index
    %74 = memref.load %arg2[%c72] : memref<317xf32, #tpu.memory_space<smem>>
    %c73 = arith.constant 73 : index
    %75 = memref.load %arg2[%c73] : memref<317xf32, #tpu.memory_space<smem>>
    %c74 = arith.constant 74 : index
    %76 = memref.load %arg2[%c74] : memref<317xf32, #tpu.memory_space<smem>>
    %c75 = arith.constant 75 : index
    %77 = memref.load %arg2[%c75] : memref<317xf32, #tpu.memory_space<smem>>
    %c76 = arith.constant 76 : index
    %78 = memref.load %arg2[%c76] : memref<317xf32, #tpu.memory_space<smem>>
    %c77 = arith.constant 77 : index
    %79 = memref.load %arg2[%c77] : memref<317xf32, #tpu.memory_space<smem>>
    %c78 = arith.constant 78 : index
    %80 = memref.load %arg2[%c78] : memref<317xf32, #tpu.memory_space<smem>>
    %c79 = arith.constant 79 : index
    %81 = memref.load %arg2[%c79] : memref<317xf32, #tpu.memory_space<smem>>
    %c80 = arith.constant 80 : index
    %82 = memref.load %arg2[%c80] : memref<317xf32, #tpu.memory_space<smem>>
    %c81 = arith.constant 81 : index
    %83 = memref.load %arg2[%c81] : memref<317xf32, #tpu.memory_space<smem>>
    %c82 = arith.constant 82 : index
    %84 = memref.load %arg2[%c82] : memref<317xf32, #tpu.memory_space<smem>>
    %c83 = arith.constant 83 : index
    %85 = memref.load %arg2[%c83] : memref<317xf32, #tpu.memory_space<smem>>
    %c84 = arith.constant 84 : index
    %86 = memref.load %arg2[%c84] : memref<317xf32, #tpu.memory_space<smem>>
    %c85 = arith.constant 85 : index
    %87 = memref.load %arg2[%c85] : memref<317xf32, #tpu.memory_space<smem>>
    %c86 = arith.constant 86 : index
    %88 = memref.load %arg2[%c86] : memref<317xf32, #tpu.memory_space<smem>>
    %c87 = arith.constant 87 : index
    %89 = memref.load %arg2[%c87] : memref<317xf32, #tpu.memory_space<smem>>
    %c88 = arith.constant 88 : index
    %90 = memref.load %arg2[%c88] : memref<317xf32, #tpu.memory_space<smem>>
    %c89 = arith.constant 89 : index
    %91 = memref.load %arg2[%c89] : memref<317xf32, #tpu.memory_space<smem>>
    %c90 = arith.constant 90 : index
    %92 = memref.load %arg2[%c90] : memref<317xf32, #tpu.memory_space<smem>>
    %c91 = arith.constant 91 : index
    %93 = memref.load %arg2[%c91] : memref<317xf32, #tpu.memory_space<smem>>
    %c92 = arith.constant 92 : index
    %94 = memref.load %arg2[%c92] : memref<317xf32, #tpu.memory_space<smem>>
    %c93 = arith.constant 93 : index
    %95 = memref.load %arg2[%c93] : memref<317xf32, #tpu.memory_space<smem>>
    %c94 = arith.constant 94 : index
    %96 = memref.load %arg2[%c94] : memref<317xf32, #tpu.memory_space<smem>>
    %c95 = arith.constant 95 : index
    %97 = memref.load %arg2[%c95] : memref<317xf32, #tpu.memory_space<smem>>
    %c96 = arith.constant 96 : index
    %98 = memref.load %arg2[%c96] : memref<317xf32, #tpu.memory_space<smem>>
    %c97 = arith.constant 97 : index
    %99 = memref.load %arg2[%c97] : memref<317xf32, #tpu.memory_space<smem>>
    %c98 = arith.constant 98 : index
    %100 = memref.load %arg2[%c98] : memref<317xf32, #tpu.memory_space<smem>>
    %c99 = arith.constant 99 : index
    %101 = memref.load %arg2[%c99] : memref<317xf32, #tpu.memory_space<smem>>
    %c100 = arith.constant 100 : index
    %102 = memref.load %arg2[%c100] : memref<317xf32, #tpu.memory_space<smem>>
    %c101 = arith.constant 101 : index
    %103 = memref.load %arg2[%c101] : memref<317xf32, #tpu.memory_space<smem>>
    %c102 = arith.constant 102 : index
    %104 = memref.load %arg2[%c102] : memref<317xf32, #tpu.memory_space<smem>>
    %c103 = arith.constant 103 : index
    %105 = memref.load %arg2[%c103] : memref<317xf32, #tpu.memory_space<smem>>
    %c104 = arith.constant 104 : index
    %106 = memref.load %arg2[%c104] : memref<317xf32, #tpu.memory_space<smem>>
    %c105 = arith.constant 105 : index
    %107 = memref.load %arg2[%c105] : memref<317xf32, #tpu.memory_space<smem>>
    %c106 = arith.constant 106 : index
    %108 = memref.load %arg2[%c106] : memref<317xf32, #tpu.memory_space<smem>>
    %c107 = arith.constant 107 : index
    %109 = memref.load %arg2[%c107] : memref<317xf32, #tpu.memory_space<smem>>
    %c108 = arith.constant 108 : index
    %110 = memref.load %arg2[%c108] : memref<317xf32, #tpu.memory_space<smem>>
    %c109 = arith.constant 109 : index
    %111 = memref.load %arg2[%c109] : memref<317xf32, #tpu.memory_space<smem>>
    %c110 = arith.constant 110 : index
    %112 = memref.load %arg2[%c110] : memref<317xf32, #tpu.memory_space<smem>>
    %c111 = arith.constant 111 : index
    %113 = memref.load %arg2[%c111] : memref<317xf32, #tpu.memory_space<smem>>
    %c112 = arith.constant 112 : index
    %114 = memref.load %arg2[%c112] : memref<317xf32, #tpu.memory_space<smem>>
    %c113 = arith.constant 113 : index
    %115 = memref.load %arg2[%c113] : memref<317xf32, #tpu.memory_space<smem>>
    %c114 = arith.constant 114 : index
    %116 = memref.load %arg2[%c114] : memref<317xf32, #tpu.memory_space<smem>>
    %c115 = arith.constant 115 : index
    %117 = memref.load %arg2[%c115] : memref<317xf32, #tpu.memory_space<smem>>
    %c116 = arith.constant 116 : index
    %118 = memref.load %arg2[%c116] : memref<317xf32, #tpu.memory_space<smem>>
    %c117 = arith.constant 117 : index
    %119 = memref.load %arg2[%c117] : memref<317xf32, #tpu.memory_space<smem>>
    %c118 = arith.constant 118 : index
    %120 = memref.load %arg2[%c118] : memref<317xf32, #tpu.memory_space<smem>>
    %c119 = arith.constant 119 : index
    %121 = memref.load %arg2[%c119] : memref<317xf32, #tpu.memory_space<smem>>
    %c120 = arith.constant 120 : index
    %122 = memref.load %arg2[%c120] : memref<317xf32, #tpu.memory_space<smem>>
    %c121 = arith.constant 121 : index
    %123 = memref.load %arg2[%c121] : memref<317xf32, #tpu.memory_space<smem>>
    %c122 = arith.constant 122 : index
    %124 = memref.load %arg2[%c122] : memref<317xf32, #tpu.memory_space<smem>>
    %c123 = arith.constant 123 : index
    %125 = memref.load %arg2[%c123] : memref<317xf32, #tpu.memory_space<smem>>
    %c124 = arith.constant 124 : index
    %126 = memref.load %arg2[%c124] : memref<317xf32, #tpu.memory_space<smem>>
    %c125 = arith.constant 125 : index
    %127 = memref.load %arg2[%c125] : memref<317xf32, #tpu.memory_space<smem>>
    %c126 = arith.constant 126 : index
    %128 = memref.load %arg2[%c126] : memref<317xf32, #tpu.memory_space<smem>>
    %c127 = arith.constant 127 : index
    %129 = memref.load %arg2[%c127] : memref<317xf32, #tpu.memory_space<smem>>
    %c128 = arith.constant 128 : index
    %130 = memref.load %arg2[%c128] : memref<317xf32, #tpu.memory_space<smem>>
    %c129 = arith.constant 129 : index
    %131 = memref.load %arg2[%c129] : memref<317xf32, #tpu.memory_space<smem>>
    %c130 = arith.constant 130 : index
    %132 = memref.load %arg2[%c130] : memref<317xf32, #tpu.memory_space<smem>>
    %c131 = arith.constant 131 : index
    %133 = memref.load %arg2[%c131] : memref<317xf32, #tpu.memory_space<smem>>
    %c132 = arith.constant 132 : index
    %134 = memref.load %arg2[%c132] : memref<317xf32, #tpu.memory_space<smem>>
    %c133 = arith.constant 133 : index
    %135 = memref.load %arg2[%c133] : memref<317xf32, #tpu.memory_space<smem>>
    %c134 = arith.constant 134 : index
    %136 = memref.load %arg2[%c134] : memref<317xf32, #tpu.memory_space<smem>>
    %c135 = arith.constant 135 : index
    %137 = memref.load %arg2[%c135] : memref<317xf32, #tpu.memory_space<smem>>
    %c136 = arith.constant 136 : index
    %138 = memref.load %arg2[%c136] : memref<317xf32, #tpu.memory_space<smem>>
    %c137 = arith.constant 137 : index
    %139 = memref.load %arg2[%c137] : memref<317xf32, #tpu.memory_space<smem>>
    %c138 = arith.constant 138 : index
    %140 = memref.load %arg2[%c138] : memref<317xf32, #tpu.memory_space<smem>>
    %c139 = arith.constant 139 : index
    %141 = memref.load %arg2[%c139] : memref<317xf32, #tpu.memory_space<smem>>
    %c140 = arith.constant 140 : index
    %142 = memref.load %arg2[%c140] : memref<317xf32, #tpu.memory_space<smem>>
    %c141 = arith.constant 141 : index
    %143 = memref.load %arg2[%c141] : memref<317xf32, #tpu.memory_space<smem>>
    %c142 = arith.constant 142 : index
    %144 = memref.load %arg2[%c142] : memref<317xf32, #tpu.memory_space<smem>>
    %c143 = arith.constant 143 : index
    %145 = memref.load %arg2[%c143] : memref<317xf32, #tpu.memory_space<smem>>
    %c144 = arith.constant 144 : index
    %146 = memref.load %arg2[%c144] : memref<317xf32, #tpu.memory_space<smem>>
    %c145 = arith.constant 145 : index
    %147 = memref.load %arg2[%c145] : memref<317xf32, #tpu.memory_space<smem>>
    %c146 = arith.constant 146 : index
    %148 = memref.load %arg2[%c146] : memref<317xf32, #tpu.memory_space<smem>>
    %c147 = arith.constant 147 : index
    %149 = memref.load %arg2[%c147] : memref<317xf32, #tpu.memory_space<smem>>
    %c148 = arith.constant 148 : index
    %150 = memref.load %arg2[%c148] : memref<317xf32, #tpu.memory_space<smem>>
    %c149 = arith.constant 149 : index
    %151 = memref.load %arg2[%c149] : memref<317xf32, #tpu.memory_space<smem>>
    %c150 = arith.constant 150 : index
    %152 = memref.load %arg2[%c150] : memref<317xf32, #tpu.memory_space<smem>>
    %c151 = arith.constant 151 : index
    %153 = memref.load %arg2[%c151] : memref<317xf32, #tpu.memory_space<smem>>
    %c152 = arith.constant 152 : index
    %154 = memref.load %arg2[%c152] : memref<317xf32, #tpu.memory_space<smem>>
    %c153 = arith.constant 153 : index
    %155 = memref.load %arg2[%c153] : memref<317xf32, #tpu.memory_space<smem>>
    %c154 = arith.constant 154 : index
    %156 = memref.load %arg2[%c154] : memref<317xf32, #tpu.memory_space<smem>>
    %c155 = arith.constant 155 : index
    %157 = memref.load %arg2[%c155] : memref<317xf32, #tpu.memory_space<smem>>
    %c156 = arith.constant 156 : index
    %158 = memref.load %arg2[%c156] : memref<317xf32, #tpu.memory_space<smem>>
    %c157 = arith.constant 157 : index
    %159 = memref.load %arg2[%c157] : memref<317xf32, #tpu.memory_space<smem>>
    %c158 = arith.constant 158 : index
    %160 = memref.load %arg2[%c158] : memref<317xf32, #tpu.memory_space<smem>>
    %c159 = arith.constant 159 : index
    %161 = memref.load %arg2[%c159] : memref<317xf32, #tpu.memory_space<smem>>
    %c160 = arith.constant 160 : index
    %162 = memref.load %arg2[%c160] : memref<317xf32, #tpu.memory_space<smem>>
    %c161 = arith.constant 161 : index
    %163 = memref.load %arg2[%c161] : memref<317xf32, #tpu.memory_space<smem>>
    %c162 = arith.constant 162 : index
    %164 = memref.load %arg2[%c162] : memref<317xf32, #tpu.memory_space<smem>>
    %c163 = arith.constant 163 : index
    %165 = memref.load %arg2[%c163] : memref<317xf32, #tpu.memory_space<smem>>
    %c164 = arith.constant 164 : index
    %166 = memref.load %arg2[%c164] : memref<317xf32, #tpu.memory_space<smem>>
    %c165 = arith.constant 165 : index
    %167 = memref.load %arg2[%c165] : memref<317xf32, #tpu.memory_space<smem>>
    %c166 = arith.constant 166 : index
    %168 = memref.load %arg2[%c166] : memref<317xf32, #tpu.memory_space<smem>>
    %c167 = arith.constant 167 : index
    %169 = memref.load %arg2[%c167] : memref<317xf32, #tpu.memory_space<smem>>
    %c168 = arith.constant 168 : index
    %170 = memref.load %arg2[%c168] : memref<317xf32, #tpu.memory_space<smem>>
    %c169 = arith.constant 169 : index
    %171 = memref.load %arg2[%c169] : memref<317xf32, #tpu.memory_space<smem>>
    %c170 = arith.constant 170 : index
    %172 = memref.load %arg2[%c170] : memref<317xf32, #tpu.memory_space<smem>>
    %c171 = arith.constant 171 : index
    %173 = memref.load %arg2[%c171] : memref<317xf32, #tpu.memory_space<smem>>
    %c172 = arith.constant 172 : index
    %174 = memref.load %arg2[%c172] : memref<317xf32, #tpu.memory_space<smem>>
    %c173 = arith.constant 173 : index
    %175 = memref.load %arg2[%c173] : memref<317xf32, #tpu.memory_space<smem>>
    %c174 = arith.constant 174 : index
    %176 = memref.load %arg2[%c174] : memref<317xf32, #tpu.memory_space<smem>>
    %c175 = arith.constant 175 : index
    %177 = memref.load %arg2[%c175] : memref<317xf32, #tpu.memory_space<smem>>
    %c176 = arith.constant 176 : index
    %178 = memref.load %arg2[%c176] : memref<317xf32, #tpu.memory_space<smem>>
    %c177 = arith.constant 177 : index
    %179 = memref.load %arg2[%c177] : memref<317xf32, #tpu.memory_space<smem>>
    %c178 = arith.constant 178 : index
    %180 = memref.load %arg2[%c178] : memref<317xf32, #tpu.memory_space<smem>>
    %c179 = arith.constant 179 : index
    %181 = memref.load %arg2[%c179] : memref<317xf32, #tpu.memory_space<smem>>
    %c180 = arith.constant 180 : index
    %182 = memref.load %arg2[%c180] : memref<317xf32, #tpu.memory_space<smem>>
    %c181 = arith.constant 181 : index
    %183 = memref.load %arg2[%c181] : memref<317xf32, #tpu.memory_space<smem>>
    %c182 = arith.constant 182 : index
    %184 = memref.load %arg2[%c182] : memref<317xf32, #tpu.memory_space<smem>>
    %c183 = arith.constant 183 : index
    %185 = memref.load %arg2[%c183] : memref<317xf32, #tpu.memory_space<smem>>
    %c184 = arith.constant 184 : index
    %186 = memref.load %arg2[%c184] : memref<317xf32, #tpu.memory_space<smem>>
    %c185 = arith.constant 185 : index
    %187 = memref.load %arg2[%c185] : memref<317xf32, #tpu.memory_space<smem>>
    %c186 = arith.constant 186 : index
    %188 = memref.load %arg2[%c186] : memref<317xf32, #tpu.memory_space<smem>>
    %c187 = arith.constant 187 : index
    %189 = memref.load %arg2[%c187] : memref<317xf32, #tpu.memory_space<smem>>
    %c188 = arith.constant 188 : index
    %190 = memref.load %arg2[%c188] : memref<317xf32, #tpu.memory_space<smem>>
    %c189 = arith.constant 189 : index
    %191 = memref.load %arg2[%c189] : memref<317xf32, #tpu.memory_space<smem>>
    %c190 = arith.constant 190 : index
    %192 = memref.load %arg2[%c190] : memref<317xf32, #tpu.memory_space<smem>>
    %c191 = arith.constant 191 : index
    %193 = memref.load %arg2[%c191] : memref<317xf32, #tpu.memory_space<smem>>
    %c192 = arith.constant 192 : index
    %194 = memref.load %arg2[%c192] : memref<317xf32, #tpu.memory_space<smem>>
    %c193 = arith.constant 193 : index
    %195 = memref.load %arg2[%c193] : memref<317xf32, #tpu.memory_space<smem>>
    %c194 = arith.constant 194 : index
    %196 = memref.load %arg2[%c194] : memref<317xf32, #tpu.memory_space<smem>>
    %c195 = arith.constant 195 : index
    %197 = memref.load %arg2[%c195] : memref<317xf32, #tpu.memory_space<smem>>
    %c196 = arith.constant 196 : index
    %198 = memref.load %arg2[%c196] : memref<317xf32, #tpu.memory_space<smem>>
    %c197 = arith.constant 197 : index
    %199 = memref.load %arg2[%c197] : memref<317xf32, #tpu.memory_space<smem>>
    %c198 = arith.constant 198 : index
    %200 = memref.load %arg2[%c198] : memref<317xf32, #tpu.memory_space<smem>>
    %c199 = arith.constant 199 : index
    %201 = memref.load %arg2[%c199] : memref<317xf32, #tpu.memory_space<smem>>
    %c200 = arith.constant 200 : index
    %202 = memref.load %arg2[%c200] : memref<317xf32, #tpu.memory_space<smem>>
    %c201 = arith.constant 201 : index
    %203 = memref.load %arg2[%c201] : memref<317xf32, #tpu.memory_space<smem>>
    %c202 = arith.constant 202 : index
    %204 = memref.load %arg2[%c202] : memref<317xf32, #tpu.memory_space<smem>>
    %c203 = arith.constant 203 : index
    %205 = memref.load %arg2[%c203] : memref<317xf32, #tpu.memory_space<smem>>
    %c204 = arith.constant 204 : index
    %206 = memref.load %arg2[%c204] : memref<317xf32, #tpu.memory_space<smem>>
    %c205 = arith.constant 205 : index
    %207 = memref.load %arg2[%c205] : memref<317xf32, #tpu.memory_space<smem>>
    %c206 = arith.constant 206 : index
    %208 = memref.load %arg2[%c206] : memref<317xf32, #tpu.memory_space<smem>>
    %c207 = arith.constant 207 : index
    %209 = memref.load %arg2[%c207] : memref<317xf32, #tpu.memory_space<smem>>
    %c208 = arith.constant 208 : index
    %210 = memref.load %arg2[%c208] : memref<317xf32, #tpu.memory_space<smem>>
    %c209 = arith.constant 209 : index
    %211 = memref.load %arg2[%c209] : memref<317xf32, #tpu.memory_space<smem>>
    %c210 = arith.constant 210 : index
    %212 = memref.load %arg2[%c210] : memref<317xf32, #tpu.memory_space<smem>>
    %c211 = arith.constant 211 : index
    %213 = memref.load %arg2[%c211] : memref<317xf32, #tpu.memory_space<smem>>
    %c212 = arith.constant 212 : index
    %214 = memref.load %arg2[%c212] : memref<317xf32, #tpu.memory_space<smem>>
    %c213 = arith.constant 213 : index
    %215 = memref.load %arg2[%c213] : memref<317xf32, #tpu.memory_space<smem>>
    %c214 = arith.constant 214 : index
    %216 = memref.load %arg2[%c214] : memref<317xf32, #tpu.memory_space<smem>>
    %c215 = arith.constant 215 : index
    %217 = memref.load %arg2[%c215] : memref<317xf32, #tpu.memory_space<smem>>
    %c216 = arith.constant 216 : index
    %218 = memref.load %arg2[%c216] : memref<317xf32, #tpu.memory_space<smem>>
    %c217 = arith.constant 217 : index
    %219 = memref.load %arg2[%c217] : memref<317xf32, #tpu.memory_space<smem>>
    %c218 = arith.constant 218 : index
    %220 = memref.load %arg2[%c218] : memref<317xf32, #tpu.memory_space<smem>>
    %c219 = arith.constant 219 : index
    %221 = memref.load %arg2[%c219] : memref<317xf32, #tpu.memory_space<smem>>
    %c220 = arith.constant 220 : index
    %222 = memref.load %arg2[%c220] : memref<317xf32, #tpu.memory_space<smem>>
    %c221 = arith.constant 221 : index
    %223 = memref.load %arg2[%c221] : memref<317xf32, #tpu.memory_space<smem>>
    %c222 = arith.constant 222 : index
    %224 = memref.load %arg2[%c222] : memref<317xf32, #tpu.memory_space<smem>>
    %c223 = arith.constant 223 : index
    %225 = memref.load %arg2[%c223] : memref<317xf32, #tpu.memory_space<smem>>
    %c224 = arith.constant 224 : index
    %226 = memref.load %arg2[%c224] : memref<317xf32, #tpu.memory_space<smem>>
    %c225 = arith.constant 225 : index
    %227 = memref.load %arg2[%c225] : memref<317xf32, #tpu.memory_space<smem>>
    %c226 = arith.constant 226 : index
    %228 = memref.load %arg2[%c226] : memref<317xf32, #tpu.memory_space<smem>>
    %c227 = arith.constant 227 : index
    %229 = memref.load %arg2[%c227] : memref<317xf32, #tpu.memory_space<smem>>
    %c228 = arith.constant 228 : index
    %230 = memref.load %arg2[%c228] : memref<317xf32, #tpu.memory_space<smem>>
    %c229 = arith.constant 229 : index
    %231 = memref.load %arg2[%c229] : memref<317xf32, #tpu.memory_space<smem>>
    %c230 = arith.constant 230 : index
    %232 = memref.load %arg2[%c230] : memref<317xf32, #tpu.memory_space<smem>>
    %c231 = arith.constant 231 : index
    %233 = memref.load %arg2[%c231] : memref<317xf32, #tpu.memory_space<smem>>
    %c232 = arith.constant 232 : index
    %234 = memref.load %arg2[%c232] : memref<317xf32, #tpu.memory_space<smem>>
    %c233 = arith.constant 233 : index
    %235 = memref.load %arg2[%c233] : memref<317xf32, #tpu.memory_space<smem>>
    %c234 = arith.constant 234 : index
    %236 = memref.load %arg2[%c234] : memref<317xf32, #tpu.memory_space<smem>>
    %c235 = arith.constant 235 : index
    %237 = memref.load %arg2[%c235] : memref<317xf32, #tpu.memory_space<smem>>
    %c236 = arith.constant 236 : index
    %238 = memref.load %arg2[%c236] : memref<317xf32, #tpu.memory_space<smem>>
    %c237 = arith.constant 237 : index
    %239 = memref.load %arg2[%c237] : memref<317xf32, #tpu.memory_space<smem>>
    %c238 = arith.constant 238 : index
    %240 = memref.load %arg2[%c238] : memref<317xf32, #tpu.memory_space<smem>>
    %c239 = arith.constant 239 : index
    %241 = memref.load %arg2[%c239] : memref<317xf32, #tpu.memory_space<smem>>
    %c240 = arith.constant 240 : index
    %242 = memref.load %arg2[%c240] : memref<317xf32, #tpu.memory_space<smem>>
    %c241 = arith.constant 241 : index
    %243 = memref.load %arg2[%c241] : memref<317xf32, #tpu.memory_space<smem>>
    %c242 = arith.constant 242 : index
    %244 = memref.load %arg2[%c242] : memref<317xf32, #tpu.memory_space<smem>>
    %c243 = arith.constant 243 : index
    %245 = memref.load %arg2[%c243] : memref<317xf32, #tpu.memory_space<smem>>
    %c244 = arith.constant 244 : index
    %246 = memref.load %arg2[%c244] : memref<317xf32, #tpu.memory_space<smem>>
    %c245 = arith.constant 245 : index
    %247 = memref.load %arg2[%c245] : memref<317xf32, #tpu.memory_space<smem>>
    %c246 = arith.constant 246 : index
    %248 = memref.load %arg2[%c246] : memref<317xf32, #tpu.memory_space<smem>>
    %c247 = arith.constant 247 : index
    %249 = memref.load %arg2[%c247] : memref<317xf32, #tpu.memory_space<smem>>
    %c248 = arith.constant 248 : index
    %250 = memref.load %arg2[%c248] : memref<317xf32, #tpu.memory_space<smem>>
    %c249 = arith.constant 249 : index
    %251 = memref.load %arg2[%c249] : memref<317xf32, #tpu.memory_space<smem>>
    %c250 = arith.constant 250 : index
    %252 = memref.load %arg2[%c250] : memref<317xf32, #tpu.memory_space<smem>>
    %c251 = arith.constant 251 : index
    %253 = memref.load %arg2[%c251] : memref<317xf32, #tpu.memory_space<smem>>
    %c252 = arith.constant 252 : index
    %254 = memref.load %arg2[%c252] : memref<317xf32, #tpu.memory_space<smem>>
    %c253 = arith.constant 253 : index
    %255 = memref.load %arg2[%c253] : memref<317xf32, #tpu.memory_space<smem>>
    %c254 = arith.constant 254 : index
    %256 = memref.load %arg2[%c254] : memref<317xf32, #tpu.memory_space<smem>>
    %c255 = arith.constant 255 : index
    %257 = memref.load %arg2[%c255] : memref<317xf32, #tpu.memory_space<smem>>
    %c256 = arith.constant 256 : index
    %258 = memref.load %arg2[%c256] : memref<317xf32, #tpu.memory_space<smem>>
    %c257 = arith.constant 257 : index
    %259 = memref.load %arg2[%c257] : memref<317xf32, #tpu.memory_space<smem>>
    %c258 = arith.constant 258 : index
    %260 = memref.load %arg2[%c258] : memref<317xf32, #tpu.memory_space<smem>>
    %c259 = arith.constant 259 : index
    %261 = memref.load %arg2[%c259] : memref<317xf32, #tpu.memory_space<smem>>
    %c260 = arith.constant 260 : index
    %262 = memref.load %arg2[%c260] : memref<317xf32, #tpu.memory_space<smem>>
    %c261 = arith.constant 261 : index
    %263 = memref.load %arg2[%c261] : memref<317xf32, #tpu.memory_space<smem>>
    %c262 = arith.constant 262 : index
    %264 = memref.load %arg2[%c262] : memref<317xf32, #tpu.memory_space<smem>>
    %c263 = arith.constant 263 : index
    %265 = memref.load %arg2[%c263] : memref<317xf32, #tpu.memory_space<smem>>
    %c264 = arith.constant 264 : index
    %266 = memref.load %arg2[%c264] : memref<317xf32, #tpu.memory_space<smem>>
    %c265 = arith.constant 265 : index
    %267 = memref.load %arg2[%c265] : memref<317xf32, #tpu.memory_space<smem>>
    %c266 = arith.constant 266 : index
    %268 = memref.load %arg2[%c266] : memref<317xf32, #tpu.memory_space<smem>>
    %c267 = arith.constant 267 : index
    %269 = memref.load %arg2[%c267] : memref<317xf32, #tpu.memory_space<smem>>
    %c268 = arith.constant 268 : index
    %270 = memref.load %arg2[%c268] : memref<317xf32, #tpu.memory_space<smem>>
    %c269 = arith.constant 269 : index
    %271 = memref.load %arg2[%c269] : memref<317xf32, #tpu.memory_space<smem>>
    %c270 = arith.constant 270 : index
    %272 = memref.load %arg2[%c270] : memref<317xf32, #tpu.memory_space<smem>>
    %c271 = arith.constant 271 : index
    %273 = memref.load %arg2[%c271] : memref<317xf32, #tpu.memory_space<smem>>
    %c272 = arith.constant 272 : index
    %274 = memref.load %arg2[%c272] : memref<317xf32, #tpu.memory_space<smem>>
    %c273 = arith.constant 273 : index
    %275 = memref.load %arg2[%c273] : memref<317xf32, #tpu.memory_space<smem>>
    %c274 = arith.constant 274 : index
    %276 = memref.load %arg2[%c274] : memref<317xf32, #tpu.memory_space<smem>>
    %c275 = arith.constant 275 : index
    %277 = memref.load %arg2[%c275] : memref<317xf32, #tpu.memory_space<smem>>
    %c276 = arith.constant 276 : index
    %278 = memref.load %arg2[%c276] : memref<317xf32, #tpu.memory_space<smem>>
    %c277 = arith.constant 277 : index
    %279 = memref.load %arg2[%c277] : memref<317xf32, #tpu.memory_space<smem>>
    %c278 = arith.constant 278 : index
    %280 = memref.load %arg2[%c278] : memref<317xf32, #tpu.memory_space<smem>>
    %c279 = arith.constant 279 : index
    %281 = memref.load %arg2[%c279] : memref<317xf32, #tpu.memory_space<smem>>
    %c280 = arith.constant 280 : index
    %282 = memref.load %arg2[%c280] : memref<317xf32, #tpu.memory_space<smem>>
    %c281 = arith.constant 281 : index
    %283 = memref.load %arg2[%c281] : memref<317xf32, #tpu.memory_space<smem>>
    %c282 = arith.constant 282 : index
    %284 = memref.load %arg2[%c282] : memref<317xf32, #tpu.memory_space<smem>>
    %c283 = arith.constant 283 : index
    %285 = memref.load %arg2[%c283] : memref<317xf32, #tpu.memory_space<smem>>
    %c284 = arith.constant 284 : index
    %286 = memref.load %arg2[%c284] : memref<317xf32, #tpu.memory_space<smem>>
    %c285 = arith.constant 285 : index
    %287 = memref.load %arg2[%c285] : memref<317xf32, #tpu.memory_space<smem>>
    %c286 = arith.constant 286 : index
    %288 = memref.load %arg2[%c286] : memref<317xf32, #tpu.memory_space<smem>>
    %c287 = arith.constant 287 : index
    %289 = memref.load %arg2[%c287] : memref<317xf32, #tpu.memory_space<smem>>
    %c288 = arith.constant 288 : index
    %290 = memref.load %arg2[%c288] : memref<317xf32, #tpu.memory_space<smem>>
    %c289 = arith.constant 289 : index
    %291 = memref.load %arg2[%c289] : memref<317xf32, #tpu.memory_space<smem>>
    %c290 = arith.constant 290 : index
    %292 = memref.load %arg2[%c290] : memref<317xf32, #tpu.memory_space<smem>>
    %c291 = arith.constant 291 : index
    %293 = memref.load %arg2[%c291] : memref<317xf32, #tpu.memory_space<smem>>
    %c292 = arith.constant 292 : index
    %294 = memref.load %arg2[%c292] : memref<317xf32, #tpu.memory_space<smem>>
    %c293 = arith.constant 293 : index
    %295 = memref.load %arg2[%c293] : memref<317xf32, #tpu.memory_space<smem>>
    %c294 = arith.constant 294 : index
    %296 = memref.load %arg2[%c294] : memref<317xf32, #tpu.memory_space<smem>>
    %c295 = arith.constant 295 : index
    %297 = memref.load %arg2[%c295] : memref<317xf32, #tpu.memory_space<smem>>
    %c296 = arith.constant 296 : index
    %298 = memref.load %arg2[%c296] : memref<317xf32, #tpu.memory_space<smem>>
    %c297 = arith.constant 297 : index
    %299 = memref.load %arg2[%c297] : memref<317xf32, #tpu.memory_space<smem>>
    %c298 = arith.constant 298 : index
    %300 = memref.load %arg2[%c298] : memref<317xf32, #tpu.memory_space<smem>>
    %c299 = arith.constant 299 : index
    %301 = memref.load %arg2[%c299] : memref<317xf32, #tpu.memory_space<smem>>
    %302 = vector.extract_strided_slice %0 {offsets = [0, 0], sizes = [8, 256], strides = [1, 1]} : vector<24x384xf32> to vector<8x256xf32>
    %303 = vector.broadcast %2 : f32 to vector<8x256xf32>
    %304 = arith.mulf %303, %302 : vector<8x256xf32>
    %305 = vector.broadcast %77 : f32 to vector<8x256xf32>
    %306 = arith.mulf %305, %302 : vector<8x256xf32>
    %307 = vector.broadcast %152 : f32 to vector<8x256xf32>
    %308 = arith.mulf %307, %302 : vector<8x256xf32>
    %309 = vector.broadcast %227 : f32 to vector<8x256xf32>
    %310 = arith.mulf %309, %302 : vector<8x256xf32>
    %311 = vector.extract_strided_slice %0 {offsets = [8, 0], sizes = [8, 256], strides = [1, 1]} : vector<24x384xf32> to vector<8x256xf32>
    %312 = vector.broadcast %27 : f32 to vector<8x256xf32>
    %313 = arith.mulf %312, %311 : vector<8x256xf32>
    %314 = arith.addf %304, %313 : vector<8x256xf32>
    %315 = vector.broadcast %102 : f32 to vector<8x256xf32>
    %316 = arith.mulf %315, %311 : vector<8x256xf32>
    %317 = arith.addf %306, %316 : vector<8x256xf32>
    %318 = vector.broadcast %177 : f32 to vector<8x256xf32>
    %319 = arith.mulf %318, %311 : vector<8x256xf32>
    %320 = arith.addf %308, %319 : vector<8x256xf32>
    %321 = vector.broadcast %252 : f32 to vector<8x256xf32>
    %322 = arith.mulf %321, %311 : vector<8x256xf32>
    %323 = arith.addf %310, %322 : vector<8x256xf32>
    %324 = vector.extract_strided_slice %0 {offsets = [16, 0], sizes = [8, 256], strides = [1, 1]} : vector<24x384xf32> to vector<8x256xf32>
    %325 = vector.broadcast %52 : f32 to vector<8x256xf32>
    %326 = arith.mulf %325, %324 : vector<8x256xf32>
    %327 = arith.addf %314, %326 : vector<8x256xf32>
    %328 = vector.broadcast %127 : f32 to vector<8x256xf32>
    %329 = arith.mulf %328, %324 : vector<8x256xf32>
    %330 = arith.addf %317, %329 : vector<8x256xf32>
    %331 = vector.broadcast %202 : f32 to vector<8x256xf32>
    %332 = arith.mulf %331, %324 : vector<8x256xf32>
    %333 = arith.addf %320, %332 : vector<8x256xf32>
    %334 = vector.broadcast %277 : f32 to vector<8x256xf32>
    %335 = arith.mulf %334, %324 : vector<8x256xf32>
    %336 = arith.addf %323, %335 : vector<8x256xf32>
    %c383_i32 = arith.constant 383 : i32
    %337 = tpu.dynamic_rotate %0 by %c383_i32 dim 1 : vector<24x384xf32>, i32 -> vector<24x384xf32>
    %338 = vector.extract_strided_slice %337 {offsets = [0, 0], sizes = [8, 256], strides = [1, 1]} : vector<24x384xf32> to vector<8x256xf32>
    %339 = vector.broadcast %3 : f32 to vector<8x256xf32>
    %340 = arith.mulf %339, %338 : vector<8x256xf32>
    %341 = vector.broadcast %78 : f32 to vector<8x256xf32>
    %342 = arith.mulf %341, %338 : vector<8x256xf32>
    %343 = vector.broadcast %153 : f32 to vector<8x256xf32>
    %344 = arith.mulf %343, %338 : vector<8x256xf32>
    %345 = vector.broadcast %228 : f32 to vector<8x256xf32>
    %346 = arith.mulf %345, %338 : vector<8x256xf32>
    %347 = vector.extract_strided_slice %337 {offsets = [8, 0], sizes = [8, 256], strides = [1, 1]} : vector<24x384xf32> to vector<8x256xf32>
    %348 = vector.broadcast %28 : f32 to vector<8x256xf32>
    %349 = arith.mulf %348, %347 : vector<8x256xf32>
    %350 = arith.addf %340, %349 : vector<8x256xf32>
    %351 = vector.broadcast %103 : f32 to vector<8x256xf32>
    %352 = arith.mulf %351, %347 : vector<8x256xf32>
    %353 = arith.addf %342, %352 : vector<8x256xf32>
    %354 = vector.broadcast %178 : f32 to vector<8x256xf32>
    %355 = arith.mulf %354, %347 : vector<8x256xf32>
    %356 = arith.addf %344, %355 : vector<8x256xf32>
    %357 = vector.broadcast %253 : f32 to vector<8x256xf32>
    %358 = arith.mulf %357, %347 : vector<8x256xf32>
    %359 = arith.addf %346, %358 : vector<8x256xf32>
    %360 = vector.extract_strided_slice %337 {offsets = [16, 0], sizes = [8, 256], strides = [1, 1]} : vector<24x384xf32> to vector<8x256xf32>
    %361 = vector.broadcast %53 : f32 to vector<8x256xf32>
    %362 = arith.mulf %361, %360 : vector<8x256xf32>
    %363 = arith.addf %350, %362 : vector<8x256xf32>
    %364 = vector.broadcast %128 : f32 to vector<8x256xf32>
    %365 = arith.mulf %364, %360 : vector<8x256xf32>
    %366 = arith.addf %353, %365 : vector<8x256xf32>
    %367 = vector.broadcast %203 : f32 to vector<8x256xf32>
    %368 = arith.mulf %367, %360 : vector<8x256xf32>
    %369 = arith.addf %356, %368 : vector<8x256xf32>
    %370 = vector.broadcast %278 : f32 to vector<8x256xf32>
    %371 = arith.mulf %370, %360 : vector<8x256xf32>
    %372 = arith.addf %359, %371 : vector<8x256xf32>
    %c382_i32 = arith.constant 382 : i32
    %373 = tpu.dynamic_rotate %0 by %c382_i32 dim 1 : vector<24x384xf32>, i32 -> vector<24x384xf32>
    %374 = vector.extract_strided_slice %373 {offsets = [0, 0], sizes = [8, 256], strides = [1, 1]} : vector<24x384xf32> to vector<8x256xf32>
    %375 = vector.broadcast %4 : f32 to vector<8x256xf32>
    %376 = arith.mulf %375, %374 : vector<8x256xf32>
    %377 = arith.addf %327, %376 : vector<8x256xf32>
    %378 = vector.broadcast %79 : f32 to vector<8x256xf32>
    %379 = arith.mulf %378, %374 : vector<8x256xf32>
    %380 = arith.addf %330, %379 : vector<8x256xf32>
    %381 = vector.broadcast %154 : f32 to vector<8x256xf32>
    %382 = arith.mulf %381, %374 : vector<8x256xf32>
    %383 = arith.addf %333, %382 : vector<8x256xf32>
    %384 = vector.broadcast %229 : f32 to vector<8x256xf32>
    %385 = arith.mulf %384, %374 : vector<8x256xf32>
    %386 = arith.addf %336, %385 : vector<8x256xf32>
    %387 = vector.extract_strided_slice %373 {offsets = [8, 0], sizes = [8, 256], strides = [1, 1]} : vector<24x384xf32> to vector<8x256xf32>
    %388 = vector.broadcast %29 : f32 to vector<8x256xf32>
    %389 = arith.mulf %388, %387 : vector<8x256xf32>
    %390 = arith.addf %377, %389 : vector<8x256xf32>
    %391 = vector.broadcast %104 : f32 to vector<8x256xf32>
    %392 = arith.mulf %391, %387 : vector<8x256xf32>
    %393 = arith.addf %380, %392 : vector<8x256xf32>
    %394 = vector.broadcast %179 : f32 to vector<8x256xf32>
    %395 = arith.mulf %394, %387 : vector<8x256xf32>
    %396 = arith.addf %383, %395 : vector<8x256xf32>
    %397 = vector.broadcast %254 : f32 to vector<8x256xf32>
    %398 = arith.mulf %397, %387 : vector<8x256xf32>
    %399 = arith.addf %386, %398 : vector<8x256xf32>
    %400 = vector.extract_strided_slice %373 {offsets = [16, 0], sizes = [8, 256], strides = [1, 1]} : vector<24x384xf32> to vector<8x256xf32>
    %401 = vector.broadcast %54 : f32 to vector<8x256xf32>
    %402 = arith.mulf %401, %400 : vector<8x256xf32>
    %403 = arith.addf %390, %402 : vector<8x256xf32>
    %404 = vector.broadcast %129 : f32 to vector<8x256xf32>
    %405 = arith.mulf %404, %400 : vector<8x256xf32>
    %406 = arith.addf %393, %405 : vector<8x256xf32>
    %407 = vector.broadcast %204 : f32 to vector<8x256xf32>
    %408 = arith.mulf %407, %400 : vector<8x256xf32>
    %409 = arith.addf %396, %408 : vector<8x256xf32>
    %410 = vector.broadcast %279 : f32 to vector<8x256xf32>
    %411 = arith.mulf %410, %400 : vector<8x256xf32>
    %412 = arith.addf %399, %411 : vector<8x256xf32>
    %c381_i32 = arith.constant 381 : i32
    %413 = tpu.dynamic_rotate %0 by %c381_i32 dim 1 : vector<24x384xf32>, i32 -> vector<24x384xf32>
    %414 = vector.extract_strided_slice %413 {offsets = [0, 0], sizes = [8, 256], strides = [1, 1]} : vector<24x384xf32> to vector<8x256xf32>
    %415 = vector.broadcast %5 : f32 to vector<8x256xf32>
    %416 = arith.mulf %415, %414 : vector<8x256xf32>
    %417 = arith.addf %363, %416 : vector<8x256xf32>
    %418 = vector.broadcast %80 : f32 to vector<8x256xf32>
    %419 = arith.mulf %418, %414 : vector<8x256xf32>
    %420 = arith.addf %366, %419 : vector<8x256xf32>
    %421 = vector.broadcast %155 : f32 to vector<8x256xf32>
    %422 = arith.mulf %421, %414 : vector<8x256xf32>
    %423 = arith.addf %369, %422 : vector<8x256xf32>
    %424 = vector.broadcast %230 : f32 to vector<8x256xf32>
    %425 = arith.mulf %424, %414 : vector<8x256xf32>
    %426 = arith.addf %372, %425 : vector<8x256xf32>
    %427 = vector.extract_strided_slice %413 {offsets = [8, 0], sizes = [8, 256], strides = [1, 1]} : vector<24x384xf32> to vector<8x256xf32>
    %428 = vector.broadcast %30 : f32 to vector<8x256xf32>
    %429 = arith.mulf %428, %427 : vector<8x256xf32>
    %430 = arith.addf %417, %429 : vector<8x256xf32>
    %431 = vector.broadcast %105 : f32 to vector<8x256xf32>
    %432 = arith.mulf %431, %427 : vector<8x256xf32>
    %433 = arith.addf %420, %432 : vector<8x256xf32>
    %434 = vector.broadcast %180 : f32 to vector<8x256xf32>
    %435 = arith.mulf %434, %427 : vector<8x256xf32>
    %436 = arith.addf %423, %435 : vector<8x256xf32>
    %437 = vector.broadcast %255 : f32 to vector<8x256xf32>
    %438 = arith.mulf %437, %427 : vector<8x256xf32>
    %439 = arith.addf %426, %438 : vector<8x256xf32>
    %440 = vector.extract_strided_slice %413 {offsets = [16, 0], sizes = [8, 256], strides = [1, 1]} : vector<24x384xf32> to vector<8x256xf32>
    %441 = vector.broadcast %55 : f32 to vector<8x256xf32>
    %442 = arith.mulf %441, %440 : vector<8x256xf32>
    %443 = arith.addf %430, %442 : vector<8x256xf32>
    %444 = vector.broadcast %130 : f32 to vector<8x256xf32>
    %445 = arith.mulf %444, %440 : vector<8x256xf32>
    %446 = arith.addf %433, %445 : vector<8x256xf32>
    %447 = vector.broadcast %205 : f32 to vector<8x256xf32>
    %448 = arith.mulf %447, %440 : vector<8x256xf32>
    %449 = arith.addf %436, %448 : vector<8x256xf32>
    %450 = vector.broadcast %280 : f32 to vector<8x256xf32>
    %451 = arith.mulf %450, %440 : vector<8x256xf32>
    %452 = arith.addf %439, %451 : vector<8x256xf32>
    %c380_i32 = arith.constant 380 : i32
    %453 = tpu.dynamic_rotate %0 by %c380_i32 dim 1 : vector<24x384xf32>, i32 -> vector<24x384xf32>
    %454 = vector.extract_strided_slice %453 {offsets = [0, 0], sizes = [8, 256], strides = [1, 1]} : vector<24x384xf32> to vector<8x256xf32>
    %455 = vector.broadcast %6 : f32 to vector<8x256xf32>
    %456 = arith.mulf %455, %454 : vector<8x256xf32>
    %457 = arith.addf %403, %456 : vector<8x256xf32>
    %458 = vector.broadcast %81 : f32 to vector<8x256xf32>
    %459 = arith.mulf %458, %454 : vector<8x256xf32>
    %460 = arith.addf %406, %459 : vector<8x256xf32>
    %461 = vector.broadcast %156 : f32 to vector<8x256xf32>
    %462 = arith.mulf %461, %454 : vector<8x256xf32>
    %463 = arith.addf %409, %462 : vector<8x256xf32>
    %464 = vector.broadcast %231 : f32 to vector<8x256xf32>
    %465 = arith.mulf %464, %454 : vector<8x256xf32>
    %466 = arith.addf %412, %465 : vector<8x256xf32>
    %467 = vector.extract_strided_slice %453 {offsets = [8, 0], sizes = [8, 256], strides = [1, 1]} : vector<24x384xf32> to vector<8x256xf32>
    %468 = vector.broadcast %31 : f32 to vector<8x256xf32>
    %469 = arith.mulf %468, %467 : vector<8x256xf32>
    %470 = arith.addf %457, %469 : vector<8x256xf32>
    %471 = vector.broadcast %106 : f32 to vector<8x256xf32>
    %472 = arith.mulf %471, %467 : vector<8x256xf32>
    %473 = arith.addf %460, %472 : vector<8x256xf32>
    %474 = vector.broadcast %181 : f32 to vector<8x256xf32>
    %475 = arith.mulf %474, %467 : vector<8x256xf32>
    %476 = arith.addf %463, %475 : vector<8x256xf32>
    %477 = vector.broadcast %256 : f32 to vector<8x256xf32>
    %478 = arith.mulf %477, %467 : vector<8x256xf32>
    %479 = arith.addf %466, %478 : vector<8x256xf32>
    %480 = vector.extract_strided_slice %453 {offsets = [16, 0], sizes = [8, 256], strides = [1, 1]} : vector<24x384xf32> to vector<8x256xf32>
    %481 = vector.broadcast %56 : f32 to vector<8x256xf32>
    %482 = arith.mulf %481, %480 : vector<8x256xf32>
    %483 = arith.addf %470, %482 : vector<8x256xf32>
    %484 = vector.broadcast %131 : f32 to vector<8x256xf32>
    %485 = arith.mulf %484, %480 : vector<8x256xf32>
    %486 = arith.addf %473, %485 : vector<8x256xf32>
    %487 = vector.broadcast %206 : f32 to vector<8x256xf32>
    %488 = arith.mulf %487, %480 : vector<8x256xf32>
    %489 = arith.addf %476, %488 : vector<8x256xf32>
    %490 = vector.broadcast %281 : f32 to vector<8x256xf32>
    %491 = arith.mulf %490, %480 : vector<8x256xf32>
    %492 = arith.addf %479, %491 : vector<8x256xf32>
    %c366_i32 = arith.constant 366 : i32
    %493 = tpu.dynamic_rotate %0 by %c366_i32 dim 1 : vector<24x384xf32>, i32 -> vector<24x384xf32>
    %494 = vector.extract_strided_slice %493 {offsets = [0, 0], sizes = [8, 256], strides = [1, 1]} : vector<24x384xf32> to vector<8x256xf32>
    %495 = vector.broadcast %7 : f32 to vector<8x256xf32>
    %496 = arith.mulf %495, %494 : vector<8x256xf32>
    %497 = arith.addf %443, %496 : vector<8x256xf32>
    %498 = vector.broadcast %82 : f32 to vector<8x256xf32>
    %499 = arith.mulf %498, %494 : vector<8x256xf32>
    %500 = arith.addf %446, %499 : vector<8x256xf32>
    %501 = vector.broadcast %157 : f32 to vector<8x256xf32>
    %502 = arith.mulf %501, %494 : vector<8x256xf32>
    %503 = arith.addf %449, %502 : vector<8x256xf32>
    %504 = vector.broadcast %232 : f32 to vector<8x256xf32>
    %505 = arith.mulf %504, %494 : vector<8x256xf32>
    %506 = arith.addf %452, %505 : vector<8x256xf32>
    %507 = vector.extract_strided_slice %493 {offsets = [8, 0], sizes = [8, 256], strides = [1, 1]} : vector<24x384xf32> to vector<8x256xf32>
    %508 = vector.broadcast %32 : f32 to vector<8x256xf32>
    %509 = arith.mulf %508, %507 : vector<8x256xf32>
    %510 = arith.addf %497, %509 : vector<8x256xf32>
    %511 = vector.broadcast %107 : f32 to vector<8x256xf32>
    %512 = arith.mulf %511, %507 : vector<8x256xf32>
    %513 = arith.addf %500, %512 : vector<8x256xf32>
    %514 = vector.broadcast %182 : f32 to vector<8x256xf32>
    %515 = arith.mulf %514, %507 : vector<8x256xf32>
    %516 = arith.addf %503, %515 : vector<8x256xf32>
    %517 = vector.broadcast %257 : f32 to vector<8x256xf32>
    %518 = arith.mulf %517, %507 : vector<8x256xf32>
    %519 = arith.addf %506, %518 : vector<8x256xf32>
    %520 = vector.extract_strided_slice %493 {offsets = [16, 0], sizes = [8, 256], strides = [1, 1]} : vector<24x384xf32> to vector<8x256xf32>
    %521 = vector.broadcast %57 : f32 to vector<8x256xf32>
    %522 = arith.mulf %521, %520 : vector<8x256xf32>
    %523 = arith.addf %510, %522 : vector<8x256xf32>
    %524 = vector.broadcast %132 : f32 to vector<8x256xf32>
    %525 = arith.mulf %524, %520 : vector<8x256xf32>
    %526 = arith.addf %513, %525 : vector<8x256xf32>
    %527 = vector.broadcast %207 : f32 to vector<8x256xf32>
    %528 = arith.mulf %527, %520 : vector<8x256xf32>
    %529 = arith.addf %516, %528 : vector<8x256xf32>
    %530 = vector.broadcast %282 : f32 to vector<8x256xf32>
    %531 = arith.mulf %530, %520 : vector<8x256xf32>
    %532 = arith.addf %519, %531 : vector<8x256xf32>
    %c365_i32 = arith.constant 365 : i32
    %533 = tpu.dynamic_rotate %0 by %c365_i32 dim 1 : vector<24x384xf32>, i32 -> vector<24x384xf32>
    %534 = vector.extract_strided_slice %533 {offsets = [0, 0], sizes = [8, 256], strides = [1, 1]} : vector<24x384xf32> to vector<8x256xf32>
    %535 = vector.broadcast %8 : f32 to vector<8x256xf32>
    %536 = arith.mulf %535, %534 : vector<8x256xf32>
    %537 = arith.addf %483, %536 : vector<8x256xf32>
    %538 = vector.broadcast %83 : f32 to vector<8x256xf32>
    %539 = arith.mulf %538, %534 : vector<8x256xf32>
    %540 = arith.addf %486, %539 : vector<8x256xf32>
    %541 = vector.broadcast %158 : f32 to vector<8x256xf32>
    %542 = arith.mulf %541, %534 : vector<8x256xf32>
    %543 = arith.addf %489, %542 : vector<8x256xf32>
    %544 = vector.broadcast %233 : f32 to vector<8x256xf32>
    %545 = arith.mulf %544, %534 : vector<8x256xf32>
    %546 = arith.addf %492, %545 : vector<8x256xf32>
    %547 = vector.extract_strided_slice %533 {offsets = [8, 0], sizes = [8, 256], strides = [1, 1]} : vector<24x384xf32> to vector<8x256xf32>
    %548 = vector.broadcast %33 : f32 to vector<8x256xf32>
    %549 = arith.mulf %548, %547 : vector<8x256xf32>
    %550 = arith.addf %537, %549 : vector<8x256xf32>
    %551 = vector.broadcast %108 : f32 to vector<8x256xf32>
    %552 = arith.mulf %551, %547 : vector<8x256xf32>
    %553 = arith.addf %540, %552 : vector<8x256xf32>
    %554 = vector.broadcast %183 : f32 to vector<8x256xf32>
    %555 = arith.mulf %554, %547 : vector<8x256xf32>
    %556 = arith.addf %543, %555 : vector<8x256xf32>
    %557 = vector.broadcast %258 : f32 to vector<8x256xf32>
    %558 = arith.mulf %557, %547 : vector<8x256xf32>
    %559 = arith.addf %546, %558 : vector<8x256xf32>
    %560 = vector.extract_strided_slice %533 {offsets = [16, 0], sizes = [8, 256], strides = [1, 1]} : vector<24x384xf32> to vector<8x256xf32>
    %561 = vector.broadcast %58 : f32 to vector<8x256xf32>
    %562 = arith.mulf %561, %560 : vector<8x256xf32>
    %563 = arith.addf %550, %562 : vector<8x256xf32>
    %564 = vector.broadcast %133 : f32 to vector<8x256xf32>
    %565 = arith.mulf %564, %560 : vector<8x256xf32>
    %566 = arith.addf %553, %565 : vector<8x256xf32>
    %567 = vector.broadcast %208 : f32 to vector<8x256xf32>
    %568 = arith.mulf %567, %560 : vector<8x256xf32>
    %569 = arith.addf %556, %568 : vector<8x256xf32>
    %570 = vector.broadcast %283 : f32 to vector<8x256xf32>
    %571 = arith.mulf %570, %560 : vector<8x256xf32>
    %572 = arith.addf %559, %571 : vector<8x256xf32>
    %c364_i32 = arith.constant 364 : i32
    %573 = tpu.dynamic_rotate %0 by %c364_i32 dim 1 : vector<24x384xf32>, i32 -> vector<24x384xf32>
    %574 = vector.extract_strided_slice %573 {offsets = [0, 0], sizes = [8, 256], strides = [1, 1]} : vector<24x384xf32> to vector<8x256xf32>
    %575 = vector.broadcast %9 : f32 to vector<8x256xf32>
    %576 = arith.mulf %575, %574 : vector<8x256xf32>
    %577 = arith.addf %523, %576 : vector<8x256xf32>
    %578 = vector.broadcast %84 : f32 to vector<8x256xf32>
    %579 = arith.mulf %578, %574 : vector<8x256xf32>
    %580 = arith.addf %526, %579 : vector<8x256xf32>
    %581 = vector.broadcast %159 : f32 to vector<8x256xf32>
    %582 = arith.mulf %581, %574 : vector<8x256xf32>
    %583 = arith.addf %529, %582 : vector<8x256xf32>
    %584 = vector.broadcast %234 : f32 to vector<8x256xf32>
    %585 = arith.mulf %584, %574 : vector<8x256xf32>
    %586 = arith.addf %532, %585 : vector<8x256xf32>
    %587 = vector.extract_strided_slice %573 {offsets = [8, 0], sizes = [8, 256], strides = [1, 1]} : vector<24x384xf32> to vector<8x256xf32>
    %588 = vector.broadcast %34 : f32 to vector<8x256xf32>
    %589 = arith.mulf %588, %587 : vector<8x256xf32>
    %590 = arith.addf %577, %589 : vector<8x256xf32>
    %591 = vector.broadcast %109 : f32 to vector<8x256xf32>
    %592 = arith.mulf %591, %587 : vector<8x256xf32>
    %593 = arith.addf %580, %592 : vector<8x256xf32>
    %594 = vector.broadcast %184 : f32 to vector<8x256xf32>
    %595 = arith.mulf %594, %587 : vector<8x256xf32>
    %596 = arith.addf %583, %595 : vector<8x256xf32>
    %597 = vector.broadcast %259 : f32 to vector<8x256xf32>
    %598 = arith.mulf %597, %587 : vector<8x256xf32>
    %599 = arith.addf %586, %598 : vector<8x256xf32>
    %600 = vector.extract_strided_slice %573 {offsets = [16, 0], sizes = [8, 256], strides = [1, 1]} : vector<24x384xf32> to vector<8x256xf32>
    %601 = vector.broadcast %59 : f32 to vector<8x256xf32>
    %602 = arith.mulf %601, %600 : vector<8x256xf32>
    %603 = arith.addf %590, %602 : vector<8x256xf32>
    %604 = vector.broadcast %134 : f32 to vector<8x256xf32>
    %605 = arith.mulf %604, %600 : vector<8x256xf32>
    %606 = arith.addf %593, %605 : vector<8x256xf32>
    %607 = vector.broadcast %209 : f32 to vector<8x256xf32>
    %608 = arith.mulf %607, %600 : vector<8x256xf32>
    %609 = arith.addf %596, %608 : vector<8x256xf32>
    %610 = vector.broadcast %284 : f32 to vector<8x256xf32>
    %611 = arith.mulf %610, %600 : vector<8x256xf32>
    %612 = arith.addf %599, %611 : vector<8x256xf32>
    %c363_i32 = arith.constant 363 : i32
    %613 = tpu.dynamic_rotate %0 by %c363_i32 dim 1 : vector<24x384xf32>, i32 -> vector<24x384xf32>
    %614 = vector.extract_strided_slice %613 {offsets = [0, 0], sizes = [8, 256], strides = [1, 1]} : vector<24x384xf32> to vector<8x256xf32>
    %615 = vector.broadcast %10 : f32 to vector<8x256xf32>
    %616 = arith.mulf %615, %614 : vector<8x256xf32>
    %617 = arith.addf %563, %616 : vector<8x256xf32>
    %618 = vector.broadcast %85 : f32 to vector<8x256xf32>
    %619 = arith.mulf %618, %614 : vector<8x256xf32>
    %620 = arith.addf %566, %619 : vector<8x256xf32>
    %621 = vector.broadcast %160 : f32 to vector<8x256xf32>
    %622 = arith.mulf %621, %614 : vector<8x256xf32>
    %623 = arith.addf %569, %622 : vector<8x256xf32>
    %624 = vector.broadcast %235 : f32 to vector<8x256xf32>
    %625 = arith.mulf %624, %614 : vector<8x256xf32>
    %626 = arith.addf %572, %625 : vector<8x256xf32>
    %627 = vector.extract_strided_slice %613 {offsets = [8, 0], sizes = [8, 256], strides = [1, 1]} : vector<24x384xf32> to vector<8x256xf32>
    %628 = vector.broadcast %35 : f32 to vector<8x256xf32>
    %629 = arith.mulf %628, %627 : vector<8x256xf32>
    %630 = arith.addf %617, %629 : vector<8x256xf32>
    %631 = vector.broadcast %110 : f32 to vector<8x256xf32>
    %632 = arith.mulf %631, %627 : vector<8x256xf32>
    %633 = arith.addf %620, %632 : vector<8x256xf32>
    %634 = vector.broadcast %185 : f32 to vector<8x256xf32>
    %635 = arith.mulf %634, %627 : vector<8x256xf32>
    %636 = arith.addf %623, %635 : vector<8x256xf32>
    %637 = vector.broadcast %260 : f32 to vector<8x256xf32>
    %638 = arith.mulf %637, %627 : vector<8x256xf32>
    %639 = arith.addf %626, %638 : vector<8x256xf32>
    %640 = vector.extract_strided_slice %613 {offsets = [16, 0], sizes = [8, 256], strides = [1, 1]} : vector<24x384xf32> to vector<8x256xf32>
    %641 = vector.broadcast %60 : f32 to vector<8x256xf32>
    %642 = arith.mulf %641, %640 : vector<8x256xf32>
    %643 = arith.addf %630, %642 : vector<8x256xf32>
    %644 = vector.broadcast %135 : f32 to vector<8x256xf32>
    %645 = arith.mulf %644, %640 : vector<8x256xf32>
    %646 = arith.addf %633, %645 : vector<8x256xf32>
    %647 = vector.broadcast %210 : f32 to vector<8x256xf32>
    %648 = arith.mulf %647, %640 : vector<8x256xf32>
    %649 = arith.addf %636, %648 : vector<8x256xf32>
    %650 = vector.broadcast %285 : f32 to vector<8x256xf32>
    %651 = arith.mulf %650, %640 : vector<8x256xf32>
    %652 = arith.addf %639, %651 : vector<8x256xf32>
    %c362_i32 = arith.constant 362 : i32
    %653 = tpu.dynamic_rotate %0 by %c362_i32 dim 1 : vector<24x384xf32>, i32 -> vector<24x384xf32>
    %654 = vector.extract_strided_slice %653 {offsets = [0, 0], sizes = [8, 256], strides = [1, 1]} : vector<24x384xf32> to vector<8x256xf32>
    %655 = vector.broadcast %11 : f32 to vector<8x256xf32>
    %656 = arith.mulf %655, %654 : vector<8x256xf32>
    %657 = arith.addf %603, %656 : vector<8x256xf32>
    %658 = vector.broadcast %86 : f32 to vector<8x256xf32>
    %659 = arith.mulf %658, %654 : vector<8x256xf32>
    %660 = arith.addf %606, %659 : vector<8x256xf32>
    %661 = vector.broadcast %161 : f32 to vector<8x256xf32>
    %662 = arith.mulf %661, %654 : vector<8x256xf32>
    %663 = arith.addf %609, %662 : vector<8x256xf32>
    %664 = vector.broadcast %236 : f32 to vector<8x256xf32>
    %665 = arith.mulf %664, %654 : vector<8x256xf32>
    %666 = arith.addf %612, %665 : vector<8x256xf32>
    %667 = vector.extract_strided_slice %653 {offsets = [8, 0], sizes = [8, 256], strides = [1, 1]} : vector<24x384xf32> to vector<8x256xf32>
    %668 = vector.broadcast %36 : f32 to vector<8x256xf32>
    %669 = arith.mulf %668, %667 : vector<8x256xf32>
    %670 = arith.addf %657, %669 : vector<8x256xf32>
    %671 = vector.broadcast %111 : f32 to vector<8x256xf32>
    %672 = arith.mulf %671, %667 : vector<8x256xf32>
    %673 = arith.addf %660, %672 : vector<8x256xf32>
    %674 = vector.broadcast %186 : f32 to vector<8x256xf32>
    %675 = arith.mulf %674, %667 : vector<8x256xf32>
    %676 = arith.addf %663, %675 : vector<8x256xf32>
    %677 = vector.broadcast %261 : f32 to vector<8x256xf32>
    %678 = arith.mulf %677, %667 : vector<8x256xf32>
    %679 = arith.addf %666, %678 : vector<8x256xf32>
    %680 = vector.extract_strided_slice %653 {offsets = [16, 0], sizes = [8, 256], strides = [1, 1]} : vector<24x384xf32> to vector<8x256xf32>
    %681 = vector.broadcast %61 : f32 to vector<8x256xf32>
    %682 = arith.mulf %681, %680 : vector<8x256xf32>
    %683 = arith.addf %670, %682 : vector<8x256xf32>
    %684 = vector.broadcast %136 : f32 to vector<8x256xf32>
    %685 = arith.mulf %684, %680 : vector<8x256xf32>
    %686 = arith.addf %673, %685 : vector<8x256xf32>
    %687 = vector.broadcast %211 : f32 to vector<8x256xf32>
    %688 = arith.mulf %687, %680 : vector<8x256xf32>
    %689 = arith.addf %676, %688 : vector<8x256xf32>
    %690 = vector.broadcast %286 : f32 to vector<8x256xf32>
    %691 = arith.mulf %690, %680 : vector<8x256xf32>
    %692 = arith.addf %679, %691 : vector<8x256xf32>
    %c348_i32 = arith.constant 348 : i32
    %693 = tpu.dynamic_rotate %0 by %c348_i32 dim 1 : vector<24x384xf32>, i32 -> vector<24x384xf32>
    %694 = vector.extract_strided_slice %693 {offsets = [0, 0], sizes = [8, 256], strides = [1, 1]} : vector<24x384xf32> to vector<8x256xf32>
    %695 = vector.broadcast %12 : f32 to vector<8x256xf32>
    %696 = arith.mulf %695, %694 : vector<8x256xf32>
    %697 = arith.addf %643, %696 : vector<8x256xf32>
    %698 = vector.broadcast %87 : f32 to vector<8x256xf32>
    %699 = arith.mulf %698, %694 : vector<8x256xf32>
    %700 = arith.addf %646, %699 : vector<8x256xf32>
    %701 = vector.broadcast %162 : f32 to vector<8x256xf32>
    %702 = arith.mulf %701, %694 : vector<8x256xf32>
    %703 = arith.addf %649, %702 : vector<8x256xf32>
    %704 = vector.broadcast %237 : f32 to vector<8x256xf32>
    %705 = arith.mulf %704, %694 : vector<8x256xf32>
    %706 = arith.addf %652, %705 : vector<8x256xf32>
    %707 = vector.extract_strided_slice %693 {offsets = [8, 0], sizes = [8, 256], strides = [1, 1]} : vector<24x384xf32> to vector<8x256xf32>
    %708 = vector.broadcast %37 : f32 to vector<8x256xf32>
    %709 = arith.mulf %708, %707 : vector<8x256xf32>
    %710 = arith.addf %697, %709 : vector<8x256xf32>
    %711 = vector.broadcast %112 : f32 to vector<8x256xf32>
    %712 = arith.mulf %711, %707 : vector<8x256xf32>
    %713 = arith.addf %700, %712 : vector<8x256xf32>
    %714 = vector.broadcast %187 : f32 to vector<8x256xf32>
    %715 = arith.mulf %714, %707 : vector<8x256xf32>
    %716 = arith.addf %703, %715 : vector<8x256xf32>
    %717 = vector.broadcast %262 : f32 to vector<8x256xf32>
    %718 = arith.mulf %717, %707 : vector<8x256xf32>
    %719 = arith.addf %706, %718 : vector<8x256xf32>
    %720 = vector.extract_strided_slice %693 {offsets = [16, 0], sizes = [8, 256], strides = [1, 1]} : vector<24x384xf32> to vector<8x256xf32>
    %721 = vector.broadcast %62 : f32 to vector<8x256xf32>
    %722 = arith.mulf %721, %720 : vector<8x256xf32>
    %723 = arith.addf %710, %722 : vector<8x256xf32>
    %724 = vector.broadcast %137 : f32 to vector<8x256xf32>
    %725 = arith.mulf %724, %720 : vector<8x256xf32>
    %726 = arith.addf %713, %725 : vector<8x256xf32>
    %727 = vector.broadcast %212 : f32 to vector<8x256xf32>
    %728 = arith.mulf %727, %720 : vector<8x256xf32>
    %729 = arith.addf %716, %728 : vector<8x256xf32>
    %730 = vector.broadcast %287 : f32 to vector<8x256xf32>
    %731 = arith.mulf %730, %720 : vector<8x256xf32>
    %732 = arith.addf %719, %731 : vector<8x256xf32>
    %c347_i32 = arith.constant 347 : i32
    %733 = tpu.dynamic_rotate %0 by %c347_i32 dim 1 : vector<24x384xf32>, i32 -> vector<24x384xf32>
    %734 = vector.extract_strided_slice %733 {offsets = [0, 0], sizes = [8, 256], strides = [1, 1]} : vector<24x384xf32> to vector<8x256xf32>
    %735 = vector.broadcast %13 : f32 to vector<8x256xf32>
    %736 = arith.mulf %735, %734 : vector<8x256xf32>
    %737 = arith.addf %683, %736 : vector<8x256xf32>
    %738 = vector.broadcast %88 : f32 to vector<8x256xf32>
    %739 = arith.mulf %738, %734 : vector<8x256xf32>
    %740 = arith.addf %686, %739 : vector<8x256xf32>
    %741 = vector.broadcast %163 : f32 to vector<8x256xf32>
    %742 = arith.mulf %741, %734 : vector<8x256xf32>
    %743 = arith.addf %689, %742 : vector<8x256xf32>
    %744 = vector.broadcast %238 : f32 to vector<8x256xf32>
    %745 = arith.mulf %744, %734 : vector<8x256xf32>
    %746 = arith.addf %692, %745 : vector<8x256xf32>
    %747 = vector.extract_strided_slice %733 {offsets = [8, 0], sizes = [8, 256], strides = [1, 1]} : vector<24x384xf32> to vector<8x256xf32>
    %748 = vector.broadcast %38 : f32 to vector<8x256xf32>
    %749 = arith.mulf %748, %747 : vector<8x256xf32>
    %750 = arith.addf %737, %749 : vector<8x256xf32>
    %751 = vector.broadcast %113 : f32 to vector<8x256xf32>
    %752 = arith.mulf %751, %747 : vector<8x256xf32>
    %753 = arith.addf %740, %752 : vector<8x256xf32>
    %754 = vector.broadcast %188 : f32 to vector<8x256xf32>
    %755 = arith.mulf %754, %747 : vector<8x256xf32>
    %756 = arith.addf %743, %755 : vector<8x256xf32>
    %757 = vector.broadcast %263 : f32 to vector<8x256xf32>
    %758 = arith.mulf %757, %747 : vector<8x256xf32>
    %759 = arith.addf %746, %758 : vector<8x256xf32>
    %760 = vector.extract_strided_slice %733 {offsets = [16, 0], sizes = [8, 256], strides = [1, 1]} : vector<24x384xf32> to vector<8x256xf32>
    %761 = vector.broadcast %63 : f32 to vector<8x256xf32>
    %762 = arith.mulf %761, %760 : vector<8x256xf32>
    %763 = arith.addf %750, %762 : vector<8x256xf32>
    %764 = vector.broadcast %138 : f32 to vector<8x256xf32>
    %765 = arith.mulf %764, %760 : vector<8x256xf32>
    %766 = arith.addf %753, %765 : vector<8x256xf32>
    %767 = vector.broadcast %213 : f32 to vector<8x256xf32>
    %768 = arith.mulf %767, %760 : vector<8x256xf32>
    %769 = arith.addf %756, %768 : vector<8x256xf32>
    %770 = vector.broadcast %288 : f32 to vector<8x256xf32>
    %771 = arith.mulf %770, %760 : vector<8x256xf32>
    %772 = arith.addf %759, %771 : vector<8x256xf32>
    %c346_i32 = arith.constant 346 : i32
    %773 = tpu.dynamic_rotate %0 by %c346_i32 dim 1 : vector<24x384xf32>, i32 -> vector<24x384xf32>
    %774 = vector.extract_strided_slice %773 {offsets = [0, 0], sizes = [8, 256], strides = [1, 1]} : vector<24x384xf32> to vector<8x256xf32>
    %775 = vector.broadcast %14 : f32 to vector<8x256xf32>
    %776 = arith.mulf %775, %774 : vector<8x256xf32>
    %777 = arith.addf %723, %776 : vector<8x256xf32>
    %778 = vector.broadcast %89 : f32 to vector<8x256xf32>
    %779 = arith.mulf %778, %774 : vector<8x256xf32>
    %780 = arith.addf %726, %779 : vector<8x256xf32>
    %781 = vector.broadcast %164 : f32 to vector<8x256xf32>
    %782 = arith.mulf %781, %774 : vector<8x256xf32>
    %783 = arith.addf %729, %782 : vector<8x256xf32>
    %784 = vector.broadcast %239 : f32 to vector<8x256xf32>
    %785 = arith.mulf %784, %774 : vector<8x256xf32>
    %786 = arith.addf %732, %785 : vector<8x256xf32>
    %787 = vector.extract_strided_slice %773 {offsets = [8, 0], sizes = [8, 256], strides = [1, 1]} : vector<24x384xf32> to vector<8x256xf32>
    %788 = vector.broadcast %39 : f32 to vector<8x256xf32>
    %789 = arith.mulf %788, %787 : vector<8x256xf32>
    %790 = arith.addf %777, %789 : vector<8x256xf32>
    %791 = vector.broadcast %114 : f32 to vector<8x256xf32>
    %792 = arith.mulf %791, %787 : vector<8x256xf32>
    %793 = arith.addf %780, %792 : vector<8x256xf32>
    %794 = vector.broadcast %189 : f32 to vector<8x256xf32>
    %795 = arith.mulf %794, %787 : vector<8x256xf32>
    %796 = arith.addf %783, %795 : vector<8x256xf32>
    %797 = vector.broadcast %264 : f32 to vector<8x256xf32>
    %798 = arith.mulf %797, %787 : vector<8x256xf32>
    %799 = arith.addf %786, %798 : vector<8x256xf32>
    %800 = vector.extract_strided_slice %773 {offsets = [16, 0], sizes = [8, 256], strides = [1, 1]} : vector<24x384xf32> to vector<8x256xf32>
    %801 = vector.broadcast %64 : f32 to vector<8x256xf32>
    %802 = arith.mulf %801, %800 : vector<8x256xf32>
    %803 = arith.addf %790, %802 : vector<8x256xf32>
    %804 = vector.broadcast %139 : f32 to vector<8x256xf32>
    %805 = arith.mulf %804, %800 : vector<8x256xf32>
    %806 = arith.addf %793, %805 : vector<8x256xf32>
    %807 = vector.broadcast %214 : f32 to vector<8x256xf32>
    %808 = arith.mulf %807, %800 : vector<8x256xf32>
    %809 = arith.addf %796, %808 : vector<8x256xf32>
    %810 = vector.broadcast %289 : f32 to vector<8x256xf32>
    %811 = arith.mulf %810, %800 : vector<8x256xf32>
    %812 = arith.addf %799, %811 : vector<8x256xf32>
    %c345_i32 = arith.constant 345 : i32
    %813 = tpu.dynamic_rotate %0 by %c345_i32 dim 1 : vector<24x384xf32>, i32 -> vector<24x384xf32>
    %814 = vector.extract_strided_slice %813 {offsets = [0, 0], sizes = [8, 256], strides = [1, 1]} : vector<24x384xf32> to vector<8x256xf32>
    %815 = vector.broadcast %15 : f32 to vector<8x256xf32>
    %816 = arith.mulf %815, %814 : vector<8x256xf32>
    %817 = arith.addf %763, %816 : vector<8x256xf32>
    %818 = vector.broadcast %90 : f32 to vector<8x256xf32>
    %819 = arith.mulf %818, %814 : vector<8x256xf32>
    %820 = arith.addf %766, %819 : vector<8x256xf32>
    %821 = vector.broadcast %165 : f32 to vector<8x256xf32>
    %822 = arith.mulf %821, %814 : vector<8x256xf32>
    %823 = arith.addf %769, %822 : vector<8x256xf32>
    %824 = vector.broadcast %240 : f32 to vector<8x256xf32>
    %825 = arith.mulf %824, %814 : vector<8x256xf32>
    %826 = arith.addf %772, %825 : vector<8x256xf32>
    %827 = vector.extract_strided_slice %813 {offsets = [8, 0], sizes = [8, 256], strides = [1, 1]} : vector<24x384xf32> to vector<8x256xf32>
    %828 = vector.broadcast %40 : f32 to vector<8x256xf32>
    %829 = arith.mulf %828, %827 : vector<8x256xf32>
    %830 = arith.addf %817, %829 : vector<8x256xf32>
    %831 = vector.broadcast %115 : f32 to vector<8x256xf32>
    %832 = arith.mulf %831, %827 : vector<8x256xf32>
    %833 = arith.addf %820, %832 : vector<8x256xf32>
    %834 = vector.broadcast %190 : f32 to vector<8x256xf32>
    %835 = arith.mulf %834, %827 : vector<8x256xf32>
    %836 = arith.addf %823, %835 : vector<8x256xf32>
    %837 = vector.broadcast %265 : f32 to vector<8x256xf32>
    %838 = arith.mulf %837, %827 : vector<8x256xf32>
    %839 = arith.addf %826, %838 : vector<8x256xf32>
    %840 = vector.extract_strided_slice %813 {offsets = [16, 0], sizes = [8, 256], strides = [1, 1]} : vector<24x384xf32> to vector<8x256xf32>
    %841 = vector.broadcast %65 : f32 to vector<8x256xf32>
    %842 = arith.mulf %841, %840 : vector<8x256xf32>
    %843 = arith.addf %830, %842 : vector<8x256xf32>
    %844 = vector.broadcast %140 : f32 to vector<8x256xf32>
    %845 = arith.mulf %844, %840 : vector<8x256xf32>
    %846 = arith.addf %833, %845 : vector<8x256xf32>
    %847 = vector.broadcast %215 : f32 to vector<8x256xf32>
    %848 = arith.mulf %847, %840 : vector<8x256xf32>
    %849 = arith.addf %836, %848 : vector<8x256xf32>
    %850 = vector.broadcast %290 : f32 to vector<8x256xf32>
    %851 = arith.mulf %850, %840 : vector<8x256xf32>
    %852 = arith.addf %839, %851 : vector<8x256xf32>
    %c344_i32 = arith.constant 344 : i32
    %853 = tpu.dynamic_rotate %0 by %c344_i32 dim 1 : vector<24x384xf32>, i32 -> vector<24x384xf32>
    %854 = vector.extract_strided_slice %853 {offsets = [0, 0], sizes = [8, 256], strides = [1, 1]} : vector<24x384xf32> to vector<8x256xf32>
    %855 = vector.broadcast %16 : f32 to vector<8x256xf32>
    %856 = arith.mulf %855, %854 : vector<8x256xf32>
    %857 = arith.addf %803, %856 : vector<8x256xf32>
    %858 = vector.broadcast %91 : f32 to vector<8x256xf32>
    %859 = arith.mulf %858, %854 : vector<8x256xf32>
    %860 = arith.addf %806, %859 : vector<8x256xf32>
    %861 = vector.broadcast %166 : f32 to vector<8x256xf32>
    %862 = arith.mulf %861, %854 : vector<8x256xf32>
    %863 = arith.addf %809, %862 : vector<8x256xf32>
    %864 = vector.broadcast %241 : f32 to vector<8x256xf32>
    %865 = arith.mulf %864, %854 : vector<8x256xf32>
    %866 = arith.addf %812, %865 : vector<8x256xf32>
    %867 = vector.extract_strided_slice %853 {offsets = [8, 0], sizes = [8, 256], strides = [1, 1]} : vector<24x384xf32> to vector<8x256xf32>
    %868 = vector.broadcast %41 : f32 to vector<8x256xf32>
    %869 = arith.mulf %868, %867 : vector<8x256xf32>
    %870 = arith.addf %857, %869 : vector<8x256xf32>
    %871 = vector.broadcast %116 : f32 to vector<8x256xf32>
    %872 = arith.mulf %871, %867 : vector<8x256xf32>
    %873 = arith.addf %860, %872 : vector<8x256xf32>
    %874 = vector.broadcast %191 : f32 to vector<8x256xf32>
    %875 = arith.mulf %874, %867 : vector<8x256xf32>
    %876 = arith.addf %863, %875 : vector<8x256xf32>
    %877 = vector.broadcast %266 : f32 to vector<8x256xf32>
    %878 = arith.mulf %877, %867 : vector<8x256xf32>
    %879 = arith.addf %866, %878 : vector<8x256xf32>
    %880 = vector.extract_strided_slice %853 {offsets = [16, 0], sizes = [8, 256], strides = [1, 1]} : vector<24x384xf32> to vector<8x256xf32>
    %881 = vector.broadcast %66 : f32 to vector<8x256xf32>
    %882 = arith.mulf %881, %880 : vector<8x256xf32>
    %883 = arith.addf %870, %882 : vector<8x256xf32>
    %884 = vector.broadcast %141 : f32 to vector<8x256xf32>
    %885 = arith.mulf %884, %880 : vector<8x256xf32>
    %886 = arith.addf %873, %885 : vector<8x256xf32>
    %887 = vector.broadcast %216 : f32 to vector<8x256xf32>
    %888 = arith.mulf %887, %880 : vector<8x256xf32>
    %889 = arith.addf %876, %888 : vector<8x256xf32>
    %890 = vector.broadcast %291 : f32 to vector<8x256xf32>
    %891 = arith.mulf %890, %880 : vector<8x256xf32>
    %892 = arith.addf %879, %891 : vector<8x256xf32>
    %c330_i32 = arith.constant 330 : i32
    %893 = tpu.dynamic_rotate %0 by %c330_i32 dim 1 : vector<24x384xf32>, i32 -> vector<24x384xf32>
    %894 = vector.extract_strided_slice %893 {offsets = [0, 0], sizes = [8, 256], strides = [1, 1]} : vector<24x384xf32> to vector<8x256xf32>
    %895 = vector.broadcast %17 : f32 to vector<8x256xf32>
    %896 = arith.mulf %895, %894 : vector<8x256xf32>
    %897 = arith.addf %843, %896 : vector<8x256xf32>
    %898 = vector.broadcast %92 : f32 to vector<8x256xf32>
    %899 = arith.mulf %898, %894 : vector<8x256xf32>
    %900 = arith.addf %846, %899 : vector<8x256xf32>
    %901 = vector.broadcast %167 : f32 to vector<8x256xf32>
    %902 = arith.mulf %901, %894 : vector<8x256xf32>
    %903 = arith.addf %849, %902 : vector<8x256xf32>
    %904 = vector.broadcast %242 : f32 to vector<8x256xf32>
    %905 = arith.mulf %904, %894 : vector<8x256xf32>
    %906 = arith.addf %852, %905 : vector<8x256xf32>
    %907 = vector.extract_strided_slice %893 {offsets = [8, 0], sizes = [8, 256], strides = [1, 1]} : vector<24x384xf32> to vector<8x256xf32>
    %908 = vector.broadcast %42 : f32 to vector<8x256xf32>
    %909 = arith.mulf %908, %907 : vector<8x256xf32>
    %910 = arith.addf %897, %909 : vector<8x256xf32>
    %911 = vector.broadcast %117 : f32 to vector<8x256xf32>
    %912 = arith.mulf %911, %907 : vector<8x256xf32>
    %913 = arith.addf %900, %912 : vector<8x256xf32>
    %914 = vector.broadcast %192 : f32 to vector<8x256xf32>
    %915 = arith.mulf %914, %907 : vector<8x256xf32>
    %916 = arith.addf %903, %915 : vector<8x256xf32>
    %917 = vector.broadcast %267 : f32 to vector<8x256xf32>
    %918 = arith.mulf %917, %907 : vector<8x256xf32>
    %919 = arith.addf %906, %918 : vector<8x256xf32>
    %920 = vector.extract_strided_slice %893 {offsets = [16, 0], sizes = [8, 256], strides = [1, 1]} : vector<24x384xf32> to vector<8x256xf32>
    %921 = vector.broadcast %67 : f32 to vector<8x256xf32>
    %922 = arith.mulf %921, %920 : vector<8x256xf32>
    %923 = arith.addf %910, %922 : vector<8x256xf32>
    %924 = vector.broadcast %142 : f32 to vector<8x256xf32>
    %925 = arith.mulf %924, %920 : vector<8x256xf32>
    %926 = arith.addf %913, %925 : vector<8x256xf32>
    %927 = vector.broadcast %217 : f32 to vector<8x256xf32>
    %928 = arith.mulf %927, %920 : vector<8x256xf32>
    %929 = arith.addf %916, %928 : vector<8x256xf32>
    %930 = vector.broadcast %292 : f32 to vector<8x256xf32>
    %931 = arith.mulf %930, %920 : vector<8x256xf32>
    %932 = arith.addf %919, %931 : vector<8x256xf32>
    %c329_i32 = arith.constant 329 : i32
    %933 = tpu.dynamic_rotate %0 by %c329_i32 dim 1 : vector<24x384xf32>, i32 -> vector<24x384xf32>
    %934 = vector.extract_strided_slice %933 {offsets = [0, 0], sizes = [8, 256], strides = [1, 1]} : vector<24x384xf32> to vector<8x256xf32>
    %935 = vector.broadcast %18 : f32 to vector<8x256xf32>
    %936 = arith.mulf %935, %934 : vector<8x256xf32>
    %937 = arith.addf %883, %936 : vector<8x256xf32>
    %938 = vector.broadcast %93 : f32 to vector<8x256xf32>
    %939 = arith.mulf %938, %934 : vector<8x256xf32>
    %940 = arith.addf %886, %939 : vector<8x256xf32>
    %941 = vector.broadcast %168 : f32 to vector<8x256xf32>
    %942 = arith.mulf %941, %934 : vector<8x256xf32>
    %943 = arith.addf %889, %942 : vector<8x256xf32>
    %944 = vector.broadcast %243 : f32 to vector<8x256xf32>
    %945 = arith.mulf %944, %934 : vector<8x256xf32>
    %946 = arith.addf %892, %945 : vector<8x256xf32>
    %947 = vector.extract_strided_slice %933 {offsets = [8, 0], sizes = [8, 256], strides = [1, 1]} : vector<24x384xf32> to vector<8x256xf32>
    %948 = vector.broadcast %43 : f32 to vector<8x256xf32>
    %949 = arith.mulf %948, %947 : vector<8x256xf32>
    %950 = arith.addf %937, %949 : vector<8x256xf32>
    %951 = vector.broadcast %118 : f32 to vector<8x256xf32>
    %952 = arith.mulf %951, %947 : vector<8x256xf32>
    %953 = arith.addf %940, %952 : vector<8x256xf32>
    %954 = vector.broadcast %193 : f32 to vector<8x256xf32>
    %955 = arith.mulf %954, %947 : vector<8x256xf32>
    %956 = arith.addf %943, %955 : vector<8x256xf32>
    %957 = vector.broadcast %268 : f32 to vector<8x256xf32>
    %958 = arith.mulf %957, %947 : vector<8x256xf32>
    %959 = arith.addf %946, %958 : vector<8x256xf32>
    %960 = vector.extract_strided_slice %933 {offsets = [16, 0], sizes = [8, 256], strides = [1, 1]} : vector<24x384xf32> to vector<8x256xf32>
    %961 = vector.broadcast %68 : f32 to vector<8x256xf32>
    %962 = arith.mulf %961, %960 : vector<8x256xf32>
    %963 = arith.addf %950, %962 : vector<8x256xf32>
    %964 = vector.broadcast %143 : f32 to vector<8x256xf32>
    %965 = arith.mulf %964, %960 : vector<8x256xf32>
    %966 = arith.addf %953, %965 : vector<8x256xf32>
    %967 = vector.broadcast %218 : f32 to vector<8x256xf32>
    %968 = arith.mulf %967, %960 : vector<8x256xf32>
    %969 = arith.addf %956, %968 : vector<8x256xf32>
    %970 = vector.broadcast %293 : f32 to vector<8x256xf32>
    %971 = arith.mulf %970, %960 : vector<8x256xf32>
    %972 = arith.addf %959, %971 : vector<8x256xf32>
    %c328_i32 = arith.constant 328 : i32
    %973 = tpu.dynamic_rotate %0 by %c328_i32 dim 1 : vector<24x384xf32>, i32 -> vector<24x384xf32>
    %974 = vector.extract_strided_slice %973 {offsets = [0, 0], sizes = [8, 256], strides = [1, 1]} : vector<24x384xf32> to vector<8x256xf32>
    %975 = vector.broadcast %19 : f32 to vector<8x256xf32>
    %976 = arith.mulf %975, %974 : vector<8x256xf32>
    %977 = arith.addf %923, %976 : vector<8x256xf32>
    %978 = vector.broadcast %94 : f32 to vector<8x256xf32>
    %979 = arith.mulf %978, %974 : vector<8x256xf32>
    %980 = arith.addf %926, %979 : vector<8x256xf32>
    %981 = vector.broadcast %169 : f32 to vector<8x256xf32>
    %982 = arith.mulf %981, %974 : vector<8x256xf32>
    %983 = arith.addf %929, %982 : vector<8x256xf32>
    %984 = vector.broadcast %244 : f32 to vector<8x256xf32>
    %985 = arith.mulf %984, %974 : vector<8x256xf32>
    %986 = arith.addf %932, %985 : vector<8x256xf32>
    %987 = vector.extract_strided_slice %973 {offsets = [8, 0], sizes = [8, 256], strides = [1, 1]} : vector<24x384xf32> to vector<8x256xf32>
    %988 = vector.broadcast %44 : f32 to vector<8x256xf32>
    %989 = arith.mulf %988, %987 : vector<8x256xf32>
    %990 = arith.addf %977, %989 : vector<8x256xf32>
    %991 = vector.broadcast %119 : f32 to vector<8x256xf32>
    %992 = arith.mulf %991, %987 : vector<8x256xf32>
    %993 = arith.addf %980, %992 : vector<8x256xf32>
    %994 = vector.broadcast %194 : f32 to vector<8x256xf32>
    %995 = arith.mulf %994, %987 : vector<8x256xf32>
    %996 = arith.addf %983, %995 : vector<8x256xf32>
    %997 = vector.broadcast %269 : f32 to vector<8x256xf32>
    %998 = arith.mulf %997, %987 : vector<8x256xf32>
    %999 = arith.addf %986, %998 : vector<8x256xf32>
    %1000 = vector.extract_strided_slice %973 {offsets = [16, 0], sizes = [8, 256], strides = [1, 1]} : vector<24x384xf32> to vector<8x256xf32>
    %1001 = vector.broadcast %69 : f32 to vector<8x256xf32>
    %1002 = arith.mulf %1001, %1000 : vector<8x256xf32>
    %1003 = arith.addf %990, %1002 : vector<8x256xf32>
    %1004 = vector.broadcast %144 : f32 to vector<8x256xf32>
    %1005 = arith.mulf %1004, %1000 : vector<8x256xf32>
    %1006 = arith.addf %993, %1005 : vector<8x256xf32>
    %1007 = vector.broadcast %219 : f32 to vector<8x256xf32>
    %1008 = arith.mulf %1007, %1000 : vector<8x256xf32>
    %1009 = arith.addf %996, %1008 : vector<8x256xf32>
    %1010 = vector.broadcast %294 : f32 to vector<8x256xf32>
    %1011 = arith.mulf %1010, %1000 : vector<8x256xf32>
    %1012 = arith.addf %999, %1011 : vector<8x256xf32>
    %c327_i32 = arith.constant 327 : i32
    %1013 = tpu.dynamic_rotate %0 by %c327_i32 dim 1 : vector<24x384xf32>, i32 -> vector<24x384xf32>
    %1014 = vector.extract_strided_slice %1013 {offsets = [0, 0], sizes = [8, 256], strides = [1, 1]} : vector<24x384xf32> to vector<8x256xf32>
    %1015 = vector.broadcast %20 : f32 to vector<8x256xf32>
    %1016 = arith.mulf %1015, %1014 : vector<8x256xf32>
    %1017 = arith.addf %963, %1016 : vector<8x256xf32>
    %1018 = vector.broadcast %95 : f32 to vector<8x256xf32>
    %1019 = arith.mulf %1018, %1014 : vector<8x256xf32>
    %1020 = arith.addf %966, %1019 : vector<8x256xf32>
    %1021 = vector.broadcast %170 : f32 to vector<8x256xf32>
    %1022 = arith.mulf %1021, %1014 : vector<8x256xf32>
    %1023 = arith.addf %969, %1022 : vector<8x256xf32>
    %1024 = vector.broadcast %245 : f32 to vector<8x256xf32>
    %1025 = arith.mulf %1024, %1014 : vector<8x256xf32>
    %1026 = arith.addf %972, %1025 : vector<8x256xf32>
    %1027 = vector.extract_strided_slice %1013 {offsets = [8, 0], sizes = [8, 256], strides = [1, 1]} : vector<24x384xf32> to vector<8x256xf32>
    %1028 = vector.broadcast %45 : f32 to vector<8x256xf32>
    %1029 = arith.mulf %1028, %1027 : vector<8x256xf32>
    %1030 = arith.addf %1017, %1029 : vector<8x256xf32>
    %1031 = vector.broadcast %120 : f32 to vector<8x256xf32>
    %1032 = arith.mulf %1031, %1027 : vector<8x256xf32>
    %1033 = arith.addf %1020, %1032 : vector<8x256xf32>
    %1034 = vector.broadcast %195 : f32 to vector<8x256xf32>
    %1035 = arith.mulf %1034, %1027 : vector<8x256xf32>
    %1036 = arith.addf %1023, %1035 : vector<8x256xf32>
    %1037 = vector.broadcast %270 : f32 to vector<8x256xf32>
    %1038 = arith.mulf %1037, %1027 : vector<8x256xf32>
    %1039 = arith.addf %1026, %1038 : vector<8x256xf32>
    %1040 = vector.extract_strided_slice %1013 {offsets = [16, 0], sizes = [8, 256], strides = [1, 1]} : vector<24x384xf32> to vector<8x256xf32>
    %1041 = vector.broadcast %70 : f32 to vector<8x256xf32>
    %1042 = arith.mulf %1041, %1040 : vector<8x256xf32>
    %1043 = arith.addf %1030, %1042 : vector<8x256xf32>
    %1044 = vector.broadcast %145 : f32 to vector<8x256xf32>
    %1045 = arith.mulf %1044, %1040 : vector<8x256xf32>
    %1046 = arith.addf %1033, %1045 : vector<8x256xf32>
    %1047 = vector.broadcast %220 : f32 to vector<8x256xf32>
    %1048 = arith.mulf %1047, %1040 : vector<8x256xf32>
    %1049 = arith.addf %1036, %1048 : vector<8x256xf32>
    %1050 = vector.broadcast %295 : f32 to vector<8x256xf32>
    %1051 = arith.mulf %1050, %1040 : vector<8x256xf32>
    %1052 = arith.addf %1039, %1051 : vector<8x256xf32>
    %c326_i32 = arith.constant 326 : i32
    %1053 = tpu.dynamic_rotate %0 by %c326_i32 dim 1 : vector<24x384xf32>, i32 -> vector<24x384xf32>
    %1054 = vector.extract_strided_slice %1053 {offsets = [0, 0], sizes = [8, 256], strides = [1, 1]} : vector<24x384xf32> to vector<8x256xf32>
    %1055 = vector.broadcast %21 : f32 to vector<8x256xf32>
    %1056 = arith.mulf %1055, %1054 : vector<8x256xf32>
    %1057 = arith.addf %1003, %1056 : vector<8x256xf32>
    %1058 = vector.broadcast %96 : f32 to vector<8x256xf32>
    %1059 = arith.mulf %1058, %1054 : vector<8x256xf32>
    %1060 = arith.addf %1006, %1059 : vector<8x256xf32>
    %1061 = vector.broadcast %171 : f32 to vector<8x256xf32>
    %1062 = arith.mulf %1061, %1054 : vector<8x256xf32>
    %1063 = arith.addf %1009, %1062 : vector<8x256xf32>
    %1064 = vector.broadcast %246 : f32 to vector<8x256xf32>
    %1065 = arith.mulf %1064, %1054 : vector<8x256xf32>
    %1066 = arith.addf %1012, %1065 : vector<8x256xf32>
    %1067 = vector.extract_strided_slice %1053 {offsets = [8, 0], sizes = [8, 256], strides = [1, 1]} : vector<24x384xf32> to vector<8x256xf32>
    %1068 = vector.broadcast %46 : f32 to vector<8x256xf32>
    %1069 = arith.mulf %1068, %1067 : vector<8x256xf32>
    %1070 = arith.addf %1057, %1069 : vector<8x256xf32>
    %1071 = vector.broadcast %121 : f32 to vector<8x256xf32>
    %1072 = arith.mulf %1071, %1067 : vector<8x256xf32>
    %1073 = arith.addf %1060, %1072 : vector<8x256xf32>
    %1074 = vector.broadcast %196 : f32 to vector<8x256xf32>
    %1075 = arith.mulf %1074, %1067 : vector<8x256xf32>
    %1076 = arith.addf %1063, %1075 : vector<8x256xf32>
    %1077 = vector.broadcast %271 : f32 to vector<8x256xf32>
    %1078 = arith.mulf %1077, %1067 : vector<8x256xf32>
    %1079 = arith.addf %1066, %1078 : vector<8x256xf32>
    %1080 = vector.extract_strided_slice %1053 {offsets = [16, 0], sizes = [8, 256], strides = [1, 1]} : vector<24x384xf32> to vector<8x256xf32>
    %1081 = vector.broadcast %71 : f32 to vector<8x256xf32>
    %1082 = arith.mulf %1081, %1080 : vector<8x256xf32>
    %1083 = arith.addf %1070, %1082 : vector<8x256xf32>
    %1084 = vector.broadcast %146 : f32 to vector<8x256xf32>
    %1085 = arith.mulf %1084, %1080 : vector<8x256xf32>
    %1086 = arith.addf %1073, %1085 : vector<8x256xf32>
    %1087 = vector.broadcast %221 : f32 to vector<8x256xf32>
    %1088 = arith.mulf %1087, %1080 : vector<8x256xf32>
    %1089 = arith.addf %1076, %1088 : vector<8x256xf32>
    %1090 = vector.broadcast %296 : f32 to vector<8x256xf32>
    %1091 = arith.mulf %1090, %1080 : vector<8x256xf32>
    %1092 = arith.addf %1079, %1091 : vector<8x256xf32>
    %c312_i32 = arith.constant 312 : i32
    %1093 = tpu.dynamic_rotate %0 by %c312_i32 dim 1 : vector<24x384xf32>, i32 -> vector<24x384xf32>
    %1094 = vector.extract_strided_slice %1093 {offsets = [0, 0], sizes = [8, 256], strides = [1, 1]} : vector<24x384xf32> to vector<8x256xf32>
    %1095 = vector.broadcast %22 : f32 to vector<8x256xf32>
    %1096 = arith.mulf %1095, %1094 : vector<8x256xf32>
    %1097 = arith.addf %1043, %1096 : vector<8x256xf32>
    %1098 = vector.broadcast %97 : f32 to vector<8x256xf32>
    %1099 = arith.mulf %1098, %1094 : vector<8x256xf32>
    %1100 = arith.addf %1046, %1099 : vector<8x256xf32>
    %1101 = vector.broadcast %172 : f32 to vector<8x256xf32>
    %1102 = arith.mulf %1101, %1094 : vector<8x256xf32>
    %1103 = arith.addf %1049, %1102 : vector<8x256xf32>
    %1104 = vector.broadcast %247 : f32 to vector<8x256xf32>
    %1105 = arith.mulf %1104, %1094 : vector<8x256xf32>
    %1106 = arith.addf %1052, %1105 : vector<8x256xf32>
    %1107 = vector.extract_strided_slice %1093 {offsets = [8, 0], sizes = [8, 256], strides = [1, 1]} : vector<24x384xf32> to vector<8x256xf32>
    %1108 = vector.broadcast %47 : f32 to vector<8x256xf32>
    %1109 = arith.mulf %1108, %1107 : vector<8x256xf32>
    %1110 = arith.addf %1097, %1109 : vector<8x256xf32>
    %1111 = vector.broadcast %122 : f32 to vector<8x256xf32>
    %1112 = arith.mulf %1111, %1107 : vector<8x256xf32>
    %1113 = arith.addf %1100, %1112 : vector<8x256xf32>
    %1114 = vector.broadcast %197 : f32 to vector<8x256xf32>
    %1115 = arith.mulf %1114, %1107 : vector<8x256xf32>
    %1116 = arith.addf %1103, %1115 : vector<8x256xf32>
    %1117 = vector.broadcast %272 : f32 to vector<8x256xf32>
    %1118 = arith.mulf %1117, %1107 : vector<8x256xf32>
    %1119 = arith.addf %1106, %1118 : vector<8x256xf32>
    %1120 = vector.extract_strided_slice %1093 {offsets = [16, 0], sizes = [8, 256], strides = [1, 1]} : vector<24x384xf32> to vector<8x256xf32>
    %1121 = vector.broadcast %72 : f32 to vector<8x256xf32>
    %1122 = arith.mulf %1121, %1120 : vector<8x256xf32>
    %1123 = arith.addf %1110, %1122 : vector<8x256xf32>
    %1124 = vector.broadcast %147 : f32 to vector<8x256xf32>
    %1125 = arith.mulf %1124, %1120 : vector<8x256xf32>
    %1126 = arith.addf %1113, %1125 : vector<8x256xf32>
    %1127 = vector.broadcast %222 : f32 to vector<8x256xf32>
    %1128 = arith.mulf %1127, %1120 : vector<8x256xf32>
    %1129 = arith.addf %1116, %1128 : vector<8x256xf32>
    %1130 = vector.broadcast %297 : f32 to vector<8x256xf32>
    %1131 = arith.mulf %1130, %1120 : vector<8x256xf32>
    %1132 = arith.addf %1119, %1131 : vector<8x256xf32>
    %c311_i32 = arith.constant 311 : i32
    %1133 = tpu.dynamic_rotate %0 by %c311_i32 dim 1 : vector<24x384xf32>, i32 -> vector<24x384xf32>
    %1134 = vector.extract_strided_slice %1133 {offsets = [0, 0], sizes = [8, 256], strides = [1, 1]} : vector<24x384xf32> to vector<8x256xf32>
    %1135 = vector.broadcast %23 : f32 to vector<8x256xf32>
    %1136 = arith.mulf %1135, %1134 : vector<8x256xf32>
    %1137 = arith.addf %1083, %1136 : vector<8x256xf32>
    %1138 = vector.broadcast %98 : f32 to vector<8x256xf32>
    %1139 = arith.mulf %1138, %1134 : vector<8x256xf32>
    %1140 = arith.addf %1086, %1139 : vector<8x256xf32>
    %1141 = vector.broadcast %173 : f32 to vector<8x256xf32>
    %1142 = arith.mulf %1141, %1134 : vector<8x256xf32>
    %1143 = arith.addf %1089, %1142 : vector<8x256xf32>
    %1144 = vector.broadcast %248 : f32 to vector<8x256xf32>
    %1145 = arith.mulf %1144, %1134 : vector<8x256xf32>
    %1146 = arith.addf %1092, %1145 : vector<8x256xf32>
    %1147 = vector.extract_strided_slice %1133 {offsets = [8, 0], sizes = [8, 256], strides = [1, 1]} : vector<24x384xf32> to vector<8x256xf32>
    %1148 = vector.broadcast %48 : f32 to vector<8x256xf32>
    %1149 = arith.mulf %1148, %1147 : vector<8x256xf32>
    %1150 = arith.addf %1137, %1149 : vector<8x256xf32>
    %1151 = vector.broadcast %123 : f32 to vector<8x256xf32>
    %1152 = arith.mulf %1151, %1147 : vector<8x256xf32>
    %1153 = arith.addf %1140, %1152 : vector<8x256xf32>
    %1154 = vector.broadcast %198 : f32 to vector<8x256xf32>
    %1155 = arith.mulf %1154, %1147 : vector<8x256xf32>
    %1156 = arith.addf %1143, %1155 : vector<8x256xf32>
    %1157 = vector.broadcast %273 : f32 to vector<8x256xf32>
    %1158 = arith.mulf %1157, %1147 : vector<8x256xf32>
    %1159 = arith.addf %1146, %1158 : vector<8x256xf32>
    %1160 = vector.extract_strided_slice %1133 {offsets = [16, 0], sizes = [8, 256], strides = [1, 1]} : vector<24x384xf32> to vector<8x256xf32>
    %1161 = vector.broadcast %73 : f32 to vector<8x256xf32>
    %1162 = arith.mulf %1161, %1160 : vector<8x256xf32>
    %1163 = arith.addf %1150, %1162 : vector<8x256xf32>
    %1164 = vector.broadcast %148 : f32 to vector<8x256xf32>
    %1165 = arith.mulf %1164, %1160 : vector<8x256xf32>
    %1166 = arith.addf %1153, %1165 : vector<8x256xf32>
    %1167 = vector.broadcast %223 : f32 to vector<8x256xf32>
    %1168 = arith.mulf %1167, %1160 : vector<8x256xf32>
    %1169 = arith.addf %1156, %1168 : vector<8x256xf32>
    %1170 = vector.broadcast %298 : f32 to vector<8x256xf32>
    %1171 = arith.mulf %1170, %1160 : vector<8x256xf32>
    %1172 = arith.addf %1159, %1171 : vector<8x256xf32>
    %c310_i32 = arith.constant 310 : i32
    %1173 = tpu.dynamic_rotate %0 by %c310_i32 dim 1 : vector<24x384xf32>, i32 -> vector<24x384xf32>
    %1174 = vector.extract_strided_slice %1173 {offsets = [0, 0], sizes = [8, 256], strides = [1, 1]} : vector<24x384xf32> to vector<8x256xf32>
    %1175 = vector.broadcast %24 : f32 to vector<8x256xf32>
    %1176 = arith.mulf %1175, %1174 : vector<8x256xf32>
    %1177 = arith.addf %1123, %1176 : vector<8x256xf32>
    %1178 = vector.broadcast %99 : f32 to vector<8x256xf32>
    %1179 = arith.mulf %1178, %1174 : vector<8x256xf32>
    %1180 = arith.addf %1126, %1179 : vector<8x256xf32>
    %1181 = vector.broadcast %174 : f32 to vector<8x256xf32>
    %1182 = arith.mulf %1181, %1174 : vector<8x256xf32>
    %1183 = arith.addf %1129, %1182 : vector<8x256xf32>
    %1184 = vector.broadcast %249 : f32 to vector<8x256xf32>
    %1185 = arith.mulf %1184, %1174 : vector<8x256xf32>
    %1186 = arith.addf %1132, %1185 : vector<8x256xf32>
    %1187 = vector.extract_strided_slice %1173 {offsets = [8, 0], sizes = [8, 256], strides = [1, 1]} : vector<24x384xf32> to vector<8x256xf32>
    %1188 = vector.broadcast %49 : f32 to vector<8x256xf32>
    %1189 = arith.mulf %1188, %1187 : vector<8x256xf32>
    %1190 = arith.addf %1177, %1189 : vector<8x256xf32>
    %1191 = vector.broadcast %124 : f32 to vector<8x256xf32>
    %1192 = arith.mulf %1191, %1187 : vector<8x256xf32>
    %1193 = arith.addf %1180, %1192 : vector<8x256xf32>
    %1194 = vector.broadcast %199 : f32 to vector<8x256xf32>
    %1195 = arith.mulf %1194, %1187 : vector<8x256xf32>
    %1196 = arith.addf %1183, %1195 : vector<8x256xf32>
    %1197 = vector.broadcast %274 : f32 to vector<8x256xf32>
    %1198 = arith.mulf %1197, %1187 : vector<8x256xf32>
    %1199 = arith.addf %1186, %1198 : vector<8x256xf32>
    %1200 = vector.extract_strided_slice %1173 {offsets = [16, 0], sizes = [8, 256], strides = [1, 1]} : vector<24x384xf32> to vector<8x256xf32>
    %1201 = vector.broadcast %74 : f32 to vector<8x256xf32>
    %1202 = arith.mulf %1201, %1200 : vector<8x256xf32>
    %1203 = arith.addf %1190, %1202 : vector<8x256xf32>
    %1204 = vector.broadcast %149 : f32 to vector<8x256xf32>
    %1205 = arith.mulf %1204, %1200 : vector<8x256xf32>
    %1206 = arith.addf %1193, %1205 : vector<8x256xf32>
    %1207 = vector.broadcast %224 : f32 to vector<8x256xf32>
    %1208 = arith.mulf %1207, %1200 : vector<8x256xf32>
    %1209 = arith.addf %1196, %1208 : vector<8x256xf32>
    %1210 = vector.broadcast %299 : f32 to vector<8x256xf32>
    %1211 = arith.mulf %1210, %1200 : vector<8x256xf32>
    %1212 = arith.addf %1199, %1211 : vector<8x256xf32>
    %c309_i32 = arith.constant 309 : i32
    %1213 = tpu.dynamic_rotate %0 by %c309_i32 dim 1 : vector<24x384xf32>, i32 -> vector<24x384xf32>
    %1214 = vector.extract_strided_slice %1213 {offsets = [0, 0], sizes = [8, 256], strides = [1, 1]} : vector<24x384xf32> to vector<8x256xf32>
    %1215 = vector.broadcast %25 : f32 to vector<8x256xf32>
    %1216 = arith.mulf %1215, %1214 : vector<8x256xf32>
    %1217 = arith.addf %1163, %1216 : vector<8x256xf32>
    %1218 = vector.broadcast %100 : f32 to vector<8x256xf32>
    %1219 = arith.mulf %1218, %1214 : vector<8x256xf32>
    %1220 = arith.addf %1166, %1219 : vector<8x256xf32>
    %1221 = vector.broadcast %175 : f32 to vector<8x256xf32>
    %1222 = arith.mulf %1221, %1214 : vector<8x256xf32>
    %1223 = arith.addf %1169, %1222 : vector<8x256xf32>
    %1224 = vector.broadcast %250 : f32 to vector<8x256xf32>
    %1225 = arith.mulf %1224, %1214 : vector<8x256xf32>
    %1226 = arith.addf %1172, %1225 : vector<8x256xf32>
    %1227 = vector.extract_strided_slice %1213 {offsets = [8, 0], sizes = [8, 256], strides = [1, 1]} : vector<24x384xf32> to vector<8x256xf32>
    %1228 = vector.broadcast %50 : f32 to vector<8x256xf32>
    %1229 = arith.mulf %1228, %1227 : vector<8x256xf32>
    %1230 = arith.addf %1217, %1229 : vector<8x256xf32>
    %1231 = vector.broadcast %125 : f32 to vector<8x256xf32>
    %1232 = arith.mulf %1231, %1227 : vector<8x256xf32>
    %1233 = arith.addf %1220, %1232 : vector<8x256xf32>
    %1234 = vector.broadcast %200 : f32 to vector<8x256xf32>
    %1235 = arith.mulf %1234, %1227 : vector<8x256xf32>
    %1236 = arith.addf %1223, %1235 : vector<8x256xf32>
    %1237 = vector.broadcast %275 : f32 to vector<8x256xf32>
    %1238 = arith.mulf %1237, %1227 : vector<8x256xf32>
    %1239 = arith.addf %1226, %1238 : vector<8x256xf32>
    %1240 = vector.extract_strided_slice %1213 {offsets = [16, 0], sizes = [8, 256], strides = [1, 1]} : vector<24x384xf32> to vector<8x256xf32>
    %1241 = vector.broadcast %75 : f32 to vector<8x256xf32>
    %1242 = arith.mulf %1241, %1240 : vector<8x256xf32>
    %1243 = arith.addf %1230, %1242 : vector<8x256xf32>
    %1244 = vector.broadcast %150 : f32 to vector<8x256xf32>
    %1245 = arith.mulf %1244, %1240 : vector<8x256xf32>
    %1246 = arith.addf %1233, %1245 : vector<8x256xf32>
    %1247 = vector.broadcast %225 : f32 to vector<8x256xf32>
    %1248 = arith.mulf %1247, %1240 : vector<8x256xf32>
    %1249 = arith.addf %1236, %1248 : vector<8x256xf32>
    %1250 = vector.broadcast %300 : f32 to vector<8x256xf32>
    %1251 = arith.mulf %1250, %1240 : vector<8x256xf32>
    %1252 = arith.addf %1239, %1251 : vector<8x256xf32>
    %c308_i32 = arith.constant 308 : i32
    %1253 = tpu.dynamic_rotate %0 by %c308_i32 dim 1 : vector<24x384xf32>, i32 -> vector<24x384xf32>
    %1254 = vector.extract_strided_slice %1253 {offsets = [0, 0], sizes = [8, 256], strides = [1, 1]} : vector<24x384xf32> to vector<8x256xf32>
    %1255 = vector.broadcast %26 : f32 to vector<8x256xf32>
    %1256 = arith.mulf %1255, %1254 : vector<8x256xf32>
    %1257 = arith.addf %1203, %1256 : vector<8x256xf32>
    %1258 = vector.broadcast %101 : f32 to vector<8x256xf32>
    %1259 = arith.mulf %1258, %1254 : vector<8x256xf32>
    %1260 = arith.addf %1206, %1259 : vector<8x256xf32>
    %1261 = vector.broadcast %176 : f32 to vector<8x256xf32>
    %1262 = arith.mulf %1261, %1254 : vector<8x256xf32>
    %1263 = arith.addf %1209, %1262 : vector<8x256xf32>
    %1264 = vector.broadcast %251 : f32 to vector<8x256xf32>
    %1265 = arith.mulf %1264, %1254 : vector<8x256xf32>
    %1266 = arith.addf %1212, %1265 : vector<8x256xf32>
    %1267 = vector.extract_strided_slice %1253 {offsets = [8, 0], sizes = [8, 256], strides = [1, 1]} : vector<24x384xf32> to vector<8x256xf32>
    %1268 = vector.broadcast %51 : f32 to vector<8x256xf32>
    %1269 = arith.mulf %1268, %1267 : vector<8x256xf32>
    %1270 = arith.addf %1257, %1269 : vector<8x256xf32>
    %1271 = vector.broadcast %126 : f32 to vector<8x256xf32>
    %1272 = arith.mulf %1271, %1267 : vector<8x256xf32>
    %1273 = arith.addf %1260, %1272 : vector<8x256xf32>
    %1274 = vector.broadcast %201 : f32 to vector<8x256xf32>
    %1275 = arith.mulf %1274, %1267 : vector<8x256xf32>
    %1276 = arith.addf %1263, %1275 : vector<8x256xf32>
    %1277 = vector.broadcast %276 : f32 to vector<8x256xf32>
    %1278 = arith.mulf %1277, %1267 : vector<8x256xf32>
    %1279 = arith.addf %1266, %1278 : vector<8x256xf32>
    %1280 = vector.extract_strided_slice %1253 {offsets = [16, 0], sizes = [8, 256], strides = [1, 1]} : vector<24x384xf32> to vector<8x256xf32>
    %1281 = vector.broadcast %76 : f32 to vector<8x256xf32>
    %1282 = arith.mulf %1281, %1280 : vector<8x256xf32>
    %1283 = arith.addf %1270, %1282 : vector<8x256xf32>
    %1284 = vector.broadcast %151 : f32 to vector<8x256xf32>
    %1285 = arith.mulf %1284, %1280 : vector<8x256xf32>
    %1286 = arith.addf %1273, %1285 : vector<8x256xf32>
    %1287 = vector.broadcast %226 : f32 to vector<8x256xf32>
    %1288 = arith.mulf %1287, %1280 : vector<8x256xf32>
    %1289 = arith.addf %1276, %1288 : vector<8x256xf32>
    %1290 = vector.broadcast %301 : f32 to vector<8x256xf32>
    %1291 = arith.mulf %1290, %1280 : vector<8x256xf32>
    %1292 = arith.addf %1279, %1291 : vector<8x256xf32>
    %1293 = arith.addf %1283, %1243 : vector<8x256xf32>
    %c300 = arith.constant 300 : index
    %1294 = memref.load %arg2[%c300] : memref<317xf32, #tpu.memory_space<smem>>
    %1295 = vector.broadcast %1294 : f32 to vector<8x256xf32>
    %1296 = arith.addf %1293, %1295 : vector<8x256xf32>
    %1297 = arith.mulf %1296, %1 : vector<8x256xf32>
    %cst = arith.constant dense<0.000000e+00> : vector<8xf32>
    %1298 = vector.multi_reduction <add>, %1297, %cst [1] : vector<8x256xf32> to vector<8xf32>
    %1299 = vector.shape_cast %1298 : vector<8xf32> to vector<8x1xf32>
    %cst_4 = arith.constant dense<0.000000e+00> : vector<1xf32>
    %1300 = vector.multi_reduction <add>, %1299, %cst_4 [0] : vector<8x1xf32> to vector<1xf32>
    %1301 = vector.shape_cast %1300 : vector<1xf32> to vector<1x1xf32>
    %1302 = arith.mulf %1297, %1297 : vector<8x256xf32>
    %cst_5 = arith.constant dense<0.000000e+00> : vector<8xf32>
    %1303 = vector.multi_reduction <add>, %1302, %cst_5 [1] : vector<8x256xf32> to vector<8xf32>
    %1304 = vector.shape_cast %1303 : vector<8xf32> to vector<8x1xf32>
    %cst_6 = arith.constant dense<0.000000e+00> : vector<1xf32>
    %1305 = vector.multi_reduction <add>, %1304, %cst_6 [0] : vector<8x1xf32> to vector<1xf32>
    %1306 = vector.shape_cast %1305 : vector<1xf32> to vector<1x1xf32>
    %cst_7 = arith.constant 0.00255102036 : f32
    %1307 = vector.broadcast %cst_7 : f32 to vector<1x1xf32>
    %1308 = arith.mulf %1301, %1307 : vector<1x1xf32>
    %cst_8 = arith.constant 0.00255102036 : f32
    %1309 = vector.broadcast %cst_8 : f32 to vector<1x1xf32>
    %1310 = arith.mulf %1306, %1309 : vector<1x1xf32>
    %1311 = arith.mulf %1308, %1308 : vector<1x1xf32>
    %1312 = arith.subf %1310, %1311 : vector<1x1xf32>
    %c304 = arith.constant 304 : index
    %1313 = memref.load %arg2[%c304] : memref<317xf32, #tpu.memory_space<smem>>
    %cst_9 = arith.constant 9.99999974E-6 : f32
    %1314 = vector.broadcast %cst_9 : f32 to vector<1x1xf32>
    %1315 = arith.addf %1312, %1314 : vector<1x1xf32>
    %1316 = math.rsqrt %1315 : vector<1x1xf32>
    %1317 = vector.broadcast %1313 : f32 to vector<1x1xf32>
    %1318 = arith.mulf %1317, %1316 : vector<1x1xf32>
    %c308 = arith.constant 308 : index
    %1319 = memref.load %arg2[%c308] : memref<317xf32, #tpu.memory_space<smem>>
    %1320 = arith.mulf %1308, %1318 : vector<1x1xf32>
    %1321 = vector.broadcast %1319 : f32 to vector<1x1xf32>
    %1322 = arith.subf %1321, %1320 : vector<1x1xf32>
    %1323 = vector.broadcast %1318 : vector<1x1xf32> to vector<8x256xf32>
    %1324 = arith.mulf %1296, %1323 : vector<8x256xf32>
    %1325 = vector.broadcast %1322 : vector<1x1xf32> to vector<8x256xf32>
    %1326 = arith.addf %1324, %1325 : vector<8x256xf32>
    %cst_10 = arith.constant 0.000000e+00 : f32
    %1327 = vector.broadcast %cst_10 : f32 to vector<8x256xf32>
    %1328 = arith.maximumf %1326, %1327 : vector<8x256xf32>
    %1329 = arith.mulf %1328, %1 : vector<8x256xf32>
    %cst_11 = arith.constant dense<0.000000e+00> : vector<8xf32>
    %1330 = vector.multi_reduction <add>, %1329, %cst_11 [1] : vector<8x256xf32> to vector<8xf32>
    %1331 = vector.shape_cast %1330 : vector<8xf32> to vector<8x1xf32>
    %cst_12 = arith.constant 0.00510204071 : f32
    %1332 = vector.broadcast %cst_12 : f32 to vector<8x1xf32>
    %1333 = arith.mulf %1331, %1332 : vector<8x1xf32>
    %c312 = arith.constant 312 : index
    %1334 = memref.load %arg2[%c312] : memref<317xf32, #tpu.memory_space<smem>>
    %1335 = vector.broadcast %1334 : f32 to vector<8x1xf32>
    %1336 = arith.mulf %1333, %1335 : vector<8x1xf32>
    %1337 = arith.addf %1286, %1246 : vector<8x256xf32>
    %c301 = arith.constant 301 : index
    %1338 = memref.load %arg2[%c301] : memref<317xf32, #tpu.memory_space<smem>>
    %1339 = vector.broadcast %1338 : f32 to vector<8x256xf32>
    %1340 = arith.addf %1337, %1339 : vector<8x256xf32>
    %1341 = arith.mulf %1340, %1 : vector<8x256xf32>
    %cst_13 = arith.constant dense<0.000000e+00> : vector<8xf32>
    %1342 = vector.multi_reduction <add>, %1341, %cst_13 [1] : vector<8x256xf32> to vector<8xf32>
    %1343 = vector.shape_cast %1342 : vector<8xf32> to vector<8x1xf32>
    %cst_14 = arith.constant dense<0.000000e+00> : vector<1xf32>
    %1344 = vector.multi_reduction <add>, %1343, %cst_14 [0] : vector<8x1xf32> to vector<1xf32>
    %1345 = vector.shape_cast %1344 : vector<1xf32> to vector<1x1xf32>
    %1346 = arith.mulf %1341, %1341 : vector<8x256xf32>
    %cst_15 = arith.constant dense<0.000000e+00> : vector<8xf32>
    %1347 = vector.multi_reduction <add>, %1346, %cst_15 [1] : vector<8x256xf32> to vector<8xf32>
    %1348 = vector.shape_cast %1347 : vector<8xf32> to vector<8x1xf32>
    %cst_16 = arith.constant dense<0.000000e+00> : vector<1xf32>
    %1349 = vector.multi_reduction <add>, %1348, %cst_16 [0] : vector<8x1xf32> to vector<1xf32>
    %1350 = vector.shape_cast %1349 : vector<1xf32> to vector<1x1xf32>
    %cst_17 = arith.constant 0.00255102036 : f32
    %1351 = vector.broadcast %cst_17 : f32 to vector<1x1xf32>
    %1352 = arith.mulf %1345, %1351 : vector<1x1xf32>
    %cst_18 = arith.constant 0.00255102036 : f32
    %1353 = vector.broadcast %cst_18 : f32 to vector<1x1xf32>
    %1354 = arith.mulf %1350, %1353 : vector<1x1xf32>
    %1355 = arith.mulf %1352, %1352 : vector<1x1xf32>
    %1356 = arith.subf %1354, %1355 : vector<1x1xf32>
    %c305 = arith.constant 305 : index
    %1357 = memref.load %arg2[%c305] : memref<317xf32, #tpu.memory_space<smem>>
    %cst_19 = arith.constant 9.99999974E-6 : f32
    %1358 = vector.broadcast %cst_19 : f32 to vector<1x1xf32>
    %1359 = arith.addf %1356, %1358 : vector<1x1xf32>
    %1360 = math.rsqrt %1359 : vector<1x1xf32>
    %1361 = vector.broadcast %1357 : f32 to vector<1x1xf32>
    %1362 = arith.mulf %1361, %1360 : vector<1x1xf32>
    %c309 = arith.constant 309 : index
    %1363 = memref.load %arg2[%c309] : memref<317xf32, #tpu.memory_space<smem>>
    %1364 = arith.mulf %1352, %1362 : vector<1x1xf32>
    %1365 = vector.broadcast %1363 : f32 to vector<1x1xf32>
    %1366 = arith.subf %1365, %1364 : vector<1x1xf32>
    %1367 = vector.broadcast %1362 : vector<1x1xf32> to vector<8x256xf32>
    %1368 = arith.mulf %1340, %1367 : vector<8x256xf32>
    %1369 = vector.broadcast %1366 : vector<1x1xf32> to vector<8x256xf32>
    %1370 = arith.addf %1368, %1369 : vector<8x256xf32>
    %cst_20 = arith.constant 0.000000e+00 : f32
    %1371 = vector.broadcast %cst_20 : f32 to vector<8x256xf32>
    %1372 = arith.maximumf %1370, %1371 : vector<8x256xf32>
    %1373 = arith.mulf %1372, %1 : vector<8x256xf32>
    %cst_21 = arith.constant dense<0.000000e+00> : vector<8xf32>
    %1374 = vector.multi_reduction <add>, %1373, %cst_21 [1] : vector<8x256xf32> to vector<8xf32>
    %1375 = vector.shape_cast %1374 : vector<8xf32> to vector<8x1xf32>
    %cst_22 = arith.constant 0.00510204071 : f32
    %1376 = vector.broadcast %cst_22 : f32 to vector<8x1xf32>
    %1377 = arith.mulf %1375, %1376 : vector<8x1xf32>
    %c313 = arith.constant 313 : index
    %1378 = memref.load %arg2[%c313] : memref<317xf32, #tpu.memory_space<smem>>
    %1379 = vector.broadcast %1378 : f32 to vector<8x1xf32>
    %1380 = arith.mulf %1377, %1379 : vector<8x1xf32>
    %1381 = arith.addf %1336, %1380 : vector<8x1xf32>
    %1382 = arith.addf %1289, %1249 : vector<8x256xf32>
    %c302 = arith.constant 302 : index
    %1383 = memref.load %arg2[%c302] : memref<317xf32, #tpu.memory_space<smem>>
    %1384 = vector.broadcast %1383 : f32 to vector<8x256xf32>
    %1385 = arith.addf %1382, %1384 : vector<8x256xf32>
    %1386 = arith.mulf %1385, %1 : vector<8x256xf32>
    %cst_23 = arith.constant dense<0.000000e+00> : vector<8xf32>
    %1387 = vector.multi_reduction <add>, %1386, %cst_23 [1] : vector<8x256xf32> to vector<8xf32>
    %1388 = vector.shape_cast %1387 : vector<8xf32> to vector<8x1xf32>
    %cst_24 = arith.constant dense<0.000000e+00> : vector<1xf32>
    %1389 = vector.multi_reduction <add>, %1388, %cst_24 [0] : vector<8x1xf32> to vector<1xf32>
    %1390 = vector.shape_cast %1389 : vector<1xf32> to vector<1x1xf32>
    %1391 = arith.mulf %1386, %1386 : vector<8x256xf32>
    %cst_25 = arith.constant dense<0.000000e+00> : vector<8xf32>
    %1392 = vector.multi_reduction <add>, %1391, %cst_25 [1] : vector<8x256xf32> to vector<8xf32>
    %1393 = vector.shape_cast %1392 : vector<8xf32> to vector<8x1xf32>
    %cst_26 = arith.constant dense<0.000000e+00> : vector<1xf32>
    %1394 = vector.multi_reduction <add>, %1393, %cst_26 [0] : vector<8x1xf32> to vector<1xf32>
    %1395 = vector.shape_cast %1394 : vector<1xf32> to vector<1x1xf32>
    %cst_27 = arith.constant 0.00255102036 : f32
    %1396 = vector.broadcast %cst_27 : f32 to vector<1x1xf32>
    %1397 = arith.mulf %1390, %1396 : vector<1x1xf32>
    %cst_28 = arith.constant 0.00255102036 : f32
    %1398 = vector.broadcast %cst_28 : f32 to vector<1x1xf32>
    %1399 = arith.mulf %1395, %1398 : vector<1x1xf32>
    %1400 = arith.mulf %1397, %1397 : vector<1x1xf32>
    %1401 = arith.subf %1399, %1400 : vector<1x1xf32>
    %c306 = arith.constant 306 : index
    %1402 = memref.load %arg2[%c306] : memref<317xf32, #tpu.memory_space<smem>>
    %cst_29 = arith.constant 9.99999974E-6 : f32
    %1403 = vector.broadcast %cst_29 : f32 to vector<1x1xf32>
    %1404 = arith.addf %1401, %1403 : vector<1x1xf32>
    %1405 = math.rsqrt %1404 : vector<1x1xf32>
    %1406 = vector.broadcast %1402 : f32 to vector<1x1xf32>
    %1407 = arith.mulf %1406, %1405 : vector<1x1xf32>
    %c310 = arith.constant 310 : index
    %1408 = memref.load %arg2[%c310] : memref<317xf32, #tpu.memory_space<smem>>
    %1409 = arith.mulf %1397, %1407 : vector<1x1xf32>
    %1410 = vector.broadcast %1408 : f32 to vector<1x1xf32>
    %1411 = arith.subf %1410, %1409 : vector<1x1xf32>
    %1412 = vector.broadcast %1407 : vector<1x1xf32> to vector<8x256xf32>
    %1413 = arith.mulf %1385, %1412 : vector<8x256xf32>
    %1414 = vector.broadcast %1411 : vector<1x1xf32> to vector<8x256xf32>
    %1415 = arith.addf %1413, %1414 : vector<8x256xf32>
    %cst_30 = arith.constant 0.000000e+00 : f32
    %1416 = vector.broadcast %cst_30 : f32 to vector<8x256xf32>
    %1417 = arith.maximumf %1415, %1416 : vector<8x256xf32>
    %1418 = arith.mulf %1417, %1 : vector<8x256xf32>
    %cst_31 = arith.constant dense<0.000000e+00> : vector<8xf32>
    %1419 = vector.multi_reduction <add>, %1418, %cst_31 [1] : vector<8x256xf32> to vector<8xf32>
    %1420 = vector.shape_cast %1419 : vector<8xf32> to vector<8x1xf32>
    %cst_32 = arith.constant 0.00510204071 : f32
    %1421 = vector.broadcast %cst_32 : f32 to vector<8x1xf32>
    %1422 = arith.mulf %1420, %1421 : vector<8x1xf32>
    %c314 = arith.constant 314 : index
    %1423 = memref.load %arg2[%c314] : memref<317xf32, #tpu.memory_space<smem>>
    %1424 = vector.broadcast %1423 : f32 to vector<8x1xf32>
    %1425 = arith.mulf %1422, %1424 : vector<8x1xf32>
    %1426 = arith.addf %1381, %1425 : vector<8x1xf32>
    %1427 = arith.addf %1292, %1252 : vector<8x256xf32>
    %c303 = arith.constant 303 : index
    %1428 = memref.load %arg2[%c303] : memref<317xf32, #tpu.memory_space<smem>>
    %1429 = vector.broadcast %1428 : f32 to vector<8x256xf32>
    %1430 = arith.addf %1427, %1429 : vector<8x256xf32>
    %1431 = arith.mulf %1430, %1 : vector<8x256xf32>
    %cst_33 = arith.constant dense<0.000000e+00> : vector<8xf32>
    %1432 = vector.multi_reduction <add>, %1431, %cst_33 [1] : vector<8x256xf32> to vector<8xf32>
    %1433 = vector.shape_cast %1432 : vector<8xf32> to vector<8x1xf32>
    %cst_34 = arith.constant dense<0.000000e+00> : vector<1xf32>
    %1434 = vector.multi_reduction <add>, %1433, %cst_34 [0] : vector<8x1xf32> to vector<1xf32>
    %1435 = vector.shape_cast %1434 : vector<1xf32> to vector<1x1xf32>
    %1436 = arith.mulf %1431, %1431 : vector<8x256xf32>
    %cst_35 = arith.constant dense<0.000000e+00> : vector<8xf32>
    %1437 = vector.multi_reduction <add>, %1436, %cst_35 [1] : vector<8x256xf32> to vector<8xf32>
    %1438 = vector.shape_cast %1437 : vector<8xf32> to vector<8x1xf32>
    %cst_36 = arith.constant dense<0.000000e+00> : vector<1xf32>
    %1439 = vector.multi_reduction <add>, %1438, %cst_36 [0] : vector<8x1xf32> to vector<1xf32>
    %1440 = vector.shape_cast %1439 : vector<1xf32> to vector<1x1xf32>
    %cst_37 = arith.constant 0.00255102036 : f32
    %1441 = vector.broadcast %cst_37 : f32 to vector<1x1xf32>
    %1442 = arith.mulf %1435, %1441 : vector<1x1xf32>
    %cst_38 = arith.constant 0.00255102036 : f32
    %1443 = vector.broadcast %cst_38 : f32 to vector<1x1xf32>
    %1444 = arith.mulf %1440, %1443 : vector<1x1xf32>
    %1445 = arith.mulf %1442, %1442 : vector<1x1xf32>
    %1446 = arith.subf %1444, %1445 : vector<1x1xf32>
    %c307 = arith.constant 307 : index
    %1447 = memref.load %arg2[%c307] : memref<317xf32, #tpu.memory_space<smem>>
    %cst_39 = arith.constant 9.99999974E-6 : f32
    %1448 = vector.broadcast %cst_39 : f32 to vector<1x1xf32>
    %1449 = arith.addf %1446, %1448 : vector<1x1xf32>
    %1450 = math.rsqrt %1449 : vector<1x1xf32>
    %1451 = vector.broadcast %1447 : f32 to vector<1x1xf32>
    %1452 = arith.mulf %1451, %1450 : vector<1x1xf32>
    %c311 = arith.constant 311 : index
    %1453 = memref.load %arg2[%c311] : memref<317xf32, #tpu.memory_space<smem>>
    %1454 = arith.mulf %1442, %1452 : vector<1x1xf32>
    %1455 = vector.broadcast %1453 : f32 to vector<1x1xf32>
    %1456 = arith.subf %1455, %1454 : vector<1x1xf32>
    %1457 = vector.broadcast %1452 : vector<1x1xf32> to vector<8x256xf32>
    %1458 = arith.mulf %1430, %1457 : vector<8x256xf32>
    %1459 = vector.broadcast %1456 : vector<1x1xf32> to vector<8x256xf32>
    %1460 = arith.addf %1458, %1459 : vector<8x256xf32>
    %cst_40 = arith.constant 0.000000e+00 : f32
    %1461 = vector.broadcast %cst_40 : f32 to vector<8x256xf32>
    %1462 = arith.maximumf %1460, %1461 : vector<8x256xf32>
    %1463 = arith.mulf %1462, %1 : vector<8x256xf32>
    %cst_41 = arith.constant dense<0.000000e+00> : vector<8xf32>
    %1464 = vector.multi_reduction <add>, %1463, %cst_41 [1] : vector<8x256xf32> to vector<8xf32>
    %1465 = vector.shape_cast %1464 : vector<8xf32> to vector<8x1xf32>
    %cst_42 = arith.constant 0.00510204071 : f32
    %1466 = vector.broadcast %cst_42 : f32 to vector<8x1xf32>
    %1467 = arith.mulf %1465, %1466 : vector<8x1xf32>
    %c315 = arith.constant 315 : index
    %1468 = memref.load %arg2[%c315] : memref<317xf32, #tpu.memory_space<smem>>
    %1469 = vector.broadcast %1468 : f32 to vector<8x1xf32>
    %1470 = arith.mulf %1467, %1469 : vector<8x1xf32>
    %1471 = arith.addf %1426, %1470 : vector<8x1xf32>
    %c316 = arith.constant 316 : index
    %1472 = memref.load %arg2[%c316] : memref<317xf32, #tpu.memory_space<smem>>
    %1473 = vector.broadcast %1472 : f32 to vector<8x1xf32>
    %1474 = arith.addf %1471, %1473 : vector<8x1xf32>
    %c0_43 = arith.constant 0 : index
    %c0_44 = arith.constant 0 : index
    %1475 = vector.load %arg3[%c0_43, %c0_44] : memref<8x1xf32, #tpu.memory_space<vmem>>, vector<8x1xf32>
    tpu.vector_store %arg3[%c0_43, %c0_44], %1474 {strides = array<i32>} : memref<8x1xf32, #tpu.memory_space<vmem>>, vector<8x1xf32>,
    return
  }
}

</mosaic_0001>

<bundles_post_ra>
// kernel: testarch_forward.1
= control target key start
LH: loop header
LB: loop body
LE: loop exit
PB: predicated region body
PF: predicated region fallthrough
CT: control target
= control target key end

     0   :  { %s6864_s0 = inlined_call_operand.vmem [shape: f32[24,384], index: 0, kind: input, shape index: {}]   ;;  %s6865_s1 = inlined_call_operand.vmem [shape: f32[8,256], index: 1, kind: input, shape index: {}]   ;;  %s6866_s2 = inlined_call_operand.vmem [shape: f32[317], index: 2, kind: input, shape index: {}]   ;;  %s6867_s3 = inlined_call_operand.vmem [shape: f32[8,1], index: 3, kind: output, shape index: {}]  }
   0x1   :  { %6889 = sst [smem:[#allocation34_spill]] %s6865_s1 }
   0x2   :  { %6890 = sst [smem:[#allocation35_spill]] %s6867_s3 }
   0x3   :  { %8 = vsyncpa [#allocation3], 0  ;;  %s18_s14 = sshll.u32 %s6866_s2, 4  ;;  %s3087_s15 = smov [#allocation2]   ;;  %s19_s14 = int_to_ptr.vmem [resolvable:$true] %s18_s14 }
   0x4   :  { %21 = dma.vmem_to_smem %s19_s14, 48, %s3087_s15, [#allocation3]  }
   0x5   :  { %3085 = dma.done.wait [#allocation3], 48  }
   0x6   :  { %3086 = vsyncadd [#allocation3], 4294967248 }
   0x7   :  { %26 = sfence }
   0x8   :  { %v3138_v0 = vld [vmem:[%s6864_s0 + $0x30] sm:$0xff]  ;;  %v3143_v1 = vld [vmem:[%s6864_s0] sm:$0xff]  ;;  %s3088_s20 = smov 127   ;;  %v3156_v3 = vld [vmem:[%s6864_s0 + $0x8] sm:$0xff]  ;;  %s3089_s7 = smov 126   ;;  %v408_v36 = vlaneseq }
   0x9   :  { %394 = vrot.lane.b32.xlu1 %v3138_v0, %s3088_s20  ;;  %390 = vrot.lane.b32.xlu0 %v3143_v1, %s3088_s20  ;;  %v3150_v2 = vld [vmem:[%s6864_s0 + $0x20] sm:$0xff]  ;;  %v3161_v4 = vld [vmem:[%s6864_s0 + $0x18] sm:$0xff]  ;;  %s3090_s8 = smov 125   ;;  %s3091_s9 = smov 124  }
   0xa   :  { %398 = vrot.lane.b32.xlu2 %v3150_v2, %s3088_s20  ;;  %v3166_v5 = vld [vmem:[%s6864_s0 + $0x38] sm:$0xff]  ;;  %v3174_v6 = vld [vmem:[%s6864_s0 + $0x28] sm:$0xff]  ;;  %v3179_v7 = vld [vmem:[%s6864_s0 + $0x10] sm:$0xff]  ;;  %s3092_s10 = smov 110   ;;  %s3093_s11 = smov 109   ;;  %v3359_v39 = vand.u32 127, %v408_v36 }
   0xb   :  { %v3184_v8 = vld [vmem:[%s6864_s0 + $0x40] sm:$0xff]  ;;  %s3094_s12 = smov 108   ;;  %s3282_s13 = sld [smem:[#allocation2 + $0x33]] }
   0xc   :  { %s3284_s14 = sld [smem:[#allocation2 + $0x7e]]  ;;  %s6868_s25 = smov 107   ;;  %vm410_vm0 = vcmp.lt.s32.totalorder %v3359_v39, 127  ;;  %vm487_vm1 = vcmp.lt.s32.totalorder %v3359_v39, 126  ;;  %vm572_vm2 = vcmp.lt.s32.totalorder %v3359_v39, 125  ;;  %vm657_vm3 = vcmp.lt.s32.totalorder %v3359_v39, 124 }
   0xd   :  { %s3286_s15 = sld [smem:[#allocation2 + $0xc9]]  ;;  %s6905_s1 = smov 107   ;;  %vm742_vm4 = vcmp.lt.s32.totalorder %v3359_v39, 110  ;;  %vm827_vm5 = vcmp.lt.s32.totalorder %v3359_v39, 109  ;;  %vm912_vm6 = vcmp.lt.s32.totalorder %v3359_v39, 108  ;;  %vm997_vm7 = vcmp.lt.s32.totalorder %v3359_v39, 107 }
   0xe   :  { %s3288_s16 = sld [smem:[#allocation2 + $0x114]]  ;;  %vm1082_vm8 = vcmp.lt.s32.totalorder %v3359_v39, 106  ;;  %vm1167_vm9 = vcmp.lt.s32.totalorder %v3359_v39, 92  ;;  %vm1252_vm10 = vcmp.lt.s32.totalorder %v3359_v39, 91  ;;  %vm1337_vm11 = vcmp.lt.s32.totalorder %v3359_v39, 90 }
   0xf   :  { %s3290_s17 = sld [smem:[#allocation2 + $0x1a]]  ;;  %vm1422_vm12 = vcmp.lt.s32.totalorder %v3359_v39, 89  ;;  %vm1507_vm13 = vcmp.lt.s32.totalorder %v3359_v39, 88  ;;  %vm1592_vm14 = vcmp.lt.s32.totalorder %v3359_v39, 74  ;;  %vm1677_vm15 = vcmp.lt.s32.totalorder %v3359_v39, 73 }
  0x10   :  { %s3294_s18 = sld [smem:[#allocation2 + $0x65]] }
  0x11   :  { %396 = vrot.lane.b32.xlu1 %v3156_v3, %s3088_s20  ;;  %392 = vrot.lane.b32.xlu0 %v3161_v4, %s3088_s20  ;;  %s3297_s19 = sld [smem:[#allocation2 + $0xb0]]  ;;  %v449_v41 = vstv %s3282_s13 }
  0x12   :  { %400 = vrot.lane.b32.xlu2 %v3166_v5, %s3088_s20  ;;  %s3307_s2 = sld [smem:[#allocation2 + $0x1]]  ;;  %v454_v42 = vstv %s3284_s14 }
  0x13   :  { %s3309_s21 = sld [smem:[#allocation2 + $0x4c]]  ;;  %v459_v43 = vstv %s3286_s15 }
  0x14   :  { %s3311_s22 = sld [smem:[#allocation2 + $0x97]]  ;;  %v464_v44 = vstv %s3288_s16 }
  0x15   :  { %s3313_s23 = sld [smem:[#allocation2 + $0xe2]] }
  0x16   :  { %s3315_s24 = sld [smem:[#allocation2 + $0x34]] }
  0x17   :  { %s3321_s26 = sld [smem:[#allocation2 + $0x7f]] }
  0x18   :  { %s3325_s27 = sld [smem:[#allocation2 + $0xca]] }
  0x19   :  { %404 = vrot.lane.b32.xlu1 %v3174_v6, %s3088_s20  ;;  %402 = vrot.lane.b32.xlu0 %v3179_v7, %s3088_s20  ;;  %s3331_s28 = sld [smem:[#allocation2 + $0x115]] }
  0x1a   :  { %406 = vrot.lane.b32.xlu2 %v3184_v8, %s3088_s20  ;;  %s3303_s20 = sld [smem:[#allocation2 + $0xfb]] }
  0x1b   :  { %s3335_s29 = sld [smem:[#allocation2 + $0x1b]] }
  0x1c   :  { %s3337_s30 = sld [smem:[#allocation2 + $0x66]] }
  0x1d   :  { %s3339_s4 = sld [smem:[#allocation2]] }
  0x1e   :  { %s3341_s5 = sld [smem:[#allocation2 + $0x19]] }
  0x1f   :  { %s3343_s6 = sld [smem:[#allocation2 + $0x32]] }
  0x20   :  { %s3383_s3 = sld [smem:[#allocation2 + $0xc8]] }
  0x21   :  { %471 = vrot.lane.b32.xlu1 %v3161_v4, %s3089_s7  ;;  %469 = vrot.lane.b32.xlu0 %v3143_v1, %s3089_s7  ;;  %s3392_s13 = sld [smem:[#allocation2 + $0x113]] }
  0x22   :  { %473 = vrot.lane.b32.xlu2 %v3138_v0, %s3089_s7  ;;  %s3400_s14 = sld [smem:[#allocation2 + $0xb1]] }
  0x23   :  { %v338_v62 = vstv %s3339_s4  ;;  %s3426_s15 = sld [smem:[#allocation2 + $0x2]]  ;;  %s3096_s4 = smov 106  }
  0x24   :  { %v350_v63 = vstv %s3341_s5  ;;  %v3444_v48 = vmul.f32 %v338_v62, %v3143_v1  ;;  %s3448_s16 = sld [smem:[#allocation2 + $0x4d]] }
  0x25   :  { %v370_v47 = vstv %s3343_s6  ;;  %s3529_s5 = sld [smem:[#allocation2 + $0x98]] }
  0x26   :  { %s3548_s6 = sld [smem:[#allocation2 + $0xe3]] }
  0x29   :  { %477 = vrot.lane.b32.xlu1 %v3150_v2, %s3089_s7  ;;  %475 = vrot.lane.b32.xlu0 %v3156_v3, %s3089_s7 }
  0x2a   :  { %479 = vrot.lane.b32.xlu2 %v3166_v5, %s3089_s7 }
  0x31   :  { %483 = vrot.lane.b32.xlu1 %v3174_v6, %s3089_s7  ;;  %481 = vrot.lane.b32.xlu0 %v3179_v7, %s3089_s7 }
  0x32   :  { %485 = vrot.lane.b32.xlu2 %v3184_v8, %s3089_s7  ;;  %s3349_s7 = sld [smem:[#allocation2 + $0x4b]] }
  0x38   :  { %v341_v51 = vstv %s3349_s7  ;;  %s3562_s7 = sld [smem:[#allocation2 + $0x35]] }
  0x39   :  { %556 = vrot.lane.b32.xlu1 %v3161_v4, %s3090_s8  ;;  %554 = vrot.lane.b32.xlu0 %v3143_v1, %s3090_s8 }
  0x3a   :  { %558 = vrot.lane.b32.xlu2 %v3138_v0, %s3090_s8 }
  0x41   :  { %562 = vrot.lane.b32.xlu1 %v3150_v2, %s3090_s8  ;;  %560 = vrot.lane.b32.xlu0 %v3156_v3, %s3090_s8 }
  0x42   :  { %564 = vrot.lane.b32.xlu2 %v3166_v5, %s3090_s8 }
  0x49   :  { %568 = vrot.lane.b32.xlu1 %v3174_v6, %s3090_s8  ;;  %566 = vrot.lane.b32.xlu0 %v3179_v7, %s3090_s8 }
  0x4a   :  { %570 = vrot.lane.b32.xlu2 %v3184_v8, %s3090_s8  ;;  %s3353_s8 = sld [smem:[#allocation2 + $0x64]] }
  0x51   :  { %641 = vrot.lane.b32.xlu1 %v3161_v4, %s3091_s9  ;;  %639 = vrot.lane.b32.xlu0 %v3143_v1, %s3091_s9 }
  0x52   :  { %643 = vrot.lane.b32.xlu2 %v3138_v0, %s3091_s9 }
  0x59   :  { %647 = vrot.lane.b32.xlu1 %v3150_v2, %s3091_s9  ;;  %645 = vrot.lane.b32.xlu0 %v3156_v3, %s3091_s9 }
  0x5a   :  { %649 = vrot.lane.b32.xlu2 %v3166_v5, %s3091_s9 }
  0x61   :  { %653 = vrot.lane.b32.xlu1 %v3174_v6, %s3091_s9  ;;  %651 = vrot.lane.b32.xlu0 %v3179_v7, %s3091_s9 }
  0x62   :  { %655 = vrot.lane.b32.xlu2 %v3184_v8, %s3091_s9  ;;  %s3361_s9 = sld [smem:[#allocation2 + $0x7d]] }
  0x64   :  { %v3216_v9 = vpop.permute.xlu2 %398 }
  0x68   :  { %v375_v46 = vstv %s3361_s9  ;;  %s3590_s9 = sld [smem:[#allocation2 + $0xcb]] }
  0x69   :  { %726 = vrot.lane.b32.xlu1 %v3161_v4, %s3092_s10  ;;  %724 = vrot.lane.b32.xlu0 %v3143_v1, %s3092_s10 }
  0x6a   :  { %728 = vrot.lane.b32.xlu2 %v3138_v0, %s3092_s10 }
  0x6c   :  { %v3221_v10 = vpop.permute.xlu2 %400 }
  0x71   :  { %732 = vrot.lane.b32.xlu1 %v3150_v2, %s3092_s10  ;;  %730 = vrot.lane.b32.xlu0 %v3156_v3, %s3092_s10 }
  0x72   :  { %734 = vrot.lane.b32.xlu2 %v3166_v5, %s3092_s10 }
  0x74   :  { %v3226_v11 = vpop.permute.xlu2 %406 }
  0x75   :  { %v413_v45 = vsel %vm410_vm0, %v3221_v10, %v3226_v11  ;;  %v355_v11 = vstv %s3353_s8  ;;  %s3576_s8 = sld [smem:[#allocation2 + $0x80]] }
  0x76   :  { %v3406_v56 = vmul.f32 %v449_v41, %v413_v45  ;;  %v3415_v61 = vmul.f32 %v454_v42, %v413_v45  ;;  %v3424_v57 = vmul.f32 %v459_v43, %v413_v45  ;;  %v3430_v53 = vmul.f32 %v464_v44, %v413_v45 }
  0x78   :  { %6909 = vst [vmem:[#allocation22_spill] sm:$0xff] %v3415_v61 }
  0x79   :  { %738 = vrot.lane.b32.xlu1 %v3174_v6, %s3092_s10  ;;  %736 = vrot.lane.b32.xlu0 %v3179_v7, %s3092_s10  ;;  %6910 = vst [vmem:[#allocation23_spill] sm:$0xff] %v3424_v57  ;;  %v6924_v57 = vstv %s3309_s21 }
  0x7a   :  { %740 = vrot.lane.b32.xlu2 %v3184_v8, %s3092_s10  ;;  %s3365_s10 = sld [smem:[#allocation2 + $0xaf]]  ;;  %6911 = vst [vmem:[#allocation24_spill] sm:$0xff] %v3430_v53  ;;  %v6923_v53 = vstv %s3307_s2 }
  0x7b   :  { %v3231_v12 = vpop.permute.xlu1 %394  ;;  %v3233_v13 = vpop.permute.xlu0 %390 }
  0x7c   :  { %v3235_v14 = vpop.permute.xlu2 %473  ;;  %v416_v36 = vsel %vm410_vm0, %v3231_v12, %v3221_v10  ;;  %v3438_v10 = vmul.f32 %v350_v63, %v3161_v4  ;;  %v3441_v12 = vmul.f32 %v355_v11, %v3161_v4 }
  0x7d   :  { %v3446_v45 = vmul.f32 %v449_v41, %v416_v36  ;;  %v3461_v41 = vmul.f32 %v454_v42, %v416_v36 }
  0x80   :  { %v360_v59 = vstv %s3365_s10  ;;  %s3603_s10 = sld [smem:[#allocation2 + $0x116]] }
  0x81   :  { %811 = vrot.lane.b32.xlu1 %v3161_v4, %s3093_s11  ;;  %809 = vrot.lane.b32.xlu0 %v3143_v1, %s3093_s11  ;;  %v3451_v52 = vmul.f32 %v360_v59, %v3161_v4 }
  0x82   :  { %813 = vrot.lane.b32.xlu2 %v3138_v0, %s3093_s11 }
  0x83   :  { %v3240_v15 = vpop.permute.xlu1 %396  ;;  %v3242_v16 = vpop.permute.xlu0 %392 }
  0x84   :  { %v3244_v17 = vpop.permute.xlu2 %479 }
  0x89   :  { %817 = vrot.lane.b32.xlu1 %v3150_v2, %s3093_s11  ;;  %815 = vrot.lane.b32.xlu0 %v3156_v3, %s3093_s11 }
  0x8a   :  { %819 = vrot.lane.b32.xlu2 %v3166_v5, %s3093_s11 }
  0x8b   :  { %v3249_v18 = vpop.permute.xlu1 %404  ;;  %v3251_v19 = vpop.permute.xlu0 %402 }
  0x8c   :  { %v3253_v20 = vpop.permute.xlu2 %485 }
  0x91   :  { %823 = vrot.lane.b32.xlu1 %v3174_v6, %s3093_s11  ;;  %821 = vrot.lane.b32.xlu0 %v3179_v7, %s3093_s11 }
  0x92   :  { %825 = vrot.lane.b32.xlu2 %v3184_v8, %s3093_s11  ;;  %s3367_s11 = sld [smem:[#allocation2 + $0xfa]] }
  0x93   :  { %v3258_v21 = vpop.permute.xlu1 %471  ;;  %v3260_v22 = vpop.permute.xlu0 %469 }
  0x94   :  { %v3262_v23 = vpop.permute.xlu2 %558 }
  0x95   :  { %6891 = vst [vmem:[#allocation5_spill] sm:$0xff] %v3262_v23 }
  0x98   :  { %v365_v58 = vstv %s3367_s11  ;;  %s3826_s11 = sld [smem:[#allocation2 + $0x68]] }
  0x99   :  { %896 = vrot.lane.b32.xlu1 %v3161_v4, %s3094_s12  ;;  %894 = vrot.lane.b32.xlu0 %v3143_v1, %s3094_s12  ;;  %v3454_v49 = vmul.f32 %v365_v58, %v3161_v4 }
  0x9a   :  { %898 = vrot.lane.b32.xlu2 %v3138_v0, %s3094_s12 }
  0x9b   :  { %v3267_v24 = vpop.permute.xlu1 %477  ;;  %v3269_v25 = vpop.permute.xlu0 %475 }
  0x9c   :  { %v3271_v26 = vpop.permute.xlu2 %564 }
  0x9d   :  { %6892 = vst [vmem:[#allocation6_spill] sm:$0xff] %v3271_v26 }
  0xa1   :  { %902 = vrot.lane.b32.xlu1 %v3150_v2, %s3094_s12  ;;  %900 = vrot.lane.b32.xlu0 %v3156_v3, %s3094_s12 }
  0xa2   :  { %904 = vrot.lane.b32.xlu2 %v3166_v5, %s3094_s12 }
  0xa3   :  { %v3276_v27 = vpop.permute.xlu1 %483  ;;  %v3278_v28 = vpop.permute.xlu0 %481 }
  0xa4   :  { %6893 = vst [vmem:[#allocation7_spill] sm:$0xff] %v3276_v27  ;;  %v3280_v29 = vpop.permute.xlu2 %570  ;;  %v6921_v27 = vstv %s3297_s19 }
  0xa5   :  { %6894 = vst [vmem:[#allocation8_spill] sm:$0xff] %v3278_v28  ;;  %v6926_v28 = vstv %s3313_s23 }
  0xa6   :  { %6895 = vst [vmem:[#allocation9_spill] sm:$0xff] %v3280_v29  ;;  %v6920_v29 = vstv %s3294_s18 }
  0xa9   :  { %908 = vrot.lane.b32.xlu1 %v3174_v6, %s3094_s12  ;;  %906 = vrot.lane.b32.xlu0 %v3179_v7, %s3094_s12 }
  0xaa   :  { %910 = vrot.lane.b32.xlu2 %v3184_v8, %s3094_s12  ;;  %s3369_s12 = sld [smem:[#allocation2 + $0x96]] }
  0xab   :  { %v3299_v30 = vpop.permute.xlu1 %556  ;;  %v3301_v31 = vpop.permute.xlu0 %554 }
  0xac   :  { %6896 = vst [vmem:[#allocation10_spill] sm:$0xff] %v3299_v30  ;;  %v3305_v32 = vpop.permute.xlu2 %643  ;;  %v6919_v30 = vstv %s3290_s17 }
  0xad   :  { %6897 = vst [vmem:[#allocation11_spill] sm:$0xff] %v3301_v31  ;;  %v352_v31 = vmul.f32 %v350_v63, %v3150_v2  ;;  %v6942_v63 = vstv %s3307_s2  ;;  %s3692_s2 = sld [smem:[#allocation2 + $0x4e]] }
  0xae   :  { %6898 = vst [vmem:[#allocation12_spill] sm:$0xff] %v3305_v32 }
  0xb0   :  { %v344_v50 = vstv %s3369_s12  ;;  %s3840_s12 = sld [smem:[#allocation2 + $0xb3]] }
  0xb1   :  { %981 = vrot.lane.b32.xlu1 %v3161_v4, %s6868_s25  ;;  %979 = vrot.lane.b32.xlu0 %v3143_v1, %s6868_s25 }
  0xb2   :  { %983 = vrot.lane.b32.xlu2 %v3138_v0, %s6868_s25 }
  0xb3   :  { %v3327_v33 = vpop.permute.xlu1 %562  ;;  %v3329_v34 = vpop.permute.xlu0 %560 }
  0xb4   :  { %6899 = vst [vmem:[#allocation13_spill] sm:$0xff] %v3327_v33  ;;  %v3333_v35 = vpop.permute.xlu2 %649 }
  0xb5   :  { %6900 = vst [vmem:[#allocation14_spill] sm:$0xff] %v3329_v34  ;;  %v362_v34 = vmul.f32 %v360_v59, %v3150_v2 }
  0xb6   :  { %6901 = vst [vmem:[#allocation15_spill] sm:$0xff] %v3333_v35  ;;  %v3494_v35 = vmul.f32 %v375_v46, %v3138_v0 }
  0xb9   :  { %987 = vrot.lane.b32.xlu1 %v3150_v2, %s6868_s25  ;;  %985 = vrot.lane.b32.xlu0 %v3156_v3, %s6868_s25 }
  0xba   :  { %989 = vrot.lane.b32.xlu2 %v3166_v5, %s6868_s25  ;;  %s3375_s25 = sld [smem:[#allocation2 + $0xe1]] }
  0xbb   :  { %v3355_v37 = vpop.permute.xlu1 %568  ;;  %v3357_v38 = vpop.permute.xlu0 %566 }
  0xbc   :  { %6902 = vst [vmem:[#allocation16_spill] sm:$0xff] %v3355_v37  ;;  %v3363_v40 = vpop.permute.xlu2 %655 }
  0xbd   :  { %6903 = vst [vmem:[#allocation17_spill] sm:$0xff] %v3357_v38 }
  0xbe   :  { %6904 = vst [vmem:[#allocation18_spill] sm:$0xff] %v3363_v40  ;;  %v3470_v40 = vmul.f32 %v464_v44, %v416_v36 }
  0xc0   :  { %6913 = vst [vmem:[#allocation26_spill] sm:$0xff] %v3470_v40 }
  0xc1   :  { %993 = vrot.lane.b32.xlu1 %v3174_v6, %s6905_s1  ;;  %991 = vrot.lane.b32.xlu0 %v3179_v7, %s6905_s1 }
  0xc2   :  { %995 = vrot.lane.b32.xlu2 %v3184_v8, %s6905_s1  ;;  %s3411_s1 = sld [smem:[#allocation2 + $0xfc]] }
  0xc3   :  { %v3402_v54 = vpop.permute.xlu1 %641  ;;  %v3404_v55 = vpop.permute.xlu0 %639 }
  0xc4   :  { %6906 = vst [vmem:[#allocation19_spill] sm:$0xff] %v3402_v54  ;;  %v3413_v60 = vpop.permute.xlu2 %728  ;;  %v415_v54 = vsel %vm410_vm0, %v3242_v16, %v3216_v9  ;;  %v6917_v16 = vstv %s3383_s3 }
  0xc5   :  { %6907 = vst [vmem:[#allocation20_spill] sm:$0xff] %v3404_v55  ;;  %v3468_v55 = vmul.f32 %v459_v43, %v416_v36  ;;  %v3485_v43 = vmul.f32 %v370_v47, %v3138_v0  ;;  %v414_v36 = vsel %vm410_vm0, %v3233_v13, %v3240_v15  ;;  %v3499_v38 = vmul.f32 %v6917_v16, %v3138_v0 }
  0xc6   :  { %6908 = vst [vmem:[#allocation21_spill] sm:$0xff] %v3413_v60  ;;  %v6918_v60 = vstv %s3392_s13  ;;  %v346_v13 = vmul.f32 %v344_v50, %v3156_v3  ;;  %v430_v33 = vmul.f32 %v6919_v30, %v415_v54  ;;  %v357_v16 = vmul.f32 %v355_v11, %v3150_v2 }
  0xc7   :  { %6912 = vst [vmem:[#allocation25_spill] sm:$0xff] %v3468_v55  ;;  %v3504_v32 = vmul.f32 %v6918_v60, %v3138_v0  ;;  %v435_v60 = vmul.f32 %v6920_v29, %v415_v54  ;;  %v440_v23 = vmul.f32 %v6921_v27, %v415_v54  ;;  %v418_v40 = vmul.f32 %v6923_v53, %v414_v36 }
  0xc8   :  { %v421_v55 = vmul.f32 %v6924_v57, %v414_v36  ;;  %v427_v30 = vmul.f32 %v6926_v28, %v414_v36  ;;  %v6927_v27 = vstv %s3375_s25  ;;  %v367_v53 = vmul.f32 %v365_v58, %v3150_v2  ;;  %s3780_s25 = sld [smem:[#allocation2 + $0x81]] }
  0xc9   :  { %1066 = vrot.lane.b32.xlu1 %v3161_v4, %s3096_s4  ;;  %1064 = vrot.lane.b32.xlu0 %v3143_v1, %s3096_s4  ;;  %v349_v29 = vmul.f32 %v6927_v27, %v3156_v3  ;;  %v345_v57 = vmul.f32 %v344_v50, %v3143_v1  ;;  %v493_v28 = vsel %vm487_vm1, %v3235_v14, %v3244_v17 }
  0xca   :  { %1068 = vrot.lane.b32.xlu2 %v3138_v0, %s3096_s4  ;;  %v372_v11 = vmul.f32 %v370_v47, %v3166_v5  ;;  %v377_v58 = vmul.f32 %v375_v46, %v3166_v5  ;;  %v3560_v14 = vadd.f32 %v430_v33, %v418_v40  ;;  %v364_v47 = vadd.f32 %v362_v34, %v346_v13 }
  0xcb   :  { %v3474_v37 = vpop.permute.xlu1 %647  ;;  %v3476_v42 = vpop.permute.xlu0 %645  ;;  %v6931_v33 = vstv %s3315_s24 }
  0xcc   :  { %6914 = vst [vmem:[#allocation27_spill] sm:$0xff] %v3474_v37  ;;  %v3487_v44 = vpop.permute.xlu2 %734  ;;  %v343_v37 = vmul.f32 %v341_v51, %v3156_v3  ;;  %v3580_v34 = vmul.f32 %v6931_v33, %v493_v28 }
  0xcd   :  { %6915 = vst [vmem:[#allocation28_spill] sm:$0xff] %v3476_v42  ;;  %v6925_v42 = vstv %s3311_s22 }
  0xce   :  { %6916 = vst [vmem:[#allocation29_spill] sm:$0xff] %v3487_v44  ;;  %v340_v44 = vmul.f32 %v338_v62, %v3156_v3  ;;  %v6922_v62 = vstv %s3303_s20  ;;  %v424_v61 = vmul.f32 %v6925_v42, %v414_v36  ;;  %v412_v42 = vsel %vm410_vm0, %v3216_v9, %v3249_v18 }
  0xcf   :  { %v445_v26 = vmul.f32 %v6922_v62, %v415_v54  ;;  %v342_v54 = vmul.f32 %v341_v51, %v3143_v1  ;;  %v411_v18 = vsel %vm410_vm0, %v3240_v15, %v3251_v19  ;;  %v6936_v19 = vstv %s3383_s3  ;;  %s3613_s3 = sld [smem:[#allocation2 + $0x1c]] }
  0xd0   :  { %v354_v59 = vadd.f32 %v352_v31, %v340_v44  ;;  %v359_v31 = vadd.f32 %v357_v16, %v343_v37  ;;  %v3566_v44 = vadd.f32 %v435_v60, %v421_v55  ;;  %v3568_v36 = vadd.f32 %v440_v23, %v424_v61 }
  0xd1   :  { %1072 = vrot.lane.b32.xlu1 %v3150_v2, %s3096_s4  ;;  %1070 = vrot.lane.b32.xlu0 %v3156_v3, %s3096_s4  ;;  %v3570_v9 = vadd.f32 %v445_v26, %v427_v30  ;;  %v6932_v37 = vstv %s3321_s26  ;;  %v6933_v23 = vstv %s3325_s27  ;;  %v369_v55 = vadd.f32 %v367_v53, %v349_v29 }
  0xd2   :  { %1074 = vrot.lane.b32.xlu2 %v3166_v5, %s3096_s4  ;;  %v3584_v40 = vmul.f32 %v6932_v37, %v493_v28  ;;  %v3588_v26 = vmul.f32 %v6933_v23, %v493_v28  ;;  %v6935_v61 = vstv %s3290_s17  ;;  %v382_v13 = vmul.f32 %v6936_v19, %v3166_v5  ;;  %s3622_s17 = sld [smem:[#allocation2 + $0x67]] }
  0xd3   :  { %v3552_v51 = vpop.permute.xlu1 %653  ;;  %v3554_v50 = vpop.permute.xlu0 %651  ;;  %v431_v15 = vmul.f32 %v6935_v61, %v412_v42  ;;  %v6937_v16 = vstv %s3392_s13  ;;  %v6938_v62 = vmov %v6927_v27  ;;  %v6939_v27 = vstv %s3294_s18  ;;  %s3640_s18 = sld [smem:[#allocation2 + $0xb2]] }
  0xd4   :  { %6928 = vst [vmem:[#allocation30_spill] sm:$0xff] %v3552_v51  ;;  %v3564_v46 = vpop.permute.xlu2 %740  ;;  %v387_v60 = vmul.f32 %v6937_v16, %v3166_v5  ;;  %v348_v30 = vmul.f32 %v6938_v62, %v3143_v1  ;;  %v436_v33 = vmul.f32 %v6939_v27, %v412_v42  ;;  %v6940_v37 = vstv %s3297_s19  ;;  %s3649_s19 = sld [smem:[#allocation2 + $0xfd]] }
  0xd5   :  { %6929 = vst [vmem:[#allocation31_spill] sm:$0xff] %v3554_v50  ;;  %v441_v29 = vmul.f32 %v6940_v37, %v412_v42  ;;  %v6941_v53 = vstv %s3303_s20  ;;  %v419_v61 = vmul.f32 %v6942_v63, %v411_v18  ;;  %v6943_v19 = vstv %s3309_s21  ;;  %s3686_s20 = sld [smem:[#allocation2 + $0x3]] }
  0xd6   :  { %6930 = vst [vmem:[#allocation32_spill] sm:$0xff] %v3564_v46  ;;  %v446_v23 = vmul.f32 %v6941_v53, %v412_v42  ;;  %v422_v46 = vmul.f32 %v6943_v19, %v411_v18  ;;  %v6944_v51 = vstv %s3311_s22  ;;  %v6945_v50 = vstv %s3313_s23  ;;  %s3696_s21 = sld [smem:[#allocation2 + $0x99]]  ;;  %s3097_s22 = smov 92  }
  0xd7   :  { %6934 = vst [vmem:[#allocation33_spill] sm:$0xff] %v3588_v26  ;;  %v425_v16 = vmul.f32 %v6944_v51, %v411_v18  ;;  %v428_v26 = vmul.f32 %v6945_v50, %v411_v18  ;;  %v504_v62 = vstv %s3529_s5  ;;  %v6946_v42 = vstv %s3331_s28  ;;  %s3738_s23 = sld [smem:[#allocation2 + $0xe4]] }
  0xd8   :  { %v3630_v27 = vmul.f32 %v6946_v42, %v493_v28  ;;  %v490_v63 = vsel %vm487_vm1, %v3244_v17, %v3253_v20  ;;  %v3636_v51 = vadd.f32 %v372_v11, %v354_v59  ;;  %v3638_v50 = vadd.f32 %v377_v58, %v359_v31  ;;  %s3814_s28 = sld [smem:[#allocation2 + $0x1d]] }
  0xd9   :  { %1078 = vrot.lane.b32.xlu1 %v3174_v6, %s3096_s4  ;;  %1076 = vrot.lane.b32.xlu0 %v3179_v7, %s3096_s4  ;;  %v509_v18 = vstv %s3548_s6  ;;  %v353_v28 = vadd.f32 %v3438_v10, %v3444_v48  ;;  %v358_v37 = vadd.f32 %v3441_v12, %v342_v54  ;;  %v363_v17 = vadd.f32 %v3451_v52, %v345_v57  ;;  %s3883_s13 = sld [smem:[#allocation2 + $0x4f]] }
  0xda   :  { %1080 = vrot.lane.b32.xlu2 %v3184_v8, %s3096_s4  ;;  %v433_v11 = vadd.f32 %v431_v15, %v419_v61  ;;  %v3655_v58 = vadd.f32 %v382_v13, %v364_v47  ;;  %v3657_v31 = vadd.f32 %v387_v60, %v369_v55  ;;  %v368_v53 = vadd.f32 %v3454_v49, %v348_v30  ;;  %s3098_s4 = smov 91   ;;  %s3975_s5 = sld [smem:[#allocation2 + $0xcd]] }
  0xdb   :  { %v3651_v20 = vpop.permute.xlu1 %726  ;;  %v3653_v59 = vpop.permute.xlu0 %724  ;;  %v438_v10 = vadd.f32 %v436_v33, %v422_v46  ;;  %v443_v52 = vadd.f32 %v441_v29, %v425_v16  ;;  %v448_v12 = vadd.f32 %v446_v23, %v428_v26  ;;  %v6947_v54 = vstv %s3315_s24  ;;  %s3773_s24 = sld [smem:[#allocation2 + $0x36]] }
  0xdc   :  { %v3660_v48 = vpop.permute.xlu2 %813  ;;  %v3664_v57 = vmul.f32 %v6947_v54, %v490_v63  ;;  %v6948_v19 = vstv %s3321_s26  ;;  %v6949_v55 = vstv %s3325_s27  ;;  %v6950_v49 = vmov %v6946_v42  ;;  %v6953_v54 = vld [vmem:[#allocation8_spill] sm:$0xff]  ;;  %s3790_s26 = sld [smem:[#allocation2 + $0xcc]] }
  0xdd   :  { %v3668_v47 = vmul.f32 %v6948_v19, %v490_v63  ;;  %v3672_v15 = vmul.f32 %v6949_v55, %v490_v63  ;;  %v3676_v13 = vmul.f32 %v6950_v49, %v490_v63  ;;  %v491_v46 = vsel %vm487_vm1, %v3260_v22, %v3269_v25  ;;  %v6954_v55 = vld [vmem:[#allocation22_spill] sm:$0xff]  ;;  %v6962_v22 = vld [vmem:[#allocation5_spill] sm:$0xff]  ;;  %s3804_s27 = sld [smem:[#allocation2 + $0x117]] }
  0xde   :  { %v373_v26 = vadd.f32 %v3485_v43, %v353_v28  ;;  %v378_v60 = vadd.f32 %v3494_v35, %v358_v37  ;;  %v383_v30 = vadd.f32 %v3499_v38, %v363_v17  ;;  %v388_v33 = vadd.f32 %v3504_v32, %v368_v53  ;;  %v6957_v37 = vld [vmem:[#allocation23_spill] sm:$0xff]  ;;  %s3992_s6 = sld [smem:[#allocation2 + $0x118]] }
  0xdf   :  { %v3700_v35 = vadd.f32 %v3446_v45, %v3560_v14  ;;  %v3703_v32 = vadd.f32 %v3406_v56, %v433_v11  ;;  %v492_v38 = vsel %vm487_vm1, %v3258_v21, %v3267_v24  ;;  %v6951_v16 = vstv %s3426_s15 }
  0xe0   :  { %v495_v42 = vmul.f32 %v6951_v16, %v491_v46  ;;  %v6952_v45 = vstv %s3448_s16  ;;  %v505_v56 = vmul.f32 %v504_v62, %v491_v46  ;;  %v3726_v17 = vadd.f32 %v3461_v41, %v3566_v44  ;;  %v6955_v41 = vld [vmem:[#allocation25_spill] sm:$0xff] }
  0xe1   :  { %1151 = vrot.lane.b32.xlu1 %v3161_v4, %s3097_s22  ;;  %1149 = vrot.lane.b32.xlu0 %v3143_v1, %s3097_s22  ;;  %v500_v14 = vmul.f32 %v6952_v45, %v491_v46  ;;  %v510_v53 = vmul.f32 %v509_v18, %v491_v46  ;;  %v488_v19 = vsel %vm487_vm1, %v3269_v25, %v6953_v54  ;;  %v6956_v46 = vstv %s3335_s29  ;;  %v6958_v25 = vld [vmem:[#allocation26_spill] sm:$0xff] }
  0xe2   :  { %1153 = vrot.lane.b32.xlu2 %v3138_v0, %s3097_s22  ;;  %v3741_v49 = vadd.f32 %v6954_v55, %v438_v10  ;;  %v3745_v44 = vadd.f32 %v6955_v41, %v3568_v36  ;;  %v515_v45 = vmul.f32 %v6956_v46, %v492_v38  ;;  %v3752_v28 = vadd.f32 %v6957_v37, %v443_v52  ;;  %v6959_v10 = vld [vmem:[#allocation24_spill] sm:$0xff]  ;;  %v6961_v46 = vld [vmem:[#allocation6_spill] sm:$0xff] }
  0xe3   :  { %v3728_v11 = vpop.permute.xlu1 %732  ;;  %v3730_v21 = vpop.permute.xlu0 %730  ;;  %v3756_v54 = vadd.f32 %v6958_v25, %v3570_v9  ;;  %v3759_v55 = vadd.f32 %v6959_v10, %v448_v12  ;;  %v6960_v63 = vstv %s3337_s30  ;;  %v497_v41 = vadd.f32 %v495_v42, %v373_v26 }
  0xe4   :  { %v3747_v16 = vpop.permute.xlu2 %819  ;;  %v520_v36 = vmul.f32 %v6960_v63, %v492_v38  ;;  %v502_v43 = vadd.f32 %v500_v14, %v378_v60  ;;  %v578_v52 = vsel %vm572_vm2, %v6962_v22, %v6961_v46  ;;  %v6963_v37 = vstv %s3400_s14 }
  0xe5   :  { %v525_v61 = vmul.f32 %v6963_v37, %v492_v38  ;;  %v6964_v9 = vstv %s3426_s15  ;;  %v6965_v23 = vstv %s3448_s16  ;;  %v507_v12 = vadd.f32 %v505_v56, %v383_v30  ;;  %s3958_s15 = sld [smem:[#allocation2 + $0x37]] }
  0xe6   :  { %v496_v25 = vmul.f32 %v6964_v9, %v488_v19  ;;  %v501_v29 = vmul.f32 %v6965_v23, %v488_v19  ;;  %v6966_v10 = vstv %s3411_s1  ;;  %v506_v26 = vmul.f32 %v504_v62, %v488_v19  ;;  %v6968_v62 = vld [vmem:[#allocation7_spill] sm:$0xff]  ;;  %v6974_v23 = vld [vmem:[#allocation9_spill] sm:$0xff]  ;;  %s3967_s16 = sld [smem:[#allocation2 + $0x82]] }
  0xe7   :  { %v530_v63 = vmul.f32 %v6966_v10, %v492_v38  ;;  %v512_v60 = vadd.f32 %v510_v53, %v388_v33  ;;  %v6880_v42 = vstv %s3686_s20  ;;  %v511_v22 = vmul.f32 %v509_v18, %v488_v19 }
  0xe8   :  { %v6967_v14 = vstv %s3562_s7  ;;  %v6879_v9 = vstv %s3692_s2  ;;  %v489_v18 = vsel %vm487_vm1, %v3267_v24, %v6968_v62  ;;  %v517_v30 = vadd.f32 %v515_v45, %v497_v41 }
  0xe9   :  { %v3786_v37 = vmul.f32 %v6967_v14, %v578_v52  ;;  %1157 = vrot.lane.b32.xlu1 %v3150_v2, %s3097_s22  ;;  %1155 = vrot.lane.b32.xlu0 %v3156_v3, %s3097_s22  ;;  %v522_v33 = vadd.f32 %v520_v36, %v502_v43  ;;  %v6969_v38 = vstv %s3576_s8  ;;  %v498_v53 = vadd.f32 %v496_v25, %v3636_v51 }
  0xea   :  { %v3802_v56 = vmul.f32 %v6969_v38, %v578_v52  ;;  %1159 = vrot.lane.b32.xlu2 %v3166_v5, %s3097_s22  ;;  %v503_v19 = vadd.f32 %v501_v29, %v3638_v50  ;;  %v527_v10 = vadd.f32 %v525_v61, %v507_v12  ;;  %v6970_v14 = vstv %s3590_s9 }
  0xeb   :  { %v3812_v24 = vmul.f32 %v6970_v14, %v578_v52  ;;  %v3816_v43 = vpop.permute.xlu1 %738  ;;  %v3818_v45 = vpop.permute.xlu0 %736  ;;  %v508_v36 = vadd.f32 %v506_v26, %v3655_v58  ;;  %v532_v41 = vadd.f32 %v530_v63, %v512_v60  ;;  %v6971_v62 = vstv %s3603_s10 }
  0xec   :  { %v3823_v38 = vmul.f32 %v6971_v62, %v578_v52  ;;  %v6878_v51 = vstv %s3738_s23  ;;  %v3828_v50 = vpop.permute.xlu2 %825  ;;  %v6972_v29 = vstv %s3335_s29  ;;  %v6973_v25 = vstv %s3337_s30  ;;  %s3846_s29 = sld [smem:[#allocation2 + $0xfe]]  ;;  %v6977_v62 = vld [vmem:[#allocation14_spill] sm:$0xff] }
  0xed   :  { %v516_v61 = vmul.f32 %v6972_v29, %v489_v18  ;;  %v521_v12 = vmul.f32 %v6973_v25, %v489_v18  ;;  %v513_v14 = vadd.f32 %v511_v22, %v3657_v31  ;;  %v575_v58 = vsel %vm572_vm2, %v6961_v46, %v6974_v23  ;;  %v6978_v29 = vld [vmem:[#allocation11_spill] sm:$0xff]  ;;  %s3869_s30 = sld [smem:[#allocation2 + $0x4]] }
  0xee   :  { %v6975_v52 = vstv %s3400_s14  ;;  %v6976_v26 = vstv %s3411_s1  ;;  %v3849_v31 = vadd.f32 %v3580_v34, %v517_v30  ;;  %v3852_v22 = vadd.f32 %v3584_v40, %v522_v33  ;;  %s3895_s14 = sld [smem:[#allocation2 + $0x9a]] }
  0xef   :  { %v526_v63 = vmul.f32 %v6975_v52, %v489_v18  ;;  %v531_v60 = vmul.f32 %v6976_v26, %v489_v18  ;;  %v518_v46 = vadd.f32 %v516_v61, %v498_v53  ;;  %v523_v23 = vadd.f32 %v521_v12, %v503_v19  ;;  %v6979_v52 = vld [vmem:[#allocation33_spill] sm:$0xff]  ;;  %s3922_s1 = sld [smem:[#allocation2 + $0xe5]] }
  0xf0   :  { %v576_v25 = vsel %vm572_vm2, %v6978_v29, %v6977_v62  ;;  %v3859_v18 = vadd.f32 %v6979_v52, %v527_v10  ;;  %v6980_v34 = vstv %s3562_s7  ;;  %v6981_v40 = vstv %s3576_s8  ;;  %s4001_s7 = sld [smem:[#allocation2 + $0x1e]] }
  0xf1   :  { %v528_v26 = vadd.f32 %v526_v63, %v508_v36  ;;  %v3863_v30 = vmul.f32 %v6980_v34, %v575_v58  ;;  %v3867_v33 = vmul.f32 %v6981_v40, %v575_v58  ;;  %v3872_v53 = vadd.f32 %v3630_v27, %v532_v41  ;;  %1163 = vrot.lane.b32.xlu1 %v3174_v6, %s3097_s22  ;;  %v6988_v63 = vld [vmem:[#allocation17_spill] sm:$0xff]  ;;  %s4012_s8 = sld [smem:[#allocation2 + $0x69]] }
  0xf2   :  { %v533_v19 = vadd.f32 %v531_v60, %v513_v14  ;;  %v6982_v61 = vstv %s3590_s9  ;;  %v6983_v10 = vstv %s3603_s10  ;;  %1161 = vrot.lane.b32.xlu0 %v3179_v7, %s3097_s22  ;;  %v580_v27 = vmul.f32 %v6880_v42, %v576_v25  ;;  %1165 = vrot.lane.b32.xlu2 %v3184_v8, %s3097_s22  ;;  %v6985_v60 = vld [vmem:[#allocation10_spill] sm:$0xff]  ;;  %s4020_s9 = sld [smem:[#allocation2 + $0xb4]] }
  0xf3   :  { %v3876_v12 = vmul.f32 %v6982_v61, %v575_v58  ;;  %v3880_v29 = vmul.f32 %v6983_v10, %v575_v58  ;;  %v585_v41 = vmul.f32 %v6879_v9, %v576_v25  ;;  %v6984_v58 = vld [vmem:[#allocation13_spill] sm:$0xff]  ;;  %v3905_v52 = vadd.f32 %v3664_v57, %v518_v46  ;;  %v3910_v40 = vpop.permute.xlu1 %811  ;;  %v3912_v61 = vpop.permute.xlu0 %809  ;;  %s4044_s10 = sld [smem:[#allocation2 + $0xff]] }
  0xf4   :  { %v577_v6 = vsel %vm572_vm2, %v6985_v60, %v6984_v58  ;;  %v3908_v34 = vadd.f32 %v3668_v47, %v523_v23  ;;  %6986 = vst [vmem:[#allocation8_spill] sm:$0xff] %v3910_v40  ;;  %v6987_v8 = vstv %s3696_s21  ;;  %v595_v60 = vmul.f32 %v6878_v51, %v576_v25  ;;  %v3927_v46 = vpop.permute.xlu2 %898  ;;  %v6995_v40 = vld [vmem:[#allocation16_spill] sm:$0xff]  ;;  %s4267_s22 = sld [smem:[#allocation2 + $0x51]] }
  0xf5   :  { %v590_v10 = vmul.f32 %v6987_v8, %v576_v25  ;;  %v573_v57 = vsel %vm572_vm2, %v6977_v62, %v6988_v63  ;;  %v3925_v47 = vadd.f32 %v3672_v15, %v528_v26  ;;  %6989 = vst [vmem:[#allocation22_spill] sm:$0xff] %v3927_v46  ;;  %v3933_v25 = vadd.f32 %v3676_v13, %v533_v19  ;;  %v6996_v19 = vld [vmem:[#allocation15_spill] sm:$0xff]  ;;  %v7005_v15 = vld [vmem:[#allocation18_spill] sm:$0xff] }
  0xf6   :  { %v6990_v14 = vstv %s3613_s3  ;;  %v582_v62 = vadd.f32 %v580_v27, %v3700_v35  ;;  %v587_v63 = vadd.f32 %v585_v41, %v3726_v17  ;;  %v6991_v26 = vstv %s3622_s17  ;;  %v6997_v27 = vld [vmem:[#allocation12_spill] sm:$0xff] }
  0xf7   :  { %v600_v36 = vmul.f32 %v6990_v14, %v577_v6  ;;  %v605_v51 = vmul.f32 %v6991_v26, %v577_v6  ;;  %v6992_v9 = vstv %s3640_s18  ;;  %v6993_v7 = vstv %s3649_s19 }
  0xf8   :  { %v610_v23 = vmul.f32 %v6992_v9, %v577_v6  ;;  %v615_v42 = vmul.f32 %v6993_v7, %v577_v6  ;;  %v6994_v8 = vstv %s3686_s20  ;;  %v574_v13 = vsel %vm572_vm2, %v6984_v58, %v6995_v40  ;;  %s4139_s20 = sld [smem:[#allocation2 + $0x38]] }
  0xf9   :  { %v581_v46 = vmul.f32 %v6994_v8, %v573_v57  ;;  %v592_v35 = vadd.f32 %v590_v10, %v3745_v44  ;;  %v597_v17 = vadd.f32 %v595_v60, %v3756_v54  ;;  %v663_v9 = vsel %vm657_vm3, %v6997_v27, %v6996_v19  ;;  %1236 = vrot.lane.b32.xlu1 %v3161_v4, %s3098_s4 }
  0xfa   :  { %v6998_v41 = vstv %s3692_s2  ;;  %v6999_v6 = vstv %s3696_s21  ;;  %v7000_v8 = vstv %s3738_s23  ;;  %v664_v40 = vstv %s3869_s30  ;;  %s4191_s30 = sld [smem:[#allocation2 + $0x119]] }
  0xfb   :  { %v586_v14 = vmul.f32 %v6998_v41, %v573_v57  ;;  %v591_v7 = vmul.f32 %v6999_v6, %v573_v57  ;;  %v596_v58 = vmul.f32 %v7000_v8, %v573_v57  ;;  %1234 = vrot.lane.b32.xlu0 %v3143_v1, %s3098_s4  ;;  %v602_v44 = vadd.f32 %v600_v36, %v582_v62  ;;  %v3996_v36 = vpop.permute.xlu0 %815  ;;  %s4413_s21 = sld [smem:[#allocation2 + $0x20]] }
  0xfc   :  { %v607_v54 = vadd.f32 %v605_v51, %v587_v63  ;;  %v6883_v10 = vstv %s3883_s13  ;;  %v6882_v60 = vstv %s3895_s14  ;;  %1238 = vrot.lane.b32.xlu2 %v3138_v0, %s3098_s4  ;;  %v583_v57 = vadd.f32 %v581_v46, %v3703_v32  ;;  %v3994_v51 = vpop.permute.xlu1 %817  ;;  %v4003_v8 = vpop.permute.xlu2 %904  ;;  %s4426_s23 = sld [smem:[#allocation2 + $0x6b]] }
  0xfd   :  { %v7001_v26 = vstv %s3773_s24  ;;  %v7002_v41 = vstv %s3780_s25  ;;  %v7003_v6 = vstv %s3790_s26  ;;  %v7004_v0 = vstv %s3613_s3  ;;  %s4053_s3 = sld [smem:[#allocation2 + $0x5]] }
  0xfe   :  { %v3982_v27 = vmul.f32 %v7001_v26, %v663_v9  ;;  %v3986_v4 = vmul.f32 %v7002_v41, %v663_v9  ;;  %v3990_v1 = vmul.f32 %v7003_v6, %v663_v9  ;;  %v601_v62 = vmul.f32 %v7004_v0, %v574_v13  ;;  %s4779_s2 = sld [smem:[#allocation2 + $0x6d]] }
  0xff   :  { %v612_v32 = vadd.f32 %v610_v23, %v592_v35  ;;  %v617_v46 = vadd.f32 %v615_v42, %v597_v17  ;;  %v6881_v63 = vstv %s3922_s1  ;;  %v588_v26 = vadd.f32 %v586_v14, %v3741_v49 }
 0x100   :  { %v593_v41 = vadd.f32 %v591_v7, %v3752_v28  ;;  %v598_v6 = vadd.f32 %v596_v58, %v3759_v55  ;;  %v660_v23 = vsel %vm657_vm3, %v6996_v19, %v7005_v15  ;;  %v7006_v42 = vstv %s3622_s17  ;;  %v7010_v58 = vld [vmem:[#allocation28_spill] sm:$0xff]  ;;  %s4070_s17 = sld [smem:[#allocation2 + $0x50]] }
 0x101   :  { %v606_v35 = vmul.f32 %v7006_v42, %v574_v13  ;;  %v7007_v17 = vstv %s3804_s27  ;;  %v4023_v49 = vadd.f32 %v3786_v37, %v602_v44  ;;  %v4026_v28 = vadd.f32 %v3802_v56, %v607_v54  ;;  %v7011_v42 = vld [vmem:[#allocation20_spill] sm:$0xff]  ;;  %1242 = vrot.lane.b32.xlu1 %v3150_v2, %s3098_s4 }
 0x102   :  { %v4018_v0 = vmul.f32 %v7007_v17, %v663_v9  ;;  %v7008_v55 = vstv %s3640_s18  ;;  %v7009_v7 = vstv %s3649_s19  ;;  %v603_v19 = vadd.f32 %v601_v62, %v583_v57  ;;  %s4077_s18 = sld [smem:[#allocation2 + $0x9b]] }
 0x103   :  { %v611_v14 = vmul.f32 %v7008_v55, %v574_v13  ;;  %v616_v15 = vmul.f32 %v7009_v7, %v574_v13  ;;  %v661_v9 = vsel %vm657_vm3, %v7011_v42, %v7010_v58  ;;  %v7012_v17 = vstv %s3773_s24  ;;  %1240 = vrot.lane.b32.xlu0 %v3156_v3, %s3098_s4  ;;  %v7017_v7 = vld [vmem:[#allocation27_spill] sm:$0xff]  ;;  %s4099_s19 = sld [smem:[#allocation2 + $0xe6]] }
 0x104   :  { %v4038_v37 = vmul.f32 %v7012_v17, %v660_v23  ;;  %v7013_v44 = vstv %s3780_s25  ;;  %v4047_v13 = vadd.f32 %v3812_v24, %v612_v32  ;;  %v4050_v54 = vadd.f32 %v3823_v38, %v617_v46  ;;  %1244 = vrot.lane.b32.xlu2 %v3166_v5, %s3098_s4  ;;  %v7020_v3 = vld [vmem:[#allocation31_spill] sm:$0xff]  ;;  %s4159_s24 = sld [smem:[#allocation2 + $0x83]] }
 0x105   :  { %v4042_v56 = vmul.f32 %v7013_v44, %v660_v23  ;;  %v608_v57 = vadd.f32 %v606_v35, %v588_v26  ;;  %v613_v62 = vadd.f32 %v611_v14, %v593_v41  ;;  %v618_v55 = vadd.f32 %v616_v15, %v598_v6  ;;  %v4084_v14 = vpop.permute.xlu0 %821  ;;  %v7018_v15 = vld [vmem:[#allocation19_spill] sm:$0xff]  ;;  %s4589_s25 = sld [smem:[#allocation2 + $0x21]] }
 0x106   :  { %v7014_v24 = vstv %s3790_s26  ;;  %v7015_v38 = vstv %s3804_s27  ;;  %v665_v26 = vmul.f32 %v664_v40, %v661_v9  ;;  %v4080_v35 = vadd.f32 %v3863_v30, %v603_v19  ;;  %v4096_v19 = vpop.permute.xlu2 %910  ;;  %s4181_s27 = sld [smem:[#allocation2 + $0xce]] }
 0x107   :  { %v4061_v32 = vmul.f32 %v7014_v24, %v660_v23  ;;  %v4065_v46 = vmul.f32 %v7015_v38, %v660_v23  ;;  %v4082_v23 = vpop.permute.xlu1 %823  ;;  %v662_v5 = vsel %vm657_vm3, %v7018_v15, %v7017_v7  ;;  %v670_v42 = vmul.f32 %v6883_v10, %v661_v9  ;;  %7019 = vst [vmem:[#allocation23_spill] sm:$0xff] %v4096_v19  ;;  %s4743_s26 = sld [smem:[#allocation2 + $0x86]] }
 0x108   :  { %7016 = vst [vmem:[#allocation25_spill] sm:$0xff] %v4082_v23  ;;  %v675_v17 = vmul.f32 %v6882_v60, %v661_v9  ;;  %v680_v30 = vmul.f32 %v6881_v63, %v661_v9  ;;  %v4102_v24 = vadd.f32 %v3867_v33, %v608_v57  ;;  %v4105_v38 = vadd.f32 %v3876_v12, %v613_v62 }
 0x109   :  { %v4108_v15 = vadd.f32 %v3880_v29, %v618_v55  ;;  %v658_v9 = vsel %vm657_vm3, %v7010_v58, %v7020_v3  ;;  %v667_v44 = vadd.f32 %v665_v26, %v3849_v31  ;;  %v7021_v33 = vstv %s3814_s28  ;;  %v7025_v31 = vld [vmem:[#allocation29_spill] sm:$0xff] }
 0x10a   :  { %v685_v57 = vmul.f32 %v7021_v33, %v662_v5  ;;  %v7022_v41 = vstv %s3826_s11  ;;  %v7023_v12 = vstv %s3840_s12  ;;  %v7024_v60 = vstv %s3846_s29  ;;  %v7026_v26 = vld [vmem:[#allocation21_spill] sm:$0xff] }
 0x10b   :  { %v690_v63 = vmul.f32 %v7022_v41, %v662_v5  ;;  %v695_v62 = vmul.f32 %v7023_v12, %v662_v5  ;;  %v700_v29 = vmul.f32 %v7024_v60, %v662_v5  ;;  %v672_v55 = vadd.f32 %v670_v42, %v3852_v22  ;;  %v4144_v22 = vld [vmem:[%s6864_s0 + $0x28] sm:$0xff] }
 0x10c   :  { %v677_v10 = vadd.f32 %v675_v17, %v3859_v18  ;;  %v682_v58 = vadd.f32 %v680_v30, %v3872_v53  ;;  %v748_v3 = vsel %vm742_vm4, %v7026_v26, %v7025_v31  ;;  %v666_v41 = vmul.f32 %v664_v40, %v658_v9  ;;  %1248 = vrot.lane.b32.xlu1 %v4144_v22, %s3098_s4  ;;  %v4151_v18 = vld [vmem:[%s6864_s0 + $0x10] sm:$0xff]  ;;  %v4164_v26 = vld [vmem:[%s6864_s0 + $0x40] sm:$0xff] }
 0x10d   :  { %v7027_v33 = vstv %s3883_s13  ;;  %v7028_v12 = vstv %s3895_s14  ;;  %1246 = vrot.lane.b32.xlu0 %v4151_v18, %s3098_s4  ;;  %v7029_v53 = vstv %s3922_s1  ;;  %v687_v42 = vadd.f32 %v685_v57, %v667_v44  ;;  %7030 = vst [vmem:[#allocation26_spill] sm:$0xff] %v4164_v26  ;;  %v4185_v30 = vpop.permute.xlu0 %894  ;;  %s4199_s13 = sld [smem:[#allocation2 + $0x1f]] }
 0x10e   :  { %v671_v2 = vmul.f32 %v7027_v33, %v658_v9  ;;  %v676_v60 = vmul.f32 %v7028_v12, %v658_v9  ;;  %v681_v40 = vmul.f32 %v7029_v53, %v658_v9  ;;  %1250 = vrot.lane.b32.xlu2 %v4164_v26, %s3098_s4  ;;  %v7031_v33 = vld [vmem:[#allocation30_spill] sm:$0xff]  ;;  %v7032_v9 = vstv %s3958_s15  ;;  %7035 = vst [vmem:[#allocation6_spill] sm:$0xff] %v4185_v30  ;;  %s4208_s14 = sld [smem:[#allocation2 + $0x6a]]  ;;  %s3099_s4 = smov 90  }
 0x10f   :  { %v659_v12 = vsel %vm657_vm3, %v7017_v7, %v7031_v33  ;;  %v4174_v44 = vmul.f32 %v7032_v9, %v748_v3  ;;  %v7033_v57 = vstv %s3967_s16  ;;  %v4183_v6 = vpop.permute.xlu1 %896  ;;  %v692_v17 = vadd.f32 %v690_v63, %v672_v55  ;;  %s4229_s1 = sld [smem:[#allocation2 + $0x100]] }
 0x110   :  { %v4178_v53 = vmul.f32 %v7033_v57, %v748_v3  ;;  %7034 = vst [vmem:[#allocation24_spill] sm:$0xff] %v4183_v6  ;;  %v697_v19 = vadd.f32 %v695_v62, %v677_v10  ;;  %v702_v7 = vadd.f32 %v700_v29, %v682_v58  ;;  %v7036_v33 = vstv %s3975_s5  ;;  %v4193_v57 = vpop.permute.xlu2 %983 }
 0x111   :  { %v4189_v9 = vmul.f32 %v7036_v33, %v748_v3  ;;  %7037 = vst [vmem:[#allocation5_spill] sm:$0xff] %v4193_v57  ;;  %v668_v5 = vadd.f32 %v666_v41, %v3905_v52  ;;  %v673_v23 = vadd.f32 %v671_v2, %v3908_v34  ;;  %v678_v6 = vadd.f32 %v676_v60, %v3925_v47  ;;  %v7042_v47 = vld [vmem:[#allocation32_spill] sm:$0xff] }
 0x112   :  { %v6884_v30 = vstv %s4099_s19  ;;  %v7038_v10 = vstv %s3814_s28  ;;  %v683_v62 = vadd.f32 %v681_v40, %v3933_v25  ;;  %v7039_v29 = vstv %s3992_s6  ;;  %s4225_s28 = sld [smem:[#allocation2 + $0xb5]] }
 0x113   :  { %v686_v63 = vmul.f32 %v7038_v10, %v659_v12  ;;  %v4206_v55 = vmul.f32 %v7039_v29, %v748_v3  ;;  %v4211_v58 = vadd.f32 %v3982_v27, %v687_v42  ;;  %v7040_v52 = vstv %s3826_s11  ;;  %s4241_s11 = sld [smem:[#allocation2 + $0x6]] }
 0x114   :  { %v691_v41 = vmul.f32 %v7040_v52, %v659_v12  ;;  %v7041_v34 = vstv %s3840_s12  ;;  %v745_v60 = vsel %vm742_vm4, %v7025_v31, %v7042_v47  ;;  %v746_v25 = vsel %vm742_vm4, %v3653_v59, %v3730_v21  ;;  %s4363_s12 = sld [smem:[#allocation2 + $0x39]] }
 0x115   :  { %v696_v2 = vmul.f32 %v7041_v34, %v659_v12  ;;  %v7043_v3 = vstv %s3846_s29  ;;  %v4232_v27 = vadd.f32 %v3986_v4, %v692_v17  ;;  %v4235_v42 = vadd.f32 %v3990_v1, %v697_v19  ;;  %v4246_v4 = vld [vmem:[%s6864_s0 + $0x18] sm:$0xff]  ;;  %v4253_v1 = vld [vmem:[%s6864_s0] sm:$0xff]  ;;  %v4290_v47 = vpop.permute.xlu0 %900  ;;  %s4735_s6 = sld [smem:[#allocation2 + $0x3b]] }
 0x116   :  { %v701_v40 = vmul.f32 %v7043_v3, %v659_v12  ;;  %v4238_v31 = vadd.f32 %v4018_v0, %v702_v7  ;;  %v688_v33 = vadd.f32 %v686_v63, %v668_v5  ;;  %v693_v59 = vadd.f32 %v691_v41, %v673_v23  ;;  %1321 = vrot.lane.b32.xlu1 %v4246_v4, %s3099_s4  ;;  %v4272_v7 = vld [vmem:[%s6864_s0 + $0x30] sm:$0xff]  ;;  %s4769_s29 = sld [smem:[#allocation2 + $0x22]] }
 0x117   :  { %v698_v10 = vadd.f32 %v696_v2, %v678_v6  ;;  %1319 = vrot.lane.b32.xlu0 %v4253_v1, %s3099_s4  ;;  %v7044_v6 = vstv %s3958_s15  ;;  %v7045_v19 = vstv %s3967_s16  ;;  %v7046_v17 = vstv %s4053_s3  ;;  %s4286_s15 = sld [smem:[#allocation2 + $0x9c]]  ;;  %v4288_v2 = vpop.permute.xlu1 %902 }
 0x118   :  { %v703_v0 = vadd.f32 %v701_v40, %v683_v62  ;;  %v4259_v23 = vmul.f32 %v7044_v6, %v745_v60  ;;  %v4263_v5 = vmul.f32 %v7045_v19, %v745_v60  ;;  %v750_v12 = vmul.f32 %v7046_v17, %v746_v25  ;;  %1323 = vrot.lane.b32.xlu2 %v4272_v7, %s3099_s4  ;;  %v4300_v17 = vpop.permute.xlu2 %989  ;;  %s4304_s16 = sld [smem:[#allocation2 + $0xe7]] }
 0x119   :  { %v7047_v63 = vstv %s3975_s5  ;;  %v4282_v52 = vmul.f32 %v7039_v29, %v745_v60  ;;  %v747_v3 = vsel %vm742_vm4, %v3651_v20, %v3728_v11  ;;  %v7048_v40 = vstv %s4070_s17  ;;  %7049 = vst [vmem:[#allocation7_spill] sm:$0xff] %v4300_v17  ;;  %s4699_s5 = sld [smem:[#allocation2 + $0xe9]] }
 0x11a   :  { %v4278_v62 = vmul.f32 %v7047_v63, %v745_v60  ;;  %v755_v60 = vmul.f32 %v7048_v40, %v746_v25  ;;  %v7050_v63 = vstv %s4077_s18  ;;  %v4307_v34 = vadd.f32 %v4038_v37, %v688_v33 }
 0x11b   :  { %v760_v29 = vmul.f32 %v7050_v63, %v746_v25  ;;  %v4310_v20 = vadd.f32 %v4042_v56, %v693_v59  ;;  %v4313_v40 = vadd.f32 %v4061_v32, %v698_v10  ;;  %v752_v19 = vadd.f32 %v750_v12, %v4023_v49 }
 0x11c   :  { %v765_v6 = vmul.f32 %v6884_v30, %v746_v25  ;;  %v743_v63 = vsel %vm742_vm4, %v3730_v21, %v3818_v45  ;;  %v4323_v37 = vadd.f32 %v4065_v46, %v703_v0  ;;  %v7051_v33 = vstv %s4001_s7 }
 0x11d   :  { %v770_v41 = vmul.f32 %v7051_v33, %v747_v3  ;;  %v7052_v10 = vstv %s4012_s8  ;;  %v7053_v49 = vstv %s4020_s9  ;;  %v7054_v25 = vstv %s4044_s10  ;;  %v4382_v33 = vpop.permute.xlu0 %906 }
 0x11e   :  { %v775_v57 = vmul.f32 %v7052_v10, %v747_v3  ;;  %v780_v12 = vmul.f32 %v7053_v49, %v747_v3  ;;  %v785_v30 = vmul.f32 %v7054_v25, %v747_v3  ;;  %v757_v17 = vadd.f32 %v755_v60, %v4026_v28  ;;  %v4348_v3 = vld [vmem:[%s6864_s0 + $0x20] sm:$0xff]  ;;  %v4355_v28 = vld [vmem:[%s6864_s0 + $0x8] sm:$0xff]  ;;  %v4368_v49 = vld [vmem:[%s6864_s0 + $0x38] sm:$0xff] }
 0x11f   :  { %v762_v21 = vadd.f32 %v760_v29, %v4047_v13  ;;  %v7055_v45 = vstv %s4053_s3  ;;  %v833_v0 = vsel %vm827_vm5, %v3660_v48, %v3747_v16  ;;  %1327 = vrot.lane.b32.xlu1 %v4348_v3, %s3099_s4  ;;  %1325 = vrot.lane.b32.xlu0 %v4355_v28, %s3099_s4  ;;  %v767_v48 = vadd.f32 %v765_v6, %v4050_v54  ;;  %s4758_s3 = sld [smem:[#allocation2 + $0xd1]] }
 0x120   :  { %v751_v46 = vmul.f32 %v7055_v45, %v743_v63  ;;  %v772_v13 = vadd.f32 %v770_v41, %v752_v19  ;;  %v7056_v60 = vstv %s4070_s17  ;;  %1329 = vrot.lane.b32.xlu2 %v4368_v49, %s3099_s4  ;;  %v7057_v25 = vstv %s4077_s18  ;;  %s4378_s17 = sld [smem:[#allocation2 + $0x84]]  ;;  %v4398_v19 = vpop.permute.xlu2 %995 }
 0x121   :  { %v756_v29 = vmul.f32 %v7056_v60, %v743_v63  ;;  %v761_v45 = vmul.f32 %v7057_v25, %v743_v63  ;;  %v7058_v54 = vstv %s4099_s19  ;;  %v4380_v60 = vpop.permute.xlu1 %908  ;;  %v744_v32 = vsel %vm742_vm4, %v3728_v11, %v3816_v43  ;;  %s4396_s18 = sld [smem:[#allocation2 + $0xcf]] }
 0x122   :  { %v766_v41 = vmul.f32 %v7058_v54, %v743_v63  ;;  %7059 = vst [vmem:[#allocation9_spill] sm:$0xff] %v4380_v60  ;;  %v777_v59 = vadd.f32 %v775_v57, %v757_v17  ;;  %v7060_v25 = vstv %s4139_s20  ;;  %v7061_v63 = vstv %s4159_s24  ;;  %s4406_s19 = sld [smem:[#allocation2 + $0x11a]] }
 0x123   :  { %v4390_v56 = vmul.f32 %v7060_v25, %v833_v0  ;;  %v4394_v54 = vmul.f32 %v7061_v63, %v833_v0  ;;  %v782_v6 = vadd.f32 %v780_v12, %v762_v21  ;;  %v753_v10 = vadd.f32 %v751_v46, %v4080_v35 }
 0x124   :  { %v7062_v60 = vstv %s4181_s27  ;;  %v849_v43 = vstv %s4304_s16  ;;  %v787_v57 = vadd.f32 %v785_v30, %v767_v48  ;;  %v758_v17 = vadd.f32 %v756_v29, %v4102_v24  ;;  %s4669_s16 = sld [smem:[#allocation2 + $0x9e]] }
 0x125   :  { %v4403_v11 = vmul.f32 %v7062_v60, %v833_v0  ;;  %v7063_v25 = vstv %s4191_s30  ;;  %v4416_v12 = vadd.f32 %v4174_v44, %v772_v13  ;;  %v7064_v21 = vstv %s4001_s7  ;;  %s4434_s7 = sld [smem:[#allocation2 + $0xb6]] }
 0x126   :  { %v4411_v63 = vmul.f32 %v7063_v25, %v833_v0  ;;  %v771_v35 = vmul.f32 %v7064_v21, %v744_v32  ;;  %v763_v46 = vadd.f32 %v761_v45, %v4105_v38  ;;  %v768_v60 = vadd.f32 %v766_v41, %v4108_v15  ;;  %s4546_s30 = sld [smem:[#allocation2 + $0x3a]] }
 0x127   :  { %v830_v24 = vsel %vm827_vm5, %v3747_v16, %v3828_v50  ;;  %v7065_v30 = vstv %s4012_s8  ;;  %v7066_v48 = vstv %s4020_s9  ;;  %v7067_v13 = vstv %s4044_s10  ;;  %s4444_s8 = sld [smem:[#allocation2 + $0x101]]  ;;  %1333 = vrot.lane.b32.xlu1 %v4144_v22, %s3099_s4 }
 0x128   :  { %v776_v0 = vmul.f32 %v7065_v30, %v744_v32  ;;  %v781_v44 = vmul.f32 %v7066_v48, %v744_v32  ;;  %v786_v29 = vmul.f32 %v7067_v13, %v744_v32  ;;  %v4437_v38 = vadd.f32 %v4178_v53, %v777_v59  ;;  %1331 = vrot.lane.b32.xlu0 %v4151_v18, %s3099_s4  ;;  %s4461_s9 = sld [smem:[#allocation2 + $0x7]]  ;;  %v4489_v48 = vpop.permute.xlu2 %1068 }
 0x129   :  { %v773_v15 = vadd.f32 %v771_v35, %v753_v10  ;;  %v831_v16 = vsel %vm827_vm5, %v3912_v61, %v3996_v36  ;;  %v4447_v50 = vadd.f32 %v4189_v9, %v782_v6  ;;  %v7068_v59 = vstv %s4139_s20  ;;  %1335 = vrot.lane.b32.xlu2 %v4164_v26, %s3099_s4  ;;  %s4473_s10 = sld [smem:[#allocation2 + $0x52]]  ;;  %v4475_v21 = vpop.permute.xlu1 %981  ;;  %7074 = vst [vmem:[#allocation11_spill] sm:$0xff] %v4489_v48 }
 0x12a   :  { %v778_v53 = vadd.f32 %v776_v0, %v758_v17  ;;  %v4455_v61 = vmul.f32 %v7068_v59, %v830_v24  ;;  %v7069_v32 = vstv %s4159_s24  ;;  %v4464_v9 = vadd.f32 %v4206_v55, %v787_v57  ;;  %7071 = vst [vmem:[#allocation14_spill] sm:$0xff] %v4475_v21  ;;  %v4477_v55 = vpop.permute.xlu0 %979  ;;  %s4487_s20 = sld [smem:[#allocation2 + $0x9d]] }
 0x12b   :  { %v4459_v10 = vmul.f32 %v7069_v32, %v830_v24  ;;  %v783_v45 = vadd.f32 %v781_v44, %v763_v46  ;;  %v788_v41 = vadd.f32 %v786_v29, %v768_v60  ;;  %v7070_v6 = vstv %s4181_s27  ;;  %v7075_v44 = vld [vmem:[#allocation8_spill] sm:$0xff]  ;;  %s4514_s24 = sld [smem:[#allocation2 + $0xe8]]  ;;  %s3100_s27 = smov 89  }
 0x12c   :  { %v4470_v17 = vmul.f32 %v7070_v6, %v830_v24  ;;  %v7072_v57 = vmov %v7063_v25  ;;  %v7073_v30 = vstv %s4241_s11  ;;  %v832_v13 = vsel %vm827_vm5, %v7075_v44, %v3994_v51  ;;  %s4569_s4 = sld [smem:[#allocation2 + $0xd0]] }
 0x12d   :  { %v4481_v35 = vmul.f32 %v7072_v57, %v830_v24  ;;  %v835_v46 = vmul.f32 %v7073_v30, %v831_v16  ;;  %v7076_v29 = vstv %s4267_s22  ;;  %v4499_v32 = vadd.f32 %v4259_v23, %v773_v15 }
 0x12e   :  { %v840_v59 = vmul.f32 %v7076_v29, %v831_v16  ;;  %v7077_v6 = vstv %s4286_s15  ;;  %v850_v30 = vmul.f32 %v849_v43, %v831_v16  ;;  %v828_v0 = vsel %vm827_vm5, %v3996_v36, %v4084_v14 }
 0x12f   :  { %v845_v57 = vmul.f32 %v7077_v6, %v831_v16  ;;  %v4510_v44 = vadd.f32 %v4263_v5, %v778_v53  ;;  %v4517_v23 = vadd.f32 %v4278_v62, %v783_v45  ;;  %v4520_v15 = vadd.f32 %v4282_v52, %v788_v41  ;;  %1406 = vrot.lane.b32.xlu1 %v4246_v4, %s3100_s27 }
 0x130   :  { %v7078_v16 = vstv %s4199_s13  ;;  %v7079_v60 = vstv %s4208_s14  ;;  %v837_v36 = vadd.f32 %v835_v46, %v4211_v58  ;;  %v7080_v5 = vstv %s4225_s28  ;;  %1404 = vrot.lane.b32.xlu0 %v4253_v1, %s3100_s27  ;;  %v4571_v45 = vpop.permute.xlu2 %1074 }
 0x131   :  { %v855_v6 = vmul.f32 %v7078_v16, %v832_v13  ;;  %v860_v25 = vmul.f32 %v7079_v60, %v832_v13  ;;  %v865_v53 = vmul.f32 %v7080_v5, %v832_v13  ;;  %v7081_v24 = vstv %s4241_s11  ;;  %v7083_v60 = vld [vmem:[#allocation22_spill] sm:$0xff]  ;;  %1408 = vrot.lane.b32.xlu2 %v4272_v7, %s3100_s27  ;;  %s4556_s11 = sld [smem:[#allocation2 + $0x85]] }
 0x132   :  { %v836_v29 = vmul.f32 %v7081_v24, %v828_v0  ;;  %v842_v62 = vadd.f32 %v840_v59, %v4232_v27  ;;  %v7082_v58 = vstv %s4267_s22  ;;  %v847_v41 = vadd.f32 %v845_v57, %v4235_v42  ;;  %v4560_v57 = vpop.permute.xlu0 %985  ;;  %s4582_s22 = sld [smem:[#allocation2 + $0x11b]] }
 0x133   :  { %v841_v52 = vmul.f32 %v7082_v58, %v828_v0  ;;  %v852_v46 = vadd.f32 %v850_v30, %v4238_v31  ;;  %v918_v27 = vsel %vm912_vm6, %v7083_v60, %v4003_v8  ;;  %v7084_v59 = vstv %s4229_s1  ;;  %v4558_v31 = vpop.permute.xlu1 %987  ;;  %v7086_v30 = vld [vmem:[#allocation25_spill] sm:$0xff] }
 0x134   :  { %v870_v24 = vmul.f32 %v7084_v59, %v832_v13  ;;  %v7085_v16 = vstv %s4286_s15  ;;  %v829_v60 = vsel %vm827_vm5, %v3994_v51, %v7086_v30  ;;  %v851_v13 = vmul.f32 %v849_v43, %v828_v0  ;;  %s4599_s15 = sld [smem:[#allocation2 + $0x6c]] }
 0x135   :  { %v846_v5 = vmul.f32 %v7085_v16, %v828_v0  ;;  %v857_v59 = vadd.f32 %v855_v6, %v837_v36  ;;  %v838_v14 = vadd.f32 %v836_v29, %v4307_v34  ;;  %v862_v42 = vadd.f32 %v860_v25, %v842_v62 }
 0x136   :  { %v7087_v58 = vstv %s4363_s12  ;;  %v7088_v21 = vstv %s4378_s17  ;;  %v843_v43 = vadd.f32 %v841_v52, %v4310_v20  ;;  %v867_v0 = vadd.f32 %v865_v53, %v847_v41  ;;  %v7093_v52 = vld [vmem:[#allocation23_spill] sm:$0xff] }
 0x137   :  { %v4576_v48 = vmul.f32 %v7087_v58, %v918_v27  ;;  %v4580_v51 = vmul.f32 %v7088_v21, %v918_v27  ;;  %v872_v6 = vadd.f32 %v870_v24, %v852_v46  ;;  %v7089_v36 = vstv %s4396_s18  ;;  %1412 = vrot.lane.b32.xlu1 %v4348_v3, %s3100_s27 }
 0x138   :  { %v4587_v30 = vmul.f32 %v7089_v36, %v918_v27  ;;  %v7090_v34 = vstv %s4199_s13  ;;  %v848_v29 = vadd.f32 %v846_v5, %v4313_v40  ;;  %v7091_v62 = vstv %s4406_s19  ;;  %s4608_s13 = sld [smem:[#allocation2 + $0xb7]]  ;;  %1410 = vrot.lane.b32.xlu0 %v4355_v28, %s3100_s27 }
 0x139   :  { %v856_v25 = vmul.f32 %v7090_v34, %v829_v60  ;;  %v4596_v21 = vmul.f32 %v7091_v62, %v918_v27  ;;  %v6886_v58 = vstv %s4514_s24  ;;  %v7092_v16 = vstv %s4208_s14  ;;  %s4620_s14 = sld [smem:[#allocation2 + $0x102]]  ;;  %1414 = vrot.lane.b32.xlu2 %v4368_v49, %s3100_s27 }
 0x13a   :  { %v861_v20 = vmul.f32 %v7092_v16, %v829_v60  ;;  %v853_v53 = vadd.f32 %v851_v13, %v4323_v37  ;;  %v915_v41 = vsel %vm912_vm6, %v4003_v8, %v7093_v52  ;;  %v4611_v40 = vadd.f32 %v4390_v56, %v857_v59  ;;  %s4798_s19 = sld [smem:[#allocation2 + $0x9]] }
 0x13b   :  { %v7094_v46 = vstv %s4225_s28  ;;  %v858_v24 = vadd.f32 %v856_v25, %v838_v14  ;;  %v4623_v8 = vadd.f32 %v4394_v54, %v862_v42  ;;  %v7095_v37 = vstv %s4229_s1  ;;  %s4649_s28 = sld [smem:[#allocation2 + $0x8]] }
 0x13c   :  { %v866_v27 = vmul.f32 %v7094_v46, %v829_v60  ;;  %v871_v56 = vmul.f32 %v7095_v37, %v829_v60  ;;  %v863_v5 = vadd.f32 %v861_v20, %v843_v43  ;;  %v4628_v14 = vadd.f32 %v4403_v11, %v867_v0  ;;  %v7098_v60 = vld [vmem:[#allocation6_spill] sm:$0xff]  ;;  %v4651_v43 = vpop.permute.xlu0 %991  ;;  %s4662_s1 = sld [smem:[#allocation2 + $0x53]]  ;;  %v4664_v20 = vpop.permute.xlu2 %1080 }
 0x13d   :  { %v4631_v13 = vadd.f32 %v4411_v63, %v872_v6  ;;  %v7096_v16 = vstv %s4363_s12  ;;  %v7097_v42 = vstv %s4378_s17  ;;  %v916_v11 = vsel %vm912_vm6, %v7098_v60, %v4290_v47  ;;  %v4647_v63 = vpop.permute.xlu1 %993  ;;  %s4765_s12 = sld [smem:[#allocation2 + $0x11c]]  ;;  %s3101_s17 = smov 88  }
 0x13e   :  { %v868_v59 = vadd.f32 %v866_v27, %v848_v29  ;;  %v4637_v54 = vmul.f32 %v7096_v16, %v915_v41  ;;  %v4641_v36 = vmul.f32 %v7097_v42, %v915_v41  ;;  %v873_v0 = vadd.f32 %v871_v56, %v853_v53 }
 0x13f   :  { %v7099_v6 = vstv %s4396_s18  ;;  %v7100_v25 = vmov %v7091_v62  ;;  %v4672_v53 = vadd.f32 %v4455_v61, %v858_v24  ;;  %v7102_v56 = vstv %s4461_s9  ;;  %1418 = vrot.lane.b32.xlu1 %v4144_v22, %s3100_s27  ;;  %s4794_s18 = sld [smem:[#allocation2 + $0xb8]] }
 0x140   :  { %v4655_v34 = vmul.f32 %v7099_v6, %v915_v41  ;;  %v4659_v29 = vmul.f32 %v7100_v25, %v915_v41  ;;  %v7101_v41 = vld [vmem:[#allocation24_spill] sm:$0xff]  ;;  %v920_v16 = vmul.f32 %v7102_v56, %v916_v11  ;;  %v7103_v42 = vstv %s4473_s10  ;;  %1416 = vrot.lane.b32.xlu0 %v4151_v18, %s3100_s27  ;;  %s4876_s9 = sld [smem:[#allocation2 + $0x87]] }
 0x141   :  { %v917_v37 = vsel %vm912_vm6, %v7101_v41, %v4288_v2  ;;  %v925_v60 = vmul.f32 %v7103_v42, %v916_v11  ;;  %v4683_v6 = vadd.f32 %v4459_v10, %v863_v5  ;;  %v7104_v25 = vstv %s4487_s20  ;;  %1420 = vrot.lane.b32.xlu2 %v4164_v26, %s3100_s27  ;;  %s4923_s27 = sld [smem:[#allocation2 + $0x6e]] }
 0x142   :  { %v930_v27 = vmul.f32 %v7104_v25, %v916_v11  ;;  %v935_v46 = vmul.f32 %v6886_v58, %v916_v11  ;;  %v913_v61 = vsel %vm912_vm6, %v4290_v47, %v4382_v33  ;;  %v4694_v24 = vadd.f32 %v4470_v17, %v868_v59 }
 0x143   :  { %v4702_v10 = vadd.f32 %v4481_v35, %v873_v0  ;;  %v7106_v5 = vstv %s4413_s21  ;;  %v7107_v42 = vstv %s4426_s23  ;;  %v7108_v62 = vstv %s4434_s7  ;;  %v7110_v0 = vld [vmem:[#allocation7_spill] sm:$0xff] }
 0x144   :  { %v940_v11 = vmul.f32 %v7106_v5, %v917_v37  ;;  %v945_v25 = vmul.f32 %v7107_v42, %v917_v37  ;;  %v950_v58 = vmul.f32 %v7108_v62, %v917_v37  ;;  %v922_v33 = vadd.f32 %v920_v16, %v4416_v12  ;;  %v7111_v5 = vld [vmem:[#allocation5_spill] sm:$0xff]  ;;  %v4733_v52 = vpop.permute.xlu0 %1064 }
 0x145   :  { %7105 = vst [vmem:[#allocation33_spill] sm:$0xff] %v4702_v10  ;;  %v927_v17 = vadd.f32 %v925_v60, %v4437_v38  ;;  %v7109_v35 = vmov %v7102_v56  ;;  %v1003_v62 = vsel %vm997_vm7, %v7111_v5, %v7110_v0  ;;  %v932_v42 = vadd.f32 %v930_v27, %v4447_v50 }
 0x146   :  { %v921_v59 = vmul.f32 %v7109_v35, %v913_v61  ;;  %v937_v47 = vadd.f32 %v935_v46, %v4464_v9  ;;  %v7112_v12 = vstv %s4473_s10  ;;  %v7113_v38 = vstv %s4487_s20  ;;  %v4731_v35 = vpop.permute.xlu1 %1066  ;;  %7115 = vst [vmem:[#allocation10_spill] sm:$0xff] %v4733_v52  ;;  %v1154_v9 = vpop.permute.xlu2 %1153  ;;  %v7118_v46 = vld [vmem:[#allocation9_spill] sm:$0xff]  ;;  %s4891_s10 = sld [smem:[#allocation2 + $0xd2]] }
 0x147   :  { %v926_v16 = vmul.f32 %v7112_v12, %v913_v61  ;;  %v931_v60 = vmul.f32 %v7113_v38, %v913_v61  ;;  %7114 = vst [vmem:[#allocation13_spill] sm:$0xff] %v4731_v35  ;;  %v7116_v5 = vstv %s4444_s8  ;;  %v7117_v41 = vstv %s4514_s24  ;;  %1491 = vrot.lane.b32.xlu1 %v4246_v4, %s3101_s17  ;;  %s4902_s20 = sld [smem:[#allocation2 + $0x11d]] }
 0x148   :  { %v955_v56 = vmul.f32 %v7116_v5, %v917_v37  ;;  %v936_v10 = vmul.f32 %v7117_v41, %v913_v61  ;;  %v914_v27 = vsel %vm912_vm6, %v4288_v2, %v7118_v46  ;;  %v7119_v12 = vstv %s4546_s30  ;;  %1489 = vrot.lane.b32.xlu0 %v4253_v1, %s3101_s17  ;;  %s4916_s24 = sld [smem:[#allocation2 + $0x23]] }
 0x149   :  { %v4751_v38 = vmul.f32 %v7119_v12, %v1003_v62  ;;  %v7120_v35 = vstv %s4556_s11  ;;  %v942_v61 = vadd.f32 %v940_v11, %v922_v33  ;;  %v947_v41 = vadd.f32 %v945_v25, %v927_v17  ;;  %1493 = vrot.lane.b32.xlu2 %v4272_v7, %s3101_s17 }
 0x14a   :  { %v4755_v52 = vmul.f32 %v7120_v35, %v1003_v62  ;;  %v923_v5 = vadd.f32 %v921_v59, %v4499_v32  ;;  %v7121_v50 = vstv %s4569_s4  ;;  %v952_v2 = vadd.f32 %v950_v58, %v932_v42 }
 0x14b   :  { %v4763_v26 = vmul.f32 %v7121_v50, %v1003_v62  ;;  %v957_v46 = vadd.f32 %v955_v56, %v937_v47  ;;  %v928_v35 = vadd.f32 %v926_v16, %v4510_v44  ;;  %v933_v12 = vadd.f32 %v931_v60, %v4517_v23 }
 0x14c   :  { %v7122_v37 = vstv %s4413_s21  ;;  %v938_v25 = vadd.f32 %v936_v10, %v4520_v15  ;;  %v7123_v33 = vstv %s4582_s22  ;;  %v6888_v17 = vstv %s4699_s5  ;;  %v4810_v60 = vpop.permute.xlu0 %1070  ;;  %s4812_s21 = sld [smem:[#allocation2 + $0x54]] }
 0x14d   :  { %v941_v11 = vmul.f32 %v7122_v37, %v914_v27  ;;  %v4776_v32 = vmul.f32 %v7123_v33, %v1003_v62  ;;  %v7124_v59 = vstv %s4426_s23  ;;  %v7125_v56 = vstv %s4434_s7  ;;  %s4828_s23 = sld [smem:[#allocation2 + $0x9f]] }
 0x14e   :  { %v946_v58 = vmul.f32 %v7124_v59, %v914_v27  ;;  %v951_v47 = vmul.f32 %v7125_v56, %v914_v27  ;;  %v1000_v44 = vsel %vm997_vm7, %v7110_v0, %v4398_v19  ;;  %v7126_v23 = vstv %s4444_s8  ;;  %v4808_v16 = vpop.permute.xlu1 %1072  ;;  %s4847_s7 = sld [smem:[#allocation2 + $0xea]] }
 0x14f   :  { %v956_v15 = vmul.f32 %v7126_v23, %v914_v27  ;;  %v943_v10 = vadd.f32 %v941_v11, %v923_v5  ;;  %v4801_v19 = vadd.f32 %v4576_v48, %v942_v61  ;;  %v4804_v0 = vadd.f32 %v4580_v51, %v947_v41  ;;  %v1160_v5 = vpop.permute.xlu2 %1159  ;;  %s4862_s8 = sld [smem:[#allocation2 + $0x3c]]  ;;  %1497 = vrot.lane.b32.xlu1 %v4348_v3, %s3101_s17 }
 0x150   :  { %v948_v62 = vadd.f32 %v946_v58, %v928_v35  ;;  %v953_v42 = vadd.f32 %v951_v47, %v933_v12  ;;  %v4815_v48 = vadd.f32 %v4587_v30, %v952_v2  ;;  %v4818_v51 = vadd.f32 %v4596_v21, %v957_v46  ;;  %v7131_v58 = vld [vmem:[#allocation14_spill] sm:$0xff]  ;;  %1495 = vrot.lane.b32.xlu0 %v4355_v28, %s3101_s17  ;;  %s4966_s22 = sld [smem:[#allocation2 + $0x55]] }
 0x151   :  { %v958_v50 = vadd.f32 %v956_v15, %v938_v25  ;;  %v7127_v27 = vstv %s4546_s30  ;;  %v7128_v61 = vstv %s4556_s11  ;;  %v7129_v35 = vstv %s4569_s4  ;;  %1499 = vrot.lane.b32.xlu2 %v4368_v49, %s3101_s17  ;;  %s4933_s30 = sld [smem:[#allocation2 + $0xb9]] }
 0x152   :  { %v4822_v37 = vmul.f32 %v7127_v27, %v1000_v44  ;;  %v4826_v41 = vmul.f32 %v7128_v61, %v1000_v44  ;;  %v4833_v30 = vmul.f32 %v7129_v35, %v1000_v44  ;;  %v7130_v2 = vmov %v7123_v33  ;;  %s4946_s11 = sld [smem:[#allocation2 + $0x104]] }
 0x153   :  { %v4837_v21 = vmul.f32 %v7130_v2, %v1000_v44  ;;  %v1001_v46 = vsel %vm997_vm7, %v4477_v55, %v4560_v57  ;;  %v1129_v12 = vstv %s4735_s6  ;;  %v4850_v59 = vadd.f32 %v4637_v54, %v943_v10  ;;  %s4962_s4 = sld [smem:[#allocation2 + $0xa]] }
 0x154   :  { %v1002_v56 = vsel %vm997_vm7, %v7131_v58, %v4558_v31  ;;  %v4857_v47 = vadd.f32 %v4641_v36, %v948_v62  ;;  %v4860_v55 = vadd.f32 %v4655_v34, %v953_v42  ;;  %v4866_v54 = vsel %vm1167_vm9, %v1154_v9, %v1160_v5  ;;  %s5164_s6 = sld [smem:[#allocation2 + $0xba]] }
 0x155   :  { %v7132_v44 = vstv %s4649_s28  ;;  %v7133_v15 = vstv %s4662_s1  ;;  %v4874_v36 = vadd.f32 %v4659_v29, %v958_v50  ;;  %v7134_v34 = vstv %s4669_s16 }
 0x156   :  { %v1005_v23 = vmul.f32 %v7132_v44, %v1001_v46  ;;  %v1010_v10 = vmul.f32 %v7133_v15, %v1001_v46  ;;  %v1015_v62 = vmul.f32 %v7134_v34, %v1001_v46  ;;  %v1020_v42 = vmul.f32 %v6888_v17, %v1001_v46  ;;  %v7137_v46 = vld [vmem:[#allocation11_spill] sm:$0xff] }
 0x157   :  { %v998_v9 = vsel %vm997_vm7, %v4560_v57, %v4651_v43  ;;  %v7135_v50 = vstv %s4589_s25  ;;  %v7136_v35 = vstv %s4599_s15  ;;  %v1088_v57 = vsel %vm1082_vm8, %v7137_v46, %v4571_v45  ;;  %v4914_v46 = vpop.permute.xlu0 %1076  ;;  %1503 = vrot.lane.b32.xlu1 %v4144_v22, %s3101_s17 }
 0x158   :  { %v1025_v61 = vmul.f32 %v7135_v50, %v1002_v56  ;;  %v1030_v2 = vmul.f32 %v7136_v35, %v1002_v56  ;;  %v7138_v58 = vstv %s4608_s13  ;;  %v7139_v15 = vstv %s4620_s14  ;;  %v4910_v50 = vpop.permute.xlu1 %1078  ;;  %1501 = vrot.lane.b32.xlu0 %v4151_v18, %s3101_s17  ;;  %v7148_v18 = vld [vmem:[#allocation26_spill] sm:$0xff] }
 0x159   :  { %v1035_v44 = vmul.f32 %v7138_v58, %v1002_v56  ;;  %v1040_v34 = vmul.f32 %v7139_v15, %v1002_v56  ;;  %v7140_v43 = vstv %s4649_s28  ;;  %v1007_v33 = vadd.f32 %v1005_v23, %v4611_v40  ;;  %v1166_v15 = vpop.permute.xlu2 %1165  ;;  %s4975_s28 = sld [smem:[#allocation2 + $0xa0]]  ;;  %1505 = vrot.lane.b32.xlu2 %v7148_v18, %s3101_s17 }
 0x15a   :  { %v1006_v27 = vmul.f32 %v7140_v43, %v998_v9  ;;  %v1012_v58 = vadd.f32 %v1010_v10, %v4623_v8  ;;  %v7141_v35 = vstv %s4662_s1  ;;  %v1017_v17 = vadd.f32 %v1015_v62, %v4628_v14  ;;  %s4985_s1 = sld [smem:[#allocation2 + $0xeb]] }
 0x15b   :  { %v1011_v29 = vmul.f32 %v7141_v35, %v998_v9  ;;  %v1022_v25 = vadd.f32 %v1020_v42, %v4631_v13  ;;  %v4931_v11 = vmul.f32 %v1129_v12, %v1088_v57  ;;  %v7142_v40 = vstv %s4669_s16  ;;  %s5154_s16 = sld [smem:[#allocation2 + $0x24]] }
 0x15c   :  { %v1016_v23 = vmul.f32 %v7142_v40, %v998_v9  ;;  %v7143_v8 = vstv %s4743_s26  ;;  %v7144_v43 = vstv %s4758_s3  ;;  %v999_v14 = vsel %vm997_vm7, %v4558_v31, %v4647_v63  ;;  %s5376_s17 = sld [smem:[#allocation2 + $0x57]] }
 0x15d   :  { %v4939_v10 = vmul.f32 %v7143_v8, %v1088_v57  ;;  %v4943_v56 = vmul.f32 %v7144_v43, %v1088_v57  ;;  %v7145_v13 = vstv %s4699_s5  ;;  %v7146_v42 = vstv %s4765_s12  ;;  %s5158_s5 = sld [smem:[#allocation2 + $0x6f]] }
 0x15e   :  { %v1021_v62 = vmul.f32 %v7145_v13, %v998_v9  ;;  %v4956_v40 = vmul.f32 %v7146_v42, %v1088_v57  ;;  %v4960_v8 = vsel %vm1167_vm9, %v1160_v5, %v1166_v15  ;;  %v1008_v43 = vadd.f32 %v1006_v27, %v4672_v53 }
 0x15f   :  { %v1027_v31 = vadd.f32 %v1025_v61, %v1007_v33  ;;  %v1032_v63 = vadd.f32 %v1030_v2, %v1012_v58  ;;  %v1013_v9 = vadd.f32 %v1011_v29, %v4683_v6  ;;  %v1037_v53 = vadd.f32 %v1035_v44, %v1017_v17  ;;  %v7151_v44 = vld [vmem:[#allocation33_spill] sm:$0xff] }
 0x160   :  { %v7147_v27 = vstv %s4589_s25  ;;  %v1018_v33 = vadd.f32 %v1016_v23, %v4694_v24  ;;  %v1085_v6 = vsel %vm1082_vm8, %v4571_v45, %v4664_v20  ;;  %v7149_v29 = vstv %s4599_s15  ;;  %v1152_v58 = vpop.permute.xlu1 %1151  ;;  %v1150_v23 = vpop.permute.xlu0 %1149  ;;  %s3102_s25 = smov 74   ;;  %s5100_s15 = sld [smem:[#allocation2 + $0x103]] }
 0x161   :  { %v1026_v15 = vmul.f32 %v7147_v27, %v999_v14  ;;  %v1031_v61 = vmul.f32 %v7149_v29, %v999_v14  ;;  %v7150_v17 = vstv %s4608_s13  ;;  %v1023_v24 = vadd.f32 %v1021_v62, %v7151_v44  ;;  %v1239_v29 = vpop.permute.xlu2 %1238  ;;  %1576 = vrot.lane.b32.xlu1 %v4246_v4, %s3102_s25  ;;  %1574 = vrot.lane.b32.xlu0 %v4253_v1, %s3102_s25  ;;  %s5132_s13 = sld [smem:[#allocation2 + $0x3d]] }
 0x162   :  { %v1036_v2 = vmul.f32 %v7150_v17, %v999_v14  ;;  %v1042_v45 = vadd.f32 %v1040_v34, %v1022_v25  ;;  %v7152_v20 = vstv %s4620_s14  ;;  %v1047_v27 = vadd.f32 %v4751_v38, %v1027_v31  ;;  %v7158_v38 = vld [vmem:[#allocation10_spill] sm:$0xff]  ;;  %1578 = vrot.lane.b32.xlu2 %v4272_v7, %s3102_s25  ;;  %s5144_s14 = sld [smem:[#allocation2 + $0x88]] }
 0x163   :  { %v1041_v13 = vmul.f32 %v7152_v20, %v999_v14  ;;  %v1028_v42 = vadd.f32 %v1026_v15, %v1008_v43  ;;  %v1052_v18 = vadd.f32 %v4755_v52, %v1032_v63  ;;  %v1033_v22 = vadd.f32 %v1031_v61, %v1013_v9 }
 0x164   :  { %v5000_v62 = vmul.f32 %v1129_v12, %v1085_v6  ;;  %v7154_v17 = vstv %s4743_s26  ;;  %v1057_v25 = vadd.f32 %v4763_v26, %v1037_v53  ;;  %v1038_v34 = vadd.f32 %v1036_v2, %v1018_v33  ;;  %v7161_v53 = vld [vmem:[#allocation13_spill] sm:$0xff]  ;;  %s5176_s26 = sld [smem:[#allocation2 + $0xb]] }
 0x165   :  { %v5004_v44 = vmul.f32 %v7154_v17, %v1085_v6  ;;  %v7156_v14 = vstv %s4758_s3  ;;  %v1086_v52 = vsel %vm1082_vm8, %v7158_v38, %v4810_v60  ;;  %v1194_v31 = vstv %s4916_s24  ;;  %s5220_s24 = sld [smem:[#allocation2 + $0xec]] }
 0x166   :  { %7153 = vst [vmem:[#allocation17_spill] sm:$0xff] %v5000_v62  ;;  %v5009_v43 = vmul.f32 %v7156_v14, %v1085_v6  ;;  %v1043_v12 = vadd.f32 %v1041_v13, %v1023_v24  ;;  %v7159_v63 = vstv %s4765_s12  ;;  %v1199_v15 = vstv %s4923_s27  ;;  %s5226_s27 = sld [smem:[#allocation2 + $0x105]] }
 0x167   :  { %7155 = vst [vmem:[#allocation16_spill] sm:$0xff] %v5004_v44  ;;  %v5018_v9 = vmul.f32 %v7159_v63, %v1085_v6  ;;  %v5026_v33 = vsel %vm1082_vm8, %v7161_v53, %v4808_v16  ;;  %v1062_v2 = vadd.f32 %v4776_v32, %v1042_v45  ;;  %v5031_v24 = vadd.f32 %v4822_v37, %v1028_v42  ;;  %s5355_s3 = sld [smem:[#allocation2 + $0xbb]] }
 0x168   :  { %7157 = vst [vmem:[#allocation15_spill] sm:$0xff] %v5009_v43  ;;  %v7162_v6 = vstv %s4798_s19  ;;  %v7163_v13 = vstv %s4812_s21  ;;  %v1174_v14 = vstv %s4962_s4  ;;  %v5043_v38 = vadd.f32 %v4826_v41, %v1033_v22  ;;  %s5363_s12 = sld [smem:[#allocation2 + $0xc]] }
 0x169   :  { %7160 = vst [vmem:[#allocation12_spill] sm:$0xff] %v5018_v9  ;;  %v1090_v20 = vmul.f32 %v7162_v6, %v1086_v52  ;;  %v1095_v17 = vmul.f32 %v7163_v13, %v1086_v52  ;;  %v1179_v32 = vstv %s4966_s22  ;;  %v1184_v45 = vstv %s4975_s28  ;;  %v1158_v6 = vpop.permute.xlu1 %1157  ;;  %1582 = vrot.lane.b32.xlu1 %v4348_v3, %s3102_s25  ;;  %1580 = vrot.lane.b32.xlu0 %v4355_v28, %s3102_s25  ;;  %s5502_s4 = sld [smem:[#allocation2 + $0xd5]]  ;;  %s3105_s28 = smov 71  }
 0x16a   :  { %v1189_v37 = vstv %s4985_s1  ;;  %v5049_v42 = vadd.f32 %v4833_v30, %v1038_v34  ;;  %v7164_v4 = vstv %s4769_s29  ;;  %v7165_v1 = vstv %s4779_s2  ;;  %v1156_v30 = vpop.permute.xlu0 %1155  ;;  %1584 = vrot.lane.b32.xlu2 %v4368_v49, %s3102_s25  ;;  %s5504_s22 = sld [smem:[#allocation2 + $0x120]] }
 0x16b   :  { %v5056_v63 = vmul.f32 %v7164_v4, %v5026_v33  ;;  %v5061_v41 = vmul.f32 %v7165_v1, %v5026_v33  ;;  %v7166_v22 = vstv %s4794_s18  ;;  %v5069_v34 = vadd.f32 %v4837_v21, %v1043_v12  ;;  %s5551_s1 = sld [smem:[#allocation2 + $0x40]] }
 0x16c   :  { %v5066_v53 = vmul.f32 %v7166_v22, %v5026_v33  ;;  %v7167_v7 = vstv %s4828_s23  ;;  %v1172_v4 = vsel %vm1167_vm9, %v1152_v58, %v1158_v6  ;;  %v1171_v1 = vsel %vm1167_vm9, %v1150_v23, %v1156_v30  ;;  %v1245_v22 = vpop.permute.xlu2 %1244 }
 0x16d   :  { %v1100_v13 = vmul.f32 %v7167_v7, %v1086_v52  ;;  %v5079_v57 = vadd.f32 %v1090_v20, %v4801_v19  ;;  %v5082_v5 = vadd.f32 %v1095_v17, %v4804_v0  ;;  %v7168_v21 = vstv %s4847_s7 }
 0x16e   :  { %v1105_v12 = vmul.f32 %v7168_v21, %v1086_v52  ;;  %v1195_v35 = vmul.f32 %v1194_v31, %v1172_v4  ;;  %v1175_v7 = vmul.f32 %v1174_v14, %v1171_v1  ;;  %v1180_v61 = vmul.f32 %v1179_v32, %v1171_v1 }
 0x16f   :  { %v1185_v58 = vmul.f32 %v1184_v45, %v1171_v1  ;;  %v1190_v26 = vmul.f32 %v1189_v37, %v1171_v1  ;;  %v1200_v23 = vmul.f32 %v1199_v15, %v1172_v4  ;;  %v7169_v9 = vstv %s4933_s30 }
 0x170   :  { %v1205_v43 = vmul.f32 %v7169_v9, %v1172_v4  ;;  %v7170_v44 = vstv %s4946_s11  ;;  %v5098_v19 = vsel %vm1252_vm10, %v1239_v29, %v1245_v22  ;;  %v1177_v0 = vadd.f32 %v1175_v7, %v1047_v27 }
 0x171   :  { %v1210_v62 = vmul.f32 %v7170_v44, %v1172_v4  ;;  %v1182_v52 = vadd.f32 %v1180_v61, %v1052_v18  ;;  %v1187_v20 = vadd.f32 %v1185_v58, %v1057_v25  ;;  %v1192_v17 = vadd.f32 %v1190_v26, %v1062_v2 }
 0x172   :  { %v5103_v1 = vadd.f32 %v1100_v13, %v4815_v48  ;;  %v5106_v9 = vadd.f32 %v1105_v12, %v4818_v51  ;;  %v5112_v27 = vsel %vm1082_vm8, %v4810_v60, %v4914_v46  ;;  %v1197_v18 = vadd.f32 %v1195_v35, %v1177_v0  ;;  %v1162_v26 = vpop.permute.xlu0 %1161 }
 0x173   :  { %v1202_v48 = vadd.f32 %v1200_v23, %v1182_v52  ;;  %v1207_v29 = vadd.f32 %v1205_v43, %v1187_v20  ;;  %v1212_v51 = vadd.f32 %v1210_v62, %v1192_v17  ;;  %v7171_v44 = vstv %s4862_s8  ;;  %v1164_v62 = vpop.permute.xlu1 %1163 }
 0x174   :  { %v1215_v60 = vmul.f32 %v7171_v44, %v4866_v54  ;;  %v7172_v46 = vstv %s4876_s9  ;;  %v7173_v25 = vstv %s4891_s10  ;;  %v7174_v35 = vstv %s4902_s20  ;;  %v1251_v12 = vpop.permute.xlu2 %1250 }
 0x175   :  { %v1220_v3 = vmul.f32 %v7172_v46, %v4866_v54  ;;  %v1225_v28 = vmul.f32 %v7173_v25, %v4866_v54  ;;  %v1230_v43 = vmul.f32 %v7174_v35, %v4866_v54  ;;  %v7175_v49 = vstv %s4798_s19  ;;  %s5378_s19 = sld [smem:[#allocation2 + $0xa2]] }
 0x176   :  { %v1091_v61 = vmul.f32 %v7175_v49, %v5112_v27  ;;  %v7176_v2 = vstv %s4812_s21  ;;  %v1169_v4 = vsel %vm1167_vm9, %v1158_v6, %v1164_v62  ;;  %v1168_v21 = vsel %vm1167_vm9, %v1156_v30, %v1162_v26  ;;  %s5202_s21 = sld [smem:[#allocation2 + $0x56]]  ;;  %v5209_v62 = vld [vmem:[%s6864_s0 + $0x40] sm:$0xff] }
 0x177   :  { %v1096_v13 = vmul.f32 %v7176_v2, %v5112_v27  ;;  %v1196_v54 = vmul.f32 %v1194_v31, %v1169_v4  ;;  %v1201_v7 = vmul.f32 %v1199_v15, %v1169_v4  ;;  %v7177_v58 = vstv %s4933_s30  ;;  %1590 = vrot.lane.b32.xlu2 %v5209_v62, %s3102_s25  ;;  %s5488_s30 = sld [smem:[#allocation2 + $0x107]] }
 0x178   :  { %v1206_v23 = vmul.f32 %v7177_v58, %v1169_v4  ;;  %v7178_v0 = vstv %s4946_s11  ;;  %v1176_v20 = vmul.f32 %v1174_v14, %v1168_v21  ;;  %v1181_v6 = vmul.f32 %v1179_v32, %v1168_v21  ;;  %s5498_s11 = sld [smem:[#allocation2 + $0x8a]] }
 0x179   :  { %v1211_v52 = vmul.f32 %v7178_v0, %v1169_v4  ;;  %v1186_v30 = vmul.f32 %v1184_v45, %v1168_v21  ;;  %v1191_v17 = vmul.f32 %v1189_v37, %v1168_v21  ;;  %v5162_v31 = vsel %vm1252_vm10, %v1245_v22, %v1251_v12 }
 0x17a   :  { %v5166_v15 = vadd.f32 %v1215_v60, %v1197_v18  ;;  %v5168_v44 = vadd.f32 %v1220_v3, %v1202_v48  ;;  %v5170_v46 = vadd.f32 %v1225_v28, %v1207_v29  ;;  %v1178_v14 = vadd.f32 %v1176_v20, %v5031_v24  ;;  %v5191_v24 = vld [vmem:[%s6864_s0 + $0x28] sm:$0xff]  ;;  %v1235_v21 = vpop.permute.xlu0 %1234 }
 0x17b   :  { %v1183_v32 = vadd.f32 %v1181_v6, %v5043_v38  ;;  %v1188_v45 = vadd.f32 %v1186_v30, %v5049_v42  ;;  %v1193_v37 = vadd.f32 %v1191_v17, %v5069_v34  ;;  %v1124_v22 = vstv %s5100_s15  ;;  %1588 = vrot.lane.b32.xlu1 %v5191_v24, %s3102_s25  ;;  %v5198_v38 = vld [vmem:[%s6864_s0 + $0x10] sm:$0xff]  ;;  %v1237_v4 = vpop.permute.xlu1 %1236  ;;  %s5555_s15 = sld [smem:[#allocation2 + $0x72]] }
 0x17c   :  { %v7179_v25 = vstv %s4862_s8  ;;  %v7180_v18 = vstv %s4876_s9  ;;  %v7181_v29 = vstv %s4891_s10  ;;  %1586 = vrot.lane.b32.xlu0 %v5198_v38, %s3102_s25  ;;  %v1198_v42 = vadd.f32 %v1196_v54, %v1178_v14  ;;  %s5204_s8 = sld [smem:[#allocation2 + $0xa1]]  ;;  %s3104_s10 = smov 72  }
 0x17d   :  { %v1216_v35 = vmul.f32 %v7179_v25, %v4960_v8  ;;  %v1221_v48 = vmul.f32 %v7180_v18, %v4960_v8  ;;  %v1226_v60 = vmul.f32 %v7181_v29, %v4960_v8  ;;  %v1203_v34 = vadd.f32 %v1201_v7, %v1183_v32  ;;  %v5287_v25 = vld [vmem:[%s6864_s0 + $0x30] sm:$0xff]  ;;  %s5401_s9 = sld [smem:[#allocation2 + $0x11f]] }
 0x17e   :  { %v1208_v3 = vadd.f32 %v1206_v23, %v1188_v45  ;;  %v1213_v28 = vadd.f32 %v1211_v52, %v1193_v37  ;;  %v1084_v26 = vsel %vm1082_vm8, %v4808_v16, %v4910_v50  ;;  %v7182_v49 = vstv %s4902_s20  ;;  %v1324_v16 = vpop.permute.xlu2 %1323  ;;  %s5486_s20 = sld [smem:[#allocation2 + $0xee]] }
 0x17f   :  { %v1231_v2 = vmul.f32 %v7182_v49, %v4960_v8  ;;  %v1112_v12 = vadd.f32 %v5056_v63, %v5079_v57  ;;  %v1117_v54 = vadd.f32 %v5061_v41, %v5082_v5  ;;  %v5228_v50 = vadd.f32 %v1230_v43, %v1212_v51  ;;  %s5553_s25 = sld [smem:[#allocation2 + $0x27]] }
 0x180   :  { %v5230_v8 = vadd.f32 %v1216_v35, %v1198_v42  ;;  %v5232_v7 = vadd.f32 %v1221_v48, %v1203_v34  ;;  %v5234_v58 = vadd.f32 %v1226_v60, %v1208_v3  ;;  %v1125_v57 = vmul.f32 %v1124_v22, %v5026_v33 }
 0x181   :  { %v7183_v63 = vstv %s4828_s23  ;;  %v7184_v5 = vstv %s4847_s7  ;;  %v1122_v0 = vadd.f32 %v5066_v53, %v5103_v1  ;;  %v1093_v51 = vadd.f32 %v1091_v61, %v4850_v59  ;;  %s5258_s23 = sld [smem:[#allocation2 + $0xd3]] }
 0x182   :  { %v1101_v23 = vmul.f32 %v7183_v63, %v5112_v27  ;;  %v1106_v41 = vmul.f32 %v7184_v5, %v5112_v27  ;;  %v1098_v43 = vadd.f32 %v1096_v13, %v4857_v47  ;;  %v1299_v52 = vstv %s5132_s13  ;;  %v1241_v42 = vpop.permute.xlu0 %1240  ;;  %s5383_s13 = sld [smem:[#allocation2 + $0xed]] }
 0x183   :  { %v5248_v20 = vadd.f32 %v1231_v2, %v1213_v28  ;;  %v7185_v6 = vstv %s4769_s29  ;;  %v7186_v17 = vstv %s4779_s2  ;;  %v1304_v14 = vstv %s5144_s14  ;;  %s5264_s29 = sld [smem:[#allocation2 + $0x11e]]  ;;  %v1243_v35 = vpop.permute.xlu1 %1242 }
 0x184   :  { %v1111_v30 = vmul.f32 %v7185_v6, %v1084_v26  ;;  %v1116_v33 = vmul.f32 %v7186_v17, %v1084_v26  ;;  %v1127_v32 = vadd.f32 %v1125_v57, %v5106_v9  ;;  %v7187_v45 = vstv %s4794_s18  ;;  %v5269_v9 = vld [vmem:[%s6864_s0 + $0x18] sm:$0xff]  ;;  %s3103_s18 = smov 73   ;;  %s5385_s14 = sld [smem:[#allocation2 + $0x106]] }
 0x185   :  { %v1121_v27 = vmul.f32 %v7187_v45, %v1084_v26  ;;  %v1126_v37 = vmul.f32 %v1124_v22, %v1084_v26  ;;  %v1132_v59 = vadd.f32 %v4931_v11, %v1112_v12  ;;  %v1137_v47 = vadd.f32 %v4939_v10, %v1117_v54  ;;  %1661 = vrot.lane.b32.xlu1 %v5269_v9, %s3103_s18  ;;  %v5276_v11 = vld [vmem:[%s6864_s0] sm:$0xff]  ;;  %v7189_v45 = vld [vmem:[#allocation16_spill] sm:$0xff]  ;;  %s5470_s2 = sld [smem:[#allocation2 + $0xd]] }
 0x186   :  { %v1103_v53 = vadd.f32 %v1101_v23, %v4860_v55  ;;  %v1108_v1 = vadd.f32 %v1106_v41, %v4874_v36  ;;  %1659 = vrot.lane.b32.xlu0 %v5276_v11, %s3103_s18  ;;  %v1279_v55 = vstv %s5154_s16  ;;  %v1142_v36 = vadd.f32 %v4943_v56, %v1122_v0  ;;  %1663 = vrot.lane.b32.xlu2 %v5287_v25, %s3103_s18  ;;  %v1330_v28 = vpop.permute.xlu2 %1329  ;;  %s5479_s7 = sld [smem:[#allocation2 + $0x58]] }
 0x187   :  { %v1113_v10 = vadd.f32 %v1111_v30, %v1093_v51  ;;  %v1118_v61 = vadd.f32 %v1116_v33, %v1098_v43  ;;  %v1284_v13 = vstv %s5158_s5  ;;  %v1289_v22 = vstv %s5164_s6  ;;  %v7188_v33 = vld [vmem:[#allocation17_spill] sm:$0xff]  ;;  %s5345_s5 = sld [smem:[#allocation2 + $0x3e]] }
 0x188   :  { %v1259_v18 = vstv %s5176_s26  ;;  %v1264_v48 = vstv %s5202_s21  ;;  %v1269_v29 = vstv %s5204_s8  ;;  %v1274_v60 = vstv %s5220_s24  ;;  %s5347_s6 = sld [smem:[#allocation2 + $0x25]] }
 0x189   :  { %v1294_v34 = vstv %s5226_s27  ;;  %v1257_v56 = vsel %vm1252_vm10, %v1237_v4, %v1243_v35  ;;  %v1256_v3 = vsel %vm1252_vm10, %v1235_v21, %v1241_v42  ;;  %v1123_v26 = vadd.f32 %v1121_v27, %v1103_v53  ;;  %s5349_s26 = sld [smem:[#allocation2 + $0x70]] }
 0x18a   :  { %v1128_v49 = vadd.f32 %v1126_v37, %v1108_v1  ;;  %v1280_v2 = vmul.f32 %v1279_v55, %v1257_v56  ;;  %v1147_v12 = vadd.f32 %v4956_v40, %v1127_v32  ;;  %v1260_v54 = vmul.f32 %v1259_v18, %v1256_v3  ;;  %v5311_v40 = vld [vmem:[%s6864_s0 + $0x20] sm:$0xff]  ;;  %v5327_v1 = vld [vmem:[%s6864_s0 + $0x38] sm:$0xff]  ;;  %s5395_s21 = sld [smem:[#allocation2 + $0x89]] }
 0x18b   :  { %v1265_v57 = vmul.f32 %v1264_v48, %v1256_v3  ;;  %v1270_v63 = vmul.f32 %v1269_v29, %v1256_v3  ;;  %v1275_v23 = vmul.f32 %v1274_v60, %v1256_v3  ;;  %v1285_v5 = vmul.f32 %v1284_v13, %v1257_v56  ;;  %s5399_s8 = sld [smem:[#allocation2 + $0xd4]] }
 0x18c   :  { %v1290_v41 = vmul.f32 %v1289_v22, %v1257_v56  ;;  %v1295_v4 = vmul.f32 %v1294_v34, %v1257_v56  ;;  %v5304_v21 = vsel %vm1337_vm11, %v1324_v16, %v1330_v28  ;;  %v1262_v0 = vadd.f32 %v1260_v54, %v1132_v59  ;;  %v5318_v16 = vld [vmem:[%s6864_s0 + $0x8] sm:$0xff]  ;;  %v1249_v56 = vpop.permute.xlu1 %1248  ;;  %v1247_v54 = vpop.permute.xlu0 %1246  ;;  %s5448_s24 = sld [smem:[#allocation2 + $0x3f]] }
 0x18d   :  { %v1267_v51 = vadd.f32 %v1265_v57, %v1137_v47  ;;  %v1272_v43 = vadd.f32 %v1270_v63, %v1142_v36  ;;  %v1277_v6 = vadd.f32 %v1275_v23, %v1147_v12  ;;  %v1309_v30 = vstv %s5258_s23  ;;  %1667 = vrot.lane.b32.xlu1 %v5311_v40, %s3103_s18  ;;  %s5450_s27 = sld [smem:[#allocation2 + $0x26]] }
 0x18e   :  { %v1314_v17 = vstv %s5264_s29  ;;  %1665 = vrot.lane.b32.xlu0 %v5318_v16, %s3103_s18  ;;  %v1133_v32 = vadd.f32 %v7188_v33, %v1113_v10  ;;  %v1138_v27 = vadd.f32 %v7189_v45, %v1118_v61  ;;  %v1282_v37 = vadd.f32 %v1280_v2, %v1262_v0  ;;  %1669 = vrot.lane.b32.xlu2 %v5327_v1, %s3103_s18  ;;  %v7190_v61 = vld [vmem:[#allocation15_spill] sm:$0xff]  ;;  %v7191_v2 = vld [vmem:[#allocation12_spill] sm:$0xff]  ;;  %s5452_s23 = sld [smem:[#allocation2 + $0x71]] }
 0x18f   :  { %v1287_v59 = vadd.f32 %v1285_v5, %v1267_v51  ;;  %v1292_v47 = vadd.f32 %v1290_v41, %v1272_v43  ;;  %v1297_v53 = vadd.f32 %v1295_v4, %v1277_v6  ;;  %v1300_v36 = vmul.f32 %v1299_v52, %v5098_v19  ;;  %v1336_v41 = vpop.permute.xlu2 %1335  ;;  %s5458_s29 = sld [smem:[#allocation2 + $0xbc]] }
 0x190   :  { %v1305_v10 = vmul.f32 %v1304_v14, %v5098_v19  ;;  %v1143_v3 = vadd.f32 %v7190_v61, %v1123_v26  ;;  %v1148_v12 = vadd.f32 %v7191_v2, %v1128_v49  ;;  %v1310_v57 = vmul.f32 %v1309_v30, %v5098_v19  ;;  %s5561_s16 = sld [smem:[#allocation2 + $0xbd]] }
 0x191   :  { %v1315_v63 = vmul.f32 %v1314_v17, %v5098_v19  ;;  %v1254_v23 = vsel %vm1252_vm10, %v1243_v35, %v1249_v56  ;;  %v1253_v5 = vsel %vm1252_vm10, %v1241_v42, %v1247_v54  ;;  %v5353_v35 = vsel %vm1337_vm11, %v1330_v28, %v1336_v41 }
 0x192   :  { %v1281_v4 = vmul.f32 %v1279_v55, %v1254_v23  ;;  %v1286_v0 = vmul.f32 %v1284_v13, %v1254_v23  ;;  %v1291_v51 = vmul.f32 %v1289_v22, %v1254_v23  ;;  %v1296_v26 = vmul.f32 %v1294_v34, %v1254_v23 }
 0x193   :  { %v1261_v49 = vmul.f32 %v1259_v18, %v1253_v5  ;;  %v1266_v43 = vmul.f32 %v1264_v48, %v1253_v5  ;;  %v1271_v19 = vmul.f32 %v1269_v29, %v1253_v5  ;;  %v1276_v6 = vmul.f32 %v1274_v60, %v1253_v5 }
 0x194   :  { %v5357_v55 = vadd.f32 %v1300_v36, %v1282_v37  ;;  %v5359_v13 = vadd.f32 %v1305_v10, %v1287_v59  ;;  %v5361_v22 = vadd.f32 %v1310_v57, %v1292_v47  ;;  %v1301_v29 = vmul.f32 %v1299_v52, %v5162_v31 }
 0x195   :  { %v1263_v42 = vadd.f32 %v1261_v49, %v1133_v32  ;;  %v1268_v18 = vadd.f32 %v1266_v43, %v1138_v27  ;;  %v1273_v34 = vadd.f32 %v1271_v19, %v1143_v3  ;;  %v1278_v48 = vadd.f32 %v1276_v6, %v1148_v12  ;;  %1673 = vrot.lane.b32.xlu1 %v5191_v24, %s3103_s18 }
 0x196   :  { %v1306_v60 = vmul.f32 %v1304_v14, %v5162_v31  ;;  %v1311_v28 = vmul.f32 %v1309_v30, %v5162_v31  ;;  %1671 = vrot.lane.b32.xlu0 %v5198_v38, %s3103_s18  ;;  %1675 = vrot.lane.b32.xlu2 %v5209_v62, %s3103_s18  ;;  %v1316_v52 = vmul.f32 %v1314_v17, %v5162_v31  ;;  %v1322_v14 = vpop.permute.xlu1 %1321  ;;  %v1320_v30 = vpop.permute.xlu0 %1319  ;;  %v1369_v10 = vstv %s5349_s26  ;;  %s5481_s18 = sld [smem:[#allocation2 + $0xa3]] }
 0x197   :  { %v1283_v33 = vadd.f32 %v1281_v4, %v1263_v42  ;;  %v1288_v32 = vadd.f32 %v1286_v0, %v1268_v18  ;;  %v1293_v45 = vadd.f32 %v1291_v51, %v1273_v34  ;;  %v1298_v27 = vadd.f32 %v1296_v26, %v1278_v48  ;;  %v1409_v37 = vpop.permute.xlu2 %1408  ;;  %s5584_s26 = sld [smem:[#allocation2 + $0xa4]] }
 0x198   :  { %v5387_v59 = vadd.f32 %v1315_v63, %v1297_v53  ;;  %v1364_v53 = vstv %s5347_s6  ;;  %v1374_v56 = vstv %s5355_s3  ;;  %v1344_v3 = vstv %s5363_s12  ;;  %s5582_s6 = sld [smem:[#allocation2 + $0x59]] }
 0x199   :  { %v5389_v47 = vadd.f32 %v1301_v29, %v1283_v33  ;;  %v5391_v36 = vadd.f32 %v1306_v60, %v1288_v32  ;;  %v5393_v31 = vadd.f32 %v1311_v28, %v1293_v45  ;;  %v5397_v17 = vadd.f32 %v1316_v52, %v1298_v27  ;;  %s5589_s3 = sld [smem:[#allocation2 + $0xef]] }
 0x19a   :  { %v1349_v2 = vstv %s5376_s17  ;;  %v1354_v12 = vstv %s5378_s19  ;;  %v1359_v54 = vstv %s5383_s13  ;;  %v1379_v63 = vstv %s5385_s14  ;;  %s5591_s12 = sld [smem:[#allocation2 + $0x108]]  ;;  %s3106_s14 = smov 70  }
 0x19b   :  { %v1384_v4 = vstv %s5345_s5  ;;  %v1389_v0 = vstv %s5395_s21  ;;  %v1394_v33 = vstv %s5399_s8  ;;  %v1399_v32 = vstv %s5401_s9  ;;  %s5573_s5 = sld [smem:[#allocation2 + $0xe]]  ;;  %s3107_s21 = smov 56  }
 0x19c   :  { %s5601_s17 = sld [smem:[#allocation2 + $0x8b]]  ;;  %vm1762_vm0 = vcmp.lt.s32.totalorder %v3359_v39, 72  ;;  %vm1847_vm1 = vcmp.lt.s32.totalorder %v3359_v39, 71  ;;  %vm1932_vm2 = vcmp.lt.s32.totalorder %v3359_v39, 70  ;;  %vm2017_vm3 = vcmp.lt.s32.totalorder %v3359_v39, 56 }
 0x19d   :  { %1746 = vrot.lane.b32.xlu1 %v5269_v9, %s3104_s10  ;;  %s5605_s19 = sld [smem:[#allocation2 + $0xd6]]  ;;  %vm2102_vm4 = vcmp.lt.s32.totalorder %v3359_v39, 55  ;;  %vm2187_vm5 = vcmp.lt.s32.totalorder %v3359_v39, 54  ;;  %vm2272_vm6 = vcmp.lt.s32.totalorder %v3359_v39, 53  ;;  %vm2357_vm7 = vcmp.lt.s32.totalorder %v3359_v39, 52 }
 0x19e   :  { %1744 = vrot.lane.b32.xlu0 %v5276_v11, %s3104_s10  ;;  %1748 = vrot.lane.b32.xlu2 %v5287_v25, %s3104_s10  ;;  %v1328_v61 = vpop.permute.xlu1 %1327  ;;  %v1326_v57 = vpop.permute.xlu0 %1325  ;;  %s5607_s13 = sld [smem:[#allocation2 + $0x121]] }
 0x19f   :  { %v1342_v23 = vsel %vm1337_vm11, %v1322_v14, %v1328_v61  ;;  %v1341_v5 = vsel %vm1337_vm11, %v1320_v30, %v1326_v57  ;;  %v1415_v41 = vpop.permute.xlu2 %1414  ;;  %v1395_v30 = vmul.f32 %v1394_v33, %v5304_v21  ;;  %s5654_s8 = sld [smem:[#allocation2 + $0x41]] }
 0x1a0   :  { %v1365_v51 = vmul.f32 %v1364_v53, %v1342_v23  ;;  %v1345_v26 = vmul.f32 %v1344_v3, %v1341_v5  ;;  %v1350_v49 = vmul.f32 %v1349_v2, %v1341_v5  ;;  %v1355_v43 = vmul.f32 %v1354_v12, %v1341_v5  ;;  %s5656_s9 = sld [smem:[#allocation2 + $0x28]] }
 0x1a1   :  { %v1360_v19 = vmul.f32 %v1359_v54, %v1341_v5  ;;  %v1370_v6 = vmul.f32 %v1369_v10, %v1342_v23  ;;  %v1375_v42 = vmul.f32 %v1374_v56, %v1342_v23  ;;  %v1380_v18 = vmul.f32 %v1379_v63, %v1342_v23 }
 0x1a2   :  { %v5426_v34 = vsel %vm1422_vm12, %v1409_v37, %v1415_v41  ;;  %v1347_v48 = vadd.f32 %v1345_v26, %v5166_v15  ;;  %v1352_v29 = vadd.f32 %v1350_v49, %v5168_v44  ;;  %v1357_v60 = vadd.f32 %v1355_v43, %v5170_v46 }
 0x1a3   :  { %v1362_v28 = vadd.f32 %v1360_v19, %v5228_v50  ;;  %v1385_v15 = vmul.f32 %v1384_v4, %v5304_v21  ;;  %v1390_v44 = vmul.f32 %v1389_v0, %v5304_v21  ;;  %v1400_v37 = vmul.f32 %v1399_v32, %v5304_v21 }
 0x1a4   :  { %v1367_v45 = vadd.f32 %v1365_v51, %v1347_v48  ;;  %v1372_v27 = vadd.f32 %v1370_v6, %v1352_v29  ;;  %v1377_v52 = vadd.f32 %v1375_v42, %v1357_v60 }
 0x1a5   :  { %1752 = vrot.lane.b32.xlu1 %v5311_v40, %s3104_s10  ;;  %v1382_v14 = vadd.f32 %v1380_v18, %v1362_v28 }
 0x1a6   :  { %1750 = vrot.lane.b32.xlu0 %v5318_v16, %s3104_s10  ;;  %1754 = vrot.lane.b32.xlu2 %v5327_v1, %s3104_s10  ;;  %v1334_v46 = vpop.permute.xlu1 %1333  ;;  %v1332_v50 = vpop.permute.xlu0 %1331 }
 0x1a7   :  { %v1339_v23 = vsel %vm1337_vm11, %v1328_v61, %v1334_v46  ;;  %v1338_v5 = vsel %vm1337_vm11, %v1326_v57, %v1332_v50  ;;  %v1421_v51 = vpop.permute.xlu2 %1420  ;;  %v5460_v61 = vadd.f32 %v1385_v15, %v1367_v45  ;;  %v1391_v57 = vmul.f32 %v1389_v0, %v5353_v35 }
 0x1a8   :  { %v1366_v26 = vmul.f32 %v1364_v53, %v1339_v23  ;;  %v1371_v49 = vmul.f32 %v1369_v10, %v1339_v23  ;;  %v1376_v43 = vmul.f32 %v1374_v56, %v1339_v23  ;;  %v1381_v19 = vmul.f32 %v1379_v63, %v1339_v23 }
 0x1a9   :  { %v1346_v6 = vmul.f32 %v1344_v3, %v1338_v5  ;;  %v1351_v42 = vmul.f32 %v1349_v2, %v1338_v5  ;;  %v1356_v18 = vmul.f32 %v1354_v12, %v1338_v5  ;;  %v1361_v48 = vmul.f32 %v1359_v54, %v1338_v5 }
 0x1aa   :  { %v5456_v21 = vsel %vm1422_vm12, %v1415_v41, %v1421_v51  ;;  %v5462_v53 = vadd.f32 %v1390_v44, %v1372_v27  ;;  %v5464_v10 = vadd.f32 %v1395_v30, %v1377_v52  ;;  %v1386_v54 = vmul.f32 %v1384_v4, %v5353_v35 }
 0x1ab   :  { %v1348_v56 = vadd.f32 %v1346_v6, %v5230_v8  ;;  %v1353_v3 = vadd.f32 %v1351_v42, %v5232_v7  ;;  %v1358_v2 = vadd.f32 %v1356_v18, %v5234_v58  ;;  %v1363_v12 = vadd.f32 %v1361_v48, %v5248_v20 }
 0x1ac   :  { %v1396_v63 = vmul.f32 %v1394_v33, %v5353_v35  ;;  %v1401_v41 = vmul.f32 %v1399_v32, %v5353_v35  ;;  %v5490_v60 = vadd.f32 %v1400_v37, %v1382_v14  ;;  %v1449_v45 = vstv %s5450_s27  ;;  %s5676_s27 = sld [smem:[#allocation2 + $0xf]] }
 0x1ad   :  { %1758 = vrot.lane.b32.xlu1 %v5191_v24, %s3104_s10  ;;  %v1368_v8 = vadd.f32 %v1366_v26, %v1348_v56  ;;  %v1373_v7 = vadd.f32 %v1371_v49, %v1353_v3  ;;  %v1378_v58 = vadd.f32 %v1376_v43, %v1358_v2  ;;  %v1383_v20 = vadd.f32 %v1381_v19, %v1363_v12 }
 0x1ae   :  { %1756 = vrot.lane.b32.xlu0 %v5198_v38, %s3104_s10  ;;  %1760 = vrot.lane.b32.xlu2 %v5209_v62, %s3104_s10  ;;  %v1407_v4 = vpop.permute.xlu1 %1406  ;;  %v1405_v0 = vpop.permute.xlu0 %1404  ;;  %v1454_v27 = vstv %s5452_s23  ;;  %v1459_v52 = vstv %s5458_s29  ;;  %s5658_s10 = sld [smem:[#allocation2 + $0x73]] }
 0x1af   :  { %v1494_v29 = vpop.permute.xlu2 %1493  ;;  %v5492_v28 = vadd.f32 %v1386_v54, %v1368_v8  ;;  %v5494_v33 = vadd.f32 %v1391_v57, %v1373_v7  ;;  %v5496_v35 = vadd.f32 %v1396_v63, %v1378_v58  ;;  %v5500_v32 = vadd.f32 %v1401_v41, %v1383_v20  ;;  %s5685_s23 = sld [smem:[#allocation2 + $0x5a]] }
 0x1b0   :  { %v1429_v15 = vstv %s5470_s2  ;;  %v1434_v44 = vstv %s5479_s7  ;;  %v1439_v46 = vstv %s5481_s18  ;;  %v1444_v50 = vstv %s5486_s20  ;;  %s5687_s29 = sld [smem:[#allocation2 + $0xa5]] }
 0x1b1   :  { %v1464_v37 = vstv %s5488_s30  ;;  %v1469_v26 = vstv %s5448_s24  ;;  %v1474_v49 = vstv %s5498_s11  ;;  %v1479_v8 = vstv %s5502_s4  ;;  %s5664_s24 = sld [smem:[#allocation2 + $0xbe]] }
 0x1b2   :  { %v1484_v7 = vstv %s5504_s22  ;;  %s5692_s2 = sld [smem:[#allocation2 + $0xf0]] }
 0x1b3   :  { %s5694_s7 = sld [smem:[#allocation2 + $0x109]] }
 0x1b4   :  { %s5704_s18 = sld [smem:[#allocation2 + $0x8c]] }
 0x1b5   :  { %1831 = vrot.lane.b32.xlu1 %v5269_v9, %s3105_s28  ;;  %s5708_s20 = sld [smem:[#allocation2 + $0xd7]] }
 0x1b6   :  { %1829 = vrot.lane.b32.xlu0 %v5276_v11, %s3105_s28  ;;  %1833 = vrot.lane.b32.xlu2 %v5287_v25, %s3105_s28  ;;  %v1413_v14 = vpop.permute.xlu1 %1412  ;;  %v1411_v30 = vpop.permute.xlu0 %1410  ;;  %s5710_s30 = sld [smem:[#allocation2 + $0x122]] }
 0x1b7   :  { %v1427_v23 = vsel %vm1422_vm12, %v1407_v4, %v1413_v14  ;;  %v1426_v5 = vsel %vm1422_vm12, %v1405_v0, %v1411_v30  ;;  %v1500_v51 = vpop.permute.xlu2 %1499  ;;  %v1480_v0 = vmul.f32 %v1479_v8, %v5426_v34  ;;  %s5757_s11 = sld [smem:[#allocation2 + $0x42]] }
 0x1b8   :  { %v1450_v43 = vmul.f32 %v1449_v45, %v1427_v23  ;;  %v1430_v19 = vmul.f32 %v1429_v15, %v1426_v5  ;;  %v1435_v6 = vmul.f32 %v1434_v44, %v1426_v5  ;;  %v1440_v42 = vmul.f32 %v1439_v46, %v1426_v5  ;;  %s5759_s4 = sld [smem:[#allocation2 + $0x29]] }
 0x1b9   :  { %v1445_v18 = vmul.f32 %v1444_v50, %v1426_v5  ;;  %v1455_v48 = vmul.f32 %v1454_v27, %v1427_v23  ;;  %v1460_v56 = vmul.f32 %v1459_v52, %v1427_v23  ;;  %v1465_v3 = vmul.f32 %v1464_v37, %v1427_v23  ;;  %s5761_s22 = sld [smem:[#allocation2 + $0x74]] }
 0x1ba   :  { %v5529_v2 = vsel %vm1507_vm13, %v1494_v29, %v1500_v51  ;;  %v1432_v12 = vadd.f32 %v1430_v19, %v5357_v55  ;;  %v1437_v54 = vadd.f32 %v1435_v6, %v5359_v13  ;;  %v1442_v57 = vadd.f32 %v1440_v42, %v5361_v22 }
 0x1bb   :  { %v1447_v63 = vadd.f32 %v1445_v18, %v5387_v59  ;;  %v1470_v55 = vmul.f32 %v1469_v26, %v5426_v34  ;;  %v1475_v13 = vmul.f32 %v1474_v49, %v5426_v34  ;;  %v1485_v29 = vmul.f32 %v1484_v7, %v5426_v34 }
 0x1bc   :  { %v1452_v58 = vadd.f32 %v1450_v43, %v1432_v12  ;;  %v1457_v20 = vadd.f32 %v1455_v48, %v1437_v54  ;;  %v1462_v41 = vadd.f32 %v1460_v56, %v1442_v57 }
 0x1bd   :  { %1837 = vrot.lane.b32.xlu1 %v5311_v40, %s3105_s28  ;;  %v1467_v4 = vadd.f32 %v1465_v3, %v1447_v63 }
 0x1be   :  { %1835 = vrot.lane.b32.xlu0 %v5318_v16, %s3105_s28  ;;  %1839 = vrot.lane.b32.xlu2 %v5327_v1, %s3105_s28  ;;  %v1419_v22 = vpop.permute.xlu1 %1418  ;;  %v1417_v59 = vpop.permute.xlu0 %1416 }
 0x1bf   :  { %v1424_v23 = vsel %vm1422_vm12, %v1413_v14, %v1419_v22  ;;  %v1423_v5 = vsel %vm1422_vm12, %v1411_v30, %v1417_v59  ;;  %v1506_v43 = vpop.permute.xlu2 %1505  ;;  %v5563_v14 = vadd.f32 %v1470_v55, %v1452_v58  ;;  %v1476_v30 = vmul.f32 %v1474_v49, %v5456_v21 }
 0x1c0   :  { %v1451_v19 = vmul.f32 %v1449_v45, %v1424_v23  ;;  %v1456_v6 = vmul.f32 %v1454_v27, %v1424_v23  ;;  %v1461_v42 = vmul.f32 %v1459_v52, %v1424_v23  ;;  %v1466_v18 = vmul.f32 %v1464_v37, %v1424_v23 }
 0x1c1   :  { %v1431_v48 = vmul.f32 %v1429_v15, %v1423_v5  ;;  %v1436_v56 = vmul.f32 %v1434_v44, %v1423_v5  ;;  %v1441_v3 = vmul.f32 %v1439_v46, %v1423_v5  ;;  %v1446_v12 = vmul.f32 %v1444_v50, %v1423_v5 }
 0x1c2   :  { %v5559_v34 = vsel %vm1507_vm13, %v1500_v51, %v1506_v43  ;;  %v5565_v45 = vadd.f32 %v1475_v13, %v1457_v20  ;;  %v5567_v27 = vadd.f32 %v1480_v0, %v1462_v41  ;;  %v1471_v50 = vmul.f32 %v1469_v26, %v5456_v21 }
 0x1c3   :  { %v1433_v52 = vadd.f32 %v1431_v48, %v5389_v47  ;;  %v1438_v15 = vadd.f32 %v1436_v56, %v5391_v36  ;;  %v1443_v44 = vadd.f32 %v1441_v3, %v5393_v31  ;;  %v1448_v46 = vadd.f32 %v1446_v12, %v5397_v17 }
 0x1c4   :  { %v1481_v37 = vmul.f32 %v1479_v8, %v5456_v21  ;;  %v1486_v51 = vmul.f32 %v1484_v7, %v5456_v21  ;;  %v5593_v57 = vadd.f32 %v1485_v29, %v1467_v4  ;;  %v1534_v58 = vstv %s5553_s25  ;;  %s5788_s25 = sld [smem:[#allocation2 + $0x5b]] }
 0x1c5   :  { %1843 = vrot.lane.b32.xlu1 %v5191_v24, %s3105_s28  ;;  %v1453_v47 = vadd.f32 %v1451_v19, %v1433_v52  ;;  %v1458_v36 = vadd.f32 %v1456_v6, %v1438_v15  ;;  %v1463_v31 = vadd.f32 %v1461_v42, %v1443_v44  ;;  %v1468_v17 = vadd.f32 %v1466_v18, %v1448_v46 }
 0x1c6   :  { %1841 = vrot.lane.b32.xlu0 %v5198_v38, %s3105_s28  ;;  %1845 = vrot.lane.b32.xlu2 %v5209_v62, %s3105_s28  ;;  %v1492_v26 = vpop.permute.xlu1 %1491  ;;  %v1490_v49 = vpop.permute.xlu0 %1489  ;;  %v1539_v20 = vstv %s5555_s15  ;;  %v1544_v41 = vstv %s5561_s16  ;;  %s5767_s28 = sld [smem:[#allocation2 + $0xbf]] }
 0x1c7   :  { %v1579_v54 = vpop.permute.xlu2 %1578  ;;  %v5595_v63 = vadd.f32 %v1471_v50, %v1453_v47  ;;  %v5597_v8 = vadd.f32 %v1476_v30, %v1458_v36  ;;  %v5599_v21 = vadd.f32 %v1481_v37, %v1463_v31  ;;  %v5603_v7 = vadd.f32 %v1486_v51, %v1468_v17  ;;  %s5790_s15 = sld [smem:[#allocation2 + $0xa6]] }
 0x1c8   :  { %v1514_v55 = vstv %s5573_s5  ;;  %v1519_v13 = vstv %s5582_s6  ;;  %v1524_v22 = vstv %s5584_s26  ;;  %v1529_v59 = vstv %s5589_s3  ;;  %s5800_s6 = sld [smem:[#allocation2 + $0xf1]] }
 0x1c9   :  { %v1549_v29 = vstv %s5591_s12  ;;  %v1554_v19 = vstv %s5551_s1  ;;  %v1559_v6 = vstv %s5601_s17  ;;  %v1564_v47 = vstv %s5605_s19  ;;  %s5779_s1 = sld [smem:[#allocation2 + $0x10]]  ;;  %s3108_s19 = smov 55  }
 0x1ca   :  { %v1569_v36 = vstv %s5607_s13  ;;  %s5802_s26 = sld [smem:[#allocation2 + $0x10a]] }
 0x1cb   :  { %s5812_s3 = sld [smem:[#allocation2 + $0x8d]] }
 0x1cc   :  { %s5816_s12 = sld [smem:[#allocation2 + $0xd8]] }
 0x1cd   :  { %1920 = vrot.lane.b32.xlu1 %v5318_v16, %s3106_s14  ;;  %s5818_s17 = sld [smem:[#allocation2 + $0x123]] }
 0x1ce   :  { %1914 = vrot.lane.b32.xlu0 %v5276_v11, %s3106_s14  ;;  %1926 = vrot.lane.b32.xlu2 %v5198_v38, %s3106_s14  ;;  %v1498_v4 = vpop.permute.xlu1 %1497  ;;  %v1496_v0 = vpop.permute.xlu0 %1495  ;;  %s5946_s16 = sld [smem:[#allocation2 + $0x124]] }
 0x1cf   :  { %v1512_v23 = vsel %vm1507_vm13, %v1492_v26, %v1498_v4  ;;  %v1511_v5 = vsel %vm1507_vm13, %v1490_v49, %v1496_v0  ;;  %v1585_v43 = vpop.permute.xlu2 %1584  ;;  %v1565_v49 = vmul.f32 %v1564_v47, %v5529_v2  ;;  %s6010_s13 = sld [smem:[#allocation2 + $0x2b]] }
 0x1d0   :  { %v1535_v42 = vmul.f32 %v1534_v58, %v1512_v23  ;;  %v1515_v18 = vmul.f32 %v1514_v55, %v1511_v5  ;;  %v1520_v48 = vmul.f32 %v1519_v13, %v1511_v5  ;;  %v1525_v56 = vmul.f32 %v1524_v22, %v1511_v5  ;;  %s6205_s5 = sld [smem:[#allocation2 + $0x10d]] }
 0x1d1   :  { %v1530_v3 = vmul.f32 %v1529_v59, %v1511_v5  ;;  %v1540_v12 = vmul.f32 %v1539_v20, %v1512_v23  ;;  %v1545_v52 = vmul.f32 %v1544_v41, %v1512_v23  ;;  %v1550_v15 = vmul.f32 %v1549_v29, %v1512_v23 }
 0x1d2   :  { %v5632_v44 = vsel %vm1592_vm14, %v1579_v54, %v1585_v43  ;;  %v1517_v46 = vadd.f32 %v1515_v18, %v5460_v61  ;;  %v1522_v50 = vadd.f32 %v1520_v48, %v5462_v53  ;;  %v1527_v30 = vadd.f32 %v1525_v56, %v5464_v10 }
 0x1d3   :  { %v1532_v37 = vadd.f32 %v1530_v3, %v5490_v60  ;;  %v1555_v61 = vmul.f32 %v1554_v19, %v5529_v2  ;;  %v1560_v53 = vmul.f32 %v1559_v6, %v5529_v2  ;;  %v1570_v54 = vmul.f32 %v1569_v36, %v5529_v2 }
 0x1d4   :  { %v1537_v31 = vadd.f32 %v1535_v42, %v1517_v46  ;;  %v1542_v17 = vadd.f32 %v1540_v12, %v1522_v50  ;;  %v1547_v51 = vadd.f32 %v1545_v52, %v1527_v30 }
 0x1d5   :  { %2005 = vrot.lane.b32.xlu1 %v5318_v16, %s3107_s21  ;;  %v1552_v26 = vadd.f32 %v1550_v15, %v1532_v37 }
 0x1d6   :  { %1999 = vrot.lane.b32.xlu0 %v5276_v11, %s3107_s21  ;;  %2011 = vrot.lane.b32.xlu2 %v5198_v38, %s3107_s21  ;;  %v1504_v10 = vpop.permute.xlu1 %1503  ;;  %v1502_v60 = vpop.permute.xlu0 %1501 }
 0x1d7   :  { %v1509_v23 = vsel %vm1507_vm13, %v1498_v4, %v1504_v10  ;;  %v1508_v5 = vsel %vm1507_vm13, %v1496_v0, %v1502_v60  ;;  %v1591_v42 = vpop.permute.xlu2 %1590  ;;  %v5666_v4 = vadd.f32 %v1555_v61, %v1537_v31  ;;  %v1561_v0 = vmul.f32 %v1559_v6, %v5559_v34 }
 0x1d8   :  { %v1536_v38 = vmul.f32 %v1534_v58, %v1509_v23  ;;  %v1541_v18 = vmul.f32 %v1539_v20, %v1509_v23  ;;  %v1546_v48 = vmul.f32 %v1544_v41, %v1509_v23  ;;  %v1551_v56 = vmul.f32 %v1549_v29, %v1509_v23 }
 0x1d9   :  { %v1516_v3 = vmul.f32 %v1514_v55, %v1508_v5  ;;  %v1521_v12 = vmul.f32 %v1519_v13, %v1508_v5  ;;  %v1526_v52 = vmul.f32 %v1524_v22, %v1508_v5  ;;  %v1531_v15 = vmul.f32 %v1529_v59, %v1508_v5 }
 0x1da   :  { %v5662_v2 = vsel %vm1592_vm14, %v1585_v43, %v1591_v42  ;;  %v5668_v58 = vadd.f32 %v1560_v53, %v1542_v17  ;;  %v5670_v20 = vadd.f32 %v1565_v49, %v1547_v51  ;;  %v1556_v59 = vmul.f32 %v1554_v19, %v5559_v34 }
 0x1db   :  { %v1518_v41 = vadd.f32 %v1516_v3, %v5492_v28  ;;  %v1523_v55 = vadd.f32 %v1521_v12, %v5494_v33  ;;  %v1528_v13 = vadd.f32 %v1526_v52, %v5496_v35  ;;  %v1533_v22 = vadd.f32 %v1531_v15, %v5500_v32 }
 0x1dc   :  { %v1566_v29 = vmul.f32 %v1564_v47, %v5559_v34  ;;  %v1571_v43 = vmul.f32 %v1569_v36, %v5559_v34  ;;  %v5696_v50 = vadd.f32 %v1570_v54, %v1552_v26  ;;  %v1619_v36 = vstv %s5656_s9  ;;  %s6030_s9 = sld [smem:[#allocation2 + $0x12]] }
 0x1dd   :  { %1922 = vrot.lane.b32.xlu1 %v5311_v40, %s3106_s14  ;;  %v1538_v28 = vadd.f32 %v1536_v38, %v1518_v41  ;;  %v1543_v33 = vadd.f32 %v1541_v18, %v1523_v55  ;;  %v1548_v35 = vadd.f32 %v1546_v48, %v1528_v13  ;;  %v1553_v32 = vadd.f32 %v1551_v56, %v1533_v22 }
 0x1de   :  { %1916 = vrot.lane.b32.xlu0 %v5269_v9, %s3106_s14  ;;  %1928 = vrot.lane.b32.xlu2 %v5191_v24, %s3106_s14  ;;  %v1577_v19 = vpop.permute.xlu1 %1576  ;;  %v1575_v6 = vpop.permute.xlu0 %1574  ;;  %v1624_v31 = vstv %s5658_s10  ;;  %v1629_v17 = vstv %s5664_s24  ;;  %s5869_s10 = sld [smem:[#allocation2 + $0x43]] }
 0x1df   :  { %v5698_v30 = vadd.f32 %v1556_v59, %v1538_v28  ;;  %v5700_v37 = vadd.f32 %v1561_v0, %v1543_v33  ;;  %v5702_v34 = vadd.f32 %v1566_v29, %v1548_v35  ;;  %v5706_v47 = vadd.f32 %v1571_v43, %v1553_v32  ;;  %s5877_s24 = sld [smem:[#allocation2 + $0x8e]] }
 0x1e0   :  { %v1664_v46 = vpop.permute.xlu2 %1663  ;;  %v1599_v26 = vstv %s5676_s27  ;;  %v1604_v61 = vstv %s5685_s23  ;;  %v1609_v53 = vstv %s5687_s29  ;;  %v1614_v10 = vstv %s5692_s2  ;;  %s5879_s27 = sld [smem:[#allocation2 + $0x2a]] }
 0x1e1   :  { %v1634_v49 = vstv %s5694_s7  ;;  %v1639_v23 = vstv %s5654_s8  ;;  %v1649_v22 = vstv %s5708_s20  ;;  %v1654_v59 = vstv %s5710_s30  ;;  %s5881_s23 = sld [smem:[#allocation2 + $0x75]]  ;;  %s3110_s7 = smov 53  }
 0x1e2   :  { %v1650_v35 = vmul.f32 %v1649_v22, %v5632_v44  ;;  %v1655_v32 = vmul.f32 %v1654_v59, %v5632_v44  ;;  %s5887_s29 = sld [smem:[#allocation2 + $0xc0]]  ;;  %s3111_s30 = smov 52  }
 0x1e3   :  { %s5899_s2 = sld [smem:[#allocation2 + $0x11]] }
 0x1e4   :  { %s6018_s8 = sld [smem:[#allocation2 + $0xc1]] }
 0x1e5   :  { %2007 = vrot.lane.b32.xlu1 %v5311_v40, %s3107_s21  ;;  %s6097_s20 = sld [smem:[#allocation2 + $0xa9]] }
 0x1e6   :  { %2001 = vrot.lane.b32.xlu0 %v5269_v9, %s3107_s21  ;;  %2013 = vrot.lane.b32.xlu2 %v5191_v24, %s3107_s21  ;;  %v1583_v51 = vpop.permute.xlu1 %1582  ;;  %v1581_v60 = vpop.permute.xlu0 %1580  ;;  %v1644_v24 = vstv %s5704_s18  ;;  %s6091_s18 = sld [smem:[#allocation2 + $0x5e]] }
 0x1e7   :  { %v1597_v40 = vsel %vm1592_vm14, %v1577_v19, %v1583_v51  ;;  %v1596_v9 = vsel %vm1592_vm14, %v1575_v6, %v1581_v60 }
 0x1e8   :  { %v1670_v54 = vpop.permute.xlu2 %1669  ;;  %v1620_v5 = vmul.f32 %v1619_v36, %v1597_v40  ;;  %v1600_v42 = vmul.f32 %v1599_v26, %v1596_v9  ;;  %v1605_v38 = vmul.f32 %v1604_v61, %v1596_v9  ;;  %v1610_v18 = vmul.f32 %v1609_v53, %v1596_v9 }
 0x1e9   :  { %v1615_v48 = vmul.f32 %v1614_v10, %v1596_v9  ;;  %v1625_v56 = vmul.f32 %v1624_v31, %v1597_v40  ;;  %v1630_v3 = vmul.f32 %v1629_v17, %v1597_v40  ;;  %v1635_v12 = vmul.f32 %v1634_v49, %v1597_v40 }
 0x1ea   :  { %v5735_v52 = vsel %vm1677_vm15, %v1664_v46, %v1670_v54  ;;  %v1602_v15 = vadd.f32 %v1600_v42, %v5563_v14  ;;  %v1607_v41 = vadd.f32 %v1605_v38, %v5565_v45  ;;  %v1612_v55 = vadd.f32 %v1610_v18, %v5567_v27 }
 0x1eb   :  { %v1617_v13 = vadd.f32 %v1615_v48, %v5593_v57  ;;  %v1640_v14 = vmul.f32 %v1639_v23, %v5632_v44  ;;  %v1645_v45 = vmul.f32 %v1644_v24, %v5632_v44 }
 0x1ec   :  { %v1622_v0 = vadd.f32 %v1620_v5, %v1602_v15  ;;  %v1627_v29 = vadd.f32 %v1625_v56, %v1607_v41  ;;  %v1632_v28 = vadd.f32 %v1630_v3, %v1612_v55  ;;  %v1704_v15 = vstv %s5759_s4  ;;  %s5920_s4 = sld [smem:[#allocation2 + $0xa7]] }
 0x1ed   :  { %1924 = vrot.lane.b32.xlu1 %v5327_v1, %s3106_s14  ;;  %v1637_v33 = vadd.f32 %v1635_v12, %v1617_v13  ;;  %v1709_v41 = vstv %s5761_s22  ;;  %v1714_v55 = vstv %s5767_s28  ;;  %v5830_v13 = vld [vmem:[%s6864_s0 + $0x10] sm:$0xff]  ;;  %s6137_s22 = sld [smem:[#allocation2 + $0x5f]] }
 0x1ee   :  { %1918 = vrot.lane.b32.xlu0 %v5287_v25, %s3106_s14  ;;  %1930 = vrot.lane.b32.xlu2 %v5209_v62, %s3106_s14  ;;  %v1589_v27 = vpop.permute.xlu1 %1588  ;;  %v1587_v57 = vpop.permute.xlu0 %1586  ;;  %s6012_s14 = sld [smem:[#allocation2 + $0x76]] }
 0x1ef   :  { %v1594_v43 = vsel %vm1592_vm14, %v1583_v51, %v1589_v27  ;;  %v1593_v19 = vsel %vm1592_vm14, %v1581_v60, %v1587_v57  ;;  %v5769_v51 = vadd.f32 %v1640_v14, %v1622_v0  ;;  %v1646_v60 = vmul.f32 %v1644_v24, %v5662_v2  ;;  %s6147_s28 = sld [smem:[#allocation2 + $0xaa]] }
 0x1f0   :  { %v1676_v6 = vpop.permute.xlu2 %1675  ;;  %v1621_v62 = vmul.f32 %v1619_v36, %v1594_v43  ;;  %v1626_v46 = vmul.f32 %v1624_v31, %v1594_v43  ;;  %v1631_v40 = vmul.f32 %v1629_v17, %v1594_v43  ;;  %v1636_v9 = vmul.f32 %v1634_v49, %v1594_v43 }
 0x1f1   :  { %v1601_v5 = vmul.f32 %v1599_v26, %v1593_v19  ;;  %v1606_v42 = vmul.f32 %v1604_v61, %v1593_v19  ;;  %v1611_v38 = vmul.f32 %v1609_v53, %v1593_v19  ;;  %v1616_v18 = vmul.f32 %v1614_v10, %v1593_v19 }
 0x1f2   :  { %v5765_v44 = vsel %vm1677_vm15, %v1670_v54, %v1676_v6  ;;  %v5771_v36 = vadd.f32 %v1645_v45, %v1627_v29  ;;  %v5773_v31 = vadd.f32 %v1650_v35, %v1632_v28  ;;  %v1641_v10 = vmul.f32 %v1639_v23, %v5662_v2  ;;  %v5795_v54 = vld [vmem:[%s6864_s0 + $0x40] sm:$0xff] }
 0x1f3   :  { %v1603_v17 = vadd.f32 %v1601_v5, %v5595_v63  ;;  %v1608_v26 = vadd.f32 %v1606_v42, %v5597_v8  ;;  %v1613_v61 = vadd.f32 %v1611_v38, %v5599_v21  ;;  %v1618_v53 = vadd.f32 %v1616_v18, %v5603_v7 }
 0x1f4   :  { %v1651_v49 = vmul.f32 %v1649_v22, %v5662_v2  ;;  %v5804_v48 = vadd.f32 %v1655_v32, %v1637_v33  ;;  %v1689_v0 = vstv %s5788_s25  ;;  %v1694_v29 = vstv %s5790_s15  ;;  %s5932_s25 = sld [smem:[#allocation2 + $0x10b]] }
 0x1f5   :  { %2009 = vrot.lane.b32.xlu1 %v5327_v1, %s3107_s21  ;;  %v1623_v63 = vadd.f32 %v1621_v62, %v1603_v17  ;;  %v1628_v8 = vadd.f32 %v1626_v46, %v1608_v26  ;;  %v1633_v21 = vadd.f32 %v1631_v40, %v1613_v61  ;;  %v1638_v7 = vadd.f32 %v1636_v9, %v1618_v53  ;;  %v5861_v53 = vld [vmem:[%s6864_s0] sm:$0xff]  ;;  %s5942_s15 = sld [smem:[#allocation2 + $0xd9]] }
 0x1f6   :  { %2003 = vrot.lane.b32.xlu0 %v5287_v25, %s3107_s21  ;;  %2015 = vrot.lane.b32.xlu2 %v5795_v54, %s3107_s21  ;;  %v1656_v1 = vmul.f32 %v1654_v59, %v5662_v2  ;;  %v1684_v59 = vstv %s5779_s1  ;;  %v1699_v28 = vstv %s5800_s6  ;;  %s3109_s21 = smov 54   ;;  %s5930_s1 = sld [smem:[#allocation2 + $0xf2]] }
 0x1f7   :  { %v1662_v23 = vpop.permute.xlu1 %1661  ;;  %v5806_v56 = vadd.f32 %v1641_v10, %v1623_v63  ;;  %v5808_v3 = vadd.f32 %v1646_v60, %v1628_v8  ;;  %v5810_v12 = vadd.f32 %v1651_v49, %v1633_v21  ;;  %v1724_v57 = vstv %s5757_s11  ;;  %s5918_s11 = sld [smem:[#allocation2 + $0x5c]] }
 0x1f8   :  { %v1660_v25 = vpop.permute.xlu0 %1659  ;;  %v1749_v24 = vpop.permute.xlu2 %1748  ;;  %v5814_v2 = vadd.f32 %v1656_v1, %v1638_v7  ;;  %v1729_v35 = vstv %s5812_s3  ;;  %v1734_v26 = vstv %s5816_s12  ;;  %v1739_v61 = vstv %s5818_s17  ;;  %s5993_s12 = sld [smem:[#allocation2 + $0x44]] }
 0x1f9   :  { %v1730_v60 = vmul.f32 %v1729_v35, %v5735_v52  ;;  %v1735_v63 = vmul.f32 %v1734_v26, %v5735_v52  ;;  %v1740_v8 = vmul.f32 %v1739_v61, %v5735_v52  ;;  %s6000_s17 = sld [smem:[#allocation2 + $0x8f]] }
 0x1fa   :  { %s6224_s6 = sld [smem:[#allocation2 + $0x2d]] }
 0x1fb   :  { %s6245_s3 = sld [smem:[#allocation2 + $0xc3]] }
 0x1fd   :  { %2090 = vrot.lane.b32.xlu1 %v5318_v16, %s3108_s19 }
 0x1fe   :  { %2084 = vrot.lane.b32.xlu0 %v5276_v11, %s3108_s19  ;;  %2096 = vrot.lane.b32.xlu2 %v5830_v13, %s3108_s19  ;;  %v1719_v11 = vstv %s5802_s26  ;;  %s6238_s26 = sld [smem:[#allocation2 + $0x78]] }
 0x1ff   :  { %v1668_v22 = vpop.permute.xlu1 %1667 }
 0x200   :  { %v1666_v33 = vpop.permute.xlu0 %1665  ;;  %v1682_v14 = vsel %vm1677_vm15, %v1662_v23, %v1668_v22  ;;  %v1755_v27 = vpop.permute.xlu2 %1754 }
 0x201   :  { %v1681_v45 = vsel %vm1677_vm15, %v1660_v25, %v1666_v33  ;;  %v1705_v32 = vmul.f32 %v1704_v15, %v1682_v14  ;;  %v1710_v46 = vmul.f32 %v1709_v41, %v1682_v14  ;;  %v1715_v40 = vmul.f32 %v1714_v55, %v1682_v14 }
 0x202   :  { %v1685_v43 = vmul.f32 %v1684_v59, %v1681_v45  ;;  %v1690_v19 = vmul.f32 %v1689_v0, %v1681_v45  ;;  %v1695_v6 = vmul.f32 %v1694_v29, %v1681_v45  ;;  %v1700_v62 = vmul.f32 %v1699_v28, %v1681_v45 }
 0x203   :  { %v1720_v9 = vmul.f32 %v1719_v11, %v1682_v14  ;;  %v5848_v5 = vsel %vm1762_vm0, %v1749_v24, %v1755_v27 }
 0x204   :  { %v1687_v42 = vadd.f32 %v1685_v43, %v5666_v4  ;;  %v1692_v38 = vadd.f32 %v1690_v19, %v5668_v58  ;;  %v1697_v18 = vadd.f32 %v1695_v6, %v5670_v20  ;;  %v1702_v17 = vadd.f32 %v1700_v62, %v5696_v50 }
 0x205   :  { %2175 = vrot.lane.b32.xlu1 %v5318_v16, %s3109_s21  ;;  %v1725_v50 = vmul.f32 %v1724_v57, %v5735_v52  ;;  %v1741_v6 = vmul.f32 %v1739_v61, %v5765_v44  ;;  %v1799_v61 = vstv %s5887_s29  ;;  %s6331_s29 = sld [smem:[#allocation2 + $0xf6]] }
 0x206   :  { %2169 = vrot.lane.b32.xlu0 %v5861_v53, %s3109_s21  ;;  %v1707_v4 = vadd.f32 %v1705_v32, %v1687_v42  ;;  %v1712_v58 = vadd.f32 %v1710_v46, %v1692_v38  ;;  %v1717_v10 = vadd.f32 %v1715_v40, %v1697_v18  ;;  %v1722_v20 = vadd.f32 %v1720_v9, %v1702_v17 }
 0x207   :  { %2181 = vrot.lane.b32.xlu2 %v5830_v13, %s3109_s21  ;;  %v1674_v16 = vpop.permute.xlu1 %1673  ;;  %v1789_v17 = vstv %s5879_s27  ;;  %s6045_s27 = sld [smem:[#allocation2 + $0xf3]] }
 0x208   :  { %v1672_v49 = vpop.permute.xlu0 %1671  ;;  %v1679_v21 = vsel %vm1677_vm15, %v1668_v22, %v1674_v16  ;;  %v1761_v1 = vpop.permute.xlu2 %1760  ;;  %v5889_v22 = vadd.f32 %v1725_v50, %v1707_v4  ;;  %v5934_v9 = vadd.f32 %v1740_v8, %v1722_v20  ;;  %v1779_v20 = vstv %s5920_s4  ;;  %s6127_s4 = sld [smem:[#allocation2 + $0x14]] }
 0x209   :  { %v1678_v7 = vsel %vm1677_vm15, %v1666_v33, %v1672_v49  ;;  %v1706_v23 = vmul.f32 %v1704_v15, %v1679_v21  ;;  %v1711_v25 = vmul.f32 %v1709_v41, %v1679_v21  ;;  %v1716_v24 = vmul.f32 %v1714_v55, %v1679_v21 }
 0x20a   :  { %v1721_v14 = vmul.f32 %v1719_v11, %v1679_v21  ;;  %v1686_v45 = vmul.f32 %v1684_v59, %v1678_v7  ;;  %v1691_v32 = vmul.f32 %v1689_v0, %v1678_v7  ;;  %v1696_v43 = vmul.f32 %v1694_v29, %v1678_v7 }
 0x20b   :  { %v1701_v19 = vmul.f32 %v1699_v28, %v1678_v7  ;;  %v5885_v52 = vsel %vm1762_vm0, %v1755_v27, %v1761_v1  ;;  %v5891_v15 = vadd.f32 %v1730_v60, %v1712_v58  ;;  %v5893_v41 = vadd.f32 %v1735_v63, %v1717_v10  ;;  %v5907_v27 = vld [vmem:[%s6864_s0 + $0x20] sm:$0xff] }
 0x20c   :  { %v1688_v55 = vadd.f32 %v1686_v45, %v5698_v30  ;;  %v1693_v59 = vadd.f32 %v1691_v32, %v5700_v37  ;;  %v1698_v0 = vadd.f32 %v1696_v43, %v5702_v34  ;;  %v1726_v28 = vmul.f32 %v1724_v57, %v5765_v44  ;;  %v5914_v30 = vld [vmem:[%s6864_s0 + $0x18] sm:$0xff] }
 0x20d   :  { %v1703_v29 = vadd.f32 %v1701_v19, %v5706_v47  ;;  %v1731_v33 = vmul.f32 %v1729_v35, %v5765_v44  ;;  %v1736_v11 = vmul.f32 %v1734_v26, %v5765_v44  ;;  %2092 = vrot.lane.b32.xlu1 %v5907_v27, %s3108_s19  ;;  %v5925_v35 = vld [vmem:[%s6864_s0 + $0x28] sm:$0xff]  ;;  %v1794_v26 = vstv %s5881_s23  ;;  %s6049_s23 = sld [smem:[#allocation2 + $0x10c]] }
 0x20e   :  { %2086 = vrot.lane.b32.xlu0 %v5914_v30, %s3108_s19  ;;  %v1708_v37 = vadd.f32 %v1706_v23, %v1688_v55  ;;  %v1713_v34 = vadd.f32 %v1711_v25, %v1693_v59  ;;  %v1718_v47 = vadd.f32 %v1716_v24, %v1698_v0  ;;  %v1769_v58 = vstv %s5899_s2  ;;  %s6340_s2 = sld [smem:[#allocation2 + $0x16]] }
 0x20f   :  { %v1723_v57 = vadd.f32 %v1721_v14, %v1703_v29  ;;  %2098 = vrot.lane.b32.xlu2 %v5925_v35, %s3108_s19  ;;  %v1747_v62 = vpop.permute.xlu1 %1746  ;;  %v1774_v10 = vstv %s5918_s11  ;;  %v1784_v50 = vstv %s5930_s1  ;;  %v1804_v16 = vstv %s5932_s25  ;;  %s6104_s11 = sld [smem:[#allocation2 + $0xf4]] }
 0x210   :  { %v1745_v46 = vpop.permute.xlu0 %1744  ;;  %v1834_v40 = vpop.permute.xlu2 %1833  ;;  %v5936_v42 = vadd.f32 %v1726_v28, %v1708_v37  ;;  %v5938_v38 = vadd.f32 %v1731_v33, %v1713_v34  ;;  %v5940_v44 = vadd.f32 %v1736_v11, %v1718_v47  ;;  %v1809_v21 = vstv %s5869_s10  ;;  %v5982_v11 = vld [vmem:[%s6864_s0 + $0x38] sm:$0xff]  ;;  %v5989_v37 = vld [vmem:[%s6864_s0 + $0x30] sm:$0xff]  ;;  %s6039_s10 = sld [smem:[#allocation2 + $0x5d]] }
 0x211   :  { %v5944_v18 = vadd.f32 %v1741_v6, %v1723_v57  ;;  %v1814_v7 = vstv %s5877_s24  ;;  %v1819_v1 = vstv %s5942_s15  ;;  %v1824_v33 = vstv %s5946_s16  ;;  %s6041_s24 = sld [smem:[#allocation2 + $0xa8]] }
 0x212   :  { %v1810_v34 = vmul.f32 %v1809_v21, %v5848_v5  ;;  %v1815_v47 = vmul.f32 %v1814_v7, %v5848_v5  ;;  %v1820_v57 = vmul.f32 %v1819_v1, %v5848_v5  ;;  %s6149_s1 = sld [smem:[#allocation2 + $0xf5]] }
 0x213   :  { %s6178_s25 = sld [smem:[#allocation2 + $0x2c]] }
 0x214   :  { %s6192_s15 = sld [smem:[#allocation2 + $0x77]] }
 0x215   :  { %2177 = vrot.lane.b32.xlu1 %v5907_v27, %s3109_s21  ;;  %s6200_s16 = sld [smem:[#allocation2 + $0xc2]] }
 0x216   :  { %2171 = vrot.lane.b32.xlu0 %v5914_v30, %s3109_s21 }
 0x217   :  { %2183 = vrot.lane.b32.xlu2 %v5925_v35, %s3109_s21  ;;  %v1753_v4 = vpop.permute.xlu1 %1752 }
 0x218   :  { %v1751_v60 = vpop.permute.xlu0 %1750  ;;  %v1767_v49 = vsel %vm1762_vm0, %v1747_v62, %v1753_v4  ;;  %v1840_v8 = vpop.permute.xlu2 %1839 }
 0x219   :  { %v1766_v63 = vsel %vm1762_vm0, %v1745_v46, %v1751_v60  ;;  %v1790_v23 = vmul.f32 %v1789_v17, %v1767_v49  ;;  %v1795_v32 = vmul.f32 %v1794_v26, %v1767_v49  ;;  %v1800_v43 = vmul.f32 %v1799_v61, %v1767_v49 }
 0x21a   :  { %v1770_v25 = vmul.f32 %v1769_v58, %v1766_v63  ;;  %v1775_v24 = vmul.f32 %v1774_v10, %v1766_v63  ;;  %v1780_v14 = vmul.f32 %v1779_v20, %v1766_v63  ;;  %v1785_v45 = vmul.f32 %v1784_v50, %v1766_v63 }
 0x21b   :  { %v1805_v19 = vmul.f32 %v1804_v16, %v1767_v49  ;;  %v5972_v55 = vsel %vm1847_vm1, %v1834_v40, %v1840_v8  ;;  %v1825_v46 = vmul.f32 %v1824_v33, %v5848_v5  ;;  %v1811_v40 = vmul.f32 %v1809_v21, %v5885_v52 }
 0x21c   :  { %v1772_v59 = vadd.f32 %v1770_v25, %v5769_v51  ;;  %v1777_v0 = vadd.f32 %v1775_v24, %v5771_v36  ;;  %v1782_v29 = vadd.f32 %v1780_v14, %v5773_v31  ;;  %v1787_v28 = vadd.f32 %v1785_v45, %v5804_v48 }
 0x21d   :  { %2094 = vrot.lane.b32.xlu1 %v5982_v11, %s3108_s19 }
 0x21e   :  { %2088 = vrot.lane.b32.xlu0 %v5989_v37, %s3108_s19  ;;  %v1792_v51 = vadd.f32 %v1790_v23, %v1772_v59  ;;  %v1797_v36 = vadd.f32 %v1795_v32, %v1777_v0  ;;  %v1802_v31 = vadd.f32 %v1800_v43, %v1782_v29  ;;  %v1807_v48 = vadd.f32 %v1805_v19, %v1787_v28 }
 0x21f   :  { %2100 = vrot.lane.b32.xlu2 %v5795_v54, %s3108_s19  ;;  %v1759_v6 = vpop.permute.xlu1 %1758  ;;  %s6008_s19 = sld [smem:[#allocation2 + $0xda]] }
 0x220   :  { %v1757_v62 = vpop.permute.xlu0 %1756  ;;  %v1764_v49 = vsel %vm1762_vm0, %v1753_v4, %v1759_v6  ;;  %v1846_v23 = vpop.permute.xlu2 %1845 }
 0x221   :  { %v1763_v63 = vsel %vm1762_vm0, %v1751_v60, %v1757_v62  ;;  %v1791_v25 = vmul.f32 %v1789_v17, %v1764_v49  ;;  %v1796_v24 = vmul.f32 %v1794_v26, %v1764_v49  ;;  %v1801_v14 = vmul.f32 %v1799_v61, %v1764_v49 }
 0x222   :  { %v1806_v45 = vmul.f32 %v1804_v16, %v1764_v49  ;;  %v1771_v32 = vmul.f32 %v1769_v58, %v1763_v63  ;;  %v1776_v43 = vmul.f32 %v1774_v10, %v1763_v63  ;;  %v1781_v5 = vmul.f32 %v1779_v20, %v1763_v63 }
 0x223   :  { %v1786_v19 = vmul.f32 %v1784_v50, %v1763_v63  ;;  %v6016_v4 = vsel %vm1847_vm1, %v1840_v8, %v1846_v23  ;;  %v6020_v60 = vadd.f32 %v1810_v34, %v1792_v51  ;;  %v6022_v17 = vadd.f32 %v1815_v47, %v1797_v36 }
 0x224   :  { %v6024_v26 = vadd.f32 %v1820_v57, %v1802_v31  ;;  %v1773_v61 = vadd.f32 %v1771_v32, %v5806_v56  ;;  %v1778_v58 = vadd.f32 %v1776_v43, %v5808_v3  ;;  %v1783_v10 = vadd.f32 %v1781_v5, %v5810_v12 }
 0x225   :  { %v1788_v20 = vadd.f32 %v1786_v19, %v5814_v2  ;;  %v1816_v50 = vmul.f32 %v1814_v7, %v5885_v52  ;;  %v1821_v16 = vmul.f32 %v1819_v1, %v5885_v52  ;;  %v1826_v8 = vmul.f32 %v1824_v33, %v5885_v52  ;;  %2179 = vrot.lane.b32.xlu1 %v5982_v11, %s3109_s21  ;;  %v3072_v33 = vld [vmem:[%s6864_s0 + $0x8] sm:$0xff]  ;;  %s6083_s0 = sld [smem:[#allocation2 + $0x13]] }
 0x226   :  { %2173 = vrot.lane.b32.xlu0 %v5989_v37, %s3109_s21  ;;  %v1793_v56 = vadd.f32 %v1791_v25, %v1773_v61  ;;  %v1798_v3 = vadd.f32 %v1796_v24, %v1778_v58  ;;  %v1803_v12 = vadd.f32 %v1801_v14, %v1783_v10  ;;  %v6047_v7 = vadd.f32 %v1825_v46, %v1807_v48 }
 0x227   :  { %v1808_v2 = vadd.f32 %v1806_v45, %v1788_v20  ;;  %2185 = vrot.lane.b32.xlu2 %v5795_v54, %s3109_s21  ;;  %v1832_v21 = vpop.permute.xlu1 %1831  ;;  %s6061_s21 = sld [smem:[#allocation2 + $0x125]]  ;;  %v1874_v51 = vstv %s6010_s13  ;;  %v1879_v36 = vstv %s6012_s14  ;;  %v1854_v48 = vstv %s6030_s9 }
 0x228   :  { %v1830_v52 = vpop.permute.xlu0 %1829  ;;  %v6051_v1 = vpop.permute.xlu2 %1926  ;;  %v6053_v59 = vadd.f32 %v1811_v40, %v1793_v56  ;;  %v6055_v0 = vadd.f32 %v1816_v50, %v1798_v3  ;;  %v6057_v29 = vadd.f32 %v1821_v16, %v1803_v12  ;;  %v1859_v34 = vstv %s6039_s10  ;;  %s6278_s13 = sld [smem:[#allocation2 + $0xdb]] }
 0x229   :  { %v6059_v28 = vadd.f32 %v1826_v8, %v1808_v2  ;;  %v1864_v47 = vstv %s6041_s24  ;;  %v1869_v57 = vstv %s6045_s27  ;;  %v1884_v62 = vstv %s6018_s8  ;;  %s6283_s14 = sld [smem:[#allocation2 + $0x126]] }
 0x22a   :  { %v1889_v46 = vstv %s6049_s23  ;;  %v1894_v23 = vstv %s5993_s12  ;;  %v1899_v25 = vstv %s6000_s17  ;;  %v1904_v24 = vstv %s6008_s19  ;;  %s6250_s12 = sld [smem:[#allocation2 + $0x10e]] }
 0x22b   :  { %v1895_v56 = vmul.f32 %v1894_v23, %v5972_v55  ;;  %v1900_v3 = vmul.f32 %v1899_v25, %v5972_v55  ;;  %v1905_v12 = vmul.f32 %v1904_v24, %v5972_v55  ;;  %s6265_s17 = sld [smem:[#allocation2 + $0x45]] }
 0x22c   :  { %s6271_s19 = sld [smem:[#allocation2 + $0x90]] }
 0x22d   :  { %2260 = vrot.lane.b32.xlu1 %v3072_v33, %s3110_s7  ;;  %v1909_v14 = vstv %s6061_s21  ;;  %s6298_s8 = sld [smem:[#allocation2 + $0x46]] }
 0x22e   :  { %2254 = vrot.lane.b32.xlu0 %v5861_v53, %s3110_s7  ;;  %v1910_v2 = vmul.f32 %v1909_v14, %v5972_v55  ;;  %v1944_v55 = vstv %s6091_s18  ;;  %s6304_s9 = sld [smem:[#allocation2 + $0x91]] }
 0x22f   :  { %2266 = vrot.lane.b32.xlu2 %v5830_v13, %s3110_s7  ;;  %v1838_v31 = vpop.permute.xlu1 %1837  ;;  %s6306_s10 = sld [smem:[#allocation2 + $0xdc]] }
 0x230   :  { %v1836_v6 = vpop.permute.xlu0 %1835  ;;  %v1852_v40 = vsel %vm1847_vm1, %v1832_v21, %v1838_v31  ;;  %v6085_v63 = vpop.permute.xlu2 %2011  ;;  %s6312_s24 = sld [smem:[#allocation2 + $0x127]] }
 0x231   :  { %v1851_v49 = vsel %vm1847_vm1, %v1830_v52, %v1836_v6  ;;  %v1875_v19 = vmul.f32 %v1874_v51, %v1852_v40  ;;  %v1880_v61 = vmul.f32 %v1879_v36, %v1852_v40  ;;  %v1885_v58 = vmul.f32 %v1884_v62, %v1852_v40  ;;  %s6321_s27 = sld [smem:[#allocation2 + $0x15]] }
 0x232   :  { %v1855_v45 = vmul.f32 %v1854_v48, %v1851_v49  ;;  %v1860_v32 = vmul.f32 %v1859_v34, %v1851_v49  ;;  %v1865_v43 = vmul.f32 %v1864_v47, %v1851_v49  ;;  %v1870_v5 = vmul.f32 %v1869_v57, %v1851_v49  ;;  %s6323_s23 = sld [smem:[#allocation2 + $0x60]] }
 0x233   :  { %v1890_v10 = vmul.f32 %v1889_v46, %v1852_v40  ;;  %s6325_s21 = sld [smem:[#allocation2 + $0xab]] }
 0x234   :  { %v1857_v20 = vadd.f32 %v1855_v45, %v5889_v22  ;;  %v1862_v50 = vadd.f32 %v1860_v32, %v5891_v15  ;;  %v1867_v16 = vadd.f32 %v1865_v43, %v5893_v41  ;;  %v1872_v8 = vadd.f32 %v1870_v5, %v5934_v9  ;;  %s6351_s18 = sld [smem:[#allocation2 + $0xf7]] }
 0x235   :  { %2345 = vrot.lane.b32.xlu1 %v3072_v33, %s3111_s30  ;;  %v1939_v43 = vstv %s6083_s0  ;;  %s6345_s0 = sld [smem:[#allocation2 + $0xac]] }
 0x236   :  { %2339 = vrot.lane.b32.xlu0 %v5861_v53, %s3111_s30  ;;  %v1877_v22 = vadd.f32 %v1875_v19, %v1857_v20  ;;  %v1882_v15 = vadd.f32 %v1880_v61, %v1862_v50  ;;  %v1887_v41 = vadd.f32 %v1885_v58, %v1867_v16  ;;  %v1892_v9 = vadd.f32 %v1890_v10, %v1872_v8 }
 0x237   :  { %2351 = vrot.lane.b32.xlu2 %v5830_v13, %s3111_s30  ;;  %v1844_v21 = vpop.permute.xlu1 %1843 }
 0x238   :  { %v1842_v52 = vpop.permute.xlu0 %1841  ;;  %v1849_v53 = vsel %vm1847_vm1, %v1838_v31, %v1844_v21  ;;  %v6119_v40 = vadd.f32 %v1895_v56, %v1877_v22  ;;  %v6121_v49 = vadd.f32 %v1900_v3, %v1882_v15  ;;  %v6123_v13 = vpop.permute.xlu2 %1928  ;;  %v6131_v20 = vadd.f32 %v1910_v2, %v1892_v9 }
 0x239   :  { %v1848_v33 = vsel %vm1847_vm1, %v1836_v6, %v1842_v52  ;;  %v1876_v45 = vmul.f32 %v1874_v51, %v1849_v53  ;;  %v1881_v32 = vmul.f32 %v1879_v36, %v1849_v53  ;;  %v1886_v31 = vmul.f32 %v1884_v62, %v1849_v53 }
 0x23a   :  { %v1856_v5 = vmul.f32 %v1854_v48, %v1848_v33  ;;  %v1861_v19 = vmul.f32 %v1859_v34, %v1848_v33  ;;  %v1866_v61 = vmul.f32 %v1864_v47, %v1848_v33  ;;  %v1871_v58 = vmul.f32 %v1869_v57, %v1848_v33 }
 0x23b   :  { %v1891_v10 = vmul.f32 %v1889_v46, %v1849_v53  ;;  %v6129_v6 = vadd.f32 %v1905_v12, %v1887_v41  ;;  %v1896_v34 = vmul.f32 %v1894_v23, %v6016_v4  ;;  %v1901_v47 = vmul.f32 %v1899_v25, %v6016_v4 }
 0x23c   :  { %v1858_v50 = vadd.f32 %v1856_v5, %v5936_v42  ;;  %v1863_v51 = vadd.f32 %v1861_v19, %v5938_v38  ;;  %v1868_v36 = vadd.f32 %v1866_v61, %v5940_v44  ;;  %v1873_v48 = vadd.f32 %v1871_v58, %v5944_v18 }
 0x23d   :  { %2262 = vrot.lane.b32.xlu1 %v5907_v27, %s3110_s7  ;;  %v1949_v42 = vstv %s6097_s20  ;;  %v1954_v38 = vstv %s6104_s11  ;;  %v1906_v46 = vmul.f32 %v1904_v24, %v6016_v4  ;;  %v1911_v23 = vmul.f32 %v1909_v14, %v6016_v4  ;;  %s6358_s20 = sld [smem:[#allocation2 + $0x2e]] }
 0x23e   :  { %2256 = vrot.lane.b32.xlu0 %v5914_v30, %s3110_s7  ;;  %v1878_v44 = vadd.f32 %v1876_v45, %v1858_v50  ;;  %v1883_v57 = vadd.f32 %v1881_v32, %v1863_v51  ;;  %v1888_v18 = vadd.f32 %v1886_v31, %v1868_v36  ;;  %v1893_v62 = vadd.f32 %v1891_v10, %v1873_v48  ;;  %s6365_s11 = sld [smem:[#allocation2 + $0xc4]] }
 0x23f   :  { %2268 = vrot.lane.b32.xlu2 %v5925_v35, %s3110_s7  ;;  %v1921_v25 = vpop.permute.xlu1 %1920 }
 0x240   :  { %v1915_v16 = vpop.permute.xlu0 %1914  ;;  %v1933_v8 = vsel %vm1932_vm2, %v1921_v25, %v6051_v1  ;;  %v1898_v3 = vadd.f32 %v1896_v34, %v1878_v44  ;;  %v1903_v22 = vadd.f32 %v1901_v47, %v1883_v57  ;;  %v6164_v15 = vpop.permute.xlu2 %2013  ;;  %v1959_v57 = vstv %s6178_s25  ;;  %s6429_s25 = sld [smem:[#allocation2 + $0x110]] }
 0x241   :  { %v1936_v56 = vsel %vm1932_vm2, %v1915_v16, %v1921_v25  ;;  %v1941_v41 = vmul.f32 %v1939_v43, %v1933_v8  ;;  %v1946_v9 = vmul.f32 %v1944_v55, %v1933_v8  ;;  %v1951_v12 = vmul.f32 %v1949_v42, %v1933_v8 }
 0x242   :  { %v1956_v24 = vmul.f32 %v1954_v38, %v1933_v8  ;;  %v1940_v2 = vmul.f32 %v1939_v43, %v1936_v56  ;;  %v1945_v21 = vmul.f32 %v1944_v55, %v1936_v56  ;;  %v1950_v4 = vmul.f32 %v1949_v42, %v1936_v56 }
 0x243   :  { %v1955_v14 = vmul.f32 %v1954_v38, %v1936_v56  ;;  %v6167_v52 = vadd.f32 %v1941_v41, %v6053_v59  ;;  %v6170_v1 = vadd.f32 %v1946_v9, %v6055_v0  ;;  %v6173_v53 = vadd.f32 %v1951_v12, %v6057_v29 }
 0x244   :  { %v6176_v33 = vadd.f32 %v1956_v24, %v6059_v28  ;;  %v6181_v45 = vadd.f32 %v1940_v2, %v6020_v60  ;;  %v6184_v59 = vadd.f32 %v1945_v21, %v6022_v17  ;;  %v6187_v0 = vadd.f32 %v1950_v4, %v6024_v26 }
 0x245   :  { %v6190_v32 = vadd.f32 %v1955_v14, %v6047_v7  ;;  %2347 = vrot.lane.b32.xlu1 %v5907_v27, %s3111_s30  ;;  %v2024_v60 = vstv %s6127_s4  ;;  %v1908_v29 = vadd.f32 %v1906_v46, %v1888_v18  ;;  %v1913_v17 = vadd.f32 %v1911_v23, %v1893_v62  ;;  %s6371_s4 = sld [smem:[#allocation2 + $0x10f]] }
 0x246   :  { %2341 = vrot.lane.b32.xlu0 %v5914_v30, %s3111_s30  ;;  %v2029_v26 = vstv %s6137_s22  ;;  %v2034_v28 = vstv %s6147_s28  ;;  %v2039_v43 = vstv %s6149_s1  ;;  %s6421_s22 = sld [smem:[#allocation2 + $0x2f]] }
 0x247   :  { %2353 = vrot.lane.b32.xlu2 %v5925_v35, %s3111_s30  ;;  %v2006_v7 = vpop.permute.xlu1 %2005  ;;  %v1974_v18 = vstv %s6205_s5  ;;  %s6423_s28 = sld [smem:[#allocation2 + $0x7a]] }
 0x248   :  { %v2000_v27 = vpop.permute.xlu0 %1999  ;;  %v2018_v30 = vsel %vm2017_vm3, %v2006_v7, %v6085_v63  ;;  %v6214_v5 = vpop.permute.xlu2 %1930  ;;  %s6427_s1 = sld [smem:[#allocation2 + $0xc5]] }
 0x249   :  { %v2021_v55 = vsel %vm2017_vm3, %v2000_v27, %v2006_v7  ;;  %v2026_v19 = vmul.f32 %v2024_v60, %v2018_v30  ;;  %v2031_v61 = vmul.f32 %v2029_v26, %v2018_v30  ;;  %v2036_v58 = vmul.f32 %v2034_v28, %v2018_v30  ;;  %s6435_s5 = sld [smem:[#allocation2 + $0xdd]] }
 0x24a   :  { %v2041_v31 = vmul.f32 %v2039_v43, %v2018_v30  ;;  %v2025_v10 = vmul.f32 %v2024_v60, %v2021_v55  ;;  %v2030_v50 = vmul.f32 %v2029_v26, %v2021_v55  ;;  %v2035_v51 = vmul.f32 %v2034_v28, %v2021_v55 }
 0x24b   :  { %v2040_v35 = vmul.f32 %v2039_v43, %v2021_v55  ;;  %v6216_v36 = vadd.f32 %v2026_v19, %v1898_v3  ;;  %v6218_v63 = vadd.f32 %v2031_v61, %v1903_v22  ;;  %v6220_v48 = vadd.f32 %v2036_v58, %v1908_v29 }
 0x24c   :  { %v6222_v34 = vadd.f32 %v2041_v31, %v1913_v17  ;;  %v6227_v47 = vadd.f32 %v2025_v10, %v6119_v40  ;;  %v6230_v42 = vadd.f32 %v2030_v50, %v6121_v49  ;;  %v6233_v38 = vadd.f32 %v2035_v51, %v6129_v6 }
 0x24d   :  { %v6236_v44 = vadd.f32 %v2040_v35, %v6131_v20  ;;  %2264 = vrot.lane.b32.xlu1 %v5982_v11, %s3110_s7  ;;  %v1964_v40 = vstv %s6192_s15  ;;  %v1969_v49 = vstv %s6200_s16  ;;  %v1979_v10 = vstv %s6265_s17  ;;  %s6431_s15 = sld [smem:[#allocation2 + $0x47]] }
 0x24e   :  { %2258 = vrot.lane.b32.xlu0 %v5989_v37, %s3110_s7  ;;  %v1984_v50 = vstv %s6271_s19  ;;  %v1989_v51 = vstv %s6278_s13  ;;  %v1994_v35 = vstv %s6283_s14  ;;  %s6433_s16 = sld [smem:[#allocation2 + $0x92]] }
 0x24f   :  { %2270 = vrot.lane.b32.xlu2 %v5795_v54, %s3110_s7  ;;  %v1923_v6 = vpop.permute.xlu1 %1922  ;;  %s6342_s7 = sld [smem:[#allocation2 + $0x61]] }
 0x250   :  { %v1917_v20 = vpop.permute.xlu0 %1916  ;;  %v1934_v62 = vsel %vm1932_vm2, %v1923_v6, %v6123_v13  ;;  %v6259_v23 = vpop.permute.xlu2 %2015  ;;  %s6445_s17 = sld [smem:[#allocation2 + $0x129]] }
 0x251   :  { %v1937_v46 = vsel %vm1932_vm2, %v1917_v20, %v1923_v6  ;;  %v1961_v25 = vmul.f32 %v1959_v57, %v1934_v62  ;;  %v1966_v16 = vmul.f32 %v1964_v40, %v1934_v62  ;;  %v1971_v8 = vmul.f32 %v1969_v49, %v1934_v62  ;;  %s6449_s19 = sld [smem:[#allocation2 + $0x17]] }
 0x252   :  { %v1976_v56 = vmul.f32 %v1974_v18, %v1934_v62  ;;  %v1960_v3 = vmul.f32 %v1959_v57, %v1937_v46  ;;  %v1965_v22 = vmul.f32 %v1964_v40, %v1937_v46  ;;  %v1970_v41 = vmul.f32 %v1969_v49, %v1937_v46  ;;  %s6451_s13 = sld [smem:[#allocation2 + $0x62]] }
 0x253   :  { %v1975_v9 = vmul.f32 %v1974_v18, %v1937_v46  ;;  %v1963_v12 = vadd.f32 %v1961_v25, %v6167_v52  ;;  %v1968_v13 = vadd.f32 %v1966_v16, %v6170_v1  ;;  %v1973_v24 = vadd.f32 %v1971_v8, %v6173_v53  ;;  %s6453_s14 = sld [smem:[#allocation2 + $0xad]] }
 0x254   :  { %v1978_v2 = vadd.f32 %v1976_v56, %v6176_v33  ;;  %v1962_v21 = vadd.f32 %v1960_v3, %v6181_v45  ;;  %v1967_v4 = vadd.f32 %v1965_v22, %v6184_v59  ;;  %v1972_v14 = vadd.f32 %v1970_v41, %v6187_v0 }
 0x255   :  { %v1977_v60 = vadd.f32 %v1975_v9, %v6190_v32  ;;  %2349 = vrot.lane.b32.xlu1 %v5982_v11, %s3111_s30  ;;  %v2044_v52 = vstv %s6224_s6  ;;  %v2049_v1 = vstv %s6238_s26  ;;  %v2054_v53 = vstv %s6245_s3  ;;  %s6437_s6 = sld [smem:[#allocation2 + $0x128]] }
 0x256   :  { %2343 = vrot.lane.b32.xlu0 %v5989_v37, %s3111_s30  ;;  %v2059_v33 = vstv %s6250_s12  ;;  %v2064_v3 = vstv %s6298_s8  ;;  %v2069_v22 = vstv %s6304_s9  ;;  %s6439_s26 = sld [smem:[#allocation2 + $0x48]] }
 0x257   :  { %2355 = vrot.lane.b32.xlu2 %v5795_v54, %s3111_s30  ;;  %v2008_v45 = vpop.permute.xlu1 %2007  ;;  %v2074_v41 = vstv %s6306_s10  ;;  %v2079_v9 = vstv %s6312_s24  ;;  %s6360_s30 = sld [smem:[#allocation2 + $0x79]] }
 0x258   :  { %v2002_v59 = vpop.permute.xlu0 %2001  ;;  %v2019_v11 = vsel %vm2017_vm3, %v2008_v45, %v6164_v15  ;;  %v6292_v0 = vpop.permute.xlu2 %2096  ;;  %s6441_s3 = sld [smem:[#allocation2 + $0x93]] }
 0x259   :  { %v2022_v37 = vsel %vm2017_vm3, %v2002_v59, %v2008_v45  ;;  %v2046_v32 = vmul.f32 %v2044_v52, %v2019_v11  ;;  %v2051_v29 = vmul.f32 %v2049_v1, %v2019_v11  ;;  %v2056_v17 = vmul.f32 %v2054_v53, %v2019_v11  ;;  %s6443_s12 = sld [smem:[#allocation2 + $0xde]] }
 0x25a   :  { %v2061_v26 = vmul.f32 %v2059_v33, %v2019_v11  ;;  %v2045_v28 = vmul.f32 %v2044_v52, %v2022_v37  ;;  %v2050_v43 = vmul.f32 %v2049_v1, %v2022_v37  ;;  %v2055_v54 = vmul.f32 %v2054_v53, %v2022_v37  ;;  %s6455_s8 = sld [smem:[#allocation2 + $0xf8]] }
 0x25b   :  { %v2060_v7 = vmul.f32 %v2059_v33, %v2022_v37  ;;  %v2048_v27 = vadd.f32 %v2046_v32, %v6216_v36  ;;  %v2053_v15 = vadd.f32 %v2051_v29, %v6218_v63  ;;  %v2058_v30 = vadd.f32 %v2056_v17, %v6220_v48  ;;  %s6461_s9 = sld [smem:[#allocation2 + $0x18]] }
 0x25c   :  { %v2063_v55 = vadd.f32 %v2061_v26, %v6222_v34  ;;  %v2047_v19 = vadd.f32 %v2045_v28, %v6227_v47  ;;  %v2052_v61 = vadd.f32 %v2050_v43, %v6230_v42  ;;  %v2057_v58 = vadd.f32 %v2055_v54, %v6233_v38  ;;  %s6463_s10 = sld [smem:[#allocation2 + $0x63]] }
 0x25d   :  { %v2062_v31 = vadd.f32 %v2060_v7, %v6236_v44  ;;  %v2109_v28 = vstv %s6321_s27  ;;  %v2114_v43 = vstv %s6323_s23  ;;  %v2119_v54 = vstv %s6325_s21  ;;  %s6465_s24 = sld [smem:[#allocation2 + $0xae]] }
 0x25e   :  { %v2124_v7 = vstv %s6331_s29  ;;  %s6468_s27 = sld [smem:[#allocation2 + $0xf9]] }
 0x25f   :  { %v1925_v36 = vpop.permute.xlu1 %1924  ;;  %s6487_s23 = sld [smem:[#allocation2 + $0x30]] }
 0x260   :  { %v1919_v63 = vpop.permute.xlu0 %1918  ;;  %v1935_v48 = vsel %vm1932_vm2, %v1925_v36, %v6214_v5  ;;  %s6492_s21 = sld [smem:[#allocation2 + $0x7b]] }
 0x261   :  { %v1938_v34 = vsel %vm1932_vm2, %v1919_v63, %v1925_v36  ;;  %v6319_v47 = vpop.permute.xlu2 %2181  ;;  %v1981_v42 = vmul.f32 %v1979_v10, %v1935_v48  ;;  %v1986_v38 = vmul.f32 %v1984_v50, %v1935_v48  ;;  %v1991_v44 = vmul.f32 %v1989_v51, %v1935_v48  ;;  %s6498_s29 = sld [smem:[#allocation2 + $0xc6]] }
 0x262   :  { %v1996_v57 = vmul.f32 %v1994_v35, %v1935_v48  ;;  %v1980_v40 = vmul.f32 %v1979_v10, %v1938_v34  ;;  %v1985_v49 = vmul.f32 %v1984_v50, %v1938_v34  ;;  %v1990_v18 = vmul.f32 %v1989_v51, %v1938_v34 }
 0x263   :  { %v1995_v6 = vmul.f32 %v1994_v35, %v1938_v34  ;;  %v1983_v20 = vadd.f32 %v1981_v42, %v1963_v12  ;;  %v1988_v62 = vadd.f32 %v1986_v38, %v1968_v13  ;;  %v1993_v5 = vadd.f32 %v1991_v44, %v1973_v24 }
 0x264   :  { %v1998_v46 = vadd.f32 %v1996_v57, %v1978_v2  ;;  %v1982_v25 = vadd.f32 %v1980_v40, %v1962_v21  ;;  %v1987_v16 = vadd.f32 %v1985_v49, %v1967_v4  ;;  %v1992_v8 = vadd.f32 %v1990_v18, %v1972_v14 }
 0x265   :  { %v1997_v56 = vadd.f32 %v1995_v6, %v1977_v60  ;;  %v2194_v40 = vstv %s6340_s2  ;;  %v2199_v49 = vstv %s6342_s7  ;;  %v2204_v18 = vstv %s6345_s0  ;;  %s6503_s2 = sld [smem:[#allocation2 + $0x111]] }
 0x266   :  { %v2209_v6 = vstv %s6351_s18  ;;  %s6515_s7 = sld [smem:[#allocation2 + $0x31]] }
 0x267   :  { %v2010_v12 = vpop.permute.xlu1 %2009  ;;  %s6521_s0 = sld [smem:[#allocation2 + $0x7c]] }
 0x268   :  { %v2004_v13 = vpop.permute.xlu0 %2003  ;;  %v2020_v24 = vsel %vm2017_vm3, %v2010_v12, %v6259_v23  ;;  %s6526_s18 = sld [smem:[#allocation2 + $0xc7]] }
 0x269   :  { %v2023_v2 = vsel %vm2017_vm3, %v2004_v13, %v2010_v12  ;;  %v2066_v21 = vmul.f32 %v2064_v3, %v2020_v24  ;;  %v2071_v4 = vmul.f32 %v2069_v22, %v2020_v24  ;;  %v2076_v14 = vmul.f32 %v2074_v41, %v2020_v24  ;;  %v6338_v45 = vpop.permute.xlu2 %2098 }
 0x26a   :  { %v2081_v60 = vmul.f32 %v2079_v9, %v2020_v24  ;;  %v2065_v52 = vmul.f32 %v2064_v3, %v2023_v2  ;;  %v2070_v1 = vmul.f32 %v2069_v22, %v2023_v2  ;;  %v2075_v53 = vmul.f32 %v2074_v41, %v2023_v2 }
 0x26b   :  { %v2080_v33 = vmul.f32 %v2079_v9, %v2023_v2  ;;  %v2068_v59 = vadd.f32 %v2066_v21, %v2048_v27  ;;  %v2073_v11 = vadd.f32 %v2071_v4, %v2053_v15  ;;  %v2078_v23 = vadd.f32 %v2076_v14, %v2058_v30 }
 0x26c   :  { %v2083_v37 = vadd.f32 %v2081_v60, %v2063_v55  ;;  %v2067_v32 = vadd.f32 %v2065_v52, %v2047_v19  ;;  %v2072_v29 = vadd.f32 %v2070_v1, %v2052_v61  ;;  %v2077_v17 = vadd.f32 %v2075_v53, %v2057_v58 }
 0x26d   :  { %v2082_v26 = vadd.f32 %v2080_v33, %v2062_v31  ;;  %v2129_v60 = vstv %s6358_s20  ;;  %v2134_v52 = vstv %s6360_s30  ;;  %v2139_v1 = vstv %s6365_s11  ;;  %s6529_s20 = sld [smem:[#allocation2 + $0x112]] }
 0x26e   :  { %v2144_v53 = vstv %s6371_s4  ;;  %s6550_s30 = sld [smem:[#allocation2 + $0x49]] }
 0x26f   :  { %v2091_v27 = vpop.permute.xlu1 %2090  ;;  %s6556_s11 = sld [smem:[#allocation2 + $0x94]] }
 0x270   :  { %v2085_v15 = vpop.permute.xlu0 %2084  ;;  %v2103_v30 = vsel %vm2102_vm4, %v2091_v27, %v6292_v0  ;;  %s6563_s4 = sld [smem:[#allocation2 + $0xdf]] }
 0x271   :  { %v2106_v55 = vsel %vm2102_vm4, %v2085_v15, %v2091_v27  ;;  %v2111_v19 = vmul.f32 %v2109_v28, %v2103_v30  ;;  %v2116_v61 = vmul.f32 %v2114_v43, %v2103_v30  ;;  %v2121_v58 = vmul.f32 %v2119_v54, %v2103_v30  ;;  %v6362_v57 = vpop.permute.xlu2 %2183 }
 0x272   :  { %v2126_v31 = vmul.f32 %v2124_v7, %v2103_v30  ;;  %v2110_v10 = vmul.f32 %v2109_v28, %v2106_v55  ;;  %v2115_v50 = vmul.f32 %v2114_v43, %v2106_v55  ;;  %v2120_v51 = vmul.f32 %v2119_v54, %v2106_v55 }
 0x273   :  { %v2125_v35 = vmul.f32 %v2124_v7, %v2106_v55  ;;  %v2113_v36 = vadd.f32 %v2111_v19, %v1983_v20  ;;  %v2118_v63 = vadd.f32 %v2116_v61, %v1988_v62  ;;  %v2123_v48 = vadd.f32 %v2121_v58, %v1993_v5 }
 0x274   :  { %v2128_v34 = vadd.f32 %v2126_v31, %v1998_v46  ;;  %v2112_v0 = vadd.f32 %v2110_v10, %v1982_v25  ;;  %v2117_v42 = vadd.f32 %v2115_v50, %v1987_v16  ;;  %v2122_v38 = vadd.f32 %v2120_v51, %v1992_v8 }
 0x275   :  { %v2127_v44 = vadd.f32 %v2125_v35, %v1997_v56 }
 0x277   :  { %v2176_v20 = vpop.permute.xlu1 %2175 }
 0x278   :  { %v2170_v62 = vpop.permute.xlu0 %2169  ;;  %v2188_v5 = vsel %vm2187_vm5, %v2176_v20, %v6319_v47 }
 0x279   :  { %v2191_v46 = vsel %vm2187_vm5, %v2170_v62, %v2176_v20  ;;  %v2196_v25 = vmul.f32 %v2194_v40, %v2188_v5  ;;  %v2201_v16 = vmul.f32 %v2199_v49, %v2188_v5  ;;  %v2206_v8 = vmul.f32 %v2204_v18, %v2188_v5  ;;  %v6398_v33 = vpop.permute.xlu2 %2100 }
 0x27a   :  { %v2211_v56 = vmul.f32 %v2209_v6, %v2188_v5  ;;  %v2195_v3 = vmul.f32 %v2194_v40, %v2191_v46  ;;  %v2200_v22 = vmul.f32 %v2199_v49, %v2191_v46  ;;  %v2205_v41 = vmul.f32 %v2204_v18, %v2191_v46 }
 0x27b   :  { %v2210_v9 = vmul.f32 %v2209_v6, %v2191_v46  ;;  %v6378_v12 = vadd.f32 %v2196_v25, %v2068_v59  ;;  %v6380_v13 = vadd.f32 %v2201_v16, %v2073_v11  ;;  %v6382_v47 = vadd.f32 %v2206_v8, %v2078_v23 }
 0x27c   :  { %v6384_v24 = vadd.f32 %v2211_v56, %v2083_v37  ;;  %v6386_v2 = vadd.f32 %v2195_v3, %v2067_v32  ;;  %v6388_v21 = vadd.f32 %v2200_v22, %v2072_v29  ;;  %v6390_v4 = vadd.f32 %v2205_v41, %v2077_v17 }
 0x27d   :  { %v6392_v14 = vadd.f32 %v2210_v9, %v2082_v26  ;;  %v2149_v49 = vstv %s6431_s15  ;;  %v2154_v18 = vstv %s6433_s16  ;;  %v2159_v6 = vstv %s6435_s5  ;;  %s6609_s15 = sld [smem:[#allocation2 + $0x12b]] }
 0x27e   :  { %v2164_v62 = vstv %s6437_s6  ;;  %v2234_v5 = vstv %s6439_s26  ;;  %v2239_v46 = vstv %s6441_s3  ;;  %v2244_v25 = vstv %s6443_s12  ;;  %s6634_s16 = sld [smem:[#allocation2 + $0x12d]] }
 0x27f   :  { %v2093_v59 = vpop.permute.xlu1 %2092  ;;  %v2249_v8 = vstv %s6445_s17  ;;  %v2284_v56 = vstv %s6451_s13  ;;  %s6646_s5 = sld [smem:[#allocation2 + $0x12c]] }
 0x280   :  { %v2087_v11 = vpop.permute.xlu0 %2086  ;;  %v2104_v23 = vsel %vm2102_vm4, %v2093_v59, %v6338_v45  ;;  %s6655_s6 = sld [smem:[#allocation2 + $0x12e]] }
 0x281   :  { %v2107_v37 = vsel %vm2102_vm4, %v2087_v11, %v2093_v59  ;;  %v2131_v32 = vmul.f32 %v2129_v60, %v2104_v23  ;;  %v2136_v29 = vmul.f32 %v2134_v52, %v2104_v23  ;;  %v2141_v17 = vmul.f32 %v2139_v1, %v2104_v23  ;;  %v6425_v50 = vpop.permute.xlu2 %2185  ;;  %s6742_s26 = sld [smem:[#allocation2 + $0x12f]] }
 0x282   :  { %v2146_v26 = vmul.f32 %v2144_v53, %v2104_v23  ;;  %v2130_v28 = vmul.f32 %v2129_v60, %v2107_v37  ;;  %v2135_v43 = vmul.f32 %v2134_v52, %v2107_v37  ;;  %v2140_v54 = vmul.f32 %v2139_v1, %v2107_v37  ;;  %s7192_s17 = sld [smem:[#allocation34_spill]] }
 0x283   :  { %v2145_v7 = vmul.f32 %v2144_v53, %v2107_v37  ;;  %v6405_v27 = vadd.f32 %v2131_v32, %v2113_v36  ;;  %v6407_v15 = vadd.f32 %v2136_v29, %v2118_v63  ;;  %v6409_v30 = vadd.f32 %v2141_v17, %v2123_v48 }
 0x284   :  { %v6411_v55 = vadd.f32 %v2146_v26, %v2128_v34  ;;  %v6413_v45 = vadd.f32 %v2130_v28, %v2112_v0  ;;  %v6415_v19 = vadd.f32 %v2135_v43, %v2117_v42  ;;  %v6417_v61 = vadd.f32 %v2140_v54, %v2122_v38 }
 0x285   :  { %v6419_v58 = vadd.f32 %v2145_v7, %v2127_v44  ;;  %v2214_v34 = vstv %s6421_s22  ;;  %v2219_v0 = vstv %s6423_s28  ;;  %v2224_v42 = vstv %s6427_s1  ;;  %s6573_s22 = sld [smem:[#allocation2 + $0x12a]] }
 0x286   :  { %v2229_v38 = vstv %s6429_s25  ;;  %v2289_v53 = vstv %s6453_s14  ;;  %v2294_v59 = vstv %s6455_s8  ;;  %v2364_v11 = vstv %s6461_s9  ;;  %s6588_s28 = sld [smem:[#allocation2 + $0x4a]] }
 0x287   :  { %v2178_v31 = vpop.permute.xlu1 %2177  ;;  %v2369_v32 = vstv %s6463_s10  ;;  %v2374_v29 = vstv %s6465_s24  ;;  %v2379_v43 = vstv %s6468_s27  ;;  %s6597_s1 = sld [smem:[#allocation2 + $0x95]] }
 0x288   :  { %v2172_v10 = vpop.permute.xlu0 %2171  ;;  %v2189_v44 = vsel %vm2187_vm5, %v2178_v31, %v6362_v57  ;;  %v2279_v57 = vstv %s6449_s19  ;;  %s6599_s25 = sld [smem:[#allocation2 + $0xe0]] }
 0x289   :  { %v6447_v36 = vpop.permute.xlu2 %2266  ;;  %v2192_v40 = vsel %vm2187_vm5, %v2172_v10, %v2178_v31  ;;  %v2216_v16 = vmul.f32 %v2214_v34, %v2189_v44  ;;  %v2221_v3 = vmul.f32 %v2219_v0, %v2189_v44  ;;  %v2226_v22 = vmul.f32 %v2224_v42, %v2189_v44  ;;  %s2997_s14 = sld [smem:[#allocation2 + $0x130]] }
 0x28a   :  { %v2231_v41 = vmul.f32 %v2229_v38, %v2189_v44  ;;  %v2215_v9 = vmul.f32 %v2214_v34, %v2192_v40  ;;  %v2220_v1 = vmul.f32 %v2219_v0, %v2192_v40  ;;  %v2225_v23 = vmul.f32 %v2224_v42, %v2192_v40  ;;  %s6811_s8 = sld [smem:[#allocation2 + $0x134]] }
 0x28b   :  { %v2218_v17 = vadd.f32 %v2216_v16, %v6378_v12  ;;  %v2230_v26 = vmul.f32 %v2229_v38, %v2192_v40  ;;  %v2223_v54 = vadd.f32 %v2221_v3, %v6380_v13  ;;  %v2228_v7 = vadd.f32 %v2226_v22, %v6382_v47  ;;  %s6817_s9 = sld [smem:[#allocation2 + $0x132]] }
 0x28c   :  { %v2233_v31 = vadd.f32 %v2231_v41, %v6384_v24  ;;  %v6524_v12 = vadd.f32 %v2220_v1, %v6388_v21  ;;  %v2227_v13 = vadd.f32 %v2225_v23, %v6390_v4  ;;  %v2299_v42 = vstv %s6487_s23  ;;  %s6819_s10 = sld [smem:[#allocation2 + $0x131]] }
 0x28d   :  { %v2304_v4 = vstv %s6492_s21  ;;  %v2314_v16 = vstv %s6503_s2  ;;  %s6824_s24 = sld [smem:[#allocation2 + $0x136]] }
 0x28e   :  { %s6828_s27 = sld [smem:[#allocation2 + $0x135]] }
 0x28f   :  { %v2095_v51 = vpop.permute.xlu1 %2094  ;;  %s6834_s23 = sld [smem:[#allocation2 + $0x133]] }
 0x290   :  { %v2089_v35 = vpop.permute.xlu0 %2088  ;;  %v2105_v37 = vsel %vm2102_vm4, %v2095_v51, %v6398_v33  ;;  %v2217_v33 = vadd.f32 %v2215_v9, %v6386_v2  ;;  %v2232_v2 = vadd.f32 %v2230_v26, %v6392_v14  ;;  %v2389_v9 = vstv %s6521_s0  ;;  %s6843_s21 = sld [smem:[#allocation2 + $0x137]] }
 0x291   :  { %v6481_v20 = vpop.permute.xlu2 %2351  ;;  %v2108_v28 = vsel %vm2102_vm4, %v2089_v35, %v2095_v51  ;;  %v2151_v10 = vmul.f32 %v2149_v49, %v2105_v37  ;;  %v2156_v51 = vmul.f32 %v2154_v18, %v2105_v37  ;;  %v2161_v35 = vmul.f32 %v2159_v6, %v2105_v37  ;;  %s2999_s2 = sld [smem:[#allocation2 + $0x138]] }
 0x292   :  { %v2166_v47 = vmul.f32 %v2164_v62, %v2105_v37  ;;  %v2150_v34 = vmul.f32 %v2149_v49, %v2108_v28  ;;  %v2155_v24 = vmul.f32 %v2154_v18, %v2108_v28  ;;  %v2160_v38 = vmul.f32 %v2159_v6, %v2108_v28  ;;  %s3011_s0 = sld [smem:[#allocation2 + $0x13b]] }
 0x293   :  { %v2165_v44 = vmul.f32 %v2164_v62, %v2108_v28  ;;  %v2309_v49 = vstv %s6498_s29  ;;  %v2153_v18 = vadd.f32 %v2151_v10, %v6405_v27  ;;  %v2158_v6 = vadd.f32 %v2156_v51, %v6407_v15  ;;  %s3003_s29 = sld [smem:[#allocation2 + $0x139]] }
 0x294   :  { %v2163_v62 = vadd.f32 %v2161_v35, %v6409_v30  ;;  %v2157_v3 = vadd.f32 %v2155_v24, %v6415_v19  ;;  %v2384_v19 = vstv %s6515_s7  ;;  %v2394_v37 = vstv %s6526_s18  ;;  %s3007_s7 = sld [smem:[#allocation2 + $0x13a]] }
 0x295   :  { %v2399_v26 = vstv %s6529_s20  ;;  %s3012_s18 = sld [smem:[#allocation2 + $0x13c]]  ;;  %vm2690_vm4 = vcmask 7168  }
 0x297   :  { %v6457_v63 = vpop.permute.xlu1 %2179 }
 0x298   :  { %v6459_v48 = vpop.permute.xlu0 %2173  ;;  %v2190_v21 = vsel %vm2187_vm5, %v6457_v63, %v6425_v50 }
 0x299   :  { %v6537_v0 = vpop.permute.xlu2 %2268  ;;  %v2193_v14 = vsel %vm2187_vm5, %v6459_v48, %v6457_v63  ;;  %v2168_v63 = vadd.f32 %v2166_v47, %v6411_v55  ;;  %v2152_v48 = vadd.f32 %v2150_v34, %v6413_v45  ;;  %v2236_v27 = vmul.f32 %v2234_v5, %v2190_v21 }
 0x29a   :  { %v2241_v15 = vmul.f32 %v2239_v46, %v2190_v21  ;;  %v2246_v30 = vmul.f32 %v2244_v25, %v2190_v21  ;;  %v2251_v22 = vmul.f32 %v2249_v8, %v2190_v21  ;;  %v2235_v41 = vmul.f32 %v2234_v5, %v2193_v14 }
 0x29b   :  { %v2162_v55 = vadd.f32 %v2160_v38, %v6417_v61  ;;  %v2167_v45 = vadd.f32 %v2165_v44, %v6419_v58  ;;  %v2240_v1 = vmul.f32 %v2239_v46, %v2193_v14  ;;  %v2245_v23 = vmul.f32 %v2244_v25, %v2193_v14 }
 0x29c   :  { %v2238_v61 = vadd.f32 %v2236_v27, %v2218_v17  ;;  %v2250_v58 = vmul.f32 %v2249_v8, %v2193_v14  ;;  %v2243_v25 = vadd.f32 %v2241_v15, %v2223_v54  ;;  %v2248_v28 = vadd.f32 %v2246_v30, %v2228_v7 }
 0x29d   :  { %v2237_v10 = vadd.f32 %v2235_v41, %v2217_v33  ;;  %v2247_v33 = vadd.f32 %v2245_v23, %v2227_v13  ;;  %v2319_v44 = vstv %s6550_s30  ;;  %v2334_v13 = vstv %s6573_s22 }
 0x29e   :  { %v2252_v47 = vadd.f32 %v2250_v58, %v2232_v2 }
 0x29f   :  { %v6494_v60 = vpop.permute.xlu1 %2260 }
 0x2a0   :  { %v6496_v52 = vpop.permute.xlu0 %2254  ;;  %v2273_v5 = vsel %vm2272_vm6, %v6494_v60, %v6447_v36  ;;  %v2253_v36 = vadd.f32 %v2251_v22, %v2233_v31  ;;  %v2242_v31 = vadd.f32 %v2240_v1, %v6524_v12  ;;  %v2324_v12 = vstv %s6556_s11  ;;  %s7193_s11 = sld [smem:[#allocation35_spill]] }
 0x2a1   :  { %v2276_v46 = vsel %vm2272_vm6, %v6496_v52, %v6494_v60  ;;  %v2281_v8 = vmul.f32 %v2279_v57, %v2273_v5  ;;  %v2286_v17 = vmul.f32 %v2284_v56, %v2273_v5  ;;  %v2291_v60 = vmul.f32 %v2289_v53, %v2273_v5  ;;  %v2354_v38 = vpop.permute.xlu2 %2353 }
 0x2a2   :  { %v2296_v52 = vmul.f32 %v2294_v59, %v2273_v5  ;;  %v2280_v51 = vmul.f32 %v2279_v57, %v2276_v46  ;;  %v2285_v35 = vmul.f32 %v2284_v56, %v2276_v46  ;;  %v2290_v34 = vmul.f32 %v2289_v53, %v2276_v46 }
 0x2a3   :  { %v2295_v24 = vmul.f32 %v2294_v59, %v2276_v46  ;;  %v2329_v57 = vstv %s6563_s4  ;;  %v2283_v56 = vadd.f32 %v2281_v8, %v2153_v18  ;;  %v2288_v2 = vadd.f32 %v2286_v17, %v2158_v6 }
 0x2a4   :  { %v2293_v53 = vadd.f32 %v2291_v60, %v2163_v62  ;;  %v2298_v59 = vadd.f32 %v2296_v52, %v2168_v63  ;;  %v2282_v14 = vadd.f32 %v2280_v51, %v2152_v48  ;;  %v2287_v27 = vadd.f32 %v2285_v35, %v2157_v3 }
 0x2a5   :  { %v2292_v30 = vadd.f32 %v2290_v34, %v2162_v55  ;;  %v2297_v18 = vadd.f32 %v2295_v24, %v2167_v45  ;;  %v2404_v62 = vstv %s6588_s28  ;;  %v2409_v3 = vstv %s6597_s1 }
 0x2a7   :  { %v6545_v40 = vpop.permute.xlu1 %2345 }
 0x2a8   :  { %v6547_v50 = vpop.permute.xlu0 %2339  ;;  %v2358_v21 = vsel %vm2357_vm7, %v6545_v40, %v6481_v20 }
 0x2a9   :  { %v2366_v20 = vmul.f32 %v2364_v11, %v2358_v21  ;;  %v2361_v15 = vsel %vm2357_vm7, %v6547_v50, %v6545_v40  ;;  %v2371_v6 = vmul.f32 %v2369_v32, %v2358_v21  ;;  %v2376_v63 = vmul.f32 %v2374_v29, %v2358_v21 }
 0x2aa   :  { %v2414_v40 = vstv %s6599_s25  ;;  %v2381_v50 = vmul.f32 %v2379_v43, %v2358_v21  ;;  %v2365_v22 = vmul.f32 %v2364_v11, %v2361_v15  ;;  %v2370_v23 = vmul.f32 %v2369_v32, %v2361_v15 }
 0x2ab   :  { %v2368_v1 = vadd.f32 %v2366_v20, %v2238_v61  ;;  %v2375_v5 = vmul.f32 %v2374_v29, %v2361_v15  ;;  %v2380_v58 = vmul.f32 %v2379_v43, %v2361_v15  ;;  %v2373_v11 = vadd.f32 %v2371_v6, %v2243_v25  ;;  %v2271_v25 = vpop.permute.xlu2 %2270 }
 0x2ac   :  { %v2378_v60 = vadd.f32 %v2376_v63, %v2248_v28  ;;  %v2383_v32 = vadd.f32 %v2381_v50, %v2253_v36  ;;  %v2372_v51 = vadd.f32 %v2370_v23, %v2242_v31  ;;  %v2492_v28 = vstv %s6634_s16 }
 0x2ad   :  { %v2377_v35 = vadd.f32 %v2375_v5, %v2247_v33  ;;  %v2382_v34 = vadd.f32 %v2380_v58, %v2252_v47 }
 0x2af   :  { %v2263_v54 = vpop.permute.xlu1 %2262 }
 0x2b0   :  { %v2257_v7 = vpop.permute.xlu0 %2256  ;;  %v2274_v48 = vsel %vm2272_vm6, %v2263_v54, %v6537_v0  ;;  %v2419_v0 = vstv %s6609_s15 }
 0x2b1   :  { %v2277_v41 = vsel %vm2272_vm6, %v2257_v7, %v2263_v54  ;;  %v2301_v46 = vmul.f32 %v2299_v42, %v2274_v48  ;;  %v2306_v8 = vmul.f32 %v2304_v4, %v2274_v48  ;;  %v2311_v17 = vmul.f32 %v2309_v49, %v2274_v48 }
 0x2b2   :  { %v2316_v52 = vmul.f32 %v2314_v16, %v2274_v48  ;;  %v2300_v54 = vmul.f32 %v2299_v42, %v2277_v41  ;;  %v2305_v61 = vmul.f32 %v2304_v4, %v2277_v41  ;;  %v2367_v7 = vadd.f32 %v2365_v22, %v2237_v10 }
 0x2b3   :  { %v2310_v29 = vmul.f32 %v2309_v49, %v2277_v41  ;;  %v2315_v43 = vmul.f32 %v2314_v16, %v2277_v41  ;;  %v2303_v24 = vadd.f32 %v2301_v46, %v2283_v56  ;;  %v2308_v21 = vadd.f32 %v2306_v8, %v2288_v2  ;;  %v2356_v8 = vpop.permute.xlu2 %2355 }
 0x2b4   :  { %v2313_v42 = vadd.f32 %v2311_v17, %v2293_v53  ;;  %v2318_v49 = vadd.f32 %v2316_v52, %v2298_v59  ;;  %v2302_v16 = vadd.f32 %v2300_v54, %v2282_v14  ;;  %v2307_v36 = vadd.f32 %v2305_v61, %v2287_v27 }
 0x2b5   :  { %v2312_v31 = vadd.f32 %v2310_v29, %v2292_v30  ;;  %v2317_v33 = vadd.f32 %v2315_v43, %v2297_v18  ;;  %v2558_v2 = vstv %s6655_s6 }
 0x2b7   :  { %v2348_v55 = vpop.permute.xlu1 %2347 }
 0x2b8   :  { %v2342_v45 = vpop.permute.xlu0 %2341  ;;  %v2359_v4 = vsel %vm2357_vm7, %v2348_v55, %v2354_v38  ;;  %v2427_v38 = vstv %s6646_s5 }
 0x2b9   :  { %v2362_v10 = vsel %vm2357_vm7, %v2342_v45, %v2348_v55  ;;  %v2386_v53 = vmul.f32 %v2384_v19, %v2359_v4  ;;  %v2391_v59 = vmul.f32 %v2389_v9, %v2359_v4  ;;  %v2396_v20 = vmul.f32 %v2394_v37, %v2359_v4 }
 0x2ba   :  { %v2401_v15 = vmul.f32 %v2399_v26, %v2359_v4  ;;  %v2385_v30 = vmul.f32 %v2384_v19, %v2362_v10  ;;  %v2390_v18 = vmul.f32 %v2389_v9, %v2362_v10  ;;  %v2395_v6 = vmul.f32 %v2394_v37, %v2362_v10 }
 0x2bb   :  { %v2400_v63 = vmul.f32 %v2399_v26, %v2362_v10  ;;  %v2388_v23 = vadd.f32 %v2386_v53, %v2368_v1  ;;  %v2393_v19 = vadd.f32 %v2391_v59, %v2373_v11  ;;  %v2398_v5 = vadd.f32 %v2396_v20, %v2378_v60 }
 0x2bc   :  { %v2403_v26 = vadd.f32 %v2401_v15, %v2383_v32  ;;  %v2387_v58 = vadd.f32 %v2385_v30, %v2367_v7  ;;  %v2392_v46 = vadd.f32 %v2390_v18, %v2372_v51  ;;  %v2397_v17 = vadd.f32 %v2395_v6, %v2377_v35 }
 0x2bd   :  { %v2402_v52 = vadd.f32 %v2400_v63, %v2382_v34 }
 0x2bf   :  { %v2265_v47 = vpop.permute.xlu1 %2264 }
 0x2c0   :  { %v2259_v56 = vpop.permute.xlu0 %2258  ;;  %v2275_v14 = vsel %vm2272_vm6, %v2265_v47, %v2271_v25 }
 0x2c1   :  { %v2278_v27 = vsel %vm2272_vm6, %v2259_v56, %v2265_v47  ;;  %v2321_v48 = vmul.f32 %v2319_v44, %v2275_v14  ;;  %v2326_v50 = vmul.f32 %v2324_v12, %v2275_v14  ;;  %v2331_v22 = vmul.f32 %v2329_v57, %v2275_v14 }
 0x2c2   :  { %v2336_v41 = vmul.f32 %v2334_v13, %v2275_v14  ;;  %v2320_v55 = vmul.f32 %v2319_v44, %v2278_v27  ;;  %v2325_v45 = vmul.f32 %v2324_v12, %v2278_v27  ;;  %v2330_v9 = vmul.f32 %v2329_v57, %v2278_v27  ;;  %v6747_v14 = vld [vmem:[%s7192_s17 + $0x8] sm:$0xff] }
 0x2c3   :  { %v2335_v37 = vmul.f32 %v2334_v13, %v2278_v27  ;;  %v2323_v44 = vadd.f32 %v2321_v48, %v2303_v24  ;;  %v2328_v12 = vadd.f32 %v2326_v50, %v2308_v21  ;;  %v2333_v1 = vadd.f32 %v2331_v22, %v2313_v42  ;;  %v6752_v27 = vld [vmem:[%s7192_s17] sm:$0xff] }
 0x2c4   :  { %v2338_v57 = vadd.f32 %v2336_v41, %v2318_v49  ;;  %v2322_v13 = vadd.f32 %v2320_v55, %v2302_v16  ;;  %v2327_v11 = vadd.f32 %v2325_v45, %v2307_v36  ;;  %v2332_v61 = vadd.f32 %v2330_v9, %v2312_v31 }
 0x2c5   :  { %v2337_v32 = vadd.f32 %v2335_v37, %v2317_v33 }
 0x2c7   :  { %v2350_v60 = vpop.permute.xlu1 %2349 }
 0x2c8   :  { %v2344_v54 = vpop.permute.xlu0 %2343  ;;  %v2360_v7 = vsel %vm2357_vm7, %v2350_v60, %v2356_v8 }
 0x2c9   :  { %v2363_v29 = vsel %vm2357_vm7, %v2344_v54, %v2350_v60  ;;  %v2406_v43 = vmul.f32 %v2404_v62, %v2360_v7  ;;  %v2411_v25 = vmul.f32 %v2409_v3, %v2360_v7  ;;  %v2416_v51 = vmul.f32 %v2414_v40, %v2360_v7 }
 0x2ca   :  { %v2421_v35 = vmul.f32 %v2419_v0, %v2360_v7  ;;  %v2405_v34 = vmul.f32 %v2404_v62, %v2363_v29  ;;  %v2410_v24 = vmul.f32 %v2409_v3, %v2363_v29  ;;  %v2415_v21 = vmul.f32 %v2414_v40, %v2363_v29 }
 0x2cb   :  { %v2420_v42 = vmul.f32 %v2419_v0, %v2363_v29  ;;  %v2408_v4 = vadd.f32 %v2406_v43, %v2388_v23  ;;  %v2413_v49 = vadd.f32 %v2411_v25, %v2393_v19  ;;  %v2418_v39 = vadd.f32 %v2416_v51, %v2398_v5 }
 0x2cc   :  { %v2423_v16 = vadd.f32 %v2421_v35, %v2403_v26  ;;  %v2407_v36 = vadd.f32 %v2405_v34, %v2387_v58  ;;  %v2412_v10 = vadd.f32 %v2410_v24, %v2392_v46  ;;  %v2417_v31 = vadd.f32 %v2415_v21, %v2397_v17 }
 0x2cd   :  { %v2422_v33 = vadd.f32 %v2420_v42, %v2402_v52  ;;  %v2425_v62 = vadd.f32 %v2408_v4, %v2323_v44  ;;  %v2490_v3 = vadd.f32 %v2413_v49, %v2328_v12  ;;  %v2556_v47 = vadd.f32 %v2418_v39, %v2333_v1 }
 0x2ce   :  { %v2622_v40 = vadd.f32 %v2423_v16, %v2338_v57  ;;  %v2424_v0 = vadd.f32 %v2407_v36, %v2322_v13  ;;  %v2489_v56 = vadd.f32 %v2412_v10, %v2327_v11  ;;  %v2555_v53 = vadd.f32 %v2417_v31, %v2332_v61 }
 0x2cf   :  { %v2621_v59 = vadd.f32 %v2422_v33, %v2337_v32  ;;  %v6756_v20 = vadd.f32 %v2492_v28, %v2490_v3  ;;  %v6760_v15 = vadd.f32 %v2427_v38, %v2425_v62  ;;  %v6764_v30 = vadd.f32 %v2558_v2, %v2556_v47 }
 0x2d0   :  { %v6768_v18 = vadd.f32 %v2492_v28, %v2489_v56  ;;  %v6772_v6 = vadd.f32 %v2427_v38, %v2424_v0  ;;  %v6776_v63 = vadd.f32 %v2558_v2, %v2555_v53  ;;  %v2624_v19 = vstv %s6742_s26 }
 0x2d1   :  { %v2496_v48 = vmul.f32 %v6756_v20, %v6747_v14  ;;  %v2431_v50 = vmul.f32 %v6760_v15, %v6747_v14  ;;  %v2562_v38 = vmul.f32 %v6764_v30, %v6747_v14  ;;  %v6791_v26 = vadd.f32 %v2624_v19, %v2621_v59 }
 0x2d2   :  { %v2495_v22 = vmul.f32 %v6768_v18, %v6752_v27  ;;  %v2430_v41 = vmul.f32 %v6772_v6, %v6752_v27  ;;  %v2561_v23 = vmul.f32 %v6776_v63, %v6752_v27  ;;  %v6793_v58 = vadd.f32 %v2624_v19, %v2622_v40 }
 0x2d3   :  { %v2442_v28 = vmul.f32 %v2431_v50, %v2431_v50  ;;  %v2573_v5 = vmul.f32 %v2562_v38, %v2562_v38  ;;  %v2507_v8 = vmul.f32 %v2496_v48, %v2496_v48  ;;  %v2627_v44 = vmul.f32 %v6791_v26, %v6752_v27 }
 0x2d4   :  { %v2497_v55 = vadd.f32 %v2496_v48, %v2495_v22  ;;  %v2432_v45 = vadd.f32 %v2431_v50, %v2430_v41  ;;  %v2441_v2 = vmul.f32 %v2430_v41, %v2430_v41  ;;  %v2572_v37 = vmul.f32 %v2561_v23, %v2561_v23 }
 0x2d5   :  { %v2506_v46 = vmul.f32 %v2495_v22, %v2495_v22  ;;  %v2563_v52 = vadd.f32 %v2562_v38, %v2561_v23  ;;  %v2628_v12 = vmul.f32 %v6793_v58, %v6747_v14  ;;  %v2638_v57 = vmul.f32 %v2627_v44, %v2627_v44 }
 0x2d6   :  { %2498 = vadd.xlane.f32.xlu1 %v2497_v55  ;;  %2433 = vadd.xlane.f32.xlu0 %v2432_v45  ;;  %v2443_v9 = vadd.f32 %v2442_v28, %v2441_v2  ;;  %v2574_v17 = vadd.f32 %v2573_v5, %v2572_v37 }
 0x2d7   :  { %v2508_v1 = vadd.f32 %v2507_v8, %v2506_v46  ;;  %v2639_v13 = vmul.f32 %v2628_v12, %v2628_v12  ;;  %v2629_v60 = vadd.f32 %v2628_v12, %v2627_v44 }
 0x2d8   :  { %2444 = vadd.xlane.f32.xlu2 %v2443_v9 }
 0x2d9   :  { %v2640_v11 = vadd.f32 %v2639_v13, %v2638_v57 }
 0x2de   :  { %2575 = vadd.xlane.f32.xlu1 %v2574_v17  ;;  %2564 = vadd.xlane.f32.xlu0 %v2563_v52 }
 0x2e0   :  { %2509 = vadd.xlane.f32.xlu2 %v2508_v1 }
 0x2e6   :  { %2641 = vadd.xlane.f32.xlu0 %v2640_v11 }
 0x2e8   :  { %2630 = vadd.xlane.f32.xlu2 %v2629_v60 }
 0x349   :  { %v2499_v54 = vpop.xlane.xlu1 %2498  ;;  %v2434_v61 = vpop.xlane.xlu0 %2433 }
 0x34a   :  { %v2500_v32 = vrot.slane %v2499_v54, 4  ;;  %v2435_v7 = vrot.slane %v2434_v61, 4 }
 0x34b   :  { %v2445_v29 = vpop.xlane.xlu2 %2444 }
 0x34c   :  { %v2501_v43 = vadd.f32 %v2500_v32, %v2499_v54  ;;  %v2436_v25 = vadd.f32 %v2435_v7, %v2434_v61  ;;  %v2446_v51 = vrot.slane %v2445_v29, 4 }
 0x34e   :  { %v2502_v35 = vrot.slane %v2501_v43, 2  ;;  %v2437_v34 = vrot.slane %v2436_v25, 2  ;;  %v2447_v24 = vadd.f32 %v2446_v51, %v2445_v29 }
 0x350   :  { %v2503_v21 = vadd.f32 %v2502_v35, %v2501_v43  ;;  %v2438_v42 = vadd.f32 %v2437_v34, %v2436_v25  ;;  %v2448_v4 = vrot.slane %v2447_v24, 2 }
 0x351   :  { %v2576_v49 = vpop.xlane.xlu1 %2575  ;;  %v2565_v39 = vpop.xlane.xlu0 %2564 }
 0x352   :  { %v2439_v16 = vrot.slane %v2438_v42, 1  ;;  %v2449_v36 = vadd.f32 %v2448_v4, %v2447_v24  ;;  %v2577_v10 = vrot.slane %v2576_v49, 4  ;;  %v2566_v31 = vrot.slane %v2565_v39, 4 }
 0x353   :  { %v2510_v33 = vpop.xlane.xlu2 %2509  ;;  %v2504_v62 = vrot.slane %v2503_v21, 1 }
 0x354   :  { %v2440_v3 = vadd.f32 %v2439_v16, %v2438_v42  ;;  %v2450_v47 = vrot.slane %v2449_v36, 1  ;;  %v2578_v40 = vadd.f32 %v2577_v10, %v2576_v49  ;;  %v2567_v0 = vadd.f32 %v2566_v31, %v2565_v39 }
 0x355   :  { %v2511_v56 = vrot.slane %v2510_v33, 4  ;;  %v2505_v41 = vadd.f32 %v2504_v62, %v2503_v21 }
 0x356   :  { %v6799_v53 = vmul.f32 0.0025510204, %v2440_v3  ;;  %v2451_v59 = vadd.f32 %v2450_v47, %v2449_v36  ;;  %v2579_v48 = vrot.slane %v2578_v40, 2  ;;  %v2568_v50 = vrot.slane %v2567_v0, 2 }
 0x357   :  { %v2512_v22 = vadd.f32 %v2511_v56, %v2510_v33  ;;  %v6803_v17 = vmul.f32 0.0025510204, %v2505_v41 }
 0x358   :  { %v2454_v28 = vmul.f32 %v6799_v53, %v6799_v53  ;;  %v2453_v38 = vmul.f32 0.0025510204, %v2451_v59  ;;  %v2580_v55 = vadd.f32 %v2579_v48, %v2578_v40  ;;  %v2569_v45 = vadd.f32 %v2568_v50, %v2567_v0 }
 0x359   :  { %v2513_v2 = vrot.slane %v2512_v22, 2  ;;  %v2642_v23 = vpop.xlane.xlu0 %2641  ;;  %v2519_v32 = vmul.f32 %v6803_v17, %v6803_v17  ;;  %v2468_v59 = vstv %s2997_s14 }
 0x35a   :  { %v2455_v19 = vsub.f32 %v2453_v38, %v2454_v28  ;;  %v2581_v9 = vrot.slane %v2580_v55, 1  ;;  %v2643_v37 = vrot.slane %v2642_v23, 4  ;;  %v2570_v5 = vrot.slane %v2569_v45, 1 }
 0x35b   :  { %v2514_v46 = vadd.f32 %v2513_v2, %v2512_v22  ;;  %v2631_v8 = vpop.xlane.xlu2 %2630 }
 0x35c   :  { %v2457_v52 = vadd.f32 1e-05, %v2455_v19  ;;  %v2644_v44 = vadd.f32 %v2643_v37, %v2642_v23  ;;  %v2632_v12 = vrot.slane %v2631_v8, 4  ;;  %v2582_v1 = vadd.f32 %v2581_v9, %v2580_v55 }
 0x35d   :  { %v2571_v57 = vadd.f32 %v2570_v5, %v2569_v45  ;;  %v2515_v13 = vrot.slane %v2514_v46, 1  ;;  %v2472_v23 = vstv %s6811_s8 }
 0x35e   :  { %3038 = vrsqrt.f32 %v2457_v52  ;;  %v2645_v11 = vrot.slane %v2644_v44, 2  ;;  %v2633_v61 = vadd.f32 %v2632_v12, %v2631_v8  ;;  %v2584_v29 = vmul.f32 0.0025510204, %v2582_v1 }
 0x35f   :  { %v6805_v60 = vmul.f32 0.0025510204, %v2571_v57  ;;  %v2516_v54 = vadd.f32 %v2515_v13, %v2514_v46  ;;  %vm2464_vm9 = vweird.f32 %v2457_v52 }
 0x360   :  { %v2646_v7 = vadd.f32 %v2645_v11, %v2644_v44  ;;  %v2634_v51 = vrot.slane %v2633_v61, 2  ;;  %v2599_v44 = vstv %s6817_s9  ;;  %v2533_v11 = vstv %s6819_s10 }
 0x361   :  { %v2585_v43 = vmul.f32 %v6805_v60, %v6805_v60  ;;  %v2518_v25 = vmul.f32 0.0025510204, %v2516_v54 }
 0x362   :  { %v2635_v24 = vadd.f32 %v2634_v51, %v2633_v61  ;;  %v2647_v42 = vrot.slane %v2646_v7, 1 }
 0x363   :  { %v2586_v35 = vsub.f32 %v2584_v29, %v2585_v43  ;;  %v2520_v34 = vsub.f32 %v2518_v25, %v2519_v32  ;;  %v2603_v43 = vstv %s6824_s24 }
 0x364   :  { %v3039_v21 = vpop.eup %3038  ;;  %v2636_v16 = vrot.slane %v2635_v24, 1  ;;  %v2648_v10 = vadd.f32 %v2647_v42, %v2646_v7 }
 0x365   :  { %v2459_v4 = vmul.f32 %v3039_v21, %v2457_v52  ;;  %v2588_v49 = vadd.f32 1e-05, %v2586_v35  ;;  %v2522_v39 = vadd.f32 1e-05, %v2520_v34  ;;  %vm2465_vm8 = vweird.f32 %v3039_v21 }
 0x366   :  { %v2637_v31 = vadd.f32 %v2636_v16, %v2635_v24  ;;  %v2650_v47 = vmul.f32 0.0025510204, %v2648_v10  ;;  %vm2466_vm10 = vmor %vm2464_vm9, %vm2465_vm8 }
 0x367   :  { %v2460_v36 = vmul.f32 %v3039_v21, %v2459_v4  ;;  %3040 = vrsqrt.f32 %v2588_v49  ;;  %vm2595_vm13 = vweird.f32 %v2588_v49  ;;  %vm2529_vm15 = vweird.f32 %v2522_v39 }
 0x368   :  { %3042 = vrsqrt.f32 %v2522_v39  ;;  %v6813_v62 = vmul.f32 0.0025510204, %v2637_v31 }
 0x369   :  { %v2461_v33 = vmul.f32 0.5, %v2460_v36 }
 0x36a   :  { %v2651_v40 = vmul.f32 %v6813_v62, %v6813_v62 }
 0x36b   :  { %v2462_v3 = vsub.f32 1.5, %v2461_v33 }
 0x36c   :  { %v2652_v22 = vsub.f32 %v2650_v47, %v2651_v40  ;;  %v2665_v40 = vstv %s6834_s23 }
 0x36d   :  { %v3041_v0 = vpop.eup %3040  ;;  %v2463_v56 = vmul.f32 %v3039_v21, %v2462_v3 }
 0x36e   :  { %v3043_v48 = vpop.eup %3042  ;;  %v2590_v50 = vmul.f32 %v3041_v0, %v2588_v49  ;;  %v6821_v55 = vadd.f32 1e-05, %v2652_v22  ;;  %vm2596_vm11 = vweird.f32 %v3041_v0 }
 0x36f   :  { %v2524_v41 = vmul.f32 %v3043_v48, %v2522_v39  ;;  %v2467_v28 = vsel %vm2466_vm10, %v3039_v21, %v2463_v56  ;;  %vm2530_vm12 = vweird.f32 %v3043_v48  ;;  %vm2597_vm14 = vmor %vm2595_vm13, %vm2596_vm11  ;;  %v2537_v21 = vstv %s6828_s27 }
 0x370   :  { %v2591_v38 = vmul.f32 %v3041_v0, %v2590_v50  ;;  %v2469_v45 = vmul.f32 %v2468_v59, %v2467_v28  ;;  %3044 = vrsqrt.f32 %v6821_v55  ;;  %vm2531_vm0 = vmor %vm2529_vm15, %vm2530_vm12  ;;  %vm2661_vm2 = vweird.f32 %v6821_v55 }
 0x371   :  { %v2525_v2 = vmul.f32 %v3043_v48, %v2524_v41 }
 0x372   :  { %v2592_v19 = vmul.f32 0.5, %v2591_v38  ;;  %v2471_v9 = vmul.f32 %v2469_v45, %v6799_v53  ;;  %v2474_v8 = vmul.f32 %v2469_v45, %v6772_v6  ;;  %v2475_v52 = vmul.f32 %v2469_v45, %v6760_v15 }
 0x373   :  { %v2526_v37 = vmul.f32 0.5, %v2525_v2  ;;  %v2669_v38 = vstv %s6843_s21 }
 0x374   :  { %v2593_v5 = vsub.f32 1.5, %v2592_v19  ;;  %v2473_v46 = vsub.f32 %v2472_v23, %v2471_v9 }
 0x375   :  { %v2527_v12 = vsub.f32 1.5, %v2526_v37 }
 0x376   :  { %v2594_v1 = vmul.f32 %v3041_v0, %v2593_v5  ;;  %v2476_v57 = vadd.f32 %v2474_v8, %v2473_v46  ;;  %v2477_v13 = vadd.f32 %v2475_v52, %v2473_v46  ;;  %v3045_v54 = vpop.eup %3044 }
 0x377   :  { %v2528_v53 = vmul.f32 %v3043_v48, %v2527_v12  ;;  %v2656_v7 = vmul.f32 %v3045_v54, %v6821_v55  ;;  %vm2662_vm1 = vweird.f32 %v3045_v54 }
 0x378   :  { %v2598_v61 = vsel %vm2597_vm14, %v3041_v0, %v2594_v1  ;;  %v2478_v6 = vmax.f32 %v2476_v57, 0.0  ;;  %v2479_v15 = vmax.f32 %v2477_v13, 0.0  ;;  %vm2663_vm3 = vmor %vm2661_vm2, %vm2662_vm1  ;;  %v2552_v13 = vstv %s3003_s29 }
 0x379   :  { %v2600_v32 = vmul.f32 %v2599_v44, %v2598_v61  ;;  %v2532_v29 = vsel %vm2531_vm0, %v3043_v48, %v2528_v53  ;;  %v2657_v24 = vmul.f32 %v3045_v54, %v2656_v7 }
 0x37a   :  { %v2480_v25 = vmul.f32 %v2478_v6, %v6752_v27  ;;  %v2481_v51 = vmul.f32 %v2479_v15, %v6747_v14  ;;  %v2534_v35 = vmul.f32 %v2533_v11, %v2532_v29 }
 0x37b   :  { %v2602_v34 = vmul.f32 %v2600_v32, %v6805_v60  ;;  %v2658_v39 = vmul.f32 0.5, %v2657_v24  ;;  %v2605_v16 = vmul.f32 %v2600_v32, %v6776_v63  ;;  %v2606_v36 = vmul.f32 %v2600_v32, %v6764_v30 }
 0x37c   :  { %v2482_v42 = vadd.f32 %v2481_v51, %v2480_v25  ;;  %v2536_v4 = vmul.f32 %v2534_v35, %v6803_v17  ;;  %v2539_v31 = vmul.f32 %v2534_v35, %v6768_v18  ;;  %v2540_v60 = vmul.f32 %v2534_v35, %v6756_v20 }
 0x37d   :  { %v2604_v49 = vsub.f32 %v2603_v43, %v2602_v34  ;;  %v2659_v33 = vsub.f32 1.5, %v2658_v39  ;;  %v2688_v25 = vstv %s3012_s18 }
 0x37e   :  { %2483 = vadd.xlane.f32.xlu1 %v2482_v42  ;;  %v2538_v10 = vsub.f32 %v2537_v21, %v2536_v4 }
 0x37f   :  { %v2607_v3 = vadd.f32 %v2605_v16, %v2604_v49  ;;  %v2608_v47 = vadd.f32 %v2606_v36, %v2604_v49  ;;  %v2660_v56 = vmul.f32 %v3045_v54, %v2659_v33 }
 0x380   :  { %v2541_v17 = vadd.f32 %v2539_v31, %v2538_v10  ;;  %v2542_v0 = vadd.f32 %v2540_v60, %v2538_v10 }
 0x381   :  { %v2609_v63 = vmax.f32 %v2607_v3, 0.0  ;;  %v2610_v59 = vmax.f32 %v2608_v47, 0.0  ;;  %v2664_v50 = vsel %vm2663_vm3, %v3045_v54, %v2660_v56 }
 0x382   :  { %v2543_v30 = vmax.f32 %v2541_v17, 0.0  ;;  %v2544_v48 = vmax.f32 %v2542_v0, 0.0  ;;  %v2666_v22 = vmul.f32 %v2665_v40, %v2664_v50 }
 0x383   :  { %v2611_v18 = vmul.f32 %v2609_v63, %v6752_v27  ;;  %v2612_v20 = vmul.f32 %v2610_v59, %v6747_v14 }
 0x384   :  { %v2545_v41 = vmul.f32 %v2543_v30, %v6752_v27  ;;  %v2546_v28 = vmul.f32 %v2544_v48, %v6747_v14  ;;  %v2668_v2 = vmul.f32 %v2666_v22, %v6813_v62  ;;  %v2671_v19 = vmul.f32 %v2666_v22, %v6791_v26 }
 0x385   :  { %v2613_v45 = vadd.f32 %v2612_v20, %v2611_v18  ;;  %v2672_v9 = vmul.f32 %v2666_v22, %v6793_v58  ;;  %v2487_v58 = vstv %s2999_s2 }
 0x386   :  { %v2547_v55 = vadd.f32 %v2546_v28, %v2545_v41  ;;  %v2670_v23 = vsub.f32 %v2669_v38, %v2668_v2 }
 0x387   :  { %2614 = vadd.xlane.f32.xlu0 %v2613_v45 }
 0x388   :  { %2548 = vadd.xlane.f32.xlu2 %v2547_v55  ;;  %v2673_v37 = vadd.f32 %v2671_v19, %v2670_v23  ;;  %v2674_v5 = vadd.f32 %v2672_v9, %v2670_v23 }
 0x38a   :  { %v2675_v46 = vmax.f32 %v2673_v37, 0.0  ;;  %v2676_v8 = vmax.f32 %v2674_v5, 0.0 }
 0x38c   :  { %v2677_v52 = vmul.f32 %v2675_v46, %v6752_v27  ;;  %v2678_v44 = vmul.f32 %v2676_v8, %v6747_v14  ;;  %v2618_v27 = vstv %s3007_s7  ;;  %v2684_v14 = vstv %s3011_s0 }
 0x38e   :  { %v2679_v12 = vadd.f32 %v2678_v44, %v2677_v52 }
 0x390   :  { %2680 = vadd.xlane.f32.xlu1 %v2679_v12 }
 0x3f1   :  { %v2484_v62 = vpop.xlane.xlu1 %2483 }
 0x3f2   :  { %v2485_v26 = vmul.f32 0.0051020407, %v2484_v62 }
 0x3f4   :  { %v2488_v54 = vmul.f32 %v2487_v58, %v2485_v26 }
 0x3fa   :  { %v2615_v53 = vpop.xlane.xlu0 %2614 }
 0x3fb   :  { %v2549_v1 = vpop.xlane.xlu2 %2548  ;;  %v2616_v61 = vmul.f32 0.0051020407, %v2615_v53 }
 0x3fc   :  { %v2550_v57 = vmul.f32 0.0051020407, %v2549_v1 }
 0x3fd   :  { %v2619_v32 = vmul.f32 %v2618_v27, %v2616_v61 }
 0x3fe   :  { %v2553_v11 = vmul.f32 %v2552_v13, %v2550_v57 }
 0x400   :  { %v2554_v6 = vadd.f32 %v2553_v11, %v2488_v54 }
 0x402   :  { %v2620_v29 = vadd.f32 %v2619_v32, %v2554_v6 }
 0x403   :  { %v2681_v15 = vpop.xlane.xlu1 %2680 }
 0x404   :  { %v2682_v7 = vmul.f32 0.0051020407, %v2681_v15 }
 0x406   :  { %v2685_v43 = vmul.f32 %v2684_v14, %v2682_v7 }
 0x408   :  { %v2686_v51 = vadd.f32 %v2685_v43, %v2620_v29 }
 0x40a   :  { %v2689_v35 = vadd.f32 %v2688_v25, %v2686_v51 }
 0x40c   :  { %2691 = vst.msk [vmem:[%s7193_s11] sm:$0xff] %vm2690_vm4, %v2689_v35 }
 0x40d   :  { %2696 = vsyncpa [#allocation3], 1 }

</bundles_post_ra>
